<compile_context>
chip_gen: v7x
topology: tpu7x:2x2x1
jax: 0.10.0
libtpu: 0.0.40
codegen_flags: <defaults>
</compile_context>

<pallas_src>
import numpy as np
import jax
import jax.numpy as jnp
from jax import lax
from jax.experimental import pallas as pl
from jax.experimental.pallas import tpu as pltpu


def _pose_fc_kernel(x_ref,
                    w1_ref, b1_ref, w2_ref, b2_ref, w3_ref, b3_ref,
                    w4_ref, b4_ref, w5_ref, b5_ref, w6_ref, b6_ref,
                    out_ref):
    """One batch tile: fused 6-layer MLP (bf16 MXU, f32 accum) + quat norm."""
    h = x_ref[...]                                            # (TB, 2048) bf16

    def dense_relu(h_bf16, w_ref, b_ref):
        y = jnp.dot(h_bf16, w_ref[...], preferred_element_type=jnp.float32)
        y = jnp.maximum(y + b_ref[...], 0.0)                  # bias + ReLU in f32
        return y.astype(jnp.bfloat16)                         # feed next MXU pass

    h = dense_relu(h, w1_ref, b1_ref)                         # (TB, 1024)
    h = dense_relu(h, w2_ref, b2_ref)                         # (TB, 1024)
    h = dense_relu(h, w3_ref, b3_ref)                         # (TB, 512)
    h = dense_relu(h, w4_ref, b4_ref)                         # (TB, 512)
    h = dense_relu(h, w5_ref, b5_ref)                         # (TB, 256)
    # final layer, padded to 128 output lanes (cols 7..127 are zeros)
    y = jnp.dot(h, w6_ref[...], preferred_element_type=jnp.float32) + b6_ref[...]

    # F.normalize(y[:, 0:4], dim=1): q / max(||q||_2, 1e-12); translation kept.
    # Lane-masked so no sub-tile slice/concat is needed.
    col = lax.broadcasted_iota(jnp.int32, y.shape, 1)
    is_quat = col < 4
    sumsq = jnp.sum(jnp.where(is_quat, y * y, 0.0), axis=-1, keepdims=True)
    inv = 1.0 / jnp.maximum(jnp.sqrt(sumsq), 1e-12)
    out_ref[...] = jnp.where(is_quat, y * inv, y).astype(out_ref.dtype)  # one lane-dense store


def _round_up(v, m):
    return ((v + m - 1) // m) * m


def _default_batch_tile():
    """128 on v5e (4x128^2 MXU), 256 on v6e/v7x (2x256^2 MXU)."""
    try:
        kind = jax.devices()[0].device_kind.lower()
    except Exception:
        return 256
    if "v5 lite" in kind or "v5e" in kind or "v5lite" in kind:
        return 128
    return 256


def pose_regression_fc(x, params, *, batch_tile=None,
                       vmem_limit_bytes=40 * 1024 * 1024):
    """x: (B, 2*bottleneck) f32.  params: list of 6 (W[in,out], b[out]) f32 tuples."""
    (w1, b1), (w2, b2), (w3, b3), (w4, b4), (w5, b5), (w6, b6) = params
    B, d_in = x.shape
    d_out = w6.shape[1]                                # 7
    d_out_pad = _round_up(max(d_out, 128), 128)        # lane-dense output block

    # fc6 padded to 128 output lanes with zeros
    w6p = jnp.pad(w6, ((0, 0), (0, d_out_pad - d_out)))
    b6p = jnp.pad(b6, (0, d_out_pad - d_out))

    # weights -> bf16 (halves weight HBM/VMEM, native MXU rate); biases stay f32.
    ws = [w.astype(jnp.bfloat16) for w in (w1, w2, w3, w4, w5, w6p)]
    bs = [b.reshape(1, -1).astype(jnp.float32) for b in (b1, b2, b3, b4, b5, b6p)]

    # batch tile: multiple of 8 sublanes, capped at batch_tile
    if batch_tile is None:
        batch_tile = _default_batch_tile()
    tb = min(batch_tile, _round_up(B, 8))
    tb = max(8, _round_up(tb, 8))
    bp = _round_up(B, tb)
    # Megacore (v7x): make sure a mid-size batch produces >=2 grid steps so both
    # TensorCores get work; tiny batches keep grid=1 (splitting them would just
    # duplicate the one-time weight fetch).
    if bp // tb == 1 and B >= 128:
        tb = _round_up((B + 1) // 2, 8)
        bp = 2 * tb

    xb = x.astype(jnp.bfloat16)
    if bp != B:
        xb = jnp.pad(xb, ((0, bp - B), (0, 0)))

    def row_spec(ncols):
        return pl.BlockSpec((tb, ncols), lambda i: (i, 0))

    def const_spec(shape):
        # constant index_map + single buffer: fetched from HBM once, VMEM-resident
        # for every batch tile (default double buffering would waste a full extra
        # copy of weights that never change).
        return pl.BlockSpec(shape, lambda i: (0, 0), pipeline_mode=pl.Buffered(1))

    in_specs = [row_spec(d_in)]
    args = [xb]
    for w, b in zip(ws, bs):
        in_specs.append(const_spec(w.shape))
        in_specs.append(const_spec(b.shape))
        args += [w, b]

    out = pl.pallas_call(
        _pose_fc_kernel,
        out_shape=jax.ShapeDtypeStruct((bp, d_out_pad), jnp.float32),
        grid=(bp // tb,),
        in_specs=in_specs,
        out_specs=row_spec(d_out_pad),
        compiler_params=pltpu.CompilerParams(
            dimension_semantics=("parallel",),      # batch tiles shard across TCs (v7x)
            vmem_limit_bytes=vmem_limit_bytes,      # ~12-16 MiB real footprint < 40 MiB cap
        ),
    )(*args)

    return out[:B, :d_out]


def pose_regression_fc_ref(x, params, *, compute_dtype=jnp.float32):
    """Pure-JAX reference matching the PyTorch forward (optionally bf16-matched)."""
    (w1, b1), (w2, b2), (w3, b3), (w4, b4), (w5, b5), (w6, b6) = params
    h = x.astype(compute_dtype)
    for w, b in ((w1, b1), (w2, b2), (w3, b3), (w4, b4), (w5, b5)):
        y = jnp.dot(h, w.astype(compute_dtype),
                    preferred_element_type=jnp.float32) + b
        h = jnp.maximum(y, 0.0).astype(compute_dtype)
    y = jnp.dot(h, w6.astype(compute_dtype),
                preferred_element_type=jnp.float32) + b6
    quat = y[:, :4]
    norm = jnp.sqrt(jnp.sum(quat * quat, axis=1, keepdims=True))
    quat = quat / jnp.maximum(norm, 1e-12)
    return jnp.concatenate([quat, y[:, 4:]], axis=1)


if __name__ == "__main__":
    key = jax.random.PRNGKey(0)
    bottleneck_size = 1024                       # module default
    B = 4
    dims = [bottleneck_size * 2, 1024, 1024, 512, 512, 256, 7]

    keys = jax.random.split(key, 2 * (len(dims) - 1) + 1)
    x = jax.random.normal(keys[0], (B, dims[0]), dtype=jnp.float32)

    params = []
    for li in range(len(dims) - 1):
        fan_in, fan_out = dims[li], dims[li + 1]
        wk, bk = keys[1 + 2 * li], keys[2 + 2 * li]
        w = jax.random.normal(wk, (fan_in, fan_out), jnp.float32) * (2.0 / fan_in) ** 0.5
        b = jax.random.normal(bk, (fan_out,), jnp.float32) * 0.01
        params.append((w, b))

    y = jax.block_until_ready(pose_regression_fc(x, params))
    assert y.shape == (B, 7)

    # precision-matched reference (bf16 operands, f32 accumulation): tight check
    y_bf16_ref = pose_regression_fc_ref(x, params, compute_dtype=jnp.bfloat16)
    np.testing.assert_allclose(np.asarray(y), np.asarray(y_bf16_ref),
                               rtol=5e-2, atol=5e-2)
    # full-f32 reference: loose check (bf16 weight/activation rounding)
    y_f32_ref = pose_regression_fc_ref(x, params, compute_dtype=jnp.float32)
    np.testing.assert_allclose(np.asarray(y), np.asarray(y_f32_ref),
                               rtol=1e-1, atol=1e-1)
    # the quaternion part must be unit-norm
    np.testing.assert_allclose(np.linalg.norm(np.asarray(y)[:, :4], axis=1),
                               np.ones(B), rtol=1e-3, atol=1e-3)

    print("KERNEL_OK")
</pallas_src>

<mosaic_0001>
module attributes {stable_mosaic.version = 11 : i64} {
  func.func @_pose_fc_kernel(%arg0: i32, %arg1: memref<8x2048xbf16, #tpu.memory_space<vmem>>, %arg2: memref<2048x1024xbf16, #tpu.memory_space<vmem>>, %arg3: memref<1x1024xf32, #tpu.memory_space<vmem>>, %arg4: memref<1024x1024xbf16, #tpu.memory_space<vmem>>, %arg5: memref<1x1024xf32, #tpu.memory_space<vmem>>, %arg6: memref<1024x512xbf16, #tpu.memory_space<vmem>>, %arg7: memref<1x512xf32, #tpu.memory_space<vmem>>, %arg8: memref<512x512xbf16, #tpu.memory_space<vmem>>, %arg9: memref<1x512xf32, #tpu.memory_space<vmem>>, %arg10: memref<512x256xbf16, #tpu.memory_space<vmem>>, %arg11: memref<1x256xf32, #tpu.memory_space<vmem>>, %arg12: memref<256x128xbf16, #tpu.memory_space<vmem>>, %arg13: memref<1x128xf32, #tpu.memory_space<vmem>>, %arg14: memref<8x128xf32, #tpu.memory_space<vmem>>) attributes {dimension_semantics = [#tpu.dimension_semantics<parallel>], iteration_bounds = array<i64: 1>, scalar_prefetch = 0 : i64, scratch_operands = 0 : i64, tpu.core_type = #tpu.core_type<tc>, window_params = [{transform_indices = @transform_0, window_bounds = array<i64: 8, 2048>}, {pipeline_mode = #tpu.pipeline_mode<synchronous>, transform_indices = @transform_1, window_bounds = array<i64: 2048, 1024>}, {pipeline_mode = #tpu.pipeline_mode<synchronous>, transform_indices = @transform_2, window_bounds = array<i64: 1, 1024>}, {pipeline_mode = #tpu.pipeline_mode<synchronous>, transform_indices = @transform_3, window_bounds = array<i64: 1024, 1024>}, {pipeline_mode = #tpu.pipeline_mode<synchronous>, transform_indices = @transform_4, window_bounds = array<i64: 1, 1024>}, {pipeline_mode = #tpu.pipeline_mode<synchronous>, transform_indices = @transform_5, window_bounds = array<i64: 1024, 512>}, {pipeline_mode = #tpu.pipeline_mode<synchronous>, transform_indices = @transform_6, window_bounds = array<i64: 1, 512>}, {pipeline_mode = #tpu.pipeline_mode<synchronous>, transform_indices = @transform_7, window_bounds = array<i64: 512, 512>}, {pipeline_mode = #tpu.pipeline_mode<synchronous>, transform_indices = @transform_8, window_bounds = array<i64: 1, 512>}, {pipeline_mode = #tpu.pipeline_mode<synchronous>, transform_indices = @transform_9, window_bounds = array<i64: 512, 256>}, {pipeline_mode = #tpu.pipeline_mode<synchronous>, transform_indices = @transform_10, window_bounds = array<i64: 1, 256>}, {pipeline_mode = #tpu.pipeline_mode<synchronous>, transform_indices = @transform_11, window_bounds = array<i64: 256, 128>}, {pipeline_mode = #tpu.pipeline_mode<synchronous>, transform_indices = @transform_12, window_bounds = array<i64: 1, 128>}, {transform_indices = @transform_13, window_bounds = array<i64: 8, 128>}]} {
    %c0 = arith.constant 0 : index
    %c0_0 = arith.constant 0 : index
    %0 = vector.load %arg1[%c0, %c0_0] : memref<8x2048xbf16, #tpu.memory_space<vmem>>, vector<8x2048xbf16>
    %c0_1 = arith.constant 0 : index
    %c0_2 = arith.constant 0 : index
    %1 = vector.load %arg2[%c0_1, %c0_2] : memref<2048x1024xbf16, #tpu.memory_space<vmem>>, vector<2048x1024xbf16>
    %cst = arith.constant dense<0.000000e+00> : vector<8x1024xf32>
    %2 = tpu.matmul %0, %1, %cst {dimension_numbers = #tpu.dot_dimension_numbers<[1], [0], [0], [1], [0, 0, 1, 1], [], []>} : vector<8x2048xbf16>, vector<2048x1024xbf16>, vector<8x1024xf32> -> vector<8x1024xf32>
    %c0_3 = arith.constant 0 : index
    %c0_4 = arith.constant 0 : index
    %3 = vector.load %arg3[%c0_3, %c0_4] : memref<1x1024xf32, #tpu.memory_space<vmem>>, vector<1x1024xf32>
    %4 = vector.broadcast %3 : vector<1x1024xf32> to vector<8x1024xf32>
    %5 = arith.addf %2, %4 : vector<8x1024xf32>
    %cst_5 = arith.constant 0.000000e+00 : f32
    %6 = vector.broadcast %cst_5 : f32 to vector<8x1024xf32>
    %7 = arith.maximumf %5, %6 : vector<8x1024xf32>
    %8 = arith.truncf %7 : vector<8x1024xf32> to vector<8x1024xbf16>
    %c0_6 = arith.constant 0 : index
    %c0_7 = arith.constant 0 : index
    %9 = vector.load %arg4[%c0_6, %c0_7] : memref<1024x1024xbf16, #tpu.memory_space<vmem>>, vector<1024x1024xbf16>
    %cst_8 = arith.constant dense<0.000000e+00> : vector<8x1024xf32>
    %10 = tpu.matmul %8, %9, %cst_8 {dimension_numbers = #tpu.dot_dimension_numbers<[1], [0], [0], [1], [0, 0, 1, 1], [], []>} : vector<8x1024xbf16>, vector<1024x1024xbf16>, vector<8x1024xf32> -> vector<8x1024xf32>
    %c0_9 = arith.constant 0 : index
    %c0_10 = arith.constant 0 : index
    %11 = vector.load %arg5[%c0_9, %c0_10] : memref<1x1024xf32, #tpu.memory_space<vmem>>, vector<1x1024xf32>
    %12 = vector.broadcast %11 : vector<1x1024xf32> to vector<8x1024xf32>
    %13 = arith.addf %10, %12 : vector<8x1024xf32>
    %cst_11 = arith.constant 0.000000e+00 : f32
    %14 = vector.broadcast %cst_11 : f32 to vector<8x1024xf32>
    %15 = arith.maximumf %13, %14 : vector<8x1024xf32>
    %16 = arith.truncf %15 : vector<8x1024xf32> to vector<8x1024xbf16>
    %c0_12 = arith.constant 0 : index
    %c0_13 = arith.constant 0 : index
    %17 = vector.load %arg6[%c0_12, %c0_13] : memref<1024x512xbf16, #tpu.memory_space<vmem>>, vector<1024x512xbf16>
    %cst_14 = arith.constant dense<0.000000e+00> : vector<8x512xf32>
    %18 = tpu.matmul %16, %17, %cst_14 {dimension_numbers = #tpu.dot_dimension_numbers<[1], [0], [0], [1], [0, 0, 1, 1], [], []>} : vector<8x1024xbf16>, vector<1024x512xbf16>, vector<8x512xf32> -> vector<8x512xf32>
    %c0_15 = arith.constant 0 : index
    %c0_16 = arith.constant 0 : index
    %19 = vector.load %arg7[%c0_15, %c0_16] : memref<1x512xf32, #tpu.memory_space<vmem>>, vector<1x512xf32>
    %20 = vector.broadcast %19 : vector<1x512xf32> to vector<8x512xf32>
    %21 = arith.addf %18, %20 : vector<8x512xf32>
    %cst_17 = arith.constant 0.000000e+00 : f32
    %22 = vector.broadcast %cst_17 : f32 to vector<8x512xf32>
    %23 = arith.maximumf %21, %22 : vector<8x512xf32>
    %24 = arith.truncf %23 : vector<8x512xf32> to vector<8x512xbf16>
    %c0_18 = arith.constant 0 : index
    %c0_19 = arith.constant 0 : index
    %25 = vector.load %arg8[%c0_18, %c0_19] : memref<512x512xbf16, #tpu.memory_space<vmem>>, vector<512x512xbf16>
    %cst_20 = arith.constant dense<0.000000e+00> : vector<8x512xf32>
    %26 = tpu.matmul %24, %25, %cst_20 {dimension_numbers = #tpu.dot_dimension_numbers<[1], [0], [0], [1], [0, 0, 1, 1], [], []>} : vector<8x512xbf16>, vector<512x512xbf16>, vector<8x512xf32> -> vector<8x512xf32>
    %c0_21 = arith.constant 0 : index
    %c0_22 = arith.constant 0 : index
    %27 = vector.load %arg9[%c0_21, %c0_22] : memref<1x512xf32, #tpu.memory_space<vmem>>, vector<1x512xf32>
    %28 = vector.broadcast %27 : vector<1x512xf32> to vector<8x512xf32>
    %29 = arith.addf %26, %28 : vector<8x512xf32>
    %cst_23 = arith.constant 0.000000e+00 : f32
    %30 = vector.broadcast %cst_23 : f32 to vector<8x512xf32>
    %31 = arith.maximumf %29, %30 : vector<8x512xf32>
    %32 = arith.truncf %31 : vector<8x512xf32> to vector<8x512xbf16>
    %c0_24 = arith.constant 0 : index
    %c0_25 = arith.constant 0 : index
    %33 = vector.load %arg10[%c0_24, %c0_25] : memref<512x256xbf16, #tpu.memory_space<vmem>>, vector<512x256xbf16>
    %cst_26 = arith.constant dense<0.000000e+00> : vector<8x256xf32>
    %34 = tpu.matmul %32, %33, %cst_26 {dimension_numbers = #tpu.dot_dimension_numbers<[1], [0], [0], [1], [0, 0, 1, 1], [], []>} : vector<8x512xbf16>, vector<512x256xbf16>, vector<8x256xf32> -> vector<8x256xf32>
    %c0_27 = arith.constant 0 : index
    %c0_28 = arith.constant 0 : index
    %35 = vector.load %arg11[%c0_27, %c0_28] : memref<1x256xf32, #tpu.memory_space<vmem>>, vector<1x256xf32>
    %36 = vector.broadcast %35 : vector<1x256xf32> to vector<8x256xf32>
    %37 = arith.addf %34, %36 : vector<8x256xf32>
    %cst_29 = arith.constant 0.000000e+00 : f32
    %38 = vector.broadcast %cst_29 : f32 to vector<8x256xf32>
    %39 = arith.maximumf %37, %38 : vector<8x256xf32>
    %40 = arith.truncf %39 : vector<8x256xf32> to vector<8x256xbf16>
    %c0_30 = arith.constant 0 : index
    %c0_31 = arith.constant 0 : index
    %41 = vector.load %arg12[%c0_30, %c0_31] : memref<256x128xbf16, #tpu.memory_space<vmem>>, vector<256x128xbf16>
    %cst_32 = arith.constant dense<0.000000e+00> : vector<8x128xf32>
    %42 = tpu.matmul %40, %41, %cst_32 {dimension_numbers = #tpu.dot_dimension_numbers<[1], [0], [0], [1], [0, 0, 1, 1], [], []>} : vector<8x256xbf16>, vector<256x128xbf16>, vector<8x128xf32> -> vector<8x128xf32>
    %c0_33 = arith.constant 0 : index
    %c0_34 = arith.constant 0 : index
    %43 = vector.load %arg13[%c0_33, %c0_34] : memref<1x128xf32, #tpu.memory_space<vmem>>, vector<1x128xf32>
    %44 = vector.broadcast %43 : vector<1x128xf32> to vector<8x128xf32>
    %45 = arith.addf %42, %44 : vector<8x128xf32>
    %46 = tpu.iota {dimensions = array<i32: 1>} : vector<8x128xi32>
    %c4_i32 = arith.constant 4 : i32
    %47 = vector.broadcast %c4_i32 : i32 to vector<8x128xi32>
    %48 = arith.cmpi slt, %46, %47 : vector<8x128xi32>
    %49 = arith.mulf %45, %45 : vector<8x128xf32>
    %cst_35 = arith.constant 0.000000e+00 : f32
    %50 = vector.broadcast %cst_35 : f32 to vector<8x128xf32>
    %51 = arith.select %48, %49, %50 : vector<8x128xi1>, vector<8x128xf32>
    %cst_36 = arith.constant dense<0.000000e+00> : vector<8xf32>
    %52 = vector.multi_reduction <add>, %51, %cst_36 [1] : vector<8x128xf32> to vector<8xf32>
    %53 = vector.shape_cast %52 : vector<8xf32> to vector<8x1xf32>
    %54 = math.sqrt %53 : vector<8x1xf32>
    %cst_37 = arith.constant 9.99999996E-13 : f32
    %55 = vector.broadcast %cst_37 : f32 to vector<8x1xf32>
    %56 = arith.maximumf %54, %55 : vector<8x1xf32>
    %cst_38 = arith.constant 1.000000e+00 : f32
    %57 = vector.broadcast %cst_38 : f32 to vector<8x1xf32>
    %58 = arith.divf %57, %56 : vector<8x1xf32>
    %59 = vector.broadcast %58 : vector<8x1xf32> to vector<8x128xf32>
    %60 = arith.mulf %45, %59 : vector<8x128xf32>
    %61 = arith.select %48, %60, %45 : vector<8x128xi1>, vector<8x128xf32>
    %c0_39 = arith.constant 0 : index
    %c0_40 = arith.constant 0 : index
    %62 = vector.load %arg14[%c0_39, %c0_40] : memref<8x128xf32, #tpu.memory_space<vmem>>, vector<8x128xf32>
    tpu.vector_store %arg14[%c0_39, %c0_40], %61 {strides = array<i32>} : memref<8x128xf32, #tpu.memory_space<vmem>>, vector<8x128xf32>,
    return
  }
  func.func @transform_0(%arg0: i32) -> (i32, i32) {
    %c0_i32 = arith.constant 0 : i32
    %c0_i32_0 = arith.constant 0 : i32
    return %arg0, %c0_i32 : i32, i32
  }
  func.func @transform_1(%arg0: i32) -> (i32, i32) {
    %c0_i32 = arith.constant 0 : i32
    %c0_i32_0 = arith.constant 0 : i32
    %c0_i32_1 = arith.constant 0 : i32
    return %c0_i32, %c0_i32_0 : i32, i32
  }
  func.func @transform_2(%arg0: i32) -> (i32, i32) {
    %c0_i32 = arith.constant 0 : i32
    %c0_i32_0 = arith.constant 0 : i32
    %c0_i32_1 = arith.constant 0 : i32
    return %c0_i32, %c0_i32_0 : i32, i32
  }
  func.func @transform_3(%arg0: i32) -> (i32, i32) {
    %c0_i32 = arith.constant 0 : i32
    %c0_i32_0 = arith.constant 0 : i32
    %c0_i32_1 = arith.constant 0 : i32
    return %c0_i32, %c0_i32_0 : i32, i32
  }
  func.func @transform_4(%arg0: i32) -> (i32, i32) {
    %c0_i32 = arith.constant 0 : i32
    %c0_i32_0 = arith.constant 0 : i32
    %c0_i32_1 = arith.constant 0 : i32
    return %c0_i32, %c0_i32_0 : i32, i32
  }
  func.func @transform_5(%arg0: i32) -> (i32, i32) {
    %c0_i32 = arith.constant 0 : i32
    %c0_i32_0 = arith.constant 0 : i32
    %c0_i32_1 = arith.constant 0 : i32
    return %c0_i32, %c0_i32_0 : i32, i32
  }
  func.func @transform_6(%arg0: i32) -> (i32, i32) {
    %c0_i32 = arith.constant 0 : i32
    %c0_i32_0 = arith.constant 0 : i32
    %c0_i32_1 = arith.constant 0 : i32
    return %c0_i32, %c0_i32_0 : i32, i32
  }
  func.func @transform_7(%arg0: i32) -> (i32, i32) {
    %c0_i32 = arith.constant 0 : i32
    %c0_i32_0 = arith.constant 0 : i32
    %c0_i32_1 = arith.constant 0 : i32
    return %c0_i32, %c0_i32_0 : i32, i32
  }
  func.func @transform_8(%arg0: i32) -> (i32, i32) {
    %c0_i32 = arith.constant 0 : i32
    %c0_i32_0 = arith.constant 0 : i32
    %c0_i32_1 = arith.constant 0 : i32
    return %c0_i32, %c0_i32_0 : i32, i32
  }
  func.func @transform_9(%arg0: i32) -> (i32, i32) {
    %c0_i32 = arith.constant 0 : i32
    %c0_i32_0 = arith.constant 0 : i32
    %c0_i32_1 = arith.constant 0 : i32
    return %c0_i32, %c0_i32_0 : i32, i32
  }
  func.func @transform_10(%arg0: i32) -> (i32, i32) {
    %c0_i32 = arith.constant 0 : i32
    %c0_i32_0 = arith.constant 0 : i32
    %c0_i32_1 = arith.constant 0 : i32
    return %c0_i32, %c0_i32_0 : i32, i32
  }
  func.func @transform_11(%arg0: i32) -> (i32, i32) {
    %c0_i32 = arith.constant 0 : i32
    %c0_i32_0 = arith.constant 0 : i32
    %c0_i32_1 = arith.constant 0 : i32
    return %c0_i32, %c0_i32_0 : i32, i32
  }
  func.func @transform_12(%arg0: i32) -> (i32, i32) {
    %c0_i32 = arith.constant 0 : i32
    %c0_i32_0 = arith.constant 0 : i32
    %c0_i32_1 = arith.constant 0 : i32
    return %c0_i32, %c0_i32_0 : i32, i32
  }
  func.func @transform_13(%arg0: i32) -> (i32, i32) {
    %c0_i32 = arith.constant 0 : i32
    %c0_i32_0 = arith.constant 0 : i32
    return %arg0, %c0_i32 : i32, i32
  }
}

</mosaic_0001>

<bundles_post_ra>
// kernel: tpu_custom_call.1
= control target key start
LH: loop header
LB: loop body
LE: loop exit
PB: predicated region body
PF: predicated region fallthrough
CT: control target
= control target key end

     0   :  { %18 = vsyncpa [#allocation3], 0  ;;  %s19047_s0 = inlined_call_operand.hbm [shape: bf16[8,2048], index: 0, kind: input, shape index: {}]   ;;  %s19048_s1 = inlined_call_operand.hbm [shape: bf16[2048,1024], index: 1, kind: input, shape index: {}]   ;;  %s19049_s2 = inlined_call_operand.hbm [shape: f32[1,1024], index: 2, kind: input, shape index: {}]   ;;  %s19050_s3 = inlined_call_operand.hbm [shape: bf16[1024,1024], index: 3, kind: input, shape index: {}]   ;;  %s19051_s4 = inlined_call_operand.hbm [shape: f32[1,1024], index: 4, kind: input, shape index: {}]   ;;  %s19052_s5 = inlined_call_operand.hbm [shape: bf16[1024,512], index: 5, kind: input, shape index: {}]   ;;  %s19053_s6 = inlined_call_operand.hbm [shape: f32[1,512], index: 6, kind: input, shape index: {}]   ;;  %s19054_s7 = inlined_call_operand.hbm [shape: bf16[512,512], index: 7, kind: input, shape index: {}]   ;;  %s19055_s8 = inlined_call_operand.hbm [shape: f32[1,512], index: 8, kind: input, shape index: {}]   ;;  %s19056_s9 = inlined_call_operand.hbm [shape: bf16[512,256], index: 9, kind: input, shape index: {}]   ;;  %s19057_s10 = inlined_call_operand.hbm [shape: f32[1,256], index: 10, kind: input, shape index: {}]   ;;  %s19058_s11 = inlined_call_operand.hbm [shape: bf16[256,128], index: 11, kind: input, shape index: {}]   ;;  %s19059_s12 = inlined_call_operand.hbm [shape: f32[1,128], index: 12, kind: input, shape index: {}]   ;;  %s19060_s13 = inlined_call_operand.hbm [shape: f32[8,128], index: 13, kind: output, shape index: {}]  }
   0x1   :  { %19 = vsyncpa [#allocation6], 0 }
   0x2   :  { %20 = vsyncpa [#allocation9], 0 }
   0x3   :  { %21 = vsyncpa [#allocation12], 0 }
   0x4   :  { %22 = vsyncpa [#allocation15], 0 }
   0x5   :  { %23 = vsyncpa [#allocation18], 0 }
   0x6   :  { %24 = vsyncpa [#allocation21], 0 }
   0x7   :  { %25 = vsyncpa [#allocation4], 0  ;;  %s18442_s25 = smov [#allocation5]   ;;  %s18118_s29 = scalar_lea.hbm %s19048_s1, 131072 }
   0x8   :  { %s41_s26 = sshll.u32 %s18442_s25, 4  ;;  %p18119_p0 = scmp.ne.s32.totalorder %s19048_s1, %s18118_s29  ;;  %s42_s26 = int_to_ptr.vmem [resolvable:$true] %s41_s26 }
   0x9   :  { %p18122_p1 = scmp.lt.u32.totalorder %s18118_s29, %s19048_s1 }
   0xb   :  { %p18124_p2 = pnand %p18122_p1, %p18119_p0 }
   0xd   :  { %18127 = shalt.err (!%p18124_p2)
}
   0xe   :  { %s18128_s17 = scalar_lea.vmem %s42_s26, 131072  ;;  %p18133_p4 = scmp.lt.s32.totalorder %s42_s26, %s42_s26 }
   0xf   :  { %p18129_p3 = scmp.ne.s32.totalorder %s42_s26, %s18128_s17  ;;  %p18134_p5 = scmp.lt.s32.totalorder %s18128_s17, %s18128_s17 }
  0x11   :  { %p18135_p6 = por %p18134_p5, %p18133_p4 }
  0x13   :  { %p18136_p7 = pnand %p18135_p6, %p18129_p3 }
  0x15   :  { %18139 = shalt.err (!%p18136_p7)
}
  0x16   :  { %s18443_s18 = smov 512   ;;  %s18444_s19 = smov 32  }
  0x17   :  { %47 = dma.hbm_to_vmem [thread:$0]  %s19048_s1, 131072, %s42_s26, [#allocation6], %s18443_s18, %s18443_s18, %s18444_s19  }
  0x18   :  { %s18445_s22 = smov [#allocation8]   ;;  %s18446_s24 = smov [#allocation11]  }
  0x19   :  { %s63_s23 = sshll.u32 %s18445_s22, 4  ;;  %s85_s25 = sshll.u32 %s18446_s24, 4  ;;  %s64_s23 = int_to_ptr.vmem [resolvable:$true] %s63_s23  ;;  %s86_s25 = int_to_ptr.vmem [resolvable:$true] %s85_s25 }
  0x1a   :  { %s18140_s29 = scalar_lea.hbm %s19050_s3, 65536 }
  0x1b   :  { %p18141_p8 = scmp.ne.s32.totalorder %s19050_s3, %s18140_s29  ;;  %p18144_p9 = scmp.lt.u32.totalorder %s18140_s29, %s19050_s3 }
  0x1d   :  { %p18146_p10 = pnand %p18144_p9, %p18141_p8 }
  0x1f   :  { %18149 = shalt.err (!%p18146_p10)
}
  0x20   :  { %s18150_s1 = scalar_lea.vmem %s64_s23, 65536  ;;  %p18155_p12 = scmp.lt.s32.totalorder %s64_s23, %s64_s23 }
  0x21   :  { %p18151_p11 = scmp.ne.s32.totalorder %s64_s23, %s18150_s1  ;;  %p18156_p13 = scmp.lt.s32.totalorder %s18150_s1, %s18150_s1 }
  0x23   :  { %p18157_p0 = por %p18156_p13, %p18155_p12 }
  0x25   :  { %p18158_p1 = pnand %p18157_p0, %p18151_p11 }
  0x27   :  { %18161 = shalt.err (!%p18158_p1)
}
  0x28   :  { %69 = dma.hbm_to_vmem [thread:$0]  %s19050_s3, 65536, %s64_s23, [#allocation9], %s18443_s18, %s18443_s18, %s18444_s19  }
  0x29   :  { %s18162_s22 = scalar_lea.hbm %s19052_s5, 32768 }
  0x2a   :  { %p18163_p2 = scmp.ne.s32.totalorder %s19052_s5, %s18162_s22  ;;  %p18166_p3 = scmp.lt.u32.totalorder %s18162_s22, %s19052_s5 }
  0x2c   :  { %p18168_p4 = pnand %p18166_p3, %p18163_p2 }
  0x2e   :  { %18171 = shalt.err (!%p18168_p4)
}
  0x2f   :  { %s18172_s30 = scalar_lea.vmem %s86_s25, 32768  ;;  %p18177_p6 = scmp.lt.s32.totalorder %s86_s25, %s86_s25 }
  0x30   :  { %p18173_p5 = scmp.ne.s32.totalorder %s86_s25, %s18172_s30  ;;  %p18178_p7 = scmp.lt.s32.totalorder %s18172_s30, %s18172_s30 }
  0x32   :  { %p18179_p8 = por %p18178_p7, %p18177_p6 }
  0x34   :  { %p18180_p9 = pnand %p18179_p8, %p18173_p5 }
  0x36   :  { %18183 = shalt.err (!%p18180_p9)
}
  0x37   :  { %s18447_s3 = smov 256   ;;  %s18448_s18 = smov 16  }
  0x38   :  { %91 = dma.hbm_to_vmem [thread:$0]  %s19052_s5, 32768, %s86_s25, [#allocation12], %s18447_s3, %s18447_s3, %s18448_s18  }
  0x39   :  { %s18449_s14 = smov [#allocation14]   ;;  %s18450_s16 = smov [#allocation17]  }
  0x3a   :  { %s107_s15 = sshll.u32 %s18449_s14, 4  ;;  %s129_s1 = sshll.u32 %s18450_s16, 4  ;;  %s108_s15 = int_to_ptr.vmem [resolvable:$true] %s107_s15  ;;  %s130_s1 = int_to_ptr.vmem [resolvable:$true] %s129_s1 }
  0x3b   :  { %s18184_s20 = scalar_lea.hbm %s19054_s7, 16384 }
  0x3c   :  { %p18185_p10 = scmp.ne.s32.totalorder %s19054_s7, %s18184_s20  ;;  %p18188_p11 = scmp.lt.u32.totalorder %s18184_s20, %s19054_s7 }
  0x3e   :  { %p18190_p12 = pnand %p18188_p11, %p18185_p10 }
  0x40   :  { %18193 = shalt.err (!%p18190_p12)
}
  0x41   :  { %s18194_s5 = scalar_lea.vmem %s108_s15, 16384  ;;  %p18199_p0 = scmp.lt.s32.totalorder %s108_s15, %s108_s15 }
  0x42   :  { %p18195_p13 = scmp.ne.s32.totalorder %s108_s15, %s18194_s5  ;;  %p18200_p1 = scmp.lt.s32.totalorder %s18194_s5, %s18194_s5 }
  0x44   :  { %p18201_p2 = por %p18200_p1, %p18199_p0 }
  0x46   :  { %p18202_p3 = pnand %p18201_p2, %p18195_p13 }
  0x48   :  { %18205 = shalt.err (!%p18202_p3)
}
  0x49   :  { %113 = dma.hbm_to_vmem [thread:$0]  %s19054_s7, 16384, %s108_s15, [#allocation15], %s18447_s3, %s18447_s3, %s18448_s18  }
  0x4a   :  { %s18206_s19 = scalar_lea.hbm %s19056_s9, 8192 }
  0x4b   :  { %p18207_p4 = scmp.ne.s32.totalorder %s19056_s9, %s18206_s19  ;;  %p18210_p5 = scmp.lt.u32.totalorder %s18206_s19, %s19056_s9 }
  0x4d   :  { %p18212_p6 = pnand %p18210_p5, %p18207_p4 }
  0x4f   :  { %18215 = shalt.err (!%p18212_p6)
}
  0x50   :  { %s18216_s17 = scalar_lea.vmem %s130_s1, 8192  ;;  %p18221_p8 = scmp.lt.s32.totalorder %s130_s1, %s130_s1 }
  0x51   :  { %p18217_p7 = scmp.ne.s32.totalorder %s130_s1, %s18216_s17  ;;  %p18222_p9 = scmp.lt.s32.totalorder %s18216_s17, %s18216_s17 }
  0x53   :  { %p18223_p10 = por %p18222_p9, %p18221_p8 }
  0x55   :  { %p18224_p11 = pnand %p18223_p10, %p18217_p7 }
  0x57   :  { %18227 = shalt.err (!%p18224_p11)
}
  0x58   :  { %s18451_s7 = smov 128   ;;  %s18452_s3 = smov 8  }
  0x59   :  { %135 = dma.hbm_to_vmem [thread:$0]  %s19056_s9, 8192, %s130_s1, [#allocation18], %s18451_s7, %s18451_s7, %s18452_s3  }
  0x5a   :  { %s18453_s20 = smov [#allocation20]   ;;  %s18228_s27 = scalar_lea.hbm %s19058_s11, 2048 }
  0x5b   :  { %s151_s21 = sshll.u32 %s18453_s20, 4  ;;  %p18229_p12 = scmp.ne.s32.totalorder %s19058_s11, %s18228_s27  ;;  %s152_s21 = int_to_ptr.vmem [resolvable:$true] %s151_s21 }
  0x5c   :  { %p18232_p13 = scmp.lt.u32.totalorder %s18228_s27, %s19058_s11 }
  0x5e   :  { %p18234_p0 = pnand %p18232_p13, %p18229_p12 }
  0x60   :  { %18237 = shalt.err (!%p18234_p0)
}
  0x61   :  { %s18238_s30 = scalar_lea.vmem %s152_s21, 2048  ;;  %p18243_p2 = scmp.lt.s32.totalorder %s152_s21, %s152_s21 }
  0x62   :  { %p18239_p1 = scmp.ne.s32.totalorder %s152_s21, %s18238_s30  ;;  %p18244_p3 = scmp.lt.s32.totalorder %s18238_s30, %s18238_s30 }
  0x64   :  { %p18245_p4 = por %p18244_p3, %p18243_p2 }
  0x66   :  { %p18246_p5 = pnand %p18245_p4, %p18239_p1 }
  0x68   :  { %18249 = shalt.err (!%p18246_p5)
}
  0x69   :  { %s18454_s9 = smov 64   ;;  %s18455_s1 = smov 4  }
  0x6a   :  { %157 = dma.hbm_to_vmem [thread:$0]  %s19058_s11, 2048, %s152_s21, [#allocation21], %s18454_s9, %s18454_s9, %s18455_s1  }
  0x6b   :  { %s18456_s14 = smov [#allocation2]   ;;  %s18457_s26 = smov [#allocation7]  }
  0x6c   :  { %s32_s16 = sshll.u32 %s18456_s14, 4  ;;  %s54_s17 = sshll.u32 %s18457_s26, 4  ;;  %s33_s16 = int_to_ptr.vmem [resolvable:$true] %s32_s16  ;;  %s55_s17 = int_to_ptr.vmem [resolvable:$true] %s54_s17 }
  0x6d   :  { %s18250_s18 = scalar_lea.hbm %s19047_s0, 1024 }
  0x6e   :  { %p18251_p6 = scmp.ne.s32.totalorder %s19047_s0, %s18250_s18  ;;  %p18254_p7 = scmp.lt.u32.totalorder %s18250_s18, %s19047_s0 }
  0x70   :  { %p18256_p8 = pnand %p18254_p7, %p18251_p6 }
  0x72   :  { %18259 = shalt.err (!%p18256_p8)
}
  0x73   :  { %s18260_s11 = scalar_lea.vmem %s33_s16, 1024  ;;  %p18265_p10 = scmp.lt.s32.totalorder %s33_s16, %s33_s16 }
  0x74   :  { %p18261_p9 = scmp.ne.s32.totalorder %s33_s16, %s18260_s11  ;;  %p18266_p11 = scmp.lt.s32.totalorder %s18260_s11, %s18260_s11 }
  0x76   :  { %p18267_p12 = por %p18266_p11, %p18265_p10 }
  0x78   :  { %p18268_p13 = pnand %p18267_p12, %p18261_p9 }
  0x7a   :  { %18271 = shalt.err (!%p18268_p13)
}
  0x7b   :  { %35 = dma.hbm_to_vmem [thread:$0]  %s19047_s0, 1024, %s33_s16, [#allocation3]  }
  0x7c   :  { %s18272_s28 = scalar_lea.hbm %s19049_s2, 128 }
  0x7d   :  { %p18273_p0 = scmp.ne.s32.totalorder %s19049_s2, %s18272_s28  ;;  %p18276_p1 = scmp.lt.u32.totalorder %s18272_s28, %s19049_s2 }
  0x7f   :  { %p18278_p2 = pnand %p18276_p1, %p18273_p0 }
  0x81   :  { %18281 = shalt.err (!%p18278_p2)
}
  0x82   :  { %s18282_s19 = scalar_lea.vmem %s55_s17, 128  ;;  %p18287_p4 = scmp.lt.s32.totalorder %s55_s17, %s55_s17 }
  0x83   :  { %p18283_p3 = scmp.ne.s32.totalorder %s55_s17, %s18282_s19  ;;  %p18288_p5 = scmp.lt.s32.totalorder %s18282_s19, %s18282_s19 }
  0x85   :  { %p18289_p6 = por %p18288_p5, %p18287_p4 }
  0x87   :  { %p18290_p7 = pnand %p18289_p6, %p18283_p3 }
  0x89   :  { %18293 = shalt.err (!%p18290_p7)
}
  0x8a   :  { %57 = dma.hbm_to_vmem [thread:$0]  %s19049_s2, 128, %s55_s17, [#allocation6]  }
  0x8b   :  { %s18458_s14 = smov [#allocation10]   ;;  %s18459_s26 = smov [#allocation13]  }
  0x8c   :  { %s76_s16 = sshll.u32 %s18458_s14, 4  ;;  %s98_s7 = sshll.u32 %s18459_s26, 4  ;;  %s77_s16 = int_to_ptr.vmem [resolvable:$true] %s76_s16  ;;  %s99_s7 = int_to_ptr.vmem [resolvable:$true] %s98_s7 }
  0x8d   :  { %s18294_s15 = scalar_lea.hbm %s19051_s4, 128 }
  0x8e   :  { %p18295_p8 = scmp.ne.s32.totalorder %s19051_s4, %s18294_s15  ;;  %p18298_p9 = scmp.lt.u32.totalorder %s18294_s15, %s19051_s4 }
  0x90   :  { %p18300_p10 = pnand %p18298_p9, %p18295_p8 }
  0x92   :  { %18303 = shalt.err (!%p18300_p10)
}
  0x93   :  { %s18304_s2 = scalar_lea.vmem %s77_s16, 128  ;;  %p18309_p12 = scmp.lt.s32.totalorder %s77_s16, %s77_s16 }
  0x94   :  { %p18305_p11 = scmp.ne.s32.totalorder %s77_s16, %s18304_s2  ;;  %p18310_p13 = scmp.lt.s32.totalorder %s18304_s2, %s18304_s2 }
  0x96   :  { %p18311_p0 = por %p18310_p13, %p18309_p12 }
  0x98   :  { %p18312_p1 = pnand %p18311_p0, %p18305_p11 }
  0x9a   :  { %18315 = shalt.err (!%p18312_p1)
}
  0x9b   :  { %79 = dma.hbm_to_vmem [thread:$0]  %s19051_s4, 128, %s77_s16, [#allocation9]  }
  0x9c   :  { %s18316_s25 = scalar_lea.hbm %s19053_s6, 64 }
  0x9d   :  { %p18317_p2 = scmp.ne.s32.totalorder %s19053_s6, %s18316_s25  ;;  %p18320_p3 = scmp.lt.u32.totalorder %s18316_s25, %s19053_s6 }
  0x9f   :  { %p18322_p4 = pnand %p18320_p3, %p18317_p2 }
  0xa1   :  { %18325 = shalt.err (!%p18322_p4)
}
  0xa2   :  { %s18326_s1 = scalar_lea.vmem %s99_s7, 64  ;;  %p18331_p6 = scmp.lt.s32.totalorder %s99_s7, %s99_s7 }
  0xa3   :  { %p18327_p5 = scmp.ne.s32.totalorder %s99_s7, %s18326_s1  ;;  %p18332_p7 = scmp.lt.s32.totalorder %s18326_s1, %s18326_s1 }
  0xa5   :  { %p18333_p8 = por %p18332_p7, %p18331_p6 }
  0xa7   :  { %p18334_p9 = pnand %p18333_p8, %p18327_p5 }
  0xa9   :  { %18337 = shalt.err (!%p18334_p9)
}
  0xaa   :  { %101 = dma.hbm_to_vmem [thread:$0]  %s19053_s6, 64, %s99_s7, [#allocation12]  }
  0xab   :  { %s18460_s0 = smov [#allocation16]   ;;  %s18461_s14 = smov [#allocation19]  }
  0xac   :  { %s120_s23 = sshll.u32 %s18460_s0, 4  ;;  %s142_s16 = sshll.u32 %s18461_s14, 4  ;;  %s121_s23 = int_to_ptr.vmem [resolvable:$true] %s120_s23  ;;  %s143_s16 = int_to_ptr.vmem [resolvable:$true] %s142_s16 }
  0xad   :  { %s18338_s18 = scalar_lea.hbm %s19055_s8, 64 }
  0xae   :  { %p18339_p10 = scmp.ne.s32.totalorder %s19055_s8, %s18338_s18  ;;  %p18342_p11 = scmp.lt.u32.totalorder %s18338_s18, %s19055_s8 }
  0xb0   :  { %p18344_p12 = pnand %p18342_p11, %p18339_p10 }
  0xb2   :  { %18347 = shalt.err (!%p18344_p12)
}
  0xb3   :  { %s18348_s6 = scalar_lea.vmem %s121_s23, 64  ;;  %p18353_p0 = scmp.lt.s32.totalorder %s121_s23, %s121_s23 }
  0xb4   :  { %p18349_p13 = scmp.ne.s32.totalorder %s121_s23, %s18348_s6  ;;  %p18354_p1 = scmp.lt.s32.totalorder %s18348_s6, %s18348_s6 }
  0xb6   :  { %p18355_p2 = por %p18354_p1, %p18353_p0 }
  0xb8   :  { %p18356_p3 = pnand %p18355_p2, %p18349_p13 }
  0xba   :  { %18359 = shalt.err (!%p18356_p3)
}
  0xbb   :  { %123 = dma.hbm_to_vmem [thread:$0]  %s19055_s8, 64, %s121_s23, [#allocation15]  }
  0xbc   :  { %s18360_s21 = scalar_lea.hbm %s19057_s10, 32 }
  0xbd   :  { %p18361_p4 = scmp.ne.s32.totalorder %s19057_s10, %s18360_s21  ;;  %p18364_p5 = scmp.lt.u32.totalorder %s18360_s21, %s19057_s10 }
  0xbf   :  { %p18366_p6 = pnand %p18364_p5, %p18361_p4 }
  0xc1   :  { %18369 = shalt.err (!%p18366_p6)
}
  0xc2   :  { %s18370_s29 = scalar_lea.vmem %s143_s16, 32  ;;  %p18375_p8 = scmp.lt.s32.totalorder %s143_s16, %s143_s16 }
  0xc3   :  { %p18371_p7 = scmp.ne.s32.totalorder %s143_s16, %s18370_s29  ;;  %p18376_p9 = scmp.lt.s32.totalorder %s18370_s29, %s18370_s29 }
  0xc5   :  { %p18377_p10 = por %p18376_p9, %p18375_p8 }
  0xc7   :  { %p18378_p11 = pnand %p18377_p10, %p18371_p7 }
  0xc9   :  { %18381 = shalt.err (!%p18378_p11)
}
  0xca   :  { %145 = dma.hbm_to_vmem [thread:$0]  %s19057_s10, 32, %s143_s16, [#allocation18]  }
  0xcb   :  { %s18462_s9 = smov [#allocation22]   ;;  %s18382_s0 = scalar_lea.hbm %s19059_s12, 16 }
  0xcc   :  { %s164_s1 = sshll.u32 %s18462_s9, 4  ;;  %p18383_p12 = scmp.ne.s32.totalorder %s19059_s12, %s18382_s0  ;;  %s165_s1 = int_to_ptr.vmem [resolvable:$true] %s164_s1 }
  0xcd   :  { %p18386_p13 = scmp.lt.u32.totalorder %s18382_s0, %s19059_s12 }
  0xcf   :  { %p18388_p0 = pnand %p18386_p13, %p18383_p12 }
  0xd1   :  { %18391 = shalt.err (!%p18388_p0)
}
  0xd2   :  { %s18392_s18 = scalar_lea.vmem %s165_s1, 16  ;;  %s18396_s10 = scalar_lea.vmem %s165_s1, 32 }
  0xd3   :  { %p18393_p1 = scmp.ne.s32.totalorder %s165_s1, %s18392_s18  ;;  %p18397_p2 = scmp.lt.s32.totalorder %s165_s1, %s165_s1 }
  0xd4   :  { %p18398_p3 = scmp.lt.s32.totalorder %s18396_s10, %s18392_s18 }
  0xd6   :  { %p18399_p4 = por %p18398_p3, %p18397_p2 }
  0xd8   :  { %p18400_p5 = pnand %p18399_p4, %p18393_p1 }
  0xda   :  { %18403 = shalt.err (!%p18400_p5)
}
  0xdb   :  { %167 = dma.hbm_to_vmem [thread:$0]  %s19059_s12, 16, %s165_s1, [#allocation21]  }
  0xdc   :  { %18426 = dma.done.wait [#allocation3], 1024  }
  0xdd   :  { %18427 = vsyncadd [#allocation3], 4294966272 }
  0xde   :  { %18428 = dma.done.wait [#allocation6], 131200  }
  0xdf   :  { %18429 = vsyncadd [#allocation6], 4294836096 }
  0xe0   :  { %18430 = dma.done.wait [#allocation9], 65664  }
  0xe1   :  { %18431 = vsyncadd [#allocation9], 4294901632 }
  0xe2   :  { %18432 = dma.done.wait [#allocation12], 32832  }
  0xe3   :  { %18433 = vsyncadd [#allocation12], 4294934464 }
  0xe4   :  { %18434 = dma.done.wait [#allocation15], 16448  }
  0xe5   :  { %18435 = vsyncadd [#allocation15], 4294950848 }
  0xe6   :  { %18436 = dma.done.wait [#allocation18], 8224  }
  0xe7   :  { %18437 = vsyncadd [#allocation18], 4294959072 }
  0xe8   :  { %18438 = dma.done.wait [#allocation21], 2064  }
  0xe9   :  { %18439 = vsyncadd [#allocation21], 4294965232  ;;  %v216_v0 = vld [vmem:[#allocation5] sm:$0xff]  ;;  %v18692_v54 = vld [vmem:[#allocation2 + $0x8] sm:$0xff]  ;;  %s18463_s12 = smov [#allocation23]  }
  0xea   :  { %v220_v1 = vld [vmem:[#allocation5 + $0x20] sm:$0xff]  ;;  %v18700_v61 = vcombine.high %v18692_v54, %v18692_v54  ;;  %s15111_s20 = sshll.u32 %s18463_s12, 4  ;;  %s15112_s20 = int_to_ptr.vmem [resolvable:$true] %s15111_s20 }
  0xeb   :  { %v344_v2 = vld [vmem:[#allocation5 + $0x400] sm:$0xff]  ;;  %v15143_v3 = vcombine.high %v216_v0, %v220_v1  ;;  %v15142_v5 = vcombine.low %v216_v0, %v220_v1  ;;  %s18404_s22 = scalar_lea.vmem %s15112_s20, 128  ;;  %p18409_p7 = scmp.lt.s32.totalorder %s15112_s20, %s15112_s20 }
  0xec   :  { %v348_v4 = vld [vmem:[#allocation5 + $0x420] sm:$0xff]  ;;  %6531 = vmatprep.mubr.bf16.mxu0 %v18700_v61  ;;  %p18405_p6 = scmp.ne.s32.totalorder %s15112_s20, %s18404_s22  ;;  %p18410_p8 = scmp.lt.s32.totalorder %s18404_s22, %s18404_s22 }
  0xed   :  { %v224_v6 = vld [vmem:[#allocation5 + $0x40] sm:$0xff]  ;;  %v15271_v8 = vcombine.high %v344_v2, %v348_v4  ;;  %v15270_v9 = vcombine.low %v344_v2, %v348_v4  ;;  %6458 = vmatprep.subr.bf16.mxu1 %v15143_v3 }
  0xee   :  { %v228_v7 = vld [vmem:[#allocation5 + $0x60] sm:$0xff]  ;;  %6459 = vmatpush1.bf16.msra.mxu1 %v15142_v5  ;;  %p18411_p9 = por %p18410_p8, %p18409_p7 }
  0xef   :  { %v15151_v10 = vcombine.high %v224_v6, %v228_v7  ;;  %v352_v11 = vld [vmem:[#allocation5 + $0x440] sm:$0xff]  ;;  %6499 = vmatprep.subr.bf16.mxu0 %v15271_v8  ;;  %v15150_v18 = vcombine.low %v224_v6, %v228_v7 }
  0xf0   :  { %v356_v12 = vld [vmem:[#allocation5 + $0x460] sm:$0xff]  ;;  %6500 = vmatpush1.bf16.msra.mxu0 %v15270_v9  ;;  %p18412_p10 = pnand %p18411_p9, %p18405_p6 }
  0xf1   :  { %v232_v13 = vld [vmem:[#allocation5 + $0x80] sm:$0xff]  ;;  %v15279_v14 = vcombine.high %v352_v11, %v356_v12  ;;  %6460 = vmatprep.subr.bf16.mxu1 %v15151_v10  ;;  %v15278_v19 = vcombine.low %v352_v11, %v356_v12 }
  0xf2   :  { %v236_v15 = vld [vmem:[#allocation5 + $0xa0] sm:$0xff]  ;;  %6461 = vmatpush1.bf16.msra.mxu1 %v15150_v18 }
  0xf3   :  { %v360_v16 = vld [vmem:[#allocation5 + $0x480] sm:$0xff]  ;;  %v15159_v20 = vcombine.high %v232_v13, %v236_v15  ;;  %6501 = vmatprep.subr.bf16.mxu0 %v15279_v14  ;;  %v15158_v26 = vcombine.low %v232_v13, %v236_v15 }
  0xf4   :  { %v364_v17 = vld [vmem:[#allocation5 + $0x4a0] sm:$0xff]  ;;  %6502 = vmatpush1.bf16.msra.mxu0 %v15278_v19 }
  0xf5   :  { %v15287_v21 = vcombine.high %v360_v16, %v364_v17  ;;  %v240_v22 = vld [vmem:[#allocation5 + $0xc0] sm:$0xff]  ;;  %6462 = vmatprep.subr.bf16.mxu1 %v15159_v20  ;;  %v15286_v27 = vcombine.low %v360_v16, %v364_v17 }
  0xf6   :  { %v244_v23 = vld [vmem:[#allocation5 + $0xe0] sm:$0xff]  ;;  %6463 = vmatpush1.bf16.msra.mxu1 %v15158_v26 }
  0xf7   :  { %v368_v24 = vld [vmem:[#allocation5 + $0x4c0] sm:$0xff]  ;;  %v15167_v28 = vcombine.high %v240_v22, %v244_v23  ;;  %6503 = vmatprep.subr.bf16.mxu0 %v15287_v21  ;;  %v15166_v34 = vcombine.low %v240_v22, %v244_v23 }
  0xf8   :  { %v372_v25 = vld [vmem:[#allocation5 + $0x4e0] sm:$0xff]  ;;  %6504 = vmatpush1.bf16.msra.mxu0 %v15286_v27 }
  0xf9   :  { %v15295_v29 = vcombine.high %v368_v24, %v372_v25  ;;  %v248_v30 = vld [vmem:[#allocation5 + $0x100] sm:$0xff]  ;;  %6464 = vmatprep.subr.bf16.mxu1 %v15167_v28  ;;  %v15294_v35 = vcombine.low %v368_v24, %v372_v25 }
  0xfa   :  { %v252_v31 = vld [vmem:[#allocation5 + $0x120] sm:$0xff]  ;;  %6465 = vmatpush1.bf16.msra.mxu1 %v15166_v34 }
  0xfb   :  { %v376_v32 = vld [vmem:[#allocation5 + $0x500] sm:$0xff]  ;;  %v15175_v36 = vcombine.high %v248_v30, %v252_v31  ;;  %6505 = vmatprep.subr.bf16.mxu0 %v15295_v29  ;;  %v15174_v42 = vcombine.low %v248_v30, %v252_v31 }
  0xfc   :  { %v380_v33 = vld [vmem:[#allocation5 + $0x520] sm:$0xff]  ;;  %6506 = vmatpush1.bf16.msra.mxu0 %v15294_v35 }
  0xfd   :  { %v15303_v37 = vcombine.high %v376_v32, %v380_v33  ;;  %v256_v38 = vld [vmem:[#allocation5 + $0x140] sm:$0xff]  ;;  %6466 = vmatprep.subr.bf16.mxu1 %v15175_v36  ;;  %v15302_v43 = vcombine.low %v376_v32, %v380_v33 }
  0xfe   :  { %v260_v39 = vld [vmem:[#allocation5 + $0x160] sm:$0xff]  ;;  %6467 = vmatpush1.bf16.msra.mxu1 %v15174_v42 }
  0xff   :  { %v384_v40 = vld [vmem:[#allocation5 + $0x540] sm:$0xff]  ;;  %v15183_v44 = vcombine.high %v256_v38, %v260_v39  ;;  %6507 = vmatprep.subr.bf16.mxu0 %v15303_v37  ;;  %v15182_v50 = vcombine.low %v256_v38, %v260_v39 }
 0x100   :  { %v388_v41 = vld [vmem:[#allocation5 + $0x560] sm:$0xff]  ;;  %6508 = vmatpush1.bf16.msra.mxu0 %v15302_v43 }
 0x101   :  { %v15311_v45 = vcombine.high %v384_v40, %v388_v41  ;;  %v264_v46 = vld [vmem:[#allocation5 + $0x180] sm:$0xff]  ;;  %6468 = vmatprep.subr.bf16.mxu1 %v15183_v44  ;;  %v15310_v51 = vcombine.low %v384_v40, %v388_v41 }
 0x102   :  { %v268_v47 = vld [vmem:[#allocation5 + $0x1a0] sm:$0xff]  ;;  %6469 = vmatpush1.bf16.msra.mxu1 %v15182_v50 }
 0x103   :  { %v392_v48 = vld [vmem:[#allocation5 + $0x580] sm:$0xff]  ;;  %v15191_v52 = vcombine.high %v264_v46, %v268_v47  ;;  %6509 = vmatprep.subr.bf16.mxu0 %v15311_v45  ;;  %v15190_v62 = vcombine.low %v264_v46, %v268_v47 }
 0x104   :  { %v396_v49 = vld [vmem:[#allocation5 + $0x5a0] sm:$0xff]  ;;  %6510 = vmatpush1.bf16.msra.mxu0 %v15310_v51 }
 0x105   :  { %v18690_v53 = vld [vmem:[#allocation2] sm:$0xff]  ;;  %v15319_v55 = vcombine.high %v392_v48, %v396_v49  ;;  %6470 = vmatprep.subr.bf16.mxu1 %v15191_v52  ;;  %v15318_v63 = vcombine.low %v392_v48, %v396_v49 }
 0x106   :  { %v272_v56 = vld [vmem:[#allocation5 + $0x1c0] sm:$0xff]  ;;  %v18696_v58 = vcombine.high %v18690_v53, %v18690_v53  ;;  %6471 = vmatpush1.bf16.msra.mxu1 %v15190_v62 }
 0x107   :  { %v276_v57 = vld [vmem:[#allocation5 + $0x1e0] sm:$0xff]  ;;  %6511 = vmatprep.subr.bf16.mxu0 %v15319_v55 }
 0x108   :  { %v400_v59 = vld [vmem:[#allocation5 + $0x5c0] sm:$0xff]  ;;  %6490 = vmatprep.mubr.bf16.mxu1 %v18696_v58  ;;  %v15199_v0 = vcombine.high %v272_v56, %v276_v57  ;;  %v15198_v6 = vcombine.low %v272_v56, %v276_v57  ;;  %6512 = vmatpush1.bf16.msra.mxu0 %v15318_v63 }
 0x109   :  { %v404_v60 = vld [vmem:[#allocation5 + $0x5e0] sm:$0xff] }
 0x10a   :  { %v15327_v1 = vcombine.high %v400_v59, %v404_v60  ;;  %v280_v2 = vld [vmem:[#allocation5 + $0x200] sm:$0xff]  ;;  %6472 = vmatprep.subr.bf16.mxu1 %v15199_v0  ;;  %v15326_v7 = vcombine.low %v400_v59, %v404_v60 }
 0x10b   :  { %v284_v3 = vld [vmem:[#allocation5 + $0x220] sm:$0xff]  ;;  %6473 = vmatpush1.bf16.msra.mxu1 %v15198_v6  ;;  %v217_v6 = vld [vmem:[#allocation5 + $0x8] sm:$0xff] }
 0x10c   :  { %v408_v4 = vld [vmem:[#allocation5 + $0x600] sm:$0xff]  ;;  %v15207_v8 = vcombine.high %v280_v2, %v284_v3  ;;  %6513 = vmatprep.subr.bf16.mxu0 %v15327_v1  ;;  %v15206_v14 = vcombine.low %v280_v2, %v284_v3 }
 0x10d   :  { %v412_v5 = vld [vmem:[#allocation5 + $0x620] sm:$0xff]  ;;  %6514 = vmatpush1.bf16.msra.mxu0 %v15326_v7  ;;  %v221_v7 = vld [vmem:[#allocation5 + $0x28] sm:$0xff] }
 0x10e   :  { %v15335_v9 = vcombine.high %v408_v4, %v412_v5  ;;  %v288_v10 = vld [vmem:[#allocation5 + $0x240] sm:$0xff]  ;;  %6474 = vmatprep.subr.bf16.mxu1 %v15207_v8  ;;  %v15334_v15 = vcombine.low %v408_v4, %v412_v5 }
 0x10f   :  { %v292_v11 = vld [vmem:[#allocation5 + $0x260] sm:$0xff]  ;;  %6475 = vmatpush1.bf16.msra.mxu1 %v15206_v14  ;;  %v225_v14 = vld [vmem:[#allocation5 + $0x48] sm:$0xff] }
 0x110   :  { %v416_v12 = vld [vmem:[#allocation5 + $0x640] sm:$0xff]  ;;  %v15215_v16 = vcombine.high %v288_v10, %v292_v11  ;;  %6515 = vmatprep.subr.bf16.mxu0 %v15335_v9  ;;  %v15214_v22 = vcombine.low %v288_v10, %v292_v11 }
 0x111   :  { %v420_v13 = vld [vmem:[#allocation5 + $0x660] sm:$0xff]  ;;  %6516 = vmatpush1.bf16.msra.mxu0 %v15334_v15  ;;  %v229_v15 = vld [vmem:[#allocation5 + $0x68] sm:$0xff] }
 0x112   :  { %v15343_v17 = vcombine.high %v416_v12, %v420_v13  ;;  %v296_v18 = vld [vmem:[#allocation5 + $0x280] sm:$0xff]  ;;  %6476 = vmatprep.subr.bf16.mxu1 %v15215_v16  ;;  %v15342_v23 = vcombine.low %v416_v12, %v420_v13  ;;  %v15145_v12 = vcombine.high %v217_v6, %v221_v7  ;;  %v18706_v16 = vcombine.low %v18690_v53, %v18690_v53  ;;  %v233_v53 = vld [vmem:[#allocation5 + $0x88] sm:$0xff] }
 0x113   :  { %v300_v19 = vld [vmem:[#allocation5 + $0x2a0] sm:$0xff]  ;;  %6477 = vmatpush1.bf16.msra.mxu1 %v15214_v22 }
 0x114   :  { %v424_v20 = vld [vmem:[#allocation5 + $0x680] sm:$0xff]  ;;  %v15223_v24 = vcombine.high %v296_v18, %v300_v19  ;;  %6517 = vmatprep.subr.bf16.mxu0 %v15343_v17  ;;  %v15222_v30 = vcombine.low %v296_v18, %v300_v19  ;;  %v18708_v19 = vld [vmem:[#allocation2 + $0x10] sm:$0xff] }
 0x115   :  { %v428_v21 = vld [vmem:[#allocation5 + $0x6a0] sm:$0xff]  ;;  %6518 = vmatpush1.bf16.msra.mxu0 %v15342_v23  ;;  %v15153_v23 = vcombine.high %v225_v14, %v229_v15 }
 0x116   :  { %v15351_v25 = vcombine.high %v424_v20, %v428_v21  ;;  %v304_v26 = vld [vmem:[#allocation5 + $0x2c0] sm:$0xff]  ;;  %6478 = vmatprep.subr.bf16.mxu1 %v15223_v24  ;;  %v15350_v31 = vcombine.low %v424_v20, %v428_v21  ;;  %v15144_v20 = vcombine.low %v217_v6, %v221_v7  ;;  %v18712_v21 = vcombine.low %v18692_v54, %v18692_v54  ;;  %v277_v7 = vld [vmem:[#allocation5 + $0x1e8] sm:$0xff] }
 0x117   :  { %v308_v27 = vld [vmem:[#allocation5 + $0x2e0] sm:$0xff]  ;;  %6479 = vmatpush1.bf16.msra.mxu1 %v15222_v30  ;;  %v15152_v54 = vcombine.low %v225_v14, %v229_v15  ;;  %v285_v15 = vld [vmem:[#allocation5 + $0x228] sm:$0xff] }
 0x118   :  { %v432_v28 = vld [vmem:[#allocation5 + $0x6c0] sm:$0xff]  ;;  %v15231_v32 = vcombine.high %v304_v26, %v308_v27  ;;  %6519 = vmatprep.subr.bf16.mxu0 %v15351_v25  ;;  %v15230_v38 = vcombine.low %v304_v26, %v308_v27  ;;  %v237_v27 = vld [vmem:[#allocation5 + $0xa8] sm:$0xff] }
 0x119   :  { %v436_v29 = vld [vmem:[#allocation5 + $0x6e0] sm:$0xff]  ;;  %6520 = vmatpush1.bf16.msra.mxu0 %v15350_v31  ;;  %v15161_v30 = vcombine.high %v233_v53, %v237_v27 }
 0x11a   :  { %v15359_v33 = vcombine.high %v432_v28, %v436_v29  ;;  %v312_v34 = vld [vmem:[#allocation5 + $0x300] sm:$0xff]  ;;  %6480 = vmatprep.subr.bf16.mxu1 %v15231_v32  ;;  %v15358_v39 = vcombine.low %v432_v28, %v436_v29  ;;  %v18716_v28 = vcombine.high %v18708_v19, %v18708_v19 }
 0x11b   :  { %v316_v35 = vld [vmem:[#allocation5 + $0x320] sm:$0xff]  ;;  %6481 = vmatpush1.bf16.msra.mxu1 %v15230_v38 }
 0x11c   :  { %v440_v36 = vld [vmem:[#allocation5 + $0x700] sm:$0xff]  ;;  %v15239_v40 = vcombine.high %v312_v34, %v316_v35  ;;  %6521 = vmatprep.subr.bf16.mxu0 %v15359_v33  ;;  %v15238_v46 = vcombine.low %v312_v34, %v316_v35  ;;  %v241_v33 = vld [vmem:[#allocation5 + $0xc8] sm:$0xff] }
 0x11d   :  { %v444_v37 = vld [vmem:[#allocation5 + $0x720] sm:$0xff]  ;;  %6522 = vmatpush1.bf16.msra.mxu0 %v15358_v39  ;;  %v245_v35 = vld [vmem:[#allocation5 + $0xe8] sm:$0xff] }
 0x11e   :  { %v15367_v41 = vcombine.high %v440_v36, %v444_v37  ;;  %v320_v42 = vld [vmem:[#allocation5 + $0x340] sm:$0xff]  ;;  %6482 = vmatprep.subr.bf16.mxu1 %v15239_v40  ;;  %v15366_v47 = vcombine.low %v440_v36, %v444_v37  ;;  %v15160_v36 = vcombine.low %v233_v53, %v237_v27  ;;  %v15169_v38 = vcombine.high %v241_v33, %v245_v35 }
 0x11f   :  { %v324_v43 = vld [vmem:[#allocation5 + $0x360] sm:$0xff]  ;;  %6483 = vmatpush1.bf16.msra.mxu1 %v15238_v46 }
 0x120   :  { %v448_v44 = vld [vmem:[#allocation5 + $0x740] sm:$0xff]  ;;  %v15247_v48 = vcombine.high %v320_v42, %v324_v43  ;;  %6523 = vmatprep.subr.bf16.mxu0 %v15367_v41  ;;  %v15246_v56 = vcombine.low %v320_v42, %v324_v43  ;;  %v249_v41 = vld [vmem:[#allocation5 + $0x108] sm:$0xff] }
 0x121   :  { %v452_v45 = vld [vmem:[#allocation5 + $0x760] sm:$0xff]  ;;  %6524 = vmatpush1.bf16.msra.mxu0 %v15366_v47  ;;  %v253_v43 = vld [vmem:[#allocation5 + $0x128] sm:$0xff] }
 0x122   :  { %v15375_v49 = vcombine.high %v448_v44, %v452_v45  ;;  %v328_v50 = vld [vmem:[#allocation5 + $0x380] sm:$0xff]  ;;  %6484 = vmatprep.subr.bf16.mxu1 %v15247_v48  ;;  %v15374_v57 = vcombine.low %v448_v44, %v452_v45  ;;  %v15168_v44 = vcombine.low %v241_v33, %v245_v35  ;;  %v15177_v46 = vcombine.high %v249_v41, %v253_v43  ;;  %v301_v33 = vld [vmem:[#allocation5 + $0x2a8] sm:$0xff] }
 0x123   :  { %v332_v51 = vld [vmem:[#allocation5 + $0x3a0] sm:$0xff]  ;;  %6485 = vmatpush1.bf16.msra.mxu1 %v15246_v56 }
 0x124   :  { %v456_v52 = vld [vmem:[#allocation5 + $0x780] sm:$0xff]  ;;  %v15255_v59 = vcombine.high %v328_v50, %v332_v51  ;;  %6525 = vmatprep.subr.bf16.mxu0 %v15375_v49  ;;  %v15254_v2 = vcombine.low %v328_v50, %v332_v51  ;;  %v257_v49 = vld [vmem:[#allocation5 + $0x148] sm:$0xff] }
 0x125   :  { %v460_v55 = vld [vmem:[#allocation5 + $0x7a0] sm:$0xff]  ;;  %6526 = vmatpush1.bf16.msra.mxu0 %v15374_v57  ;;  %v261_v51 = vld [vmem:[#allocation5 + $0x168] sm:$0xff] }
 0x126   :  { %v15383_v60 = vcombine.high %v456_v52, %v460_v55  ;;  %v336_v62 = vld [vmem:[#allocation5 + $0x3c0] sm:$0xff]  ;;  %6486 = vmatprep.subr.bf16.mxu1 %v15255_v59  ;;  %v15382_v3 = vcombine.low %v456_v52, %v460_v55  ;;  %v15176_v52 = vcombine.low %v249_v41, %v253_v43  ;;  %v15185_v56 = vcombine.high %v257_v49, %v261_v51  ;;  %v309_v41 = vld [vmem:[#allocation5 + $0x2e8] sm:$0xff] }
 0x127   :  { %v340_v63 = vld [vmem:[#allocation5 + $0x3e0] sm:$0xff]  ;;  %6487 = vmatpush1.bf16.msra.mxu1 %v15254_v2 }
 0x128   :  { %v464_v0 = vld [vmem:[#allocation5 + $0x7c0] sm:$0xff]  ;;  %v15263_v4 = vcombine.high %v336_v62, %v340_v63  ;;  %6527 = vmatprep.subr.bf16.mxu0 %v15383_v60  ;;  %v15262_v10 = vcombine.low %v336_v62, %v340_v63  ;;  %v265_v60 = vld [vmem:[#allocation5 + $0x188] sm:$0xff] }
 0x129   :  { %v468_v1 = vld [vmem:[#allocation5 + $0x7e0] sm:$0xff]  ;;  %6528 = vmatpush1.bf16.msra.mxu0 %v15382_v3  ;;  %v269_v63 = vld [vmem:[#allocation5 + $0x1a8] sm:$0xff] }
 0x12a   :  { %v15391_v5 = vcombine.high %v464_v0, %v468_v1  ;;  %v472_v8 = vld [vmem:[#allocation5 + $0x800] sm:$0xff]  ;;  %6488 = vmatprep.subr.bf16.mxu1 %v15263_v4  ;;  %v15390_v11 = vcombine.low %v464_v0, %v468_v1  ;;  %v15184_v0 = vcombine.low %v257_v49, %v261_v51  ;;  %v15193_v2 = vcombine.high %v265_v60, %v269_v63  ;;  %v317_v49 = vld [vmem:[#allocation5 + $0x328] sm:$0xff] }
 0x12b   :  { %v476_v9 = vld [vmem:[#allocation5 + $0x820] sm:$0xff]  ;;  %6489 = vmatpush1.bf16.msra.mxu1 %v15262_v10 }
 0x12c   :  { %6529 = vmatprep.subr.bf16.mxu0 %v15391_v5  ;;  %v15399_v13 = vcombine.high %v472_v8, %v476_v9  ;;  %v480_v17 = vld [vmem:[#allocation5 + $0x840] sm:$0xff]  ;;  %v15398_v22 = vcombine.low %v472_v8, %v476_v9  ;;  %6786 = vmatprep.subr.bf16.mxu1 %v15145_v12  ;;  %v273_v5 = vld [vmem:[#allocation5 + $0x1c8] sm:$0xff]  ;;  %v15192_v8 = vcombine.low %v265_v60, %v269_v63 }
 0x12d   :  { %v484_v18 = vld [vmem:[#allocation5 + $0x860] sm:$0xff]  ;;  %6530 = vmatpush1.bf16.msra.mxu0 %v15390_v11  ;;  %v15201_v10 = vcombine.high %v273_v5, %v277_v7  ;;  %v325_v60 = vld [vmem:[#allocation5 + $0x368] sm:$0xff] }
 0x12e   :  { %v488_v24 = vld [vmem:[#allocation5 + $0x880] sm:$0xff]  ;;  %6540 = vmatprep.subr.bf16.mxu0 %v15399_v13  ;;  %v15407_v26 = vcombine.high %v480_v17, %v484_v18  ;;  %6491 = vmatmul.mubr.bf16.vlgmr.msra.gmra.mrb[0].mxu1 %v18706_v16  ;;  %v15406_v29 = vcombine.low %v480_v17, %v484_v18  ;;  %v281_v13 = vld [vmem:[#allocation5 + $0x208] sm:$0xff]  ;;  %v15200_v17 = vcombine.low %v273_v5, %v277_v7 }
 0x12f   :  { %v492_v25 = vld [vmem:[#allocation5 + $0x8a0] sm:$0xff]  ;;  %6787 = vmatpush1.bf16.msra.mxu1 %v15144_v20  ;;  %6818 = vmatprep.mubr.bf16.mxu1 %v18696_v58  ;;  %v15209_v20 = vcombine.high %v281_v13, %v285_v15  ;;  %v15208_v53 = vcombine.low %v281_v13, %v285_v15  ;;  %v333_v5 = vld [vmem:[#allocation5 + $0x3a8] sm:$0xff] }
 0x130   :  { %6532 = vmatmul.mubr.bf16.vlgmr.msra.gmra.mrb[0].mxu0 %v18712_v21  ;;  %6788 = vmatprep.subr.bf16.mxu1 %v15153_v23  ;;  %v496_v31 = vld [vmem:[#allocation5 + $0x8c0] sm:$0xff]  ;;  %v15415_v34 = vcombine.high %v488_v24, %v492_v25  ;;  %v15414_v37 = vcombine.low %v488_v24, %v492_v25  ;;  %v289_v24 = vld [vmem:[#allocation5 + $0x248] sm:$0xff] }
 0x131   :  { %6541 = vmatpush1.bf16.msra.mxu0 %v15398_v22  ;;  %v500_v32 = vld [vmem:[#allocation5 + $0x8e0] sm:$0xff]  ;;  %6572 = vmatprep.mubr.bf16.mxu0 %v18716_v28  ;;  %v341_v13 = vld [vmem:[#allocation5 + $0x3e8] sm:$0xff] }
 0x132   :  { %6542 = vmatprep.subr.bf16.mxu0 %v15407_v26  ;;  %v504_v39 = vld [vmem:[#allocation5 + $0x900] sm:$0xff]  ;;  %v15423_v42 = vcombine.high %v496_v31, %v500_v32  ;;  %v15422_v45 = vcombine.low %v496_v31, %v500_v32  ;;  %v293_v26 = vld [vmem:[#allocation5 + $0x268] sm:$0xff] }
 0x133   :  { %6789 = vmatpush1.bf16.msra.mxu1 %v15152_v54  ;;  %v508_v40 = vld [vmem:[#allocation5 + $0x920] sm:$0xff]  ;;  %v15217_v54 = vcombine.high %v289_v24, %v293_v26  ;;  %v297_v31 = vld [vmem:[#allocation5 + $0x288] sm:$0xff] }
 0x134   :  { %6790 = vmatprep.subr.bf16.mxu1 %v15161_v30  ;;  %v512_v47 = vld [vmem:[#allocation5 + $0x940] sm:$0xff]  ;;  %v15431_v50 = vcombine.high %v504_v39, %v508_v40  ;;  %v15430_v55 = vcombine.low %v504_v39, %v508_v40  ;;  %v305_v39 = vld [vmem:[#allocation5 + $0x2c8] sm:$0xff] }
 0x135   :  { %6543 = vmatpush1.bf16.msra.mxu0 %v15406_v29  ;;  %v516_v48 = vld [vmem:[#allocation5 + $0x960] sm:$0xff] }
 0x136   :  { %6544 = vmatprep.subr.bf16.mxu0 %v15415_v34  ;;  %v520_v57 = vld [vmem:[#allocation5 + $0x980] sm:$0xff]  ;;  %v15439_v62 = vcombine.high %v512_v47, %v516_v48  ;;  %v15438_v1 = vcombine.low %v512_v47, %v516_v48  ;;  %v15216_v34 = vcombine.low %v289_v24, %v293_v26  ;;  %v313_v47 = vld [vmem:[#allocation5 + $0x308] sm:$0xff] }
 0x137   :  { %6791 = vmatpush1.bf16.msra.mxu1 %v15160_v36  ;;  %v524_v59 = vld [vmem:[#allocation5 + $0x9a0] sm:$0xff]  ;;  %v15225_v36 = vcombine.high %v297_v31, %v301_v33  ;;  %v349_v24 = vld [vmem:[#allocation5 + $0x428] sm:$0xff] }
 0x138   :  { %6792 = vmatprep.subr.bf16.mxu1 %v15169_v38  ;;  %v528_v3 = vld [vmem:[#allocation5 + $0x9c0] sm:$0xff]  ;;  %v15447_v6 = vcombine.high %v520_v57, %v524_v59  ;;  %v15446_v9 = vcombine.low %v520_v57, %v524_v59  ;;  %v321_v57 = vld [vmem:[#allocation5 + $0x348] sm:$0xff] }
 0x139   :  { %6545 = vmatpush1.bf16.msra.mxu0 %v15414_v37  ;;  %v532_v4 = vld [vmem:[#allocation5 + $0x9e0] sm:$0xff] }
 0x13a   :  { %6546 = vmatprep.subr.bf16.mxu0 %v15423_v42  ;;  %v536_v11 = vld [vmem:[#allocation5 + $0xa00] sm:$0xff]  ;;  %v15455_v14 = vcombine.high %v528_v3, %v532_v4  ;;  %v15454_v18 = vcombine.low %v528_v3, %v532_v4  ;;  %v15224_v42 = vcombine.low %v297_v31, %v301_v33  ;;  %v329_v3 = vld [vmem:[#allocation5 + $0x388] sm:$0xff] }
 0x13b   :  { %6793 = vmatpush1.bf16.msra.mxu1 %v15168_v44  ;;  %v540_v12 = vld [vmem:[#allocation5 + $0xa20] sm:$0xff]  ;;  %v15233_v44 = vcombine.high %v305_v39, %v309_v41 }
 0x13c   :  { %6794 = vmatprep.subr.bf16.mxu1 %v15177_v46  ;;  %v544_v22 = vld [vmem:[#allocation5 + $0xa40] sm:$0xff]  ;;  %v15463_v25 = vcombine.high %v536_v11, %v540_v12  ;;  %v15462_v27 = vcombine.low %v536_v11, %v540_v12  ;;  %v337_v11 = vld [vmem:[#allocation5 + $0x3c8] sm:$0xff] }
 0x13d   :  { %6547 = vmatpush1.bf16.msra.mxu0 %v15422_v45  ;;  %v548_v23 = vld [vmem:[#allocation5 + $0xa60] sm:$0xff] }
 0x13e   :  { %6548 = vmatprep.subr.bf16.mxu0 %v15431_v50  ;;  %v552_v29 = vld [vmem:[#allocation5 + $0xa80] sm:$0xff]  ;;  %v15471_v32 = vcombine.high %v544_v22, %v548_v23  ;;  %v15470_v35 = vcombine.low %v544_v22, %v548_v23  ;;  %v15232_v50 = vcombine.low %v305_v39, %v309_v41  ;;  %v345_v22 = vld [vmem:[#allocation5 + $0x408] sm:$0xff] }
 0x13f   :  { %6795 = vmatpush1.bf16.msra.mxu1 %v15176_v52  ;;  %v556_v30 = vld [vmem:[#allocation5 + $0xaa0] sm:$0xff]  ;;  %v15241_v52 = vcombine.high %v313_v47, %v317_v49  ;;  %v15272_v33 = vcombine.low %v345_v22, %v349_v24  ;;  %v365_v41 = vld [vmem:[#allocation5 + $0x4a8] sm:$0xff] }
 0x140   :  { %6796 = vmatprep.subr.bf16.mxu1 %v15185_v56  ;;  %v560_v37 = vld [vmem:[#allocation5 + $0xac0] sm:$0xff]  ;;  %v15479_v40 = vcombine.high %v552_v29, %v556_v30  ;;  %v15478_v43 = vcombine.low %v552_v29, %v556_v30  ;;  %v353_v29 = vld [vmem:[#allocation5 + $0x448] sm:$0xff] }
 0x141   :  { %6549 = vmatpush1.bf16.msra.mxu0 %v15430_v55  ;;  %v564_v38 = vld [vmem:[#allocation5 + $0xae0] sm:$0xff]  ;;  %v357_v30 = vld [vmem:[#allocation5 + $0x468] sm:$0xff] }
 0x142   :  { %6550 = vmatprep.subr.bf16.mxu0 %v15439_v62  ;;  %v568_v45 = vld [vmem:[#allocation5 + $0xb00] sm:$0xff]  ;;  %v15487_v48 = vcombine.high %v560_v37, %v564_v38  ;;  %v15486_v51 = vcombine.low %v560_v37, %v564_v38  ;;  %v15240_v62 = vcombine.low %v313_v47, %v317_v49  ;;  %v369_v47 = vld [vmem:[#allocation5 + $0x4c8] sm:$0xff] }
 0x143   :  { %6797 = vmatpush1.bf16.msra.mxu1 %v15184_v0  ;;  %v572_v46 = vld [vmem:[#allocation5 + $0xb20] sm:$0xff]  ;;  %v15249_v0 = vcombine.high %v321_v57, %v325_v60  ;;  %v373_v49 = vld [vmem:[#allocation5 + $0x4e8] sm:$0xff] }
 0x144   :  { %6798 = vmatprep.subr.bf16.mxu1 %v15193_v2  ;;  %v576_v55 = vld [vmem:[#allocation5 + $0xb40] sm:$0xff]  ;;  %v15495_v59 = vcombine.high %v568_v45, %v572_v46  ;;  %v15494_v63 = vcombine.low %v568_v45, %v572_v46 }
 0x145   :  { %6551 = vmatpush1.bf16.msra.mxu0 %v15438_v1  ;;  %v580_v56 = vld [vmem:[#allocation5 + $0xb60] sm:$0xff] }
 0x146   :  { %6552 = vmatprep.subr.bf16.mxu0 %v15447_v6  ;;  %v584_v1 = vld [vmem:[#allocation5 + $0xb80] sm:$0xff]  ;;  %v15503_v4 = vcombine.high %v576_v55, %v580_v56  ;;  %v15248_v6 = vcombine.low %v321_v57, %v325_v60  ;;  %v15502_v7 = vcombine.low %v576_v55, %v580_v56  ;;  %v377_v57 = vld [vmem:[#allocation5 + $0x508] sm:$0xff] }
 0x147   :  { %6799 = vmatpush1.bf16.msra.mxu1 %v15192_v8  ;;  %v588_v2 = vld [vmem:[#allocation5 + $0xba0] sm:$0xff]  ;;  %v15257_v8 = vcombine.high %v329_v3, %v333_v5  ;;  %v381_v60 = vld [vmem:[#allocation5 + $0x528] sm:$0xff] }
 0x148   :  { %6800 = vmatprep.subr.bf16.mxu1 %v15201_v10  ;;  %v596_v10 = vld [vmem:[#allocation5 + $0xbe0] sm:$0xff]  ;;  %v15511_v12 = vcombine.high %v584_v1, %v588_v2  ;;  %v15510_v15 = vcombine.low %v584_v1, %v588_v2 }
 0x149   :  { %6553 = vmatpush1.bf16.msra.mxu0 %v15446_v9  ;;  %v592_v9 = vld [vmem:[#allocation5 + $0xbc0] sm:$0xff] }
 0x14a   :  { %6554 = vmatprep.subr.bf16.mxu0 %v15455_v14  ;;  %v15256_v14 = vcombine.low %v329_v3, %v333_v5  ;;  %v15519_v23 = vcombine.high %v592_v9, %v596_v10  ;;  %v15518_v26 = vcombine.low %v592_v9, %v596_v10  ;;  %v616_v37 = vld [vmem:[#allocation5 + $0xc80] sm:$0xff]  ;;  %v385_v3 = vld [vmem:[#allocation5 + $0x548] sm:$0xff] }
 0x14b   :  { %6801 = vmatpush1.bf16.msra.mxu1 %v15200_v17  ;;  %v15265_v17 = vcombine.high %v337_v11, %v341_v13  ;;  %v620_v38 = vld [vmem:[#allocation5 + $0xca0] sm:$0xff]  ;;  %v389_v5 = vld [vmem:[#allocation5 + $0x568] sm:$0xff] }
 0x14c   :  { %6802 = vmatprep.subr.bf16.mxu1 %v15209_v20  ;;  %v604_v20 = vld [vmem:[#allocation5 + $0xc20] sm:$0xff] }
 0x14d   :  { %6555 = vmatpush1.bf16.msra.mxu0 %v15454_v18  ;;  %v600_v18 = vld [vmem:[#allocation5 + $0xc00] sm:$0xff] }
 0x14e   :  { %6556 = vmatprep.subr.bf16.mxu0 %v15463_v25  ;;  %v15264_v25 = vcombine.low %v337_v11, %v341_v13  ;;  %v15527_v31 = vcombine.high %v600_v18, %v604_v20  ;;  %v624_v45 = vld [vmem:[#allocation5 + $0xcc0] sm:$0xff]  ;;  %v393_v11 = vld [vmem:[#allocation5 + $0x588] sm:$0xff] }
 0x14f   :  { %6803 = vmatpush1.bf16.msra.mxu1 %v15208_v53  ;;  %v15273_v53 = vcombine.high %v345_v22, %v349_v24  ;;  %v628_v46 = vld [vmem:[#allocation5 + $0xce0] sm:$0xff]  ;;  %v397_v13 = vld [vmem:[#allocation5 + $0x5a8] sm:$0xff] }
 0x150   :  { %6804 = vmatprep.subr.bf16.mxu1 %v15217_v54  ;;  %v612_v54 = vld [vmem:[#allocation5 + $0xc60] sm:$0xff]  ;;  %v405_v24 = vld [vmem:[#allocation5 + $0x5e8] sm:$0xff] }
 0x151   :  { %6557 = vmatpush1.bf16.msra.mxu0 %v15462_v27  ;;  %v608_v27 = vld [vmem:[#allocation5 + $0xc40] sm:$0xff] }
 0x152   :  { %6558 = vmatprep.subr.bf16.mxu0 %v15471_v32  ;;  %v18722_v32 = vld [vmem:[#allocation2 + $0x18] sm:$0xff]  ;;  %v15535_v39 = vcombine.high %v608_v27, %v612_v54  ;;  %v632_v55 = vld [vmem:[#allocation5 + $0xd00] sm:$0xff] }
 0x153   :  { %6805 = vmatpush1.bf16.msra.mxu1 %v15216_v34  ;;  %v18726_v34 = vcombine.low %v18708_v19, %v18708_v19  ;;  %v15280_v19 = vcombine.low %v353_v29, %v357_v30  ;;  %v636_v56 = vld [vmem:[#allocation5 + $0xd20] sm:$0xff] }
 0x154   :  { %6806 = vmatprep.subr.bf16.mxu1 %v15225_v36  ;;  %v15281_v36 = vcombine.high %v353_v29, %v357_v30  ;;  %v640_v1 = vld [vmem:[#allocation5 + $0xd40] sm:$0xff]  ;;  %v409_v29 = vld [vmem:[#allocation5 + $0x608] sm:$0xff] }
 0x155   :  { %6559 = vmatpush1.bf16.msra.mxu0 %v15470_v35  ;;  %v15526_v35 = vcombine.low %v600_v18, %v604_v20  ;;  %v644_v2 = vld [vmem:[#allocation5 + $0xd60] sm:$0xff] }
 0x156   :  { %6560 = vmatprep.subr.bf16.mxu0 %v15479_v40  ;;  %v361_v40 = vld [vmem:[#allocation5 + $0x488] sm:$0xff]  ;;  %v648_v9 = vld [vmem:[#allocation5 + $0xd80] sm:$0xff] }
 0x157   :  { %6807 = vmatpush1.bf16.msra.mxu1 %v15224_v42  ;;  %v18730_v42 = vcombine.high %v18722_v32, %v18722_v32  ;;  %v652_v10 = vld [vmem:[#allocation5 + $0xda0] sm:$0xff] }
 0x158   :  { %6808 = vmatprep.subr.bf16.mxu1 %v15233_v44  ;;  %v15289_v44 = vcombine.high %v361_v40, %v365_v41  ;;  %v656_v18 = vld [vmem:[#allocation5 + $0xdc0] sm:$0xff]  ;;  %v15575_v22 = vcombine.high %v648_v9, %v652_v10 }
 0x159   :  { %6561 = vmatpush1.bf16.msra.mxu0 %v15478_v43  ;;  %v15534_v43 = vcombine.low %v608_v27, %v612_v54  ;;  %v660_v20 = vld [vmem:[#allocation5 + $0xde0] sm:$0xff] }
 0x15a   :  { %6562 = vmatprep.subr.bf16.mxu0 %v15487_v48  ;;  %v15543_v48 = vcombine.high %v616_v37, %v620_v38  ;;  %v664_v27 = vld [vmem:[#allocation5 + $0xe00] sm:$0xff]  ;;  %v15583_v30 = vcombine.high %v656_v18, %v660_v20 }
 0x15b   :  { %6809 = vmatpush1.bf16.msra.mxu1 %v15232_v50  ;;  %v15288_v50 = vcombine.low %v361_v40, %v365_v41  ;;  %v668_v54 = vld [vmem:[#allocation5 + $0xe20] sm:$0xff]  ;;  %v421_v41 = vld [vmem:[#allocation5 + $0x668] sm:$0xff] }
 0x15c   :  { %6810 = vmatprep.subr.bf16.mxu1 %v15241_v52  ;;  %v15297_v52 = vcombine.high %v369_v47, %v373_v49  ;;  %v15591_v40 = vcombine.high %v664_v27, %v668_v54 }
 0x15d   :  { %6563 = vmatpush1.bf16.msra.mxu0 %v15486_v51  ;;  %v15542_v51 = vcombine.low %v616_v37, %v620_v38  ;;  %v672_v37 = vld [vmem:[#allocation5 + $0xe40] sm:$0xff] }
 0x15e   :  { %6564 = vmatprep.subr.bf16.mxu0 %v15495_v59  ;;  %v15551_v59 = vcombine.high %v624_v45, %v628_v46  ;;  %v676_v38 = vld [vmem:[#allocation5 + $0xe60] sm:$0xff] }
 0x15f   :  { %6811 = vmatpush1.bf16.msra.mxu1 %v15240_v62  ;;  %v15296_v62 = vcombine.low %v369_v47, %v373_v49  ;;  %v425_v47 = vld [vmem:[#allocation5 + $0x688] sm:$0xff] }
 0x160   :  { %6812 = vmatprep.subr.bf16.mxu1 %v15249_v0  ;;  %v15305_v0 = vcombine.high %v377_v57, %v381_v60  ;;  %v429_v49 = vld [vmem:[#allocation5 + $0x6a8] sm:$0xff] }
 0x161   :  { %6565 = vmatpush1.bf16.msra.mxu0 %v15494_v63  ;;  %v15550_v63 = vcombine.low %v624_v45, %v628_v46  ;;  %v680_v45 = vld [vmem:[#allocation5 + $0xe80] sm:$0xff] }
 0x162   :  { %6566 = vmatprep.subr.bf16.mxu0 %v15503_v4  ;;  %v15559_v4 = vcombine.high %v632_v55, %v636_v56  ;;  %v684_v46 = vld [vmem:[#allocation5 + $0xea0] sm:$0xff] }
 0x163   :  { %6813 = vmatpush1.bf16.msra.mxu1 %v15248_v6  ;;  %v15304_v6 = vcombine.low %v377_v57, %v381_v60  ;;  %v433_v57 = vld [vmem:[#allocation5 + $0x6c8] sm:$0xff] }
 0x164   :  { %6814 = vmatprep.subr.bf16.mxu1 %v15257_v8  ;;  %v15313_v8 = vcombine.high %v385_v3, %v389_v5  ;;  %v437_v60 = vld [vmem:[#allocation5 + $0x6e8] sm:$0xff] }
 0x165   :  { %6567 = vmatpush1.bf16.msra.mxu0 %v15502_v7  ;;  %v15558_v7 = vcombine.low %v632_v55, %v636_v56  ;;  %v688_v55 = vld [vmem:[#allocation5 + $0xec0] sm:$0xff] }
 0x166   :  { %6568 = vmatprep.subr.bf16.mxu0 %v15511_v12  ;;  %v15567_v12 = vcombine.high %v640_v1, %v644_v2  ;;  %v692_v56 = vld [vmem:[#allocation5 + $0xee0] sm:$0xff] }
 0x167   :  { %6815 = vmatpush1.bf16.msra.mxu1 %v15256_v14  ;;  %v15312_v14 = vcombine.low %v385_v3, %v389_v5  ;;  %v441_v3 = vld [vmem:[#allocation5 + $0x708] sm:$0xff] }
 0x168   :  { %6816 = vmatprep.subr.bf16.mxu1 %v15265_v17  ;;  %v15321_v17 = vcombine.high %v393_v11, %v397_v13  ;;  %v445_v5 = vld [vmem:[#allocation5 + $0x728] sm:$0xff] }
 0x169   :  { %6569 = vmatpush1.bf16.msra.mxu0 %v15510_v15  ;;  %v15566_v15 = vcombine.low %v640_v1, %v644_v2  ;;  %v696_v1 = vld [vmem:[#allocation5 + $0xf00] sm:$0xff] }
 0x16a   :  { %6570 = vmatprep.subr.bf16.mxu0 %v15519_v23  ;;  %v401_v23 = vld [vmem:[#allocation5 + $0x5c8] sm:$0xff]  ;;  %v700_v2 = vld [vmem:[#allocation5 + $0xf20] sm:$0xff] }
 0x16b   :  { %6817 = vmatpush1.bf16.msra.mxu1 %v15264_v25  ;;  %v15320_v25 = vcombine.low %v393_v11, %v397_v13  ;;  %v449_v11 = vld [vmem:[#allocation5 + $0x748] sm:$0xff] }
 0x16c   :  { %6827 = vmatprep.subr.bf16.mxu1 %v15273_v53  ;;  %v15329_v53 = vcombine.high %v401_v23, %v405_v24  ;;  %v453_v13 = vld [vmem:[#allocation5 + $0x768] sm:$0xff] }
 0x16d   :  { %6571 = vmatpush1.bf16.msra.mxu0 %v15518_v26  ;;  %v15574_v26 = vcombine.low %v648_v9, %v652_v10  ;;  %v704_v9 = vld [vmem:[#allocation5 + $0xf40] sm:$0xff] }
 0x16e   :  { %6581 = vmatprep.subr.bf16.mxu0 %v15527_v31  ;;  %6819 = vmatmul.mubr.bf16.vlgmr.msra.gmra.mrb[4].mxu1 %v18706_v16  ;;  %v413_v31 = vld [vmem:[#allocation5 + $0x628] sm:$0xff]  ;;  %v708_v10 = vld [vmem:[#allocation5 + $0xf60] sm:$0xff] }
 0x16f   :  { %6828 = vmatpush1.bf16.msra.mxu1 %v15272_v33  ;;  %6859 = vmatprep.mubr.bf16.mxu1 %v18700_v61  ;;  %v15328_v33 = vcombine.low %v401_v23, %v405_v24  ;;  %v15631_v23 = vcombine.high %v704_v9, %v708_v10  ;;  %v461_v24 = vld [vmem:[#allocation5 + $0x7a8] sm:$0xff] }
 0x170   :  { %6573 = vmatmul.mubr.bf16.vlgmr.msra.gmra.mrb[0].mxu0 %v18726_v34  ;;  %6829 = vmatprep.subr.bf16.mxu1 %v15281_v36  ;;  %v15337_v36 = vcombine.high %v409_v29, %v413_v31 }
 0x171   :  { %6582 = vmatpush1.bf16.msra.mxu0 %v15526_v35  ;;  %6613 = vmatprep.mubr.bf16.mxu0 %v18730_v42  ;;  %v15582_v35 = vcombine.low %v656_v18, %v660_v20  ;;  %v712_v18 = vld [vmem:[#allocation5 + $0xf80] sm:$0xff] }
 0x172   :  { %6583 = vmatprep.subr.bf16.mxu0 %v15535_v39  ;;  %v417_v39 = vld [vmem:[#allocation5 + $0x648] sm:$0xff]  ;;  %v716_v20 = vld [vmem:[#allocation5 + $0xfa0] sm:$0xff] }
 0x173   :  { %6830 = vmatpush1.bf16.msra.mxu1 %v15280_v19  ;;  %v15336_v19 = vcombine.low %v409_v29, %v413_v31  ;;  %v465_v29 = vld [vmem:[#allocation5 + $0x7c8] sm:$0xff] }
 0x174   :  { %6831 = vmatprep.subr.bf16.mxu1 %v15289_v44  ;;  %v15345_v44 = vcombine.high %v417_v39, %v421_v41  ;;  %v469_v31 = vld [vmem:[#allocation5 + $0x7e8] sm:$0xff] }
 0x175   :  { %6584 = vmatpush1.bf16.msra.mxu0 %v15534_v43  ;;  %v15590_v43 = vcombine.low %v664_v27, %v668_v54  ;;  %v720_v27 = vld [vmem:[#allocation5 + $0xfc0] sm:$0xff] }
 0x176   :  { %6585 = vmatprep.subr.bf16.mxu0 %v15543_v48  ;;  %v15599_v48 = vcombine.high %v672_v37, %v676_v38  ;;  %v724_v54 = vld [vmem:[#allocation5 + $0xfe0] sm:$0xff] }
 0x177   :  { %6832 = vmatpush1.bf16.msra.mxu1 %v15288_v50  ;;  %v15344_v50 = vcombine.low %v417_v39, %v421_v41  ;;  %v473_v39 = vld [vmem:[#allocation5 + $0x808] sm:$0xff] }
 0x178   :  { %6833 = vmatprep.subr.bf16.mxu1 %v15297_v52  ;;  %v15353_v52 = vcombine.high %v425_v47, %v429_v49  ;;  %v477_v41 = vld [vmem:[#allocation5 + $0x828] sm:$0xff] }
 0x179   :  { %6586 = vmatpush1.bf16.msra.mxu0 %v15542_v51  ;;  %v15598_v51 = vcombine.low %v672_v37, %v676_v38  ;;  %v728_v37 = vld [vmem:[#allocation5 + $0x1000] sm:$0xff] }
 0x17a   :  { %6587 = vmatprep.subr.bf16.mxu0 %v15551_v59  ;;  %v15607_v59 = vcombine.high %v680_v45, %v684_v46  ;;  %v732_v38 = vld [vmem:[#allocation5 + $0x1020] sm:$0xff] }
 0x17b   :  { %6834 = vmatpush1.bf16.msra.mxu1 %v15296_v62  ;;  %v15352_v62 = vcombine.low %v425_v47, %v429_v49  ;;  %v481_v47 = vld [vmem:[#allocation5 + $0x848] sm:$0xff]  ;;  %v15655_v49 = vcombine.high %v728_v37, %v732_v38 }
 0x17c   :  { %6835 = vmatprep.subr.bf16.mxu1 %v15305_v0  ;;  %v15361_v0 = vcombine.high %v433_v57, %v437_v60 }
 0x17d   :  { %6588 = vmatpush1.bf16.msra.mxu0 %v15550_v63  ;;  %v15606_v63 = vcombine.low %v680_v45, %v684_v46  ;;  %v736_v45 = vld [vmem:[#allocation5 + $0x1040] sm:$0xff] }
 0x17e   :  { %6589 = vmatprep.subr.bf16.mxu0 %v15559_v4  ;;  %v15615_v4 = vcombine.high %v688_v55, %v692_v56  ;;  %v740_v46 = vld [vmem:[#allocation5 + $0x1060] sm:$0xff] }
 0x17f   :  { %6836 = vmatpush1.bf16.msra.mxu1 %v15304_v6  ;;  %v15360_v6 = vcombine.low %v433_v57, %v437_v60  ;;  %v744_v57 = vld [vmem:[#allocation5 + $0x1080] sm:$0xff]  ;;  %v15663_v60 = vcombine.high %v736_v45, %v740_v46 }
 0x180   :  { %6837 = vmatprep.subr.bf16.mxu1 %v15313_v8  ;;  %v15369_v8 = vcombine.high %v441_v3, %v445_v5 }
 0x181   :  { %6590 = vmatpush1.bf16.msra.mxu0 %v15558_v7  ;;  %v15614_v7 = vcombine.low %v688_v55, %v692_v56  ;;  %v15654_v55 = vcombine.low %v728_v37, %v732_v38 }
 0x182   :  { %6591 = vmatprep.subr.bf16.mxu0 %v15567_v12  ;;  %v15623_v12 = vcombine.high %v696_v1, %v700_v2 }
 0x183   :  { %6838 = vmatpush1.bf16.msra.mxu1 %v15312_v14  ;;  %v15368_v14 = vcombine.low %v441_v3, %v445_v5  ;;  %v752_v3 = vld [vmem:[#allocation5 + $0x10c0] sm:$0xff]  ;;  %v497_v5 = vld [vmem:[#allocation5 + $0x8c8] sm:$0xff] }
 0x184   :  { %6839 = vmatprep.subr.bf16.mxu1 %v15321_v17  ;;  %v15377_v17 = vcombine.high %v449_v11, %v453_v13 }
 0x185   :  { %6592 = vmatpush1.bf16.msra.mxu0 %v15566_v15  ;;  %v15622_v15 = vcombine.low %v696_v1, %v700_v2  ;;  %v15662_v1 = vcombine.low %v736_v45, %v740_v46 }
 0x186   :  { %6593 = vmatprep.subr.bf16.mxu0 %v15575_v22  ;;  %v457_v22 = vld [vmem:[#allocation5 + $0x788] sm:$0xff] }
 0x187   :  { %6840 = vmatpush1.bf16.msra.mxu1 %v15320_v25  ;;  %v15376_v25 = vcombine.low %v449_v11, %v453_v13  ;;  %v760_v11 = vld [vmem:[#allocation5 + $0x1100] sm:$0xff]  ;;  %v505_v13 = vld [vmem:[#allocation5 + $0x908] sm:$0xff] }
 0x188   :  { %6841 = vmatprep.subr.bf16.mxu1 %v15329_v53  ;;  %v15385_v53 = vcombine.high %v457_v22, %v461_v24 }
 0x189   :  { %6594 = vmatpush1.bf16.msra.mxu0 %v15574_v26  ;;  %v15630_v26 = vcombine.low %v704_v9, %v708_v10 }
 0x18a   :  { %6595 = vmatprep.subr.bf16.mxu0 %v15583_v30  ;;  %v15639_v30 = vcombine.high %v712_v18, %v716_v20 }
 0x18b   :  { %6842 = vmatpush1.bf16.msra.mxu1 %v15328_v33  ;;  %v15384_v33 = vcombine.low %v457_v22, %v461_v24  ;;  %v768_v22 = vld [vmem:[#allocation5 + $0x1140] sm:$0xff]  ;;  %v513_v24 = vld [vmem:[#allocation5 + $0x948] sm:$0xff] }
 0x18c   :  { %6843 = vmatprep.subr.bf16.mxu1 %v15337_v36  ;;  %v15393_v36 = vcombine.high %v465_v29, %v469_v31 }
 0x18d   :  { %6596 = vmatpush1.bf16.msra.mxu0 %v15582_v35  ;;  %v15638_v35 = vcombine.low %v712_v18, %v716_v20 }
 0x18e   :  { %6597 = vmatprep.subr.bf16.mxu0 %v15591_v40  ;;  %v15647_v40 = vcombine.high %v720_v27, %v724_v54 }
 0x18f   :  { %6844 = vmatpush1.bf16.msra.mxu1 %v15336_v19  ;;  %v15392_v19 = vcombine.low %v465_v29, %v469_v31  ;;  %v776_v29 = vld [vmem:[#allocation5 + $0x1180] sm:$0xff]  ;;  %v521_v31 = vld [vmem:[#allocation5 + $0x988] sm:$0xff] }
 0x190   :  { %6845 = vmatprep.subr.bf16.mxu1 %v15345_v44  ;;  %v15401_v44 = vcombine.high %v473_v39, %v477_v41 }
 0x191   :  { %6598 = vmatpush1.bf16.msra.mxu0 %v15590_v43  ;;  %v15646_v43 = vcombine.low %v720_v27, %v724_v54 }
 0x192   :  { %6599 = vmatprep.subr.bf16.mxu0 %v15599_v48  ;;  %v485_v48 = vld [vmem:[#allocation5 + $0x868] sm:$0xff] }
 0x193   :  { %6846 = vmatpush1.bf16.msra.mxu1 %v15344_v50  ;;  %v18736_v50 = vld [vmem:[#allocation2 + $0x20] sm:$0xff]  ;;  %v15409_v56 = vcombine.high %v481_v47, %v485_v48 }
 0x194   :  { %6847 = vmatprep.subr.bf16.mxu1 %v15353_v52  ;;  %v18740_v52 = vcombine.low %v18722_v32, %v18722_v32  ;;  %v15408_v32 = vcombine.low %v481_v47, %v485_v48  ;;  %v792_v47 = vld [vmem:[#allocation5 + $0x1200] sm:$0xff] }
 0x195   :  { %6600 = vmatpush1.bf16.msra.mxu0 %v15598_v51  ;;  %v15400_v51 = vcombine.low %v473_v39, %v477_v41  ;;  %v784_v39 = vld [vmem:[#allocation5 + $0x11c0] sm:$0xff]  ;;  %v529_v41 = vld [vmem:[#allocation5 + $0x9c8] sm:$0xff] }
 0x196   :  { %6601 = vmatprep.subr.bf16.mxu0 %v15607_v59  ;;  %v748_v59 = vld [vmem:[#allocation5 + $0x10a0] sm:$0xff] }
 0x197   :  { %6848 = vmatpush1.bf16.msra.mxu1 %v15352_v62  ;;  %v489_v62 = vld [vmem:[#allocation5 + $0x888] sm:$0xff]  ;;  %v15670_v9 = vcombine.low %v744_v57, %v748_v59  ;;  %v796_v48 = vld [vmem:[#allocation5 + $0x1220] sm:$0xff] }
 0x198   :  { %6849 = vmatprep.subr.bf16.mxu1 %v15361_v0  ;;  %v18744_v0 = vcombine.high %v18736_v50, %v18736_v50 }
 0x199   :  { %6602 = vmatpush1.bf16.msra.mxu0 %v15606_v63  ;;  %v493_v63 = vld [vmem:[#allocation5 + $0x8a8] sm:$0xff] }
 0x19a   :  { %6603 = vmatprep.subr.bf16.mxu0 %v15615_v4  ;;  %v15417_v2 = vcombine.high %v489_v62, %v493_v63  ;;  %v756_v4 = vld [vmem:[#allocation5 + $0x10e0] sm:$0xff] }
 0x19b   :  { %6850 = vmatpush1.bf16.msra.mxu1 %v15360_v6  ;;  %v15671_v6 = vcombine.high %v744_v57, %v748_v59  ;;  %v15678_v18 = vcombine.low %v752_v3, %v756_v4 }
 0x19c   :  { %6851 = vmatprep.subr.bf16.mxu1 %v15369_v8  ;;  %v15416_v8 = vcombine.low %v489_v62, %v493_v63  ;;  %v804_v62 = vld [vmem:[#allocation5 + $0x1260] sm:$0xff]  ;;  %v545_v63 = vld [vmem:[#allocation5 + $0xa48] sm:$0xff] }
 0x19d   :  { %6604 = vmatpush1.bf16.msra.mxu0 %v15614_v7  ;;  %v501_v7 = vld [vmem:[#allocation5 + $0x8e8] sm:$0xff] }
 0x19e   :  { %6605 = vmatprep.subr.bf16.mxu0 %v15623_v12  ;;  %v15425_v10 = vcombine.high %v497_v5, %v501_v7  ;;  %v764_v12 = vld [vmem:[#allocation5 + $0x1120] sm:$0xff] }
 0x19f   :  { %6852 = vmatpush1.bf16.msra.mxu1 %v15368_v14  ;;  %v15679_v14 = vcombine.high %v752_v3, %v756_v4  ;;  %v15686_v27 = vcombine.low %v760_v11, %v764_v12  ;;  %v15718_v3 = vcombine.low %v792_v47, %v796_v48 }
 0x1a0   :  { %6853 = vmatprep.subr.bf16.mxu1 %v15377_v17  ;;  %v15424_v17 = vcombine.low %v497_v5, %v501_v7  ;;  %v808_v5 = vld [vmem:[#allocation5 + $0x1280] sm:$0xff]  ;;  %v553_v7 = vld [vmem:[#allocation5 + $0xa88] sm:$0xff] }
 0x1a1   :  { %6606 = vmatpush1.bf16.msra.mxu0 %v15622_v15  ;;  %v509_v15 = vld [vmem:[#allocation5 + $0x928] sm:$0xff] }
 0x1a2   :  { %6607 = vmatprep.subr.bf16.mxu0 %v15631_v23  ;;  %v15433_v20 = vcombine.high %v505_v13, %v509_v15  ;;  %v772_v23 = vld [vmem:[#allocation5 + $0x1160] sm:$0xff] }
 0x1a3   :  { %6854 = vmatpush1.bf16.msra.mxu1 %v15376_v25  ;;  %v15687_v25 = vcombine.high %v760_v11, %v764_v12  ;;  %v15694_v37 = vcombine.low %v768_v22, %v772_v23 }
 0x1a4   :  { %6855 = vmatprep.subr.bf16.mxu1 %v15385_v53  ;;  %v15432_v53 = vcombine.low %v505_v13, %v509_v15  ;;  %v816_v13 = vld [vmem:[#allocation5 + $0x12c0] sm:$0xff]  ;;  %v561_v15 = vld [vmem:[#allocation5 + $0xac8] sm:$0xff] }
 0x1a5   :  { %6608 = vmatpush1.bf16.msra.mxu0 %v15630_v26  ;;  %v517_v26 = vld [vmem:[#allocation5 + $0x968] sm:$0xff] }
 0x1a6   :  { %6609 = vmatprep.subr.bf16.mxu0 %v15639_v30  ;;  %v15441_v54 = vcombine.high %v513_v24, %v517_v26  ;;  %v780_v30 = vld [vmem:[#allocation5 + $0x11a0] sm:$0xff] }
 0x1a7   :  { %6856 = vmatpush1.bf16.msra.mxu1 %v15384_v33  ;;  %v15695_v33 = vcombine.high %v768_v22, %v772_v23  ;;  %v15702_v45 = vcombine.low %v776_v29, %v780_v30 }
 0x1a8   :  { %6857 = vmatprep.subr.bf16.mxu1 %v15393_v36  ;;  %v15440_v36 = vcombine.low %v513_v24, %v517_v26  ;;  %v824_v24 = vld [vmem:[#allocation5 + $0x1300] sm:$0xff]  ;;  %v569_v26 = vld [vmem:[#allocation5 + $0xb08] sm:$0xff] }
 0x1a9   :  { %6610 = vmatpush1.bf16.msra.mxu0 %v15638_v35  ;;  %v525_v35 = vld [vmem:[#allocation5 + $0x9a8] sm:$0xff] }
 0x1aa   :  { %6611 = vmatprep.subr.bf16.mxu0 %v15647_v40  ;;  %v15449_v38 = vcombine.high %v521_v31, %v525_v35  ;;  %v788_v40 = vld [vmem:[#allocation5 + $0x11e0] sm:$0xff] }
 0x1ab   :  { %6858 = vmatpush1.bf16.msra.mxu1 %v15392_v19  ;;  %v15703_v19 = vcombine.high %v776_v29, %v780_v30  ;;  %v15710_v57 = vcombine.low %v784_v39, %v788_v40 }
 0x1ac   :  { %6868 = vmatprep.subr.bf16.mxu1 %v15401_v44  ;;  %v15448_v44 = vcombine.low %v521_v31, %v525_v35  ;;  %v832_v31 = vld [vmem:[#allocation5 + $0x1340] sm:$0xff]  ;;  %v577_v35 = vld [vmem:[#allocation5 + $0xb48] sm:$0xff] }
 0x1ad   :  { %6612 = vmatpush1.bf16.msra.mxu0 %v15646_v43  ;;  %v533_v43 = vld [vmem:[#allocation5 + $0x9e8] sm:$0xff] }
 0x1ae   :  { %6622 = vmatprep.subr.bf16.mxu0 %v15655_v49  ;;  %6860 = vmatmul.mubr.bf16.vlgmr.msra.gmra.mrb[4].mxu1 %v18712_v21  ;;  %v15457_v46 = vcombine.high %v529_v41, %v533_v43  ;;  %v537_v49 = vld [vmem:[#allocation5 + $0xa08] sm:$0xff] }
 0x1af   :  { %6869 = vmatpush1.bf16.msra.mxu1 %v15400_v51  ;;  %6900 = vmatprep.mubr.bf16.mxu1 %v18716_v28  ;;  %v15711_v51 = vcombine.high %v784_v39, %v788_v40 }
 0x1b0   :  { %6614 = vmatmul.mubr.bf16.vlgmr.msra.gmra.mrb[0].mxu0 %v18740_v52  ;;  %6870 = vmatprep.subr.bf16.mxu1 %v15409_v56  ;;  %v15456_v56 = vcombine.low %v529_v41, %v533_v43  ;;  %v840_v41 = vld [vmem:[#allocation5 + $0x1380] sm:$0xff]  ;;  %v585_v43 = vld [vmem:[#allocation5 + $0xb88] sm:$0xff] }
 0x1b1   :  { %6623 = vmatpush1.bf16.msra.mxu0 %v15654_v55  ;;  %6654 = vmatprep.mubr.bf16.mxu0 %v18744_v0  ;;  %v541_v55 = vld [vmem:[#allocation5 + $0xa28] sm:$0xff] }
 0x1b2   :  { %6624 = vmatprep.subr.bf16.mxu0 %v15663_v60  ;;  %v15465_v59 = vcombine.high %v537_v49, %v541_v55  ;;  %v800_v60 = vld [vmem:[#allocation5 + $0x1240] sm:$0xff] }
 0x1b3   :  { %6871 = vmatpush1.bf16.msra.mxu1 %v15408_v32  ;;  %v15719_v32 = vcombine.high %v792_v47, %v796_v48  ;;  %v15726_v11 = vcombine.low %v800_v60, %v804_v62 }
 0x1b4   :  { %6872 = vmatprep.subr.bf16.mxu1 %v15417_v2  ;;  %v15464_v2 = vcombine.low %v537_v49, %v541_v55  ;;  %v848_v49 = vld [vmem:[#allocation5 + $0x13c0] sm:$0xff]  ;;  %v593_v55 = vld [vmem:[#allocation5 + $0xbc8] sm:$0xff] }
 0x1b5   :  { %6625 = vmatpush1.bf16.msra.mxu0 %v15662_v1  ;;  %v549_v1 = vld [vmem:[#allocation5 + $0xa68] sm:$0xff] }
 0x1b6   :  { %6626 = vmatprep.subr.bf16.mxu0 %v15671_v6  ;;  %v15473_v4 = vcombine.high %v545_v63, %v549_v1  ;;  %v812_v6 = vld [vmem:[#allocation5 + $0x12a0] sm:$0xff] }
 0x1b7   :  { %6873 = vmatpush1.bf16.msra.mxu1 %v15416_v8  ;;  %v15727_v8 = vcombine.high %v800_v60, %v804_v62  ;;  %v15734_v22 = vcombine.low %v808_v5, %v812_v6 }
 0x1b8   :  { %6874 = vmatprep.subr.bf16.mxu1 %v15425_v10  ;;  %v15472_v10 = vcombine.low %v545_v63, %v549_v1  ;;  %v856_v63 = vld [vmem:[#allocation5 + $0x1400] sm:$0xff]  ;;  %v601_v1 = vld [vmem:[#allocation5 + $0xc08] sm:$0xff] }
 0x1b9   :  { %6627 = vmatpush1.bf16.msra.mxu0 %v15670_v9  ;;  %v557_v9 = vld [vmem:[#allocation5 + $0xaa8] sm:$0xff] }
 0x1ba   :  { %6628 = vmatprep.subr.bf16.mxu0 %v15679_v14  ;;  %v15481_v12 = vcombine.high %v553_v7, %v557_v9  ;;  %v820_v14 = vld [vmem:[#allocation5 + $0x12e0] sm:$0xff] }
 0x1bb   :  { %6875 = vmatpush1.bf16.msra.mxu1 %v15424_v17  ;;  %v15735_v17 = vcombine.high %v808_v5, %v812_v6  ;;  %v15742_v29 = vcombine.low %v816_v13, %v820_v14 }
 0x1bc   :  { %6876 = vmatprep.subr.bf16.mxu1 %v15433_v20  ;;  %v15480_v20 = vcombine.low %v553_v7, %v557_v9  ;;  %v864_v7 = vld [vmem:[#allocation5 + $0x1440] sm:$0xff]  ;;  %v609_v9 = vld [vmem:[#allocation5 + $0xc48] sm:$0xff] }
 0x1bd   :  { %6629 = vmatpush1.bf16.msra.mxu0 %v15678_v18  ;;  %v565_v18 = vld [vmem:[#allocation5 + $0xae8] sm:$0xff] }
 0x1be   :  { %6630 = vmatprep.subr.bf16.mxu0 %v15687_v25  ;;  %v15489_v23 = vcombine.high %v561_v15, %v565_v18  ;;  %v828_v25 = vld [vmem:[#allocation5 + $0x1320] sm:$0xff] }
 0x1bf   :  { %6877 = vmatpush1.bf16.msra.mxu1 %v15432_v53  ;;  %v15743_v53 = vcombine.high %v816_v13, %v820_v14  ;;  %v15750_v39 = vcombine.low %v824_v24, %v828_v25  ;;  %v18754_v14 = vcombine.low %v18736_v50, %v18736_v50 }
 0x1c0   :  { %6878 = vmatprep.subr.bf16.mxu1 %v15441_v54  ;;  %v15488_v54 = vcombine.low %v561_v15, %v565_v18  ;;  %v872_v18 = vld [vmem:[#allocation5 + $0x1480] sm:$0xff] }
 0x1c1   :  { %6631 = vmatpush1.bf16.msra.mxu0 %v15686_v27  ;;  %v573_v27 = vld [vmem:[#allocation5 + $0xb28] sm:$0xff] }
 0x1c2   :  { %6632 = vmatprep.subr.bf16.mxu0 %v15695_v33  ;;  %v15497_v30 = vcombine.high %v569_v26, %v573_v27  ;;  %v836_v33 = vld [vmem:[#allocation5 + $0x1360] sm:$0xff] }
 0x1c3   :  { %6879 = vmatpush1.bf16.msra.mxu1 %v15440_v36  ;;  %v15751_v36 = vcombine.high %v824_v24, %v828_v25  ;;  %v15758_v47 = vcombine.low %v832_v31, %v836_v33  ;;  %v621_v24 = vld [vmem:[#allocation5 + $0xca8] sm:$0xff] }
 0x1c4   :  { %6880 = vmatprep.subr.bf16.mxu1 %v15449_v38  ;;  %v15496_v38 = vcombine.low %v569_v26, %v573_v27  ;;  %v880_v27 = vld [vmem:[#allocation5 + $0x14c0] sm:$0xff] }
 0x1c5   :  { %6633 = vmatpush1.bf16.msra.mxu0 %v15694_v37  ;;  %v581_v37 = vld [vmem:[#allocation5 + $0xb68] sm:$0xff] }
 0x1c6   :  { %6634 = vmatprep.subr.bf16.mxu0 %v15703_v19  ;;  %v15505_v40 = vcombine.high %v577_v35, %v581_v37  ;;  %v844_v19 = vld [vmem:[#allocation5 + $0x13a0] sm:$0xff] }
 0x1c7   :  { %6881 = vmatpush1.bf16.msra.mxu1 %v15448_v44  ;;  %v15759_v44 = vcombine.high %v832_v31, %v836_v33  ;;  %v15766_v60 = vcombine.low %v840_v41, %v844_v19  ;;  %v629_v31 = vld [vmem:[#allocation5 + $0xce8] sm:$0xff] }
 0x1c8   :  { %6882 = vmatprep.subr.bf16.mxu1 %v15457_v46  ;;  %v15504_v46 = vcombine.low %v577_v35, %v581_v37  ;;  %v888_v37 = vld [vmem:[#allocation5 + $0x1500] sm:$0xff] }
 0x1c9   :  { %6635 = vmatpush1.bf16.msra.mxu0 %v15702_v45  ;;  %v589_v45 = vld [vmem:[#allocation5 + $0xba8] sm:$0xff] }
 0x1ca   :  { %6636 = vmatprep.subr.bf16.mxu0 %v15711_v51  ;;  %v15513_v48 = vcombine.high %v585_v43, %v589_v45  ;;  %v852_v51 = vld [vmem:[#allocation5 + $0x13e0] sm:$0xff] }
 0x1cb   :  { %6883 = vmatpush1.bf16.msra.mxu1 %v15456_v56  ;;  %v15767_v56 = vcombine.high %v840_v41, %v844_v19  ;;  %v15774_v5 = vcombine.low %v848_v49, %v852_v51  ;;  %v637_v41 = vld [vmem:[#allocation5 + $0xd28] sm:$0xff] }
 0x1cc   :  { %6884 = vmatprep.subr.bf16.mxu1 %v15465_v59  ;;  %v15512_v59 = vcombine.low %v585_v43, %v589_v45  ;;  %v896_v45 = vld [vmem:[#allocation5 + $0x1540] sm:$0xff] }
 0x1cd   :  { %6637 = vmatpush1.bf16.msra.mxu0 %v15710_v57  ;;  %v597_v57 = vld [vmem:[#allocation5 + $0xbe8] sm:$0xff] }
 0x1ce   :  { %6638 = vmatprep.subr.bf16.mxu0 %v15719_v32  ;;  %v15521_v62 = vcombine.high %v593_v55, %v597_v57  ;;  %v860_v32 = vld [vmem:[#allocation5 + $0x1420] sm:$0xff] }
 0x1cf   :  { %6885 = vmatpush1.bf16.msra.mxu1 %v15464_v2  ;;  %v15775_v2 = vcombine.high %v848_v49, %v852_v51  ;;  %v15782_v15 = vcombine.low %v856_v63, %v860_v32  ;;  %v645_v49 = vld [vmem:[#allocation5 + $0xd68] sm:$0xff] }
 0x1d0   :  { %6886 = vmatprep.subr.bf16.mxu1 %v15473_v4  ;;  %v15520_v4 = vcombine.low %v593_v55, %v597_v57  ;;  %v904_v57 = vld [vmem:[#allocation5 + $0x1580] sm:$0xff] }
 0x1d1   :  { %6639 = vmatpush1.bf16.msra.mxu0 %v15718_v3  ;;  %v605_v3 = vld [vmem:[#allocation5 + $0xc28] sm:$0xff] }
 0x1d2   :  { %6640 = vmatprep.subr.bf16.mxu0 %v15727_v8  ;;  %v15529_v6 = vcombine.high %v601_v1, %v605_v3  ;;  %v868_v8 = vld [vmem:[#allocation5 + $0x1460] sm:$0xff]  ;;  %v15528_v13 = vcombine.low %v601_v1, %v605_v3 }
 0x1d3   :  { %6887 = vmatpush1.bf16.msra.mxu1 %v15472_v10  ;;  %v613_v10 = vld [vmem:[#allocation5 + $0xc68] sm:$0xff]  ;;  %v15790_v26 = vcombine.low %v864_v7, %v868_v8  ;;  %v912_v3 = vld [vmem:[#allocation5 + $0x15c0] sm:$0xff] }
 0x1d4   :  { %6888 = vmatprep.subr.bf16.mxu1 %v15481_v12  ;;  %v18750_v12 = vld [vmem:[#allocation2 + $0x28] sm:$0xff]  ;;  %v15536_v50 = vcombine.low %v609_v9, %v613_v10 }
 0x1d5   :  { %6641 = vmatpush1.bf16.msra.mxu0 %v15726_v11  ;;  %v15783_v11 = vcombine.high %v856_v63, %v860_v32  ;;  %v18758_v25 = vcombine.high %v18750_v12, %v18750_v12  ;;  %v653_v63 = vld [vmem:[#allocation5 + $0xda8] sm:$0xff] }
 0x1d6   :  { %6642 = vmatprep.subr.bf16.mxu0 %v15735_v17  ;;  %v15537_v17 = vcombine.high %v609_v9, %v613_v10 }
 0x1d7   :  { %6889 = vmatpush1.bf16.msra.mxu1 %v15480_v20  ;;  %v876_v20 = vld [vmem:[#allocation5 + $0x14a0] sm:$0xff] }
 0x1d8   :  { %6890 = vmatprep.subr.bf16.mxu1 %v15489_v23  ;;  %v617_v23 = vld [vmem:[#allocation5 + $0xc88] sm:$0xff]  ;;  %v15798_v35 = vcombine.low %v872_v18, %v876_v20 }
 0x1d9   :  { %6643 = vmatpush1.bf16.msra.mxu0 %v15734_v22  ;;  %v15791_v22 = vcombine.high %v864_v7, %v868_v8  ;;  %v15544_v33 = vcombine.low %v617_v23, %v621_v24  ;;  %v661_v8 = vld [vmem:[#allocation5 + $0xde8] sm:$0xff] }
 0x1da   :  { %6644 = vmatprep.subr.bf16.mxu0 %v15743_v53  ;;  %v15545_v53 = vcombine.high %v617_v23, %v621_v24  ;;  %v669_v24 = vld [vmem:[#allocation5 + $0xe28] sm:$0xff] }
 0x1db   :  { %6891 = vmatpush1.bf16.msra.mxu1 %v15488_v54  ;;  %v884_v54 = vld [vmem:[#allocation5 + $0x14e0] sm:$0xff] }
 0x1dc   :  { %6892 = vmatprep.subr.bf16.mxu1 %v15497_v30  ;;  %v15799_v30 = vcombine.high %v872_v18, %v876_v20  ;;  %v15806_v43 = vcombine.low %v880_v27, %v884_v54  ;;  %v920_v18 = vld [vmem:[#allocation5 + $0x1600] sm:$0xff] }
 0x1dd   :  { %6645 = vmatpush1.bf16.msra.mxu0 %v15742_v29  ;;  %v625_v29 = vld [vmem:[#allocation5 + $0xcc8] sm:$0xff]  ;;  %v924_v20 = vld [vmem:[#allocation5 + $0x1620] sm:$0xff] }
 0x1de   :  { %6646 = vmatprep.subr.bf16.mxu0 %v15751_v36  ;;  %v15553_v36 = vcombine.high %v625_v29, %v629_v31  ;;  %v15552_v19 = vcombine.low %v625_v29, %v629_v31  ;;  %v673_v29 = vld [vmem:[#allocation5 + $0xe48] sm:$0xff] }
 0x1df   :  { %6893 = vmatpush1.bf16.msra.mxu1 %v15496_v38  ;;  %v892_v38 = vld [vmem:[#allocation5 + $0x1520] sm:$0xff]  ;;  %v677_v31 = vld [vmem:[#allocation5 + $0xe68] sm:$0xff] }
 0x1e0   :  { %6894 = vmatprep.subr.bf16.mxu1 %v15505_v40  ;;  %v15807_v40 = vcombine.high %v880_v27, %v884_v54  ;;  %v15814_v55 = vcombine.low %v888_v37, %v892_v38  ;;  %v928_v27 = vld [vmem:[#allocation5 + $0x1640] sm:$0xff] }
 0x1e1   :  { %6647 = vmatpush1.bf16.msra.mxu0 %v15750_v39  ;;  %v633_v39 = vld [vmem:[#allocation5 + $0xd08] sm:$0xff]  ;;  %v932_v54 = vld [vmem:[#allocation5 + $0x1660] sm:$0xff] }
 0x1e2   :  { %6648 = vmatprep.subr.bf16.mxu0 %v15759_v44  ;;  %v15561_v44 = vcombine.high %v633_v39, %v637_v41  ;;  %v15560_v51 = vcombine.low %v633_v39, %v637_v41  ;;  %v681_v39 = vld [vmem:[#allocation5 + $0xe88] sm:$0xff] }
 0x1e3   :  { %6895 = vmatpush1.bf16.msra.mxu1 %v15504_v46  ;;  %v900_v46 = vld [vmem:[#allocation5 + $0x1560] sm:$0xff]  ;;  %v685_v41 = vld [vmem:[#allocation5 + $0xea8] sm:$0xff] }
 0x1e4   :  { %6896 = vmatprep.subr.bf16.mxu1 %v15513_v48  ;;  %v15815_v48 = vcombine.high %v888_v37, %v892_v38  ;;  %v15822_v1 = vcombine.low %v896_v45, %v900_v46  ;;  %v936_v37 = vld [vmem:[#allocation5 + $0x1680] sm:$0xff] }
 0x1e5   :  { %6649 = vmatpush1.bf16.msra.mxu0 %v15758_v47  ;;  %v641_v47 = vld [vmem:[#allocation5 + $0xd48] sm:$0xff]  ;;  %v940_v38 = vld [vmem:[#allocation5 + $0x16a0] sm:$0xff] }
 0x1e6   :  { %6650 = vmatprep.subr.bf16.mxu0 %v15767_v56  ;;  %v15569_v56 = vcombine.high %v641_v47, %v645_v49  ;;  %v15568_v32 = vcombine.low %v641_v47, %v645_v49  ;;  %v689_v47 = vld [vmem:[#allocation5 + $0xec8] sm:$0xff] }
 0x1e7   :  { %6897 = vmatpush1.bf16.msra.mxu1 %v15512_v59  ;;  %v908_v59 = vld [vmem:[#allocation5 + $0x15a0] sm:$0xff]  ;;  %v693_v49 = vld [vmem:[#allocation5 + $0xee8] sm:$0xff] }
 0x1e8   :  { %6898 = vmatprep.subr.bf16.mxu1 %v15521_v62  ;;  %v15823_v62 = vcombine.high %v896_v45, %v900_v46  ;;  %v15831_v7 = vcombine.high %v904_v57, %v908_v59  ;;  %v944_v45 = vld [vmem:[#allocation5 + $0x16c0] sm:$0xff] }
 0x1e9   :  { %6651 = vmatpush1.bf16.msra.mxu0 %v15766_v60  ;;  %v649_v60 = vld [vmem:[#allocation5 + $0xd88] sm:$0xff]  ;;  %v948_v46 = vld [vmem:[#allocation5 + $0x16e0] sm:$0xff] }
 0x1ea   :  { %6652 = vmatprep.subr.bf16.mxu0 %v15775_v2  ;;  %v15577_v2 = vcombine.high %v649_v60, %v653_v63 }
 0x1eb   :  { %6899 = vmatpush1.bf16.msra.mxu1 %v15520_v4  ;;  %v916_v4 = vld [vmem:[#allocation5 + $0x15e0] sm:$0xff] }
 0x1ec   :  { %6909 = vmatprep.subr.bf16.mxu1 %v15529_v6  ;;  %v15839_v23 = vcombine.high %v912_v3, %v916_v4 }
 0x1ed   :  { %6653 = vmatpush1.bf16.msra.mxu0 %v15774_v5  ;;  %v657_v5 = vld [vmem:[#allocation5 + $0xdc8] sm:$0xff] }
 0x1ee   :  { %6663 = vmatprep.subr.bf16.mxu0 %v15783_v11  ;;  %6901 = vmatmul.mubr.bf16.vlgmr.msra.gmra.mrb[4].mxu1 %v18726_v34  ;;  %v15576_v11 = vcombine.low %v649_v60, %v653_v63  ;;  %v697_v60 = vld [vmem:[#allocation5 + $0xf08] sm:$0xff] }
 0x1ef   :  { %6910 = vmatpush1.bf16.msra.mxu1 %v15528_v13  ;;  %6941 = vmatprep.mubr.bf16.mxu1 %v18730_v42  ;;  %v701_v63 = vld [vmem:[#allocation5 + $0xf28] sm:$0xff] }
 0x1f0   :  { %6655 = vmatmul.mubr.bf16.vlgmr.msra.gmra.mrb[0].mxu0 %v18754_v14  ;;  %6911 = vmatprep.subr.bf16.mxu1 %v15537_v17  ;;  %v15585_v17 = vcombine.high %v657_v5, %v661_v8 }
 0x1f1   :  { %6664 = vmatpush1.bf16.msra.mxu0 %v15782_v15  ;;  %6695 = vmatprep.mubr.bf16.mxu0 %v18758_v25  ;;  %v15830_v15 = vcombine.low %v904_v57, %v908_v59  ;;  %v952_v57 = vld [vmem:[#allocation5 + $0x1700] sm:$0xff] }
 0x1f2   :  { %6665 = vmatprep.subr.bf16.mxu0 %v15791_v22  ;;  %v665_v22 = vld [vmem:[#allocation5 + $0xe08] sm:$0xff]  ;;  %v956_v59 = vld [vmem:[#allocation5 + $0x1720] sm:$0xff] }
 0x1f3   :  { %6912 = vmatpush1.bf16.msra.mxu1 %v15536_v50  ;;  %v15584_v50 = vcombine.low %v657_v5, %v661_v8  ;;  %v705_v5 = vld [vmem:[#allocation5 + $0xf48] sm:$0xff] }
 0x1f4   :  { %6913 = vmatprep.subr.bf16.mxu1 %v15545_v53  ;;  %v15593_v53 = vcombine.high %v665_v22, %v669_v24  ;;  %v709_v8 = vld [vmem:[#allocation5 + $0xf68] sm:$0xff] }
 0x1f5   :  { %6666 = vmatpush1.bf16.msra.mxu0 %v15790_v26  ;;  %v15838_v26 = vcombine.low %v912_v3, %v916_v4  ;;  %v960_v3 = vld [vmem:[#allocation5 + $0x1740] sm:$0xff] }
 0x1f6   :  { %6667 = vmatprep.subr.bf16.mxu0 %v15799_v30  ;;  %v15847_v30 = vcombine.high %v920_v18, %v924_v20  ;;  %v964_v4 = vld [vmem:[#allocation5 + $0x1760] sm:$0xff] }
 0x1f7   :  { %6914 = vmatpush1.bf16.msra.mxu1 %v15544_v33  ;;  %v15592_v33 = vcombine.low %v665_v22, %v669_v24  ;;  %v717_v22 = vld [vmem:[#allocation5 + $0xfa8] sm:$0xff]  ;;  %v15886_v24 = vcombine.low %v960_v3, %v964_v4 }
 0x1f8   :  { %6915 = vmatprep.subr.bf16.mxu1 %v15553_v36  ;;  %v15601_v36 = vcombine.high %v673_v29, %v677_v31 }
 0x1f9   :  { %6668 = vmatpush1.bf16.msra.mxu0 %v15798_v35  ;;  %v15846_v35 = vcombine.low %v920_v18, %v924_v20  ;;  %v713_v18 = vld [vmem:[#allocation5 + $0xf88] sm:$0xff]  ;;  %v15887_v20 = vcombine.high %v960_v3, %v964_v4 }
 0x1fa   :  { %6669 = vmatprep.subr.bf16.mxu0 %v15807_v40  ;;  %v15855_v40 = vcombine.high %v928_v27, %v932_v54  ;;  %v753_v4 = vld [vmem:[#allocation5 + $0x10c8] sm:$0xff] }
 0x1fb   :  { %6916 = vmatpush1.bf16.msra.mxu1 %v15552_v19  ;;  %v15600_v19 = vcombine.low %v673_v29, %v677_v31  ;;  %v980_v29 = vld [vmem:[#allocation5 + $0x17e0] sm:$0xff] }
 0x1fc   :  { %6917 = vmatprep.subr.bf16.mxu1 %v15561_v44  ;;  %v15609_v44 = vcombine.high %v681_v39, %v685_v41 }
 0x1fd   :  { %6670 = vmatpush1.bf16.msra.mxu0 %v15806_v43  ;;  %v15854_v43 = vcombine.low %v928_v27, %v932_v54  ;;  %v725_v27 = vld [vmem:[#allocation5 + $0xfe8] sm:$0xff]  ;;  %v976_v54 = vld [vmem:[#allocation5 + $0x17c0] sm:$0xff] }
 0x1fe   :  { %6671 = vmatprep.subr.bf16.mxu0 %v15815_v48  ;;  %v15863_v48 = vcombine.high %v936_v37, %v940_v38 }
 0x1ff   :  { %6918 = vmatpush1.bf16.msra.mxu1 %v15560_v51  ;;  %v15608_v51 = vcombine.low %v681_v39, %v685_v41  ;;  %v988_v39 = vld [vmem:[#allocation5 + $0x1820] sm:$0xff]  ;;  %v15902_v41 = vcombine.low %v976_v54, %v980_v29 }
 0x200   :  { %6919 = vmatprep.subr.bf16.mxu1 %v15569_v56  ;;  %v15617_v56 = vcombine.high %v689_v47, %v693_v49 }
 0x201   :  { %6672 = vmatpush1.bf16.msra.mxu0 %v15814_v55  ;;  %v18764_v6 = vpop.f32.mrb[0].mxu1  ;;  %v15862_v55 = vcombine.low %v936_v37, %v940_v38  ;;  %v733_v37 = vld [vmem:[#allocation5 + $0x1028] sm:$0xff]  ;;  %v984_v38 = vld [vmem:[#allocation5 + $0x1800] sm:$0xff] }
 0x202   :  { %6673 = vmatprep.subr.bf16.mxu0 %v15823_v62  ;;  %v18766_v9 = vpop.f32.mrb[1].mxu1  ;;  %v15871_v62 = vcombine.high %v944_v45, %v948_v46 }
 0x203   :  { %v6496_v10 = vpop.f32.mrb[2].mxu1  ;;  %6920 = vmatpush1.bf16.msra.mxu1 %v15568_v32  ;;  %v15616_v32 = vcombine.low %v689_v47, %v693_v49  ;;  %v996_v47 = vld [vmem:[#allocation5 + $0x1860] sm:$0xff] }
 0x204   :  { %v6497_v13 = vpop.f32.mrb[3].mxu1  ;;  %6921 = vmatprep.subr.bf16.mxu1 %v15577_v2  ;;  %v15625_v2 = vcombine.high %v697_v60, %v701_v63  ;;  %v15624_v10 = vcombine.low %v697_v60, %v701_v63  ;;  %v749_v60 = vld [vmem:[#allocation5 + $0x10a8] sm:$0xff]  ;;  %v1000_v63 = vld [vmem:[#allocation5 + $0x1880] sm:$0xff] }
 0x205   :  { %6674 = vmatpush1.bf16.msra.mxu0 %v15822_v1  ;;  %v15870_v1 = vcombine.low %v944_v45, %v948_v46  ;;  %v15633_v13 = vcombine.high %v705_v5, %v709_v8  ;;  %v741_v45 = vld [vmem:[#allocation5 + $0x1068] sm:$0xff]  ;;  %v992_v46 = vld [vmem:[#allocation5 + $0x1840] sm:$0xff] }
 0x206   :  { %6675 = vmatprep.subr.bf16.mxu0 %v15831_v7  ;;  %v15879_v7 = vcombine.high %v952_v57, %v956_v59 }
 0x207   :  { %6922 = vmatpush1.bf16.msra.mxu1 %v15576_v11  ;;  %v15878_v11 = vcombine.low %v952_v57, %v956_v59  ;;  %v15919_v57 = vcombine.high %v992_v46, %v996_v47  ;;  %v745_v59 = vld [vmem:[#allocation5 + $0x1088] sm:$0xff] }
 0x208   :  { %6923 = vmatprep.subr.bf16.mxu1 %v15585_v17  ;;  %v972_v17 = vld [vmem:[#allocation5 + $0x17a0] sm:$0xff] }
 0x209   :  { %6676 = vmatpush1.bf16.msra.mxu0 %v15830_v15  ;;  %v968_v15 = vld [vmem:[#allocation5 + $0x1780] sm:$0xff] }
 0x20a   :  { %6677 = vmatprep.subr.bf16.mxu0 %v15839_v23  ;;  %v15632_v23 = vcombine.low %v705_v5, %v709_v8  ;;  %v15894_v31 = vcombine.low %v968_v15, %v972_v17  ;;  %v757_v5 = vld [vmem:[#allocation5 + $0x10e8] sm:$0xff]  ;;  %v1012_v8 = vld [vmem:[#allocation5 + $0x18e0] sm:$0xff] }
 0x20b   :  { %6924 = vmatpush1.bf16.msra.mxu1 %v15584_v50  ;;  %v15641_v50 = vcombine.high %v713_v18, %v717_v22 }
 0x20c   :  { %6925 = vmatprep.subr.bf16.mxu1 %v15593_v53  ;;  %v721_v53 = vld [vmem:[#allocation5 + $0xfc8] sm:$0xff] }
 0x20d   :  { %6678 = vmatpush1.bf16.msra.mxu0 %v15838_v26  ;;  %v15895_v26 = vcombine.high %v968_v15, %v972_v17  ;;  %v761_v17 = vld [vmem:[#allocation5 + $0x1108] sm:$0xff] }
 0x20e   :  { %6679 = vmatprep.subr.bf16.mxu0 %v15847_v30  ;;  %v15640_v30 = vcombine.low %v713_v18, %v717_v22  ;;  %v765_v18 = vld [vmem:[#allocation5 + $0x1128] sm:$0xff]  ;;  %v1020_v22 = vld [vmem:[#allocation5 + $0x1920] sm:$0xff] }
 0x20f   :  { %6926 = vmatpush1.bf16.msra.mxu1 %v15592_v33  ;;  %v15649_v33 = vcombine.high %v721_v53, %v725_v27 }
 0x210   :  { %6927 = vmatprep.subr.bf16.mxu1 %v15601_v36  ;;  %v729_v36 = vld [vmem:[#allocation5 + $0x1008] sm:$0xff] }
 0x211   :  { %6680 = vmatpush1.bf16.msra.mxu0 %v15846_v35  ;;  %v15903_v35 = vcombine.high %v976_v54, %v980_v29  ;;  %v15656_v49 = vcombine.low %v729_v36, %v733_v37  ;;  %v1024_v54 = vld [vmem:[#allocation5 + $0x1940] sm:$0xff] }
 0x212   :  { %6681 = vmatprep.subr.bf16.mxu0 %v15855_v40  ;;  %v15648_v40 = vcombine.low %v721_v53, %v725_v27  ;;  %v769_v53 = vld [vmem:[#allocation5 + $0x1148] sm:$0xff]  ;;  %v1028_v29 = vld [vmem:[#allocation5 + $0x1960] sm:$0xff] }
 0x213   :  { %6928 = vmatpush1.bf16.msra.mxu1 %v15600_v19  ;;  %v15657_v19 = vcombine.high %v729_v36, %v733_v37  ;;  %v773_v27 = vld [vmem:[#allocation5 + $0x1168] sm:$0xff] }
 0x214   :  { %6929 = vmatprep.subr.bf16.mxu1 %v15609_v44  ;;  %v737_v44 = vld [vmem:[#allocation5 + $0x1048] sm:$0xff] }
 0x215   :  { %6682 = vmatpush1.bf16.msra.mxu0 %v15854_v43  ;;  %v15911_v43 = vcombine.high %v984_v38, %v988_v39  ;;  %v777_v36 = vld [vmem:[#allocation5 + $0x1188] sm:$0xff] }
 0x216   :  { %6683 = vmatprep.subr.bf16.mxu0 %v15863_v48  ;;  %v18768_v48 = vld [vmem:[#allocation2 + $0x30] sm:$0xff]  ;;  %v781_v37 = vld [vmem:[#allocation5 + $0x11a8] sm:$0xff] }
 0x217   :  { %6930 = vmatpush1.bf16.msra.mxu1 %v15608_v51  ;;  %v18772_v51 = vcombine.low %v18750_v12, %v18750_v12  ;;  %v15664_v12 = vcombine.low %v737_v44, %v741_v45 }
 0x218   :  { %6931 = vmatprep.subr.bf16.mxu1 %v15617_v56  ;;  %v15665_v56 = vcombine.high %v737_v44, %v741_v45  ;;  %v785_v44 = vld [vmem:[#allocation5 + $0x11c8] sm:$0xff] }
 0x219   :  { %6684 = vmatpush1.bf16.msra.mxu0 %v15862_v55  ;;  %v15910_v55 = vcombine.low %v984_v38, %v988_v39  ;;  %v1032_v38 = vld [vmem:[#allocation5 + $0x1980] sm:$0xff]  ;;  %v789_v45 = vld [vmem:[#allocation5 + $0x11e8] sm:$0xff] }
 0x21a   :  { %6685 = vmatprep.subr.bf16.mxu0 %v15871_v62  ;;  %v18776_v62 = vcombine.high %v18768_v48, %v18768_v48  ;;  %v1036_v39 = vld [vmem:[#allocation5 + $0x19a0] sm:$0xff] }
 0x21b   :  { %6932 = vmatpush1.bf16.msra.mxu1 %v15616_v32  ;;  %v1004_v32 = vld [vmem:[#allocation5 + $0x18a0] sm:$0xff] }
 0x21c   :  { %6933 = vmatprep.subr.bf16.mxu1 %v15625_v2  ;;  %v15673_v2 = vcombine.high %v745_v59, %v749_v60  ;;  %v15927_v3 = vcombine.high %v1000_v63, %v1004_v32 }
 0x21d   :  { %6686 = vmatpush1.bf16.msra.mxu0 %v15870_v1  ;;  %v15918_v1 = vcombine.low %v992_v46, %v996_v47  ;;  %v1040_v46 = vld [vmem:[#allocation5 + $0x19c0] sm:$0xff] }
 0x21e   :  { %6687 = vmatprep.subr.bf16.mxu0 %v15879_v7  ;;  %v1008_v7 = vld [vmem:[#allocation5 + $0x18c0] sm:$0xff] }
 0x21f   :  { %6934 = vmatpush1.bf16.msra.mxu1 %v15624_v10  ;;  %v15672_v10 = vcombine.low %v745_v59, %v749_v60  ;;  %v15935_v15 = vcombine.high %v1008_v7, %v1012_v8  ;;  %v1044_v47 = vld [vmem:[#allocation5 + $0x19e0] sm:$0xff]  ;;  %v793_v59 = vld [vmem:[#allocation5 + $0x1208] sm:$0xff] }
 0x220   :  { %6935 = vmatprep.subr.bf16.mxu1 %v15633_v13  ;;  %v15681_v13 = vcombine.high %v753_v4, %v757_v5  ;;  %v797_v60 = vld [vmem:[#allocation5 + $0x1228] sm:$0xff] }
 0x221   :  { %6688 = vmatpush1.bf16.msra.mxu0 %v15878_v11  ;;  %v15926_v11 = vcombine.low %v1000_v63, %v1004_v32  ;;  %v1048_v63 = vld [vmem:[#allocation5 + $0x1a00] sm:$0xff] }
 0x222   :  { %6689 = vmatprep.subr.bf16.mxu0 %v15887_v20  ;;  %v1016_v20 = vld [vmem:[#allocation5 + $0x1900] sm:$0xff] }
 0x223   :  { %6936 = vmatpush1.bf16.msra.mxu1 %v15632_v23  ;;  %v15680_v23 = vcombine.low %v753_v4, %v757_v5  ;;  %v1052_v32 = vld [vmem:[#allocation5 + $0x1a20] sm:$0xff]  ;;  %v801_v4 = vld [vmem:[#allocation5 + $0x1248] sm:$0xff] }
 0x224   :  { %6937 = vmatprep.subr.bf16.mxu1 %v15641_v50  ;;  %v15689_v50 = vcombine.high %v761_v17, %v765_v18  ;;  %v805_v5 = vld [vmem:[#allocation5 + $0x1268] sm:$0xff] }
 0x225   :  { %6690 = vmatpush1.bf16.msra.mxu0 %v15886_v24  ;;  %v15934_v24 = vcombine.low %v1008_v7, %v1012_v8  ;;  %v1056_v7 = vld [vmem:[#allocation5 + $0x1a40] sm:$0xff] }
 0x226   :  { %6691 = vmatprep.subr.bf16.mxu0 %v15895_v26  ;;  %v15943_v26 = vcombine.high %v1016_v20, %v1020_v22  ;;  %v1060_v8 = vld [vmem:[#allocation5 + $0x1a60] sm:$0xff] }
 0x227   :  { %6938 = vmatpush1.bf16.msra.mxu1 %v15640_v30  ;;  %v15688_v30 = vcombine.low %v761_v17, %v765_v18  ;;  %v809_v17 = vld [vmem:[#allocation5 + $0x1288] sm:$0xff] }
 0x228   :  { %6939 = vmatprep.subr.bf16.mxu1 %v15649_v33  ;;  %v15697_v33 = vcombine.high %v769_v53, %v773_v27  ;;  %v813_v18 = vld [vmem:[#allocation5 + $0x12a8] sm:$0xff] }
 0x229   :  { %6692 = vmatpush1.bf16.msra.mxu0 %v15894_v31  ;;  %v15942_v31 = vcombine.low %v1016_v20, %v1020_v22  ;;  %v1064_v20 = vld [vmem:[#allocation5 + $0x1a80] sm:$0xff] }
 0x22a   :  { %6693 = vmatprep.subr.bf16.mxu0 %v15903_v35  ;;  %v15951_v35 = vcombine.high %v1024_v54, %v1028_v29  ;;  %v1068_v22 = vld [vmem:[#allocation5 + $0x1aa0] sm:$0xff] }
 0x22b   :  { %6940 = vmatpush1.bf16.msra.mxu1 %v15648_v40  ;;  %v15696_v40 = vcombine.low %v769_v53, %v773_v27  ;;  %v817_v53 = vld [vmem:[#allocation5 + $0x12c8] sm:$0xff] }
 0x22c   :  { %6950 = vmatprep.subr.bf16.mxu1 %v15657_v19  ;;  %v15705_v19 = vcombine.high %v777_v36, %v781_v37  ;;  %v821_v27 = vld [vmem:[#allocation5 + $0x12e8] sm:$0xff] }
 0x22d   :  { %6694 = vmatpush1.bf16.msra.mxu0 %v15902_v41  ;;  %v15950_v41 = vcombine.low %v1024_v54, %v1028_v29  ;;  %v1072_v54 = vld [vmem:[#allocation5 + $0x1ac0] sm:$0xff] }
 0x22e   :  { %6704 = vmatprep.subr.bf16.mxu0 %v15911_v43  ;;  %6942 = vmatmul.mubr.bf16.vlgmr.msra.gmra.mrb[4].mxu1 %v18740_v52  ;;  %v15959_v43 = vcombine.high %v1032_v38, %v1036_v39  ;;  %v1076_v29 = vld [vmem:[#allocation5 + $0x1ae0] sm:$0xff] }
 0x22f   :  { %6951 = vmatpush1.bf16.msra.mxu1 %v15656_v49  ;;  %6982 = vmatprep.mubr.bf16.mxu1 %v18744_v0  ;;  %v15704_v49 = vcombine.low %v777_v36, %v781_v37  ;;  %v825_v36 = vld [vmem:[#allocation5 + $0x1308] sm:$0xff] }
 0x230   :  { %6696 = vmatmul.mubr.bf16.vlgmr.msra.gmra.mrb[0].mxu0 %v18772_v51  ;;  %6952 = vmatprep.subr.bf16.mxu1 %v15665_v56  ;;  %v15713_v56 = vcombine.high %v785_v44, %v789_v45  ;;  %v829_v37 = vld [vmem:[#allocation5 + $0x1328] sm:$0xff] }
 0x231   :  { %6705 = vmatpush1.bf16.msra.mxu0 %v15910_v55  ;;  %6736 = vmatprep.mubr.bf16.mxu0 %v18776_v62  ;;  %v15958_v55 = vcombine.low %v1032_v38, %v1036_v39  ;;  %v1080_v38 = vld [vmem:[#allocation5 + $0x1b00] sm:$0xff] }
 0x232   :  { %6706 = vmatprep.subr.bf16.mxu0 %v15919_v57  ;;  %v15967_v57 = vcombine.high %v1040_v46, %v1044_v47  ;;  %v1084_v39 = vld [vmem:[#allocation5 + $0x1b20] sm:$0xff] }
 0x233   :  { %6953 = vmatpush1.bf16.msra.mxu1 %v15664_v12  ;;  %v15712_v12 = vcombine.low %v785_v44, %v789_v45  ;;  %v833_v44 = vld [vmem:[#allocation5 + $0x1348] sm:$0xff] }
 0x234   :  { %6954 = vmatprep.subr.bf16.mxu1 %v15673_v2  ;;  %v15721_v2 = vcombine.high %v793_v59, %v797_v60  ;;  %v837_v45 = vld [vmem:[#allocation5 + $0x1368] sm:$0xff] }
 0x235   :  { %6707 = vmatpush1.bf16.msra.mxu0 %v15918_v1  ;;  %v15966_v1 = vcombine.low %v1040_v46, %v1044_v47  ;;  %v1088_v46 = vld [vmem:[#allocation5 + $0x1b40] sm:$0xff] }
 0x236   :  { %6708 = vmatprep.subr.bf16.mxu0 %v15927_v3  ;;  %v15975_v3 = vcombine.high %v1048_v63, %v1052_v32  ;;  %v1092_v47 = vld [vmem:[#allocation5 + $0x1b60] sm:$0xff] }
 0x237   :  { %6955 = vmatpush1.bf16.msra.mxu1 %v15672_v10  ;;  %v15720_v10 = vcombine.low %v793_v59, %v797_v60  ;;  %v841_v59 = vld [vmem:[#allocation5 + $0x1388] sm:$0xff] }
 0x238   :  { %6956 = vmatprep.subr.bf16.mxu1 %v15681_v13  ;;  %v15729_v13 = vcombine.high %v801_v4, %v805_v5  ;;  %v845_v60 = vld [vmem:[#allocation5 + $0x13a8] sm:$0xff] }
 0x239   :  { %6709 = vmatpush1.bf16.msra.mxu0 %v15926_v11  ;;  %v15974_v11 = vcombine.low %v1048_v63, %v1052_v32  ;;  %v1096_v63 = vld [vmem:[#allocation5 + $0x1b80] sm:$0xff] }
 0x23a   :  { %6710 = vmatprep.subr.bf16.mxu0 %v15935_v15  ;;  %v15983_v15 = vcombine.high %v1056_v7, %v1060_v8  ;;  %v1100_v32 = vld [vmem:[#allocation5 + $0x1ba0] sm:$0xff] }
 0x23b   :  { %6957 = vmatpush1.bf16.msra.mxu1 %v15680_v23  ;;  %v15728_v23 = vcombine.low %v801_v4, %v805_v5  ;;  %v849_v4 = vld [vmem:[#allocation5 + $0x13c8] sm:$0xff] }
 0x23c   :  { %6958 = vmatprep.subr.bf16.mxu1 %v15689_v50  ;;  %v15737_v50 = vcombine.high %v809_v17, %v813_v18  ;;  %v853_v5 = vld [vmem:[#allocation5 + $0x13e8] sm:$0xff] }
 0x23d   :  { %6711 = vmatpush1.bf16.msra.mxu0 %v15934_v24  ;;  %v15982_v24 = vcombine.low %v1056_v7, %v1060_v8  ;;  %v1104_v7 = vld [vmem:[#allocation5 + $0x1bc0] sm:$0xff] }
 0x23e   :  { %6712 = vmatprep.subr.bf16.mxu0 %v15943_v26  ;;  %v15991_v26 = vcombine.high %v1064_v20, %v1068_v22  ;;  %v1108_v8 = vld [vmem:[#allocation5 + $0x1be0] sm:$0xff] }
 0x23f   :  { %6959 = vmatpush1.bf16.msra.mxu1 %v15688_v30  ;;  %v15736_v30 = vcombine.low %v809_v17, %v813_v18  ;;  %v857_v17 = vld [vmem:[#allocation5 + $0x1408] sm:$0xff] }
 0x240   :  { %6960 = vmatprep.subr.bf16.mxu1 %v15697_v33  ;;  %v15745_v33 = vcombine.high %v817_v53, %v821_v27  ;;  %v861_v18 = vld [vmem:[#allocation5 + $0x1428] sm:$0xff] }
 0x241   :  { %6713 = vmatpush1.bf16.msra.mxu0 %v15942_v31  ;;  %v15990_v31 = vcombine.low %v1064_v20, %v1068_v22  ;;  %v1112_v20 = vld [vmem:[#allocation5 + $0x1c00] sm:$0xff] }
 0x242   :  { %6714 = vmatprep.subr.bf16.mxu0 %v15951_v35  ;;  %v15999_v35 = vcombine.high %v1072_v54, %v1076_v29  ;;  %v1116_v22 = vld [vmem:[#allocation5 + $0x1c20] sm:$0xff] }
 0x243   :  { %6961 = vmatpush1.bf16.msra.mxu1 %v15696_v40  ;;  %v15744_v40 = vcombine.low %v817_v53, %v821_v27  ;;  %v865_v53 = vld [vmem:[#allocation5 + $0x1448] sm:$0xff] }
 0x244   :  { %6962 = vmatprep.subr.bf16.mxu1 %v15705_v19  ;;  %v15753_v19 = vcombine.high %v825_v36, %v829_v37  ;;  %v869_v27 = vld [vmem:[#allocation5 + $0x1468] sm:$0xff] }
 0x245   :  { %6715 = vmatpush1.bf16.msra.mxu0 %v15950_v41  ;;  %v15998_v41 = vcombine.low %v1072_v54, %v1076_v29  ;;  %v1120_v54 = vld [vmem:[#allocation5 + $0x1c40] sm:$0xff] }
 0x246   :  { %6716 = vmatprep.subr.bf16.mxu0 %v15959_v43  ;;  %v16007_v43 = vcombine.high %v1080_v38, %v1084_v39  ;;  %v1124_v29 = vld [vmem:[#allocation5 + $0x1c60] sm:$0xff] }
 0x247   :  { %6963 = vmatpush1.bf16.msra.mxu1 %v15704_v49  ;;  %v15752_v49 = vcombine.low %v825_v36, %v829_v37  ;;  %v15793_v36 = vcombine.high %v865_v53, %v869_v27  ;;  %v16047_v37 = vcombine.high %v1120_v54, %v1124_v29 }
 0x248   :  { %6964 = vmatprep.subr.bf16.mxu1 %v15713_v56  ;;  %v15761_v56 = vcombine.high %v833_v44, %v837_v45 }
 0x249   :  { %6717 = vmatpush1.bf16.msra.mxu0 %v15958_v55  ;;  %v16006_v55 = vcombine.low %v1080_v38, %v1084_v39  ;;  %v873_v38 = vld [vmem:[#allocation5 + $0x1488] sm:$0xff] }
 0x24a   :  { %6718 = vmatprep.subr.bf16.mxu0 %v15967_v57  ;;  %v16015_v57 = vcombine.high %v1088_v46, %v1092_v47  ;;  %v877_v39 = vld [vmem:[#allocation5 + $0x14a8] sm:$0xff] }
 0x24b   :  { %6965 = vmatpush1.bf16.msra.mxu1 %v15712_v12  ;;  %v15760_v12 = vcombine.low %v833_v44, %v837_v45  ;;  %v15801_v44 = vcombine.high %v873_v38, %v877_v39 }
 0x24c   :  { %6966 = vmatprep.subr.bf16.mxu1 %v15721_v2  ;;  %v15769_v2 = vcombine.high %v841_v59, %v845_v60 }
 0x24d   :  { %6719 = vmatpush1.bf16.msra.mxu0 %v15966_v1  ;;  %v16014_v1 = vcombine.low %v1088_v46, %v1092_v47  ;;  %v881_v46 = vld [vmem:[#allocation5 + $0x14c8] sm:$0xff] }
 0x24e   :  { %6720 = vmatprep.subr.bf16.mxu0 %v15975_v3  ;;  %v16023_v3 = vcombine.high %v1096_v63, %v1100_v32  ;;  %v885_v47 = vld [vmem:[#allocation5 + $0x14e8] sm:$0xff] }
 0x24f   :  { %6967 = vmatpush1.bf16.msra.mxu1 %v15720_v10  ;;  %v15768_v10 = vcombine.low %v841_v59, %v845_v60  ;;  %v15809_v59 = vcombine.high %v881_v46, %v885_v47 }
 0x250   :  { %6968 = vmatprep.subr.bf16.mxu1 %v15729_v13  ;;  %v15777_v13 = vcombine.high %v849_v4, %v853_v5 }
 0x251   :  { %6721 = vmatpush1.bf16.msra.mxu0 %v15974_v11  ;;  %v16022_v11 = vcombine.low %v1096_v63, %v1100_v32  ;;  %v889_v63 = vld [vmem:[#allocation5 + $0x1508] sm:$0xff] }
 0x252   :  { %6722 = vmatprep.subr.bf16.mxu0 %v15983_v15  ;;  %v16031_v15 = vcombine.high %v1104_v7, %v1108_v8  ;;  %v893_v32 = vld [vmem:[#allocation5 + $0x1528] sm:$0xff] }
 0x253   :  { %6969 = vmatpush1.bf16.msra.mxu1 %v15728_v23  ;;  %v15776_v23 = vcombine.low %v849_v4, %v853_v5  ;;  %v15817_v4 = vcombine.high %v889_v63, %v893_v32 }
 0x254   :  { %6970 = vmatprep.subr.bf16.mxu1 %v15737_v50  ;;  %v15785_v50 = vcombine.high %v857_v17, %v861_v18 }
 0x255   :  { %6723 = vmatpush1.bf16.msra.mxu0 %v15982_v24  ;;  %v16030_v24 = vcombine.low %v1104_v7, %v1108_v8  ;;  %v897_v7 = vld [vmem:[#allocation5 + $0x1548] sm:$0xff] }
 0x256   :  { %6724 = vmatprep.subr.bf16.mxu0 %v15991_v26  ;;  %v16039_v26 = vcombine.high %v1112_v20, %v1116_v22  ;;  %v901_v8 = vld [vmem:[#allocation5 + $0x1568] sm:$0xff] }
 0x257   :  { %6971 = vmatpush1.bf16.msra.mxu1 %v15736_v30  ;;  %v18782_v30 = vld [vmem:[#allocation2 + $0x38] sm:$0xff] }
 0x258   :  { %6972 = vmatprep.subr.bf16.mxu1 %v15745_v33  ;;  %v18786_v33 = vcombine.low %v18768_v48, %v18768_v48  ;;  %v15792_v48 = vcombine.low %v865_v53, %v869_v27 }
 0x259   :  { %6725 = vmatpush1.bf16.msra.mxu0 %v15990_v31  ;;  %v15784_v31 = vcombine.low %v857_v17, %v861_v18  ;;  %v15825_v17 = vcombine.high %v897_v7, %v901_v8 }
 0x25a   :  { %6726 = vmatprep.subr.bf16.mxu0 %v15999_v35  ;;  %v16038_v35 = vcombine.low %v1112_v20, %v1116_v22  ;;  %v905_v20 = vld [vmem:[#allocation5 + $0x1588] sm:$0xff] }
 0x25b   :  { %6973 = vmatpush1.bf16.msra.mxu1 %v15744_v40  ;;  %v18790_v40 = vcombine.high %v18782_v30, %v18782_v30  ;;  %v909_v22 = vld [vmem:[#allocation5 + $0x15a8] sm:$0xff] }
 0x25c   :  { %6974 = vmatprep.subr.bf16.mxu1 %v15753_v19  ;;  %v1132_v19 = vld [vmem:[#allocation5 + $0x1ca0] sm:$0xff]  ;;  %v15833_v53 = vcombine.high %v905_v20, %v909_v22 }
 0x25d   :  { %6727 = vmatpush1.bf16.msra.mxu0 %v15998_v41  ;;  %v1128_v41 = vld [vmem:[#allocation5 + $0x1c80] sm:$0xff] }
 0x25e   :  { %6728 = vmatprep.subr.bf16.mxu0 %v16007_v43  ;;  %v16046_v43 = vcombine.low %v1120_v54, %v1124_v29  ;;  %v16055_v45 = vcombine.high %v1128_v41, %v1132_v19  ;;  %v913_v54 = vld [vmem:[#allocation5 + $0x15c8] sm:$0xff] }
 0x25f   :  { %6975 = vmatpush1.bf16.msra.mxu1 %v15752_v49  ;;  %v1136_v49 = vld [vmem:[#allocation5 + $0x1cc0] sm:$0xff]  ;;  %v917_v29 = vld [vmem:[#allocation5 + $0x15e8] sm:$0xff] }
 0x260   :  { %6976 = vmatprep.subr.bf16.mxu1 %v15761_v56  ;;  %v15800_v56 = vcombine.low %v873_v38, %v877_v39  ;;  %v15841_v38 = vcombine.high %v913_v54, %v917_v29 }
 0x261   :  { %6729 = vmatpush1.bf16.msra.mxu0 %v16006_v55  ;;  %v1140_v55 = vld [vmem:[#allocation5 + $0x1ce0] sm:$0xff] }
 0x262   :  { %6730 = vmatprep.subr.bf16.mxu0 %v16015_v57  ;;  %v16054_v57 = vcombine.low %v1128_v41, %v1132_v19  ;;  %v16063_v60 = vcombine.high %v1136_v49, %v1140_v55  ;;  %v921_v41 = vld [vmem:[#allocation5 + $0x1608] sm:$0xff] }
 0x263   :  { %6977 = vmatpush1.bf16.msra.mxu1 %v15760_v12  ;;  %v1144_v12 = vld [vmem:[#allocation5 + $0x1d00] sm:$0xff]  ;;  %v925_v19 = vld [vmem:[#allocation5 + $0x1628] sm:$0xff] }
 0x264   :  { %6978 = vmatprep.subr.bf16.mxu1 %v15769_v2  ;;  %v15808_v2 = vcombine.low %v881_v46, %v885_v47  ;;  %v15849_v46 = vcombine.high %v921_v41, %v925_v19 }
 0x265   :  { %6731 = vmatpush1.bf16.msra.mxu0 %v16014_v1  ;;  %v1148_v1 = vld [vmem:[#allocation5 + $0x1d20] sm:$0xff] }
 0x266   :  { %6732 = vmatprep.subr.bf16.mxu0 %v16023_v3  ;;  %v16062_v3 = vcombine.low %v1136_v49, %v1140_v55  ;;  %v16071_v5 = vcombine.high %v1144_v12, %v1148_v1  ;;  %v929_v49 = vld [vmem:[#allocation5 + $0x1648] sm:$0xff] }
 0x267   :  { %6979 = vmatpush1.bf16.msra.mxu1 %v15768_v10  ;;  %v1152_v10 = vld [vmem:[#allocation5 + $0x1d40] sm:$0xff]  ;;  %v933_v55 = vld [vmem:[#allocation5 + $0x1668] sm:$0xff] }
 0x268   :  { %6980 = vmatprep.subr.bf16.mxu1 %v15777_v13  ;;  %v15816_v13 = vcombine.low %v889_v63, %v893_v32  ;;  %v15857_v63 = vcombine.high %v929_v49, %v933_v55 }
 0x269   :  { %6733 = vmatpush1.bf16.msra.mxu0 %v16022_v11  ;;  %v1156_v11 = vld [vmem:[#allocation5 + $0x1d60] sm:$0xff] }
 0x26a   :  { %6734 = vmatprep.subr.bf16.mxu0 %v16031_v15  ;;  %v16070_v15 = vcombine.low %v1144_v12, %v1148_v1  ;;  %v16079_v18 = vcombine.high %v1152_v10, %v1156_v11  ;;  %v937_v12 = vld [vmem:[#allocation5 + $0x1688] sm:$0xff] }
 0x26b   :  { %6981 = vmatpush1.bf16.msra.mxu1 %v15776_v23  ;;  %v1160_v23 = vld [vmem:[#allocation5 + $0x1d80] sm:$0xff]  ;;  %v941_v1 = vld [vmem:[#allocation5 + $0x16a8] sm:$0xff] }
 0x26c   :  { %6991 = vmatprep.subr.bf16.mxu1 %v15785_v50  ;;  %v15824_v50 = vcombine.low %v897_v7, %v901_v8  ;;  %v15865_v7 = vcombine.high %v937_v12, %v941_v1 }
 0x26d   :  { %6735 = vmatpush1.bf16.msra.mxu0 %v16030_v24  ;;  %v1164_v24 = vld [vmem:[#allocation5 + $0x1da0] sm:$0xff] }
 0x26e   :  { %6745 = vmatprep.subr.bf16.mxu0 %v16039_v26  ;;  %6983 = vmatmul.mubr.bf16.vlgmr.msra.gmra.mrb[4].mxu1 %v18754_v14  ;;  %v16078_v26 = vcombine.low %v1152_v10, %v1156_v11  ;;  %v16087_v27 = vcombine.high %v1160_v23, %v1164_v24  ;;  %v945_v10 = vld [vmem:[#allocation5 + $0x16c8] sm:$0xff] }
 0x26f   :  { %6992 = vmatpush1.bf16.msra.mxu1 %v15784_v31  ;;  %7023 = vmatprep.mubr.bf16.mxu1 %v18758_v25  ;;  %v1168_v31 = vld [vmem:[#allocation5 + $0x1dc0] sm:$0xff]  ;;  %v949_v11 = vld [vmem:[#allocation5 + $0x16e8] sm:$0xff] }
 0x270   :  { %6737 = vmatmul.mubr.bf16.vlgmr.msra.gmra.mrb[0].mxu0 %v18786_v33  ;;  %6993 = vmatprep.subr.bf16.mxu1 %v15793_v36  ;;  %v15832_v36 = vcombine.low %v905_v20, %v909_v22  ;;  %v15873_v20 = vcombine.high %v945_v10, %v949_v11 }
 0x271   :  { %6746 = vmatpush1.bf16.msra.mxu0 %v16038_v35  ;;  %6777 = vmatprep.mubr.bf16.mxu0 %v18790_v40  ;;  %v1172_v35 = vld [vmem:[#allocation5 + $0x1de0] sm:$0xff] }
 0x272   :  { %6747 = vmatprep.subr.bf16.mxu0 %v16047_v37  ;;  %v16086_v37 = vcombine.low %v1160_v23, %v1164_v24  ;;  %v16095_v39 = vcombine.high %v1168_v31, %v1172_v35  ;;  %v953_v23 = vld [vmem:[#allocation5 + $0x1708] sm:$0xff] }
 0x273   :  { %6994 = vmatpush1.bf16.msra.mxu1 %v15792_v48  ;;  %v1176_v48 = vld [vmem:[#allocation5 + $0x1e00] sm:$0xff]  ;;  %v957_v24 = vld [vmem:[#allocation5 + $0x1728] sm:$0xff] }
 0x274   :  { %6995 = vmatprep.subr.bf16.mxu1 %v15801_v44  ;;  %v15840_v44 = vcombine.low %v913_v54, %v917_v29  ;;  %v15881_v54 = vcombine.high %v953_v23, %v957_v24 }
 0x275   :  { %6748 = vmatpush1.bf16.msra.mxu0 %v16046_v43  ;;  %v1180_v43 = vld [vmem:[#allocation5 + $0x1e20] sm:$0xff] }
 0x276   :  { %6749 = vmatprep.subr.bf16.mxu0 %v16055_v45  ;;  %v16094_v45 = vcombine.low %v1168_v31, %v1172_v35  ;;  %v16103_v47 = vcombine.high %v1176_v48, %v1180_v43  ;;  %v961_v31 = vld [vmem:[#allocation5 + $0x1748] sm:$0xff] }
 0x277   :  { %6996 = vmatpush1.bf16.msra.mxu1 %v15800_v56  ;;  %v1184_v56 = vld [vmem:[#allocation5 + $0x1e40] sm:$0xff]  ;;  %v965_v35 = vld [vmem:[#allocation5 + $0x1768] sm:$0xff] }
 0x278   :  { %6997 = vmatprep.subr.bf16.mxu1 %v15809_v59  ;;  %v15848_v59 = vcombine.low %v921_v41, %v925_v19  ;;  %v15889_v41 = vcombine.high %v961_v31, %v965_v35 }
 0x279   :  { %6750 = vmatpush1.bf16.msra.mxu0 %v16054_v57  ;;  %v1188_v57 = vld [vmem:[#allocation5 + $0x1e60] sm:$0xff] }
 0x27a   :  { %6751 = vmatprep.subr.bf16.mxu0 %v16063_v60  ;;  %v16102_v60 = vcombine.low %v1176_v48, %v1180_v43  ;;  %v16111_v32 = vcombine.high %v1184_v56, %v1188_v57  ;;  %v969_v48 = vld [vmem:[#allocation5 + $0x1788] sm:$0xff] }
 0x27b   :  { %6998 = vmatpush1.bf16.msra.mxu1 %v15808_v2  ;;  %v1192_v2 = vld [vmem:[#allocation5 + $0x1e80] sm:$0xff]  ;;  %v973_v43 = vld [vmem:[#allocation5 + $0x17a8] sm:$0xff] }
 0x27c   :  { %6999 = vmatprep.subr.bf16.mxu1 %v15817_v4  ;;  %v15856_v4 = vcombine.low %v929_v49, %v933_v55  ;;  %v15897_v49 = vcombine.high %v969_v48, %v973_v43 }
 0x27d   :  { %6752 = vmatpush1.bf16.msra.mxu0 %v16062_v3  ;;  %v1196_v3 = vld [vmem:[#allocation5 + $0x1ea0] sm:$0xff] }
 0x27e   :  { %6753 = vmatprep.subr.bf16.mxu0 %v16071_v5  ;;  %v16110_v5 = vcombine.low %v1184_v56, %v1188_v57  ;;  %v16119_v8 = vcombine.high %v1192_v2, %v1196_v3  ;;  %v977_v56 = vld [vmem:[#allocation5 + $0x17c8] sm:$0xff] }
 0x27f   :  { %7000 = vmatpush1.bf16.msra.mxu1 %v15816_v13  ;;  %v1200_v13 = vld [vmem:[#allocation5 + $0x1ec0] sm:$0xff]  ;;  %v981_v57 = vld [vmem:[#allocation5 + $0x17e8] sm:$0xff] }
 0x280   :  { %7001 = vmatprep.subr.bf16.mxu1 %v15825_v17  ;;  %v15864_v17 = vcombine.low %v937_v12, %v941_v1  ;;  %v15905_v12 = vcombine.high %v977_v56, %v981_v57 }
 0x281   :  { %6754 = vmatpush1.bf16.msra.mxu0 %v16070_v15  ;;  %v1204_v15 = vld [vmem:[#allocation5 + $0x1ee0] sm:$0xff] }
 0x282   :  { %6755 = vmatprep.subr.bf16.mxu0 %v16079_v18  ;;  %v16118_v18 = vcombine.low %v1192_v2, %v1196_v3  ;;  %v16127_v22 = vcombine.high %v1200_v13, %v1204_v15  ;;  %v985_v2 = vld [vmem:[#allocation5 + $0x1808] sm:$0xff] }
 0x283   :  { %7002 = vmatpush1.bf16.msra.mxu1 %v15824_v50  ;;  %v1208_v50 = vld [vmem:[#allocation5 + $0x1f00] sm:$0xff]  ;;  %v989_v3 = vld [vmem:[#allocation5 + $0x1828] sm:$0xff] }
 0x284   :  { %7003 = vmatprep.subr.bf16.mxu1 %v15833_v53  ;;  %v15872_v53 = vcombine.low %v945_v10, %v949_v11  ;;  %v15913_v10 = vcombine.high %v985_v2, %v989_v3 }
 0x285   :  { %6756 = vmatpush1.bf16.msra.mxu0 %v16078_v26  ;;  %v1212_v26 = vld [vmem:[#allocation5 + $0x1f20] sm:$0xff] }
 0x286   :  { %6757 = vmatprep.subr.bf16.mxu0 %v16087_v27  ;;  %v16126_v27 = vcombine.low %v1200_v13, %v1204_v15  ;;  %v16135_v29 = vcombine.high %v1208_v50, %v1212_v26  ;;  %v993_v13 = vld [vmem:[#allocation5 + $0x1848] sm:$0xff] }
 0x287   :  { %7004 = vmatpush1.bf16.msra.mxu1 %v15832_v36  ;;  %v1216_v36 = vld [vmem:[#allocation5 + $0x1f40] sm:$0xff]  ;;  %v997_v15 = vld [vmem:[#allocation5 + $0x1868] sm:$0xff] }
 0x288   :  { %7005 = vmatprep.subr.bf16.mxu1 %v15841_v38  ;;  %v15880_v38 = vcombine.low %v953_v23, %v957_v24  ;;  %v15921_v24 = vcombine.high %v993_v13, %v997_v15 }
 0x289   :  { %6758 = vmatpush1.bf16.msra.mxu0 %v16086_v37  ;;  %v1220_v37 = vld [vmem:[#allocation5 + $0x1f60] sm:$0xff] }
 0x28a   :  { %6759 = vmatprep.subr.bf16.mxu0 %v16095_v39  ;;  %v16134_v39 = vcombine.low %v1208_v50, %v1212_v26  ;;  %v16143_v19 = vcombine.high %v1216_v36, %v1220_v37  ;;  %v1001_v26 = vld [vmem:[#allocation5 + $0x1888] sm:$0xff] }
 0x28b   :  { %7006 = vmatpush1.bf16.msra.mxu1 %v15840_v44  ;;  %v1224_v44 = vld [vmem:[#allocation5 + $0x1f80] sm:$0xff] }
 0x28c   :  { %7007 = vmatprep.subr.bf16.mxu1 %v15849_v46  ;;  %v15888_v46 = vcombine.low %v961_v31, %v965_v35 }
 0x28d   :  { %6760 = vmatpush1.bf16.msra.mxu0 %v16094_v45  ;;  %v1228_v45 = vld [vmem:[#allocation5 + $0x1fa0] sm:$0xff] }
 0x28e   :  { %6761 = vmatprep.subr.bf16.mxu0 %v16103_v47  ;;  %v16142_v47 = vcombine.low %v1216_v36, %v1220_v37  ;;  %v16151_v55 = vcombine.high %v1224_v44, %v1228_v45  ;;  %v1009_v36 = vld [vmem:[#allocation5 + $0x18c8] sm:$0xff] }
 0x28f   :  { %7008 = vmatpush1.bf16.msra.mxu1 %v15848_v59  ;;  %v1232_v59 = vld [vmem:[#allocation5 + $0x1fc0] sm:$0xff]  ;;  %v1013_v37 = vld [vmem:[#allocation5 + $0x18e8] sm:$0xff] }
 0x290   :  { %7009 = vmatprep.subr.bf16.mxu1 %v15857_v63  ;;  %v15896_v63 = vcombine.low %v969_v48, %v973_v43  ;;  %v15937_v48 = vcombine.high %v1009_v36, %v1013_v37 }
 0x291   :  { %6762 = vmatpush1.bf16.msra.mxu0 %v16102_v60  ;;  %v1236_v60 = vld [vmem:[#allocation5 + $0x1fe0] sm:$0xff] }
 0x292   :  { %6763 = vmatprep.subr.bf16.mxu0 %v16111_v32  ;;  %v16150_v32 = vcombine.low %v1224_v44, %v1228_v45  ;;  %v16159_v1 = vcombine.high %v1232_v59, %v1236_v60  ;;  %v1017_v44 = vld [vmem:[#allocation5 + $0x1908] sm:$0xff] }
 0x293   :  { %7010 = vmatpush1.bf16.msra.mxu1 %v15856_v4  ;;  %v218_v4 = vld [vmem:[#allocation5 + $0x10] sm:$0xff]  ;;  %v1021_v45 = vld [vmem:[#allocation5 + $0x1928] sm:$0xff] }
 0x294   :  { %7011 = vmatprep.subr.bf16.mxu1 %v15865_v7  ;;  %v15904_v7 = vcombine.low %v977_v56, %v981_v57  ;;  %v15945_v56 = vcombine.high %v1017_v44, %v1021_v45 }
 0x295   :  { %6764 = vmatpush1.bf16.msra.mxu0 %v16110_v5  ;;  %v222_v5 = vld [vmem:[#allocation5 + $0x30] sm:$0xff] }
 0x296   :  { %6765 = vmatprep.subr.bf16.mxu0 %v16119_v8  ;;  %v16158_v8 = vcombine.low %v1232_v59, %v1236_v60  ;;  %v15147_v11 = vcombine.high %v218_v4, %v222_v5  ;;  %v15146_v23 = vcombine.low %v218_v4, %v222_v5  ;;  %v1025_v59 = vld [vmem:[#allocation5 + $0x1948] sm:$0xff] }
 0x297   :  { %7012 = vmatpush1.bf16.msra.mxu1 %v15864_v17  ;;  %v226_v17 = vld [vmem:[#allocation5 + $0x50] sm:$0xff]  ;;  %v1029_v60 = vld [vmem:[#allocation5 + $0x1968] sm:$0xff] }
 0x298   :  { %7013 = vmatprep.subr.bf16.mxu1 %v15873_v20  ;;  %v18798_v20 = vcombine.low %v18782_v30, %v18782_v30  ;;  %v1033_v4 = vld [vmem:[#allocation5 + $0x1988] sm:$0xff] }
 0x299   :  { %6766 = vmatpush1.bf16.msra.mxu0 %v16118_v18  ;;  %v230_v18 = vld [vmem:[#allocation5 + $0x70] sm:$0xff]  ;;  %v1037_v5 = vld [vmem:[#allocation5 + $0x19a8] sm:$0xff] }
 0x29a   :  { %6767 = vmatprep.subr.bf16.mxu0 %v16127_v22  ;;  %v15912_v22 = vcombine.low %v985_v2, %v989_v3  ;;  %v15155_v50 = vcombine.high %v226_v17, %v230_v18  ;;  %v15154_v30 = vcombine.low %v226_v17, %v230_v18  ;;  %v15953_v2 = vcombine.high %v1025_v59, %v1029_v60  ;;  %v1041_v17 = vld [vmem:[#allocation5 + $0x19c8] sm:$0xff] }
 0x29b   :  { %7014 = vmatpush1.bf16.msra.mxu1 %v15872_v53  ;;  %v1005_v53 = vld [vmem:[#allocation5 + $0x18a8] sm:$0xff] }
 0x29c   :  { %7015 = vmatprep.subr.bf16.mxu1 %v15881_v54  ;;  %v238_v54 = vld [vmem:[#allocation5 + $0xb0] sm:$0xff]  ;;  %v15929_v31 = vcombine.high %v1001_v26, %v1005_v53  ;;  %v1045_v18 = vld [vmem:[#allocation5 + $0x19e8] sm:$0xff] }
 0x29d   :  { %6768 = vmatpush1.bf16.msra.mxu0 %v16126_v27  ;;  %v234_v27 = vld [vmem:[#allocation5 + $0x90] sm:$0xff] }
 0x29e   :  { %6769 = vmatprep.subr.bf16.mxu0 %v16135_v29  ;;  %v15920_v29 = vcombine.low %v993_v13, %v997_v15  ;;  %v15163_v35 = vcombine.high %v234_v27, %v238_v54  ;;  %v15961_v13 = vcombine.high %v1033_v4, %v1037_v5 }
 0x29f   :  { %7016 = vmatpush1.bf16.msra.mxu1 %v15880_v38  ;;  %v242_v38 = vld [vmem:[#allocation5 + $0xd0] sm:$0xff] }
 0x2a0   :  { %7017 = vmatprep.subr.bf16.mxu1 %v15889_v41  ;;  %v15928_v41 = vcombine.low %v1001_v26, %v1005_v53  ;;  %v15969_v26 = vcombine.high %v1041_v17, %v1045_v18 }
 0x2a1   :  { %6770 = vmatpush1.bf16.msra.mxu0 %v16134_v39  ;;  %v246_v39 = vld [vmem:[#allocation5 + $0xf0] sm:$0xff] }
 0x2a2   :  { %6771 = vmatprep.subr.bf16.mxu0 %v16143_v19  ;;  %v15162_v19 = vcombine.low %v234_v27, %v238_v54  ;;  %v15171_v43 = vcombine.high %v242_v38, %v246_v39  ;;  %v1049_v27 = vld [vmem:[#allocation5 + $0x1a08] sm:$0xff] }
 0x2a3   :  { %7018 = vmatpush1.bf16.msra.mxu1 %v15888_v46  ;;  %v250_v46 = vld [vmem:[#allocation5 + $0x110] sm:$0xff]  ;;  %v1053_v54 = vld [vmem:[#allocation5 + $0x1a28] sm:$0xff] }
 0x2a4   :  { %7019 = vmatprep.subr.bf16.mxu1 %v15897_v49  ;;  %v15936_v49 = vcombine.low %v1009_v36, %v1013_v37  ;;  %v15977_v36 = vcombine.high %v1049_v27, %v1053_v54 }
 0x2a5   :  { %6772 = vmatpush1.bf16.msra.mxu0 %v16142_v47  ;;  %v254_v47 = vld [vmem:[#allocation5 + $0x130] sm:$0xff] }
 0x2a6   :  { %6773 = vmatprep.subr.bf16.mxu0 %v16151_v55  ;;  %v15170_v55 = vcombine.low %v242_v38, %v246_v39  ;;  %v15179_v57 = vcombine.high %v250_v46, %v254_v47  ;;  %v1057_v38 = vld [vmem:[#allocation5 + $0x1a48] sm:$0xff] }
 0x2a7   :  { %7020 = vmatpush1.bf16.msra.mxu1 %v15896_v63  ;;  %v258_v63 = vld [vmem:[#allocation5 + $0x150] sm:$0xff]  ;;  %v1061_v39 = vld [vmem:[#allocation5 + $0x1a68] sm:$0xff] }
 0x2a8   :  { %7021 = vmatprep.subr.bf16.mxu1 %v15905_v12  ;;  %v15944_v12 = vcombine.low %v1017_v44, %v1021_v45  ;;  %v15985_v44 = vcombine.high %v1057_v38, %v1061_v39 }
 0x2a9   :  { %6774 = vmatpush1.bf16.msra.mxu0 %v16150_v32  ;;  %v262_v32 = vld [vmem:[#allocation5 + $0x170] sm:$0xff] }
 0x2aa   :  { %6775 = vmatprep.subr.bf16.mxu0 %v16159_v1  ;;  %v15178_v1 = vcombine.low %v250_v46, %v254_v47  ;;  %v15187_v3 = vcombine.high %v258_v63, %v262_v32  ;;  %v1065_v46 = vld [vmem:[#allocation5 + $0x1a88] sm:$0xff] }
 0x2ab   :  { %7022 = vmatpush1.bf16.msra.mxu1 %v15904_v7  ;;  %v266_v7 = vld [vmem:[#allocation5 + $0x190] sm:$0xff]  ;;  %v1069_v47 = vld [vmem:[#allocation5 + $0x1aa8] sm:$0xff] }
 0x2ac   :  { %7032 = vmatprep.subr.bf16.mxu1 %v15913_v10  ;;  %v15952_v10 = vcombine.low %v1025_v59, %v1029_v60  ;;  %v15993_v59 = vcombine.high %v1065_v46, %v1069_v47 }
 0x2ad   :  { %6776 = vmatpush1.bf16.msra.mxu0 %v16158_v8  ;;  %v270_v8 = vld [vmem:[#allocation5 + $0x1b0] sm:$0xff] }
 0x2ae   :  { %7114 = vmatprep.subr.bf16.mxu0 %v15147_v11  ;;  %7024 = vmatmul.mubr.bf16.vlgmr.msra.gmra.mrb[4].mxu1 %v18772_v51  ;;  %v15186_v11 = vcombine.low %v258_v63, %v262_v32  ;;  %v15195_v15 = vcombine.high %v266_v7, %v270_v8  ;;  %v1073_v63 = vld [vmem:[#allocation5 + $0x1ac8] sm:$0xff] }
 0x2af   :  { %7033 = vmatpush1.bf16.msra.mxu1 %v15912_v22  ;;  %7064 = vmatprep.mubr.bf16.mxu1 %v18776_v62  ;;  %v274_v22 = vld [vmem:[#allocation5 + $0x1d0] sm:$0xff]  ;;  %v1077_v32 = vld [vmem:[#allocation5 + $0x1ae8] sm:$0xff] }
 0x2b0   :  { %6778 = vmatmul.mubr.bf16.vlgmr.msra.gmra.mrb[0].mxu0 %v18798_v20  ;;  %7034 = vmatprep.subr.bf16.mxu1 %v15921_v24  ;;  %v15960_v24 = vcombine.low %v1033_v4, %v1037_v5  ;;  %v16001_v4 = vcombine.high %v1073_v63, %v1077_v32 }
 0x2b1   :  { %7115 = vmatpush1.bf16.msra.mxu0 %v15146_v23  ;;  %7146 = vmatprep.mubr.bf16.mxu0 %v18696_v58  ;;  %v278_v23 = vld [vmem:[#allocation5 + $0x1f0] sm:$0xff] }
 0x2b2   :  { %7116 = vmatprep.subr.bf16.mxu0 %v15155_v50  ;;  %v15194_v50 = vcombine.low %v266_v7, %v270_v8  ;;  %v15203_v53 = vcombine.high %v274_v22, %v278_v23  ;;  %v1081_v7 = vld [vmem:[#allocation5 + $0x1b08] sm:$0xff] }
 0x2b3   :  { %7035 = vmatpush1.bf16.msra.mxu1 %v15920_v29  ;;  %v282_v29 = vld [vmem:[#allocation5 + $0x210] sm:$0xff]  ;;  %v1085_v8 = vld [vmem:[#allocation5 + $0x1b28] sm:$0xff] }
 0x2b4   :  { %7036 = vmatprep.subr.bf16.mxu1 %v15929_v31  ;;  %v15968_v31 = vcombine.low %v1041_v17, %v1045_v18  ;;  %v16009_v17 = vcombine.high %v1081_v7, %v1085_v8 }
 0x2b5   :  { %7117 = vmatpush1.bf16.msra.mxu0 %v15154_v30  ;;  %v286_v30 = vld [vmem:[#allocation5 + $0x230] sm:$0xff] }
 0x2b6   :  { %7118 = vmatprep.subr.bf16.mxu0 %v15163_v35  ;;  %v15202_v35 = vcombine.low %v274_v22, %v278_v23  ;;  %v15211_v37 = vcombine.high %v282_v29, %v286_v30  ;;  %v1089_v22 = vld [vmem:[#allocation5 + $0x1b48] sm:$0xff] }
 0x2b7   :  { %7037 = vmatpush1.bf16.msra.mxu1 %v15928_v41  ;;  %v290_v41 = vld [vmem:[#allocation5 + $0x250] sm:$0xff]  ;;  %v1093_v23 = vld [vmem:[#allocation5 + $0x1b68] sm:$0xff] }
 0x2b8   :  { %7038 = vmatprep.subr.bf16.mxu1 %v15937_v48  ;;  %v15976_v48 = vcombine.low %v1049_v27, %v1053_v54  ;;  %v16017_v27 = vcombine.high %v1089_v22, %v1093_v23 }
 0x2b9   :  { %7119 = vmatpush1.bf16.msra.mxu0 %v15162_v19  ;;  %v294_v19 = vld [vmem:[#allocation5 + $0x270] sm:$0xff] }
 0x2ba   :  { %7120 = vmatprep.subr.bf16.mxu0 %v15171_v43  ;;  %v15210_v43 = vcombine.low %v282_v29, %v286_v30  ;;  %v15219_v45 = vcombine.high %v290_v41, %v294_v19  ;;  %v1097_v29 = vld [vmem:[#allocation5 + $0x1b88] sm:$0xff] }
 0x2bb   :  { %7039 = vmatpush1.bf16.msra.mxu1 %v15936_v49  ;;  %v298_v49 = vld [vmem:[#allocation5 + $0x290] sm:$0xff]  ;;  %v1101_v30 = vld [vmem:[#allocation5 + $0x1ba8] sm:$0xff] }
 0x2bc   :  { %7040 = vmatprep.subr.bf16.mxu1 %v15945_v56  ;;  %v15984_v56 = vcombine.low %v1057_v38, %v1061_v39  ;;  %v16025_v38 = vcombine.high %v1097_v29, %v1101_v30 }
 0x2bd   :  { %7121 = vmatpush1.bf16.msra.mxu0 %v15170_v55  ;;  %v302_v55 = vld [vmem:[#allocation5 + $0x2b0] sm:$0xff] }
 0x2be   :  { %7122 = vmatprep.subr.bf16.mxu0 %v15179_v57  ;;  %v15218_v57 = vcombine.low %v290_v41, %v294_v19  ;;  %v15227_v60 = vcombine.high %v298_v49, %v302_v55  ;;  %v1105_v41 = vld [vmem:[#allocation5 + $0x1bc8] sm:$0xff] }
 0x2bf   :  { %7041 = vmatpush1.bf16.msra.mxu1 %v15944_v12  ;;  %v306_v12 = vld [vmem:[#allocation5 + $0x2d0] sm:$0xff]  ;;  %v1109_v19 = vld [vmem:[#allocation5 + $0x1be8] sm:$0xff] }
 0x2c0   :  { %7042 = vmatprep.subr.bf16.mxu1 %v15953_v2  ;;  %v15992_v2 = vcombine.low %v1065_v46, %v1069_v47  ;;  %v16033_v46 = vcombine.high %v1105_v41, %v1109_v19 }
 0x2c1   :  { %7123 = vmatpush1.bf16.msra.mxu0 %v15178_v1  ;;  %v310_v1 = vld [vmem:[#allocation5 + $0x2f0] sm:$0xff] }
 0x2c2   :  { %7124 = vmatprep.subr.bf16.mxu0 %v15187_v3  ;;  %v15226_v3 = vcombine.low %v298_v49, %v302_v55  ;;  %v15235_v5 = vcombine.high %v306_v12, %v310_v1  ;;  %v1113_v49 = vld [vmem:[#allocation5 + $0x1c08] sm:$0xff] }
 0x2c3   :  { %7043 = vmatpush1.bf16.msra.mxu1 %v15952_v10  ;;  %v314_v10 = vld [vmem:[#allocation5 + $0x310] sm:$0xff]  ;;  %v1117_v55 = vld [vmem:[#allocation5 + $0x1c28] sm:$0xff] }
 0x2c4   :  { %7044 = vmatprep.subr.bf16.mxu1 %v15961_v13  ;;  %v16000_v13 = vcombine.low %v1073_v63, %v1077_v32  ;;  %v16041_v63 = vcombine.high %v1113_v49, %v1117_v55 }
 0x2c5   :  { %7125 = vmatpush1.bf16.msra.mxu0 %v15186_v11  ;;  %v318_v11 = vld [vmem:[#allocation5 + $0x330] sm:$0xff] }
 0x2c6   :  { %7126 = vmatprep.subr.bf16.mxu0 %v15195_v15  ;;  %v15234_v15 = vcombine.low %v306_v12, %v310_v1  ;;  %v15243_v18 = vcombine.high %v314_v10, %v318_v11  ;;  %v1121_v12 = vld [vmem:[#allocation5 + $0x1c48] sm:$0xff] }
 0x2c7   :  { %7045 = vmatpush1.bf16.msra.mxu1 %v15960_v24  ;;  %v322_v24 = vld [vmem:[#allocation5 + $0x350] sm:$0xff]  ;;  %v1125_v1 = vld [vmem:[#allocation5 + $0x1c68] sm:$0xff] }
 0x2c8   :  { %7046 = vmatprep.subr.bf16.mxu1 %v15969_v26  ;;  %v16008_v26 = vcombine.low %v1081_v7, %v1085_v8  ;;  %v16049_v7 = vcombine.high %v1121_v12, %v1125_v1 }
 0x2c9   :  { %7127 = vmatpush1.bf16.msra.mxu0 %v15194_v50  ;;  %v326_v50 = vld [vmem:[#allocation5 + $0x370] sm:$0xff] }
 0x2ca   :  { %7128 = vmatprep.subr.bf16.mxu0 %v15203_v53  ;;  %v15242_v53 = vcombine.low %v314_v10, %v318_v11  ;;  %v15251_v54 = vcombine.high %v322_v24, %v326_v50  ;;  %v1129_v10 = vld [vmem:[#allocation5 + $0x1c88] sm:$0xff] }
 0x2cb   :  { %7047 = vmatpush1.bf16.msra.mxu1 %v15968_v31  ;;  %v330_v31 = vld [vmem:[#allocation5 + $0x390] sm:$0xff]  ;;  %v1133_v11 = vld [vmem:[#allocation5 + $0x1ca8] sm:$0xff] }
 0x2cc   :  { %7048 = vmatprep.subr.bf16.mxu1 %v15977_v36  ;;  %v16016_v36 = vcombine.low %v1089_v22, %v1093_v23  ;;  %v16057_v22 = vcombine.high %v1129_v10, %v1133_v11 }
 0x2cd   :  { %7129 = vmatpush1.bf16.msra.mxu0 %v15202_v35  ;;  %v334_v35 = vld [vmem:[#allocation5 + $0x3b0] sm:$0xff] }
 0x2ce   :  { %7130 = vmatprep.subr.bf16.mxu0 %v15211_v37  ;;  %v15250_v37 = vcombine.low %v322_v24, %v326_v50  ;;  %v15259_v39 = vcombine.high %v330_v31, %v334_v35  ;;  %v1137_v24 = vld [vmem:[#allocation5 + $0x1cc8] sm:$0xff] }
 0x2cf   :  { %7049 = vmatpush1.bf16.msra.mxu1 %v15976_v48  ;;  %v338_v48 = vld [vmem:[#allocation5 + $0x3d0] sm:$0xff]  ;;  %v1141_v50 = vld [vmem:[#allocation5 + $0x1ce8] sm:$0xff] }
 0x2d0   :  { %7050 = vmatprep.subr.bf16.mxu1 %v15985_v44  ;;  %v16024_v44 = vcombine.low %v1097_v29, %v1101_v30  ;;  %v16065_v29 = vcombine.high %v1137_v24, %v1141_v50 }
 0x2d1   :  { %7131 = vmatpush1.bf16.msra.mxu0 %v15210_v43  ;;  %v342_v43 = vld [vmem:[#allocation5 + $0x3f0] sm:$0xff] }
 0x2d2   :  { %7132 = vmatprep.subr.bf16.mxu0 %v15219_v45  ;;  %v15258_v45 = vcombine.low %v330_v31, %v334_v35  ;;  %v15267_v47 = vcombine.high %v338_v48, %v342_v43  ;;  %v1145_v31 = vld [vmem:[#allocation5 + $0x1d08] sm:$0xff] }
 0x2d3   :  { %7051 = vmatpush1.bf16.msra.mxu1 %v15984_v56  ;;  %v346_v56 = vld [vmem:[#allocation5 + $0x410] sm:$0xff]  ;;  %v1149_v35 = vld [vmem:[#allocation5 + $0x1d28] sm:$0xff] }
 0x2d4   :  { %7052 = vmatprep.subr.bf16.mxu1 %v15993_v59  ;;  %v16032_v59 = vcombine.low %v1105_v41, %v1109_v19  ;;  %v16073_v41 = vcombine.high %v1145_v31, %v1149_v35 }
 0x2d5   :  { %7133 = vmatpush1.bf16.msra.mxu0 %v15218_v57  ;;  %v350_v57 = vld [vmem:[#allocation5 + $0x430] sm:$0xff] }
 0x2d6   :  { %7134 = vmatprep.subr.bf16.mxu0 %v15227_v60  ;;  %v15266_v60 = vcombine.low %v338_v48, %v342_v43  ;;  %v15275_v32 = vcombine.high %v346_v56, %v350_v57  ;;  %v1153_v48 = vld [vmem:[#allocation5 + $0x1d48] sm:$0xff] }
 0x2d7   :  { %7053 = vmatpush1.bf16.msra.mxu1 %v15992_v2  ;;  %v354_v2 = vld [vmem:[#allocation5 + $0x450] sm:$0xff]  ;;  %v1157_v43 = vld [vmem:[#allocation5 + $0x1d68] sm:$0xff] }
 0x2d8   :  { %7054 = vmatprep.subr.bf16.mxu1 %v16001_v4  ;;  %v16040_v4 = vcombine.low %v1113_v49, %v1117_v55  ;;  %v16081_v49 = vcombine.high %v1153_v48, %v1157_v43 }
 0x2d9   :  { %7135 = vmatpush1.bf16.msra.mxu0 %v15226_v3  ;;  %v358_v3 = vld [vmem:[#allocation5 + $0x470] sm:$0xff] }
 0x2da   :  { %7136 = vmatprep.subr.bf16.mxu0 %v15235_v5  ;;  %v15274_v5 = vcombine.low %v346_v56, %v350_v57  ;;  %v15283_v8 = vcombine.high %v354_v2, %v358_v3  ;;  %v1161_v56 = vld [vmem:[#allocation5 + $0x1d88] sm:$0xff] }
 0x2db   :  { %7055 = vmatpush1.bf16.msra.mxu1 %v16000_v13  ;;  %v362_v13 = vld [vmem:[#allocation5 + $0x490] sm:$0xff]  ;;  %v1165_v57 = vld [vmem:[#allocation5 + $0x1da8] sm:$0xff] }
 0x2dc   :  { %7056 = vmatprep.subr.bf16.mxu1 %v16009_v17  ;;  %v16048_v17 = vcombine.low %v1121_v12, %v1125_v1  ;;  %v16089_v12 = vcombine.high %v1161_v56, %v1165_v57 }
 0x2dd   :  { %7137 = vmatpush1.bf16.msra.mxu0 %v15234_v15  ;;  %v366_v15 = vld [vmem:[#allocation5 + $0x4b0] sm:$0xff] }
 0x2de   :  { %7138 = vmatprep.subr.bf16.mxu0 %v15243_v18  ;;  %v15282_v18 = vcombine.low %v354_v2, %v358_v3  ;;  %v15291_v23 = vcombine.high %v362_v13, %v366_v15  ;;  %v1169_v2 = vld [vmem:[#allocation5 + $0x1dc8] sm:$0xff] }
 0x2df   :  { %7057 = vmatpush1.bf16.msra.mxu1 %v16008_v26  ;;  %v370_v26 = vld [vmem:[#allocation5 + $0x4d0] sm:$0xff]  ;;  %v1173_v3 = vld [vmem:[#allocation5 + $0x1de8] sm:$0xff] }
 0x2e0   :  { %7058 = vmatprep.subr.bf16.mxu1 %v16017_v27  ;;  %v16056_v27 = vcombine.low %v1129_v10, %v1133_v11  ;;  %v16097_v10 = vcombine.high %v1169_v2, %v1173_v3 }
 0x2e1   :  { %7139 = vmatpush1.bf16.msra.mxu0 %v15242_v53  ;;  %v374_v53 = vld [vmem:[#allocation5 + $0x4f0] sm:$0xff] }
 0x2e2   :  { %7140 = vmatprep.subr.bf16.mxu0 %v15251_v54  ;;  %v15290_v54 = vcombine.low %v362_v13, %v366_v15  ;;  %v15299_v30 = vcombine.high %v370_v26, %v374_v53  ;;  %v1177_v13 = vld [vmem:[#allocation5 + $0x1e08] sm:$0xff] }
 0x2e3   :  { %7059 = vmatpush1.bf16.msra.mxu1 %v16016_v36  ;;  %v378_v36 = vld [vmem:[#allocation5 + $0x510] sm:$0xff]  ;;  %v1181_v15 = vld [vmem:[#allocation5 + $0x1e28] sm:$0xff] }
 0x2e4   :  { %7060 = vmatprep.subr.bf16.mxu1 %v16025_v38  ;;  %v16064_v38 = vcombine.low %v1137_v24, %v1141_v50  ;;  %v16105_v24 = vcombine.high %v1177_v13, %v1181_v15 }
 0x2e5   :  { %7141 = vmatpush1.bf16.msra.mxu0 %v15250_v37  ;;  %v382_v37 = vld [vmem:[#allocation5 + $0x530] sm:$0xff] }
 0x2e6   :  { %7142 = vmatprep.subr.bf16.mxu0 %v15259_v39  ;;  %v15298_v39 = vcombine.low %v370_v26, %v374_v53  ;;  %v15307_v19 = vcombine.high %v378_v36, %v382_v37  ;;  %v1185_v26 = vld [vmem:[#allocation5 + $0x1e48] sm:$0xff] }
 0x2e7   :  { %7061 = vmatpush1.bf16.msra.mxu1 %v16024_v44  ;;  %v386_v44 = vld [vmem:[#allocation5 + $0x550] sm:$0xff]  ;;  %v1189_v53 = vld [vmem:[#allocation5 + $0x1e68] sm:$0xff] }
 0x2e8   :  { %7062 = vmatprep.subr.bf16.mxu1 %v16033_v46  ;;  %v16072_v46 = vcombine.low %v1145_v31, %v1149_v35  ;;  %v16113_v31 = vcombine.high %v1185_v26, %v1189_v53 }
 0x2e9   :  { %7143 = vmatpush1.bf16.msra.mxu0 %v15258_v45  ;;  %v390_v45 = vld [vmem:[#allocation5 + $0x570] sm:$0xff] }
 0x2ea   :  { %7144 = vmatprep.subr.bf16.mxu0 %v15267_v47  ;;  %v15306_v47 = vcombine.low %v378_v36, %v382_v37  ;;  %v15315_v55 = vcombine.high %v386_v44, %v390_v45  ;;  %v1193_v36 = vld [vmem:[#allocation5 + $0x1e88] sm:$0xff] }
 0x2eb   :  { %7063 = vmatpush1.bf16.msra.mxu1 %v16032_v59  ;;  %v394_v59 = vld [vmem:[#allocation5 + $0x590] sm:$0xff]  ;;  %v1197_v37 = vld [vmem:[#allocation5 + $0x1ea8] sm:$0xff] }
 0x2ec   :  { %7073 = vmatprep.subr.bf16.mxu1 %v16041_v63  ;;  %v16080_v63 = vcombine.low %v1153_v48, %v1157_v43  ;;  %v16121_v48 = vcombine.high %v1193_v36, %v1197_v37 }
 0x2ed   :  { %7145 = vmatpush1.bf16.msra.mxu0 %v15266_v60  ;;  %v398_v60 = vld [vmem:[#allocation5 + $0x5b0] sm:$0xff] }
 0x2ee   :  { %7155 = vmatprep.subr.bf16.mxu0 %v15275_v32  ;;  %7065 = vmatmul.mubr.bf16.vlgmr.msra.gmra.mrb[4].mxu1 %v18786_v33  ;;  %v15314_v32 = vcombine.low %v386_v44, %v390_v45  ;;  %v15323_v1 = vcombine.high %v394_v59, %v398_v60  ;;  %v1201_v44 = vld [vmem:[#allocation5 + $0x1ec8] sm:$0xff] }
 0x2ef   :  { %7074 = vmatpush1.bf16.msra.mxu1 %v16040_v4  ;;  %7105 = vmatprep.mubr.bf16.mxu1 %v18790_v40  ;;  %v402_v4 = vld [vmem:[#allocation5 + $0x5d0] sm:$0xff]  ;;  %v1205_v45 = vld [vmem:[#allocation5 + $0x1ee8] sm:$0xff] }
 0x2f0   :  { %7147 = vmatmul.mubr.bf16.vlgmr.msra.gmra.mrb[4].mxu0 %v18706_v16  ;;  %7075 = vmatprep.subr.bf16.mxu1 %v16049_v7  ;;  %v16088_v7 = vcombine.low %v1161_v56, %v1165_v57  ;;  %v16129_v56 = vcombine.high %v1201_v44, %v1205_v45 }
 0x2f1   :  { %7156 = vmatpush1.bf16.msra.mxu0 %v15274_v5  ;;  %7187 = vmatprep.mubr.bf16.mxu0 %v18700_v61  ;;  %v406_v5 = vld [vmem:[#allocation5 + $0x5f0] sm:$0xff] }
 0x2f2   :  { %7157 = vmatprep.subr.bf16.mxu0 %v15283_v8  ;;  %v15322_v8 = vcombine.low %v394_v59, %v398_v60  ;;  %v15331_v11 = vcombine.high %v402_v4, %v406_v5  ;;  %v1209_v59 = vld [vmem:[#allocation5 + $0x1f08] sm:$0xff] }
 0x2f3   :  { %7076 = vmatpush1.bf16.msra.mxu1 %v16048_v17  ;;  %v410_v17 = vld [vmem:[#allocation5 + $0x610] sm:$0xff]  ;;  %v1213_v60 = vld [vmem:[#allocation5 + $0x1f28] sm:$0xff] }
 0x2f4   :  { %7077 = vmatprep.subr.bf16.mxu1 %v16057_v22  ;;  %v16096_v22 = vcombine.low %v1169_v2, %v1173_v3  ;;  %v16137_v2 = vcombine.high %v1209_v59, %v1213_v60 }
 0x2f5   :  { %7158 = vmatpush1.bf16.msra.mxu0 %v15282_v18  ;;  %v414_v18 = vld [vmem:[#allocation5 + $0x630] sm:$0xff] }
 0x2f6   :  { %7159 = vmatprep.subr.bf16.mxu0 %v15291_v23  ;;  %v15330_v23 = vcombine.low %v402_v4, %v406_v5  ;;  %v15339_v50 = vcombine.high %v410_v17, %v414_v18  ;;  %v1217_v4 = vld [vmem:[#allocation5 + $0x1f48] sm:$0xff] }
 0x2f7   :  { %7078 = vmatpush1.bf16.msra.mxu1 %v16056_v27  ;;  %v418_v27 = vld [vmem:[#allocation5 + $0x650] sm:$0xff]  ;;  %v1221_v5 = vld [vmem:[#allocation5 + $0x1f68] sm:$0xff] }
 0x2f8   :  { %7079 = vmatprep.subr.bf16.mxu1 %v16065_v29  ;;  %v16104_v29 = vcombine.low %v1177_v13, %v1181_v15  ;;  %v16145_v13 = vcombine.high %v1217_v4, %v1221_v5 }
 0x2f9   :  { %7160 = vmatpush1.bf16.msra.mxu0 %v15290_v54  ;;  %v422_v54 = vld [vmem:[#allocation5 + $0x670] sm:$0xff] }
 0x2fa   :  { %7161 = vmatprep.subr.bf16.mxu0 %v15299_v30  ;;  %v15338_v30 = vcombine.low %v410_v17, %v414_v18  ;;  %v15347_v35 = vcombine.high %v418_v27, %v422_v54  ;;  %v1225_v17 = vld [vmem:[#allocation5 + $0x1f88] sm:$0xff] }
 0x2fb   :  { %7080 = vmatpush1.bf16.msra.mxu1 %v16064_v38  ;;  %v426_v38 = vld [vmem:[#allocation5 + $0x690] sm:$0xff]  ;;  %v1229_v18 = vld [vmem:[#allocation5 + $0x1fa8] sm:$0xff] }
 0x2fc   :  { %7081 = vmatprep.subr.bf16.mxu1 %v16073_v41  ;;  %v16112_v41 = vcombine.low %v1185_v26, %v1189_v53  ;;  %v16153_v26 = vcombine.high %v1225_v17, %v1229_v18 }
 0x2fd   :  { %7162 = vmatpush1.bf16.msra.mxu0 %v15298_v39  ;;  %v430_v39 = vld [vmem:[#allocation5 + $0x6b0] sm:$0xff] }
 0x2fe   :  { %7163 = vmatprep.subr.bf16.mxu0 %v15307_v19  ;;  %v15346_v19 = vcombine.low %v418_v27, %v422_v54  ;;  %v15355_v43 = vcombine.high %v426_v38, %v430_v39  ;;  %v1233_v27 = vld [vmem:[#allocation5 + $0x1fc8] sm:$0xff] }
 0x2ff   :  { %7082 = vmatpush1.bf16.msra.mxu1 %v16072_v46  ;;  %v434_v46 = vld [vmem:[#allocation5 + $0x6d0] sm:$0xff]  ;;  %v1237_v54 = vld [vmem:[#allocation5 + $0x1fe8] sm:$0xff] }
 0x300   :  { %7083 = vmatprep.subr.bf16.mxu1 %v16081_v49  ;;  %v16120_v49 = vcombine.low %v1193_v36, %v1197_v37  ;;  %v16161_v36 = vcombine.high %v1233_v27, %v1237_v54 }
 0x301   :  { %7164 = vmatpush1.bf16.msra.mxu0 %v15306_v47  ;;  %v438_v47 = vld [vmem:[#allocation5 + $0x6f0] sm:$0xff] }
 0x302   :  { %7165 = vmatprep.subr.bf16.mxu0 %v15315_v55  ;;  %v15354_v55 = vcombine.low %v426_v38, %v430_v39  ;;  %v15363_v57 = vcombine.high %v434_v46, %v438_v47  ;;  %v219_v38 = vld [vmem:[#allocation5 + $0x18] sm:$0xff] }
 0x303   :  { %7084 = vmatpush1.bf16.msra.mxu1 %v16080_v63  ;;  %v442_v63 = vld [vmem:[#allocation5 + $0x710] sm:$0xff]  ;;  %v223_v39 = vld [vmem:[#allocation5 + $0x38] sm:$0xff] }
 0x304   :  { %7085 = vmatprep.subr.bf16.mxu1 %v16089_v12  ;;  %v16128_v12 = vcombine.low %v1201_v44, %v1205_v45  ;;  %v15149_v44 = vcombine.high %v219_v38, %v223_v39 }
 0x305   :  { %7166 = vmatpush1.bf16.msra.mxu0 %v15314_v32  ;;  %v446_v32 = vld [vmem:[#allocation5 + $0x730] sm:$0xff] }
 0x306   :  { %7167 = vmatprep.subr.bf16.mxu0 %v15323_v1  ;;  %v15362_v1 = vcombine.low %v434_v46, %v438_v47  ;;  %v15371_v3 = vcombine.high %v442_v63, %v446_v32  ;;  %v227_v46 = vld [vmem:[#allocation5 + $0x58] sm:$0xff] }
 0x307   :  { %7086 = vmatpush1.bf16.msra.mxu1 %v16088_v7  ;;  %v450_v7 = vld [vmem:[#allocation5 + $0x750] sm:$0xff]  ;;  %v231_v47 = vld [vmem:[#allocation5 + $0x78] sm:$0xff] }
 0x308   :  { %7087 = vmatprep.subr.bf16.mxu1 %v16097_v10  ;;  %v16136_v10 = vcombine.low %v1209_v59, %v1213_v60  ;;  %v15157_v59 = vcombine.high %v227_v46, %v231_v47 }
 0x309   :  { %7168 = vmatpush1.bf16.msra.mxu0 %v15322_v8  ;;  %v454_v8 = vld [vmem:[#allocation5 + $0x770] sm:$0xff] }
 0x30a   :  { %7169 = vmatprep.subr.bf16.mxu0 %v15331_v11  ;;  %v15370_v11 = vcombine.low %v442_v63, %v446_v32  ;;  %v15379_v15 = vcombine.high %v450_v7, %v454_v8  ;;  %v235_v63 = vld [vmem:[#allocation5 + $0x98] sm:$0xff] }
 0x30b   :  { %7088 = vmatpush1.bf16.msra.mxu1 %v16096_v22  ;;  %v458_v22 = vld [vmem:[#allocation5 + $0x790] sm:$0xff]  ;;  %v239_v32 = vld [vmem:[#allocation5 + $0xb8] sm:$0xff] }
 0x30c   :  { %7089 = vmatprep.subr.bf16.mxu1 %v16105_v24  ;;  %v16144_v24 = vcombine.low %v1217_v4, %v1221_v5  ;;  %v15165_v4 = vcombine.high %v235_v63, %v239_v32 }
 0x30d   :  { %7170 = vmatpush1.bf16.msra.mxu0 %v15330_v23  ;;  %v462_v23 = vld [vmem:[#allocation5 + $0x7b0] sm:$0xff] }
 0x30e   :  { %7171 = vmatprep.subr.bf16.mxu0 %v15339_v50  ;;  %v15378_v50 = vcombine.low %v450_v7, %v454_v8  ;;  %v15387_v53 = vcombine.high %v458_v22, %v462_v23  ;;  %v243_v7 = vld [vmem:[#allocation5 + $0xd8] sm:$0xff] }
 0x30f   :  { %7090 = vmatpush1.bf16.msra.mxu1 %v16104_v29  ;;  %v466_v29 = vld [vmem:[#allocation5 + $0x7d0] sm:$0xff]  ;;  %v247_v8 = vld [vmem:[#allocation5 + $0xf8] sm:$0xff] }
 0x310   :  { %7091 = vmatprep.subr.bf16.mxu1 %v16113_v31  ;;  %v16152_v31 = vcombine.low %v1225_v17, %v1229_v18  ;;  %v15173_v17 = vcombine.high %v243_v7, %v247_v8 }
 0x311   :  { %7172 = vmatpush1.bf16.msra.mxu0 %v15338_v30  ;;  %v470_v30 = vld [vmem:[#allocation5 + $0x7f0] sm:$0xff] }
 0x312   :  { %7173 = vmatprep.subr.bf16.mxu0 %v15347_v35  ;;  %v15386_v35 = vcombine.low %v458_v22, %v462_v23  ;;  %v15395_v37 = vcombine.high %v466_v29, %v470_v30  ;;  %v251_v22 = vld [vmem:[#allocation5 + $0x118] sm:$0xff] }
 0x313   :  { %7092 = vmatpush1.bf16.msra.mxu1 %v16112_v41  ;;  %v474_v41 = vld [vmem:[#allocation5 + $0x810] sm:$0xff]  ;;  %v255_v23 = vld [vmem:[#allocation5 + $0x138] sm:$0xff] }
 0x314   :  { %7093 = vmatprep.subr.bf16.mxu1 %v16121_v48  ;;  %v16160_v48 = vcombine.low %v1233_v27, %v1237_v54  ;;  %v15181_v27 = vcombine.high %v251_v22, %v255_v23  ;;  %v259_v54 = vld [vmem:[#allocation5 + $0x158] sm:$0xff] }
 0x315   :  { %7174 = vmatpush1.bf16.msra.mxu0 %v15346_v19  ;;  %v478_v19 = vld [vmem:[#allocation5 + $0x830] sm:$0xff] }
 0x316   :  { %7175 = vmatprep.subr.bf16.mxu0 %v15355_v43  ;;  %v15394_v43 = vcombine.low %v466_v29, %v470_v30  ;;  %v15403_v45 = vcombine.high %v474_v41, %v478_v19  ;;  %v263_v29 = vld [vmem:[#allocation5 + $0x178] sm:$0xff]  ;;  %v514_v30 = vld [vmem:[#allocation5 + $0x950] sm:$0xff] }
 0x317   :  { %7094 = vmatpush1.bf16.msra.mxu1 %v16120_v49  ;;  %v482_v49 = vld [vmem:[#allocation5 + $0x850] sm:$0xff] }
 0x318   :  { %7095 = vmatprep.subr.bf16.mxu1 %v16129_v56  ;;  %v15148_v56 = vcombine.low %v219_v38, %v223_v39  ;;  %v267_v39 = vld [vmem:[#allocation5 + $0x198] sm:$0xff] }
 0x319   :  { %7176 = vmatpush1.bf16.msra.mxu0 %v15354_v55  ;;  %v486_v55 = vld [vmem:[#allocation5 + $0x870] sm:$0xff] }
 0x31a   :  { %7177 = vmatprep.subr.bf16.mxu0 %v15363_v57  ;;  %v15402_v57 = vcombine.low %v474_v41, %v478_v19  ;;  %v15411_v60 = vcombine.high %v482_v49, %v486_v55  ;;  %v271_v41 = vld [vmem:[#allocation5 + $0x1b8] sm:$0xff]  ;;  %v522_v19 = vld [vmem:[#allocation5 + $0x990] sm:$0xff] }
 0x31b   :  { %7096 = vmatpush1.bf16.msra.mxu1 %v16128_v12  ;;  %v490_v12 = vld [vmem:[#allocation5 + $0x890] sm:$0xff] }
 0x31c   :  { %7097 = vmatprep.subr.bf16.mxu1 %v16137_v2  ;;  %v15156_v2 = vcombine.low %v227_v46, %v231_v47  ;;  %v275_v47 = vld [vmem:[#allocation5 + $0x1d8] sm:$0xff] }
 0x31d   :  { %7178 = vmatpush1.bf16.msra.mxu0 %v15362_v1  ;;  %v494_v1 = vld [vmem:[#allocation5 + $0x8b0] sm:$0xff] }
 0x31e   :  { %7179 = vmatprep.subr.bf16.mxu0 %v15371_v3  ;;  %v15410_v3 = vcombine.low %v482_v49, %v486_v55  ;;  %v15419_v5 = vcombine.high %v490_v12, %v494_v1  ;;  %v279_v49 = vld [vmem:[#allocation5 + $0x1f8] sm:$0xff]  ;;  %v530_v55 = vld [vmem:[#allocation5 + $0x9d0] sm:$0xff] }
 0x31f   :  { %7098 = vmatpush1.bf16.msra.mxu1 %v16136_v10  ;;  %v498_v10 = vld [vmem:[#allocation5 + $0x8d0] sm:$0xff] }
 0x320   :  { %7099 = vmatprep.subr.bf16.mxu1 %v16145_v13  ;;  %v15164_v13 = vcombine.low %v235_v63, %v239_v32  ;;  %v283_v32 = vld [vmem:[#allocation5 + $0x218] sm:$0xff] }
 0x321   :  { %7180 = vmatpush1.bf16.msra.mxu0 %v15370_v11  ;;  %v502_v11 = vld [vmem:[#allocation5 + $0x8f0] sm:$0xff] }
 0x322   :  { %7181 = vmatprep.subr.bf16.mxu0 %v15379_v15  ;;  %v15418_v15 = vcombine.low %v490_v12, %v494_v1  ;;  %v15427_v18 = vcombine.high %v498_v10, %v502_v11  ;;  %v287_v12 = vld [vmem:[#allocation5 + $0x238] sm:$0xff]  ;;  %v538_v1 = vld [vmem:[#allocation5 + $0xa10] sm:$0xff] }
 0x323   :  { %7100 = vmatpush1.bf16.msra.mxu1 %v16144_v24  ;;  %v506_v24 = vld [vmem:[#allocation5 + $0x910] sm:$0xff] }
 0x324   :  { %7101 = vmatprep.subr.bf16.mxu1 %v16153_v26  ;;  %v15172_v26 = vcombine.low %v243_v7, %v247_v8  ;;  %v291_v8 = vld [vmem:[#allocation5 + $0x258] sm:$0xff] }
 0x325   :  { %7182 = vmatpush1.bf16.msra.mxu0 %v15378_v50  ;;  %v510_v50 = vld [vmem:[#allocation5 + $0x930] sm:$0xff] }
 0x326   :  { %7183 = vmatprep.subr.bf16.mxu0 %v15387_v53  ;;  %v15426_v53 = vcombine.low %v498_v10, %v502_v11  ;;  %v295_v10 = vld [vmem:[#allocation5 + $0x278] sm:$0xff]  ;;  %v546_v11 = vld [vmem:[#allocation5 + $0xa50] sm:$0xff] }
 0x327   :  { %7102 = vmatpush1.bf16.msra.mxu1 %v16152_v31  ;;  %v518_v31 = vld [vmem:[#allocation5 + $0x970] sm:$0xff] }
 0x328   :  { %7103 = vmatprep.subr.bf16.mxu1 %v16161_v36  ;;  %v15434_v36 = vcombine.low %v506_v24, %v510_v50  ;;  %v15443_v38 = vcombine.high %v514_v30, %v518_v31 }
 0x329   :  { %7184 = vmatpush1.bf16.msra.mxu0 %v15386_v35  ;;  %v15180_v35 = vcombine.low %v251_v22, %v255_v23  ;;  %v299_v23 = vld [vmem:[#allocation5 + $0x298] sm:$0xff] }
 0x32a   :  { %7185 = vmatprep.subr.bf16.mxu0 %v15395_v37  ;;  %v15189_v37 = vcombine.high %v259_v54, %v263_v29 }
 0x32b   :  { %7104 = vmatpush1.bf16.msra.mxu1 %v16160_v48  ;;  %v526_v48 = vld [vmem:[#allocation5 + $0x9b0] sm:$0xff] }
 0x32c   :  { %7442 = vmatprep.subr.bf16.mxu1 %v15149_v44  ;;  %v15442_v44 = vcombine.low %v514_v30, %v518_v31  ;;  %v15451_v46 = vcombine.high %v522_v19, %v526_v48  ;;  %v311_v30 = vld [vmem:[#allocation5 + $0x2f8] sm:$0xff]  ;;  %v562_v31 = vld [vmem:[#allocation5 + $0xad0] sm:$0xff] }
 0x32d   :  { %7186 = vmatpush1.bf16.msra.mxu0 %v15394_v43  ;;  %v15188_v43 = vcombine.low %v259_v54, %v263_v29  ;;  %v307_v29 = vld [vmem:[#allocation5 + $0x2d8] sm:$0xff] }
 0x32e   :  { %7196 = vmatprep.subr.bf16.mxu0 %v15403_v45  ;;  %7106 = vmatmul.mubr.bf16.vlgmr.msra.gmra.mrb[4].mxu1 %v18798_v20  ;;  %v15197_v45 = vcombine.high %v267_v39, %v271_v41 }
 0x32f   :  { %7443 = vmatpush1.bf16.msra.mxu1 %v15148_v56  ;;  %7474 = vmatprep.mubr.bf16.mxu1 %v18696_v58  ;;  %v15435_v58 = vcombine.high %v506_v24, %v510_v50  ;;  %v534_v56 = vld [vmem:[#allocation5 + $0x9f0] sm:$0xff]  ;;  %v303_v24 = vld [vmem:[#allocation5 + $0x2b8] sm:$0xff] }
 0x330   :  { %7188 = vmatmul.mubr.bf16.vlgmr.msra.gmra.mrb[4].mxu0 %v18712_v21  ;;  %7444 = vmatprep.subr.bf16.mxu1 %v15157_v59  ;;  %v15450_v59 = vcombine.low %v522_v19, %v526_v48  ;;  %v15459_v63 = vcombine.high %v530_v55, %v534_v56  ;;  %v554_v50 = vld [vmem:[#allocation5 + $0xa90] sm:$0xff]  ;;  %v319_v19 = vld [vmem:[#allocation5 + $0x338] sm:$0xff] }
 0x331   :  { %7197 = vmatpush1.bf16.msra.mxu0 %v15402_v57  ;;  %7228 = vmatprep.mubr.bf16.mxu0 %v18716_v28  ;;  %v15196_v57 = vcombine.low %v267_v39, %v271_v41  ;;  %v315_v41 = vld [vmem:[#allocation5 + $0x318] sm:$0xff]  ;;  %v570_v48 = vld [vmem:[#allocation5 + $0xb10] sm:$0xff] }
 0x332   :  { %7198 = vmatprep.subr.bf16.mxu0 %v15411_v60  ;;  %v15205_v60 = vcombine.high %v275_v47, %v279_v49 }
 0x333   :  { %7445 = vmatpush1.bf16.msra.mxu1 %v15156_v2  ;;  %v542_v2 = vld [vmem:[#allocation5 + $0xa30] sm:$0xff] }
 0x334   :  { %7446 = vmatprep.subr.bf16.mxu1 %v15165_v4  ;;  %v15458_v4 = vcombine.low %v530_v55, %v534_v56  ;;  %v15467_v7 = vcombine.high %v538_v1, %v542_v2  ;;  %v327_v55 = vld [vmem:[#allocation5 + $0x378] sm:$0xff]  ;;  %v578_v56 = vld [vmem:[#allocation5 + $0xb50] sm:$0xff] }
 0x335   :  { %7199 = vmatpush1.bf16.msra.mxu0 %v15410_v3  ;;  %v15204_v3 = vcombine.low %v275_v47, %v279_v49  ;;  %v323_v49 = vld [vmem:[#allocation5 + $0x358] sm:$0xff] }
 0x336   :  { %7200 = vmatprep.subr.bf16.mxu0 %v15419_v5  ;;  %v15213_v5 = vcombine.high %v283_v32, %v287_v12 }
 0x337   :  { %7447 = vmatpush1.bf16.msra.mxu1 %v15164_v13  ;;  %v550_v13 = vld [vmem:[#allocation5 + $0xa70] sm:$0xff] }
 0x338   :  { %7448 = vmatprep.subr.bf16.mxu1 %v15173_v17  ;;  %v15466_v17 = vcombine.low %v538_v1, %v542_v2  ;;  %v15475_v22 = vcombine.high %v546_v11, %v550_v13  ;;  %v335_v1 = vld [vmem:[#allocation5 + $0x3b8] sm:$0xff]  ;;  %v586_v2 = vld [vmem:[#allocation5 + $0xb90] sm:$0xff] }
 0x339   :  { %7201 = vmatpush1.bf16.msra.mxu0 %v15418_v15  ;;  %v15212_v15 = vcombine.low %v283_v32, %v287_v12  ;;  %v331_v12 = vld [vmem:[#allocation5 + $0x398] sm:$0xff] }
 0x33a   :  { %7202 = vmatprep.subr.bf16.mxu0 %v15427_v18  ;;  %v15221_v18 = vcombine.high %v291_v8, %v295_v10 }
 0x33b   :  { %7449 = vmatpush1.bf16.msra.mxu1 %v15172_v26  ;;  %v558_v26 = vld [vmem:[#allocation5 + $0xab0] sm:$0xff] }
 0x33c   :  { %7450 = vmatprep.subr.bf16.mxu1 %v15181_v27  ;;  %v15474_v27 = vcombine.low %v546_v11, %v550_v13  ;;  %v15483_v54 = vcombine.high %v554_v50, %v558_v26  ;;  %v343_v11 = vld [vmem:[#allocation5 + $0x3f8] sm:$0xff]  ;;  %v594_v13 = vld [vmem:[#allocation5 + $0xbd0] sm:$0xff] }
 0x33d   :  { %7203 = vmatpush1.bf16.msra.mxu0 %v15426_v53  ;;  %v15220_v53 = vcombine.low %v291_v8, %v295_v10  ;;  %v339_v10 = vld [vmem:[#allocation5 + $0x3d8] sm:$0xff] }
 0x33e   :  { %7204 = vmatprep.subr.bf16.mxu0 %v15435_v58  ;;  %v15229_v58 = vcombine.high %v299_v23, %v303_v24 }
 0x33f   :  { %7451 = vmatpush1.bf16.msra.mxu1 %v15180_v35  ;;  %v566_v35 = vld [vmem:[#allocation5 + $0xaf0] sm:$0xff] }
 0x340   :  { %7452 = vmatprep.subr.bf16.mxu1 %v15189_v37  ;;  %v15482_v37 = vcombine.low %v554_v50, %v558_v26  ;;  %v15491_v39 = vcombine.high %v562_v31, %v566_v35  ;;  %v351_v50 = vld [vmem:[#allocation5 + $0x438] sm:$0xff]  ;;  %v602_v26 = vld [vmem:[#allocation5 + $0xc10] sm:$0xff] }
 0x341   :  { %7205 = vmatpush1.bf16.msra.mxu0 %v15434_v36  ;;  %v15228_v36 = vcombine.low %v299_v23, %v303_v24  ;;  %v347_v24 = vld [vmem:[#allocation5 + $0x418] sm:$0xff] }
 0x342   :  { %7206 = vmatprep.subr.bf16.mxu0 %v15443_v38  ;;  %v15237_v38 = vcombine.high %v307_v29, %v311_v30 }
 0x343   :  { %7453 = vmatpush1.bf16.msra.mxu1 %v15188_v43  ;;  %v574_v43 = vld [vmem:[#allocation5 + $0xb30] sm:$0xff] }
 0x344   :  { %7454 = vmatprep.subr.bf16.mxu1 %v15197_v45  ;;  %v15490_v45 = vcombine.low %v562_v31, %v566_v35  ;;  %v15499_v47 = vcombine.high %v570_v48, %v574_v43  ;;  %v359_v31 = vld [vmem:[#allocation5 + $0x478] sm:$0xff]  ;;  %v610_v35 = vld [vmem:[#allocation5 + $0xc50] sm:$0xff] }
 0x345   :  { %7207 = vmatpush1.bf16.msra.mxu0 %v15442_v44  ;;  %v15236_v44 = vcombine.low %v307_v29, %v311_v30  ;;  %v355_v30 = vld [vmem:[#allocation5 + $0x458] sm:$0xff] }
 0x346   :  { %7208 = vmatprep.subr.bf16.mxu0 %v15451_v46  ;;  %v15245_v46 = vcombine.high %v315_v41, %v319_v19 }
 0x347   :  { %7455 = vmatpush1.bf16.msra.mxu1 %v15196_v57  ;;  %v582_v57 = vld [vmem:[#allocation5 + $0xb70] sm:$0xff] }
 0x348   :  { %7456 = vmatprep.subr.bf16.mxu1 %v15205_v60  ;;  %v15498_v60 = vcombine.low %v570_v48, %v574_v43  ;;  %v15507_v32 = vcombine.high %v578_v56, %v582_v57  ;;  %v367_v48 = vld [vmem:[#allocation5 + $0x4b8] sm:$0xff]  ;;  %v618_v43 = vld [vmem:[#allocation5 + $0xc90] sm:$0xff] }
 0x349   :  { %7209 = vmatpush1.bf16.msra.mxu0 %v15450_v59  ;;  %v15244_v59 = vcombine.low %v315_v41, %v319_v19  ;;  %v363_v19 = vld [vmem:[#allocation5 + $0x498] sm:$0xff] }
 0x34a   :  { %7210 = vmatprep.subr.bf16.mxu0 %v15459_v63  ;;  %v15253_v63 = vcombine.high %v323_v49, %v327_v55 }
 0x34b   :  { %7457 = vmatpush1.bf16.msra.mxu1 %v15204_v3  ;;  %v590_v3 = vld [vmem:[#allocation5 + $0xbb0] sm:$0xff] }
 0x34c   :  { %7458 = vmatprep.subr.bf16.mxu1 %v15213_v5  ;;  %v15506_v5 = vcombine.low %v578_v56, %v582_v57  ;;  %v15515_v8 = vcombine.high %v586_v2, %v590_v3  ;;  %v371_v56 = vld [vmem:[#allocation5 + $0x4d8] sm:$0xff] }
 0x34d   :  { %7211 = vmatpush1.bf16.msra.mxu0 %v15458_v4  ;;  %v15252_v4 = vcombine.low %v323_v49, %v327_v55  ;;  %v1242_v49 = vlaneseq  ;;  %v375_v57 = vld [vmem:[#allocation5 + $0x4f8] sm:$0xff] }
 0x34e   :  { %7212 = vmatprep.subr.bf16.mxu0 %v15467_v7  ;;  %v15261_v7 = vcombine.high %v331_v12, %v335_v1 }
 0x34f   :  { %7459 = vmatpush1.bf16.msra.mxu1 %v15212_v15  ;;  %v598_v15 = vld [vmem:[#allocation5 + $0xbf0] sm:$0xff] }
 0x350   :  { %7460 = vmatprep.subr.bf16.mxu1 %v15221_v18  ;;  %v15514_v18 = vcombine.low %v586_v2, %v590_v3  ;;  %v15523_v23 = vcombine.high %v594_v13, %v598_v15  ;;  %v379_v2 = vld [vmem:[#allocation5 + $0x518] sm:$0xff] }
 0x351   :  { %7213 = vmatpush1.bf16.msra.mxu0 %v15466_v17  ;;  %v15260_v17 = vcombine.low %v331_v12, %v335_v1  ;;  %v18817_v12 = vshrl.u32 %v1242_v49, 7  ;;  %v383_v3 = vld [vmem:[#allocation5 + $0x538] sm:$0xff] }
 0x352   :  { %7214 = vmatprep.subr.bf16.mxu0 %v15475_v22  ;;  %v15269_v22 = vcombine.high %v339_v10, %v343_v11 }
 0x353   :  { %7461 = vmatpush1.bf16.msra.mxu1 %v15220_v53  ;;  %v606_v53 = vld [vmem:[#allocation5 + $0xc30] sm:$0xff] }
 0x354   :  { %7462 = vmatprep.subr.bf16.mxu1 %v15229_v58  ;;  %v15522_v58 = vcombine.low %v594_v13, %v598_v15  ;;  %v15531_v29 = vcombine.high %v602_v26, %v606_v53  ;;  %v387_v13 = vld [vmem:[#allocation5 + $0x558] sm:$0xff] }
 0x355   :  { %7215 = vmatpush1.bf16.msra.mxu0 %v15474_v27  ;;  %v15268_v27 = vcombine.low %v339_v10, %v343_v11  ;;  %v18820_v10 = vsub.s32 0, %v18817_v12  ;;  %v391_v15 = vld [vmem:[#allocation5 + $0x578] sm:$0xff] }
 0x356   :  { %7216 = vmatprep.subr.bf16.mxu0 %v15483_v54  ;;  %v15277_v54 = vcombine.high %v347_v24, %v351_v50 }
 0x357   :  { %7463 = vmatpush1.bf16.msra.mxu1 %v15228_v36  ;;  %v614_v36 = vld [vmem:[#allocation5 + $0xc70] sm:$0xff] }
 0x358   :  { %7464 = vmatprep.subr.bf16.mxu1 %v15237_v38  ;;  %v15530_v38 = vcombine.low %v602_v26, %v606_v53  ;;  %v15539_v41 = vcombine.high %v610_v35, %v614_v36  ;;  %v15317_v26 = vcombine.high %v387_v13, %v391_v15 }
 0x359   :  { %7217 = vmatpush1.bf16.msra.mxu0 %v15482_v37  ;;  %v15276_v37 = vcombine.low %v347_v24, %v351_v50  ;;  %v15308_v24 = vcombine.low %v379_v2, %v383_v3 }
 0x35a   :  { %7218 = vmatprep.subr.bf16.mxu0 %v15491_v39  ;;  %v15285_v39 = vcombine.high %v355_v30, %v359_v31 }
 0x35b   :  { %7465 = vmatpush1.bf16.msra.mxu1 %v15236_v44  ;;  %v622_v44 = vld [vmem:[#allocation5 + $0xcb0] sm:$0xff] }
 0x35c   :  { %7466 = vmatprep.subr.bf16.mxu1 %v15245_v46  ;;  %v15538_v46 = vcombine.low %v610_v35, %v614_v36  ;;  %v15547_v55 = vcombine.high %v618_v43, %v622_v44  ;;  %v15316_v35 = vcombine.low %v387_v13, %v391_v15 }
 0x35d   :  { %7219 = vmatpush1.bf16.msra.mxu0 %v15490_v45  ;;  %v15284_v45 = vcombine.low %v355_v30, %v359_v31  ;;  %v650_v30 = vld [vmem:[#allocation5 + $0xd90] sm:$0xff] }
 0x35e   :  { %7220 = vmatprep.subr.bf16.mxu0 %v15499_v47  ;;  %v15293_v47 = vcombine.high %v363_v19, %v367_v48  ;;  %v654_v31 = vld [vmem:[#allocation5 + $0xdb0] sm:$0xff] }
 0x35f   :  { %7467 = vmatpush1.bf16.msra.mxu1 %v15244_v59  ;;  %v626_v59 = vld [vmem:[#allocation5 + $0xcd0] sm:$0xff] }
 0x360   :  { %7468 = vmatprep.subr.bf16.mxu1 %v15253_v63  ;;  %v15546_v63 = vcombine.low %v618_v43, %v622_v44  ;;  %v658_v44 = vld [vmem:[#allocation5 + $0xdd0] sm:$0xff] }
 0x361   :  { %7221 = vmatpush1.bf16.msra.mxu0 %v15498_v60  ;;  %v630_v60 = vld [vmem:[#allocation5 + $0xcf0] sm:$0xff] }
 0x362   :  { %7222 = vmatprep.subr.bf16.mxu0 %v15507_v32  ;;  %v15301_v32 = vcombine.high %v371_v56, %v375_v57  ;;  %v15555_v1 = vcombine.high %v626_v59, %v630_v60 }
 0x363   :  { %7469 = vmatpush1.bf16.msra.mxu1 %v15252_v4  ;;  %v634_v4 = vld [vmem:[#allocation5 + $0xd10] sm:$0xff] }
 0x364   :  { %7470 = vmatprep.subr.bf16.mxu1 %v15261_v7  ;;  %v15300_v7 = vcombine.low %v371_v56, %v375_v57 }
 0x365   :  { %7223 = vmatpush1.bf16.msra.mxu0 %v15506_v5  ;;  %v638_v5 = vld [vmem:[#allocation5 + $0xd30] sm:$0xff] }
 0x366   :  { %7224 = vmatprep.subr.bf16.mxu0 %v15515_v8  ;;  %v15554_v8 = vcombine.low %v626_v59, %v630_v60  ;;  %v15563_v11 = vcombine.high %v634_v4, %v638_v5  ;;  %v15562_v50 = vcombine.low %v634_v4, %v638_v5  ;;  %v15578_v59 = vcombine.low %v650_v30, %v654_v31 }
 0x367   :  { %7471 = vmatpush1.bf16.msra.mxu1 %v15260_v17  ;;  %v1240_v17 = vld [vmem:[#allocation7] sm:$0xff] }
 0x368   :  { %7472 = vmatprep.subr.bf16.mxu1 %v15269_v22  ;;  %v642_v22 = vld [vmem:[#allocation5 + $0xd50] sm:$0xff]  ;;  %v1245_v53 = vrot.slane %v1240_v17, %v18820_v10 }
 0x369   :  { %7225 = vmatpush1.bf16.msra.mxu0 %v15514_v18  ;;  %v18823_v18 = vsub.s32 1, %v18817_v12 }
 0x36a   :  { %7226 = vmatprep.subr.bf16.mxu0 %v15523_v23  ;;  %v646_v23 = vld [vmem:[#allocation5 + $0xd70] sm:$0xff] }
 0x36b   :  { %7473 = vmatpush1.bf16.msra.mxu1 %v15268_v27  ;;  %v15571_v27 = vcombine.high %v642_v22, %v646_v23  ;;  %v15570_v36 = vcombine.low %v642_v22, %v646_v23  ;;  %v427_v23 = vld [vmem:[#allocation5 + $0x698] sm:$0xff] }
 0x36c   :  { %7483 = vmatprep.subr.bf16.mxu1 %v15277_v54  ;;  %v399_v54 = vld [vmem:[#allocation5 + $0x5b8] sm:$0xff] }
 0x36d   :  { %7227 = vmatpush1.bf16.msra.mxu0 %v15522_v58  ;;  %v395_v58 = vld [vmem:[#allocation5 + $0x598] sm:$0xff] }
 0x36e   :  { %7237 = vmatprep.subr.bf16.mxu0 %v15531_v29  ;;  %7475 = vmatmul.mubr.bf16.vlgmr.msra.gmra.mrb[8].mxu1 %v18706_v16  ;;  %v15292_v16 = vcombine.low %v363_v19, %v367_v48  ;;  %v1249_v29 = vrot.slane %v1240_v17, %v18823_v18  ;;  %v407_v19 = vld [vmem:[#allocation5 + $0x5f8] sm:$0xff] }
 0x36f   :  { %7484 = vmatpush1.bf16.msra.mxu1 %v15276_v37  ;;  %7515 = vmatprep.mubr.bf16.mxu1 %v18700_v61  ;;  %v15309_v61 = vcombine.high %v379_v2, %v383_v3  ;;  %v15325_v37 = vcombine.high %v395_v58, %v399_v54 }
 0x370   :  { %7229 = vmatmul.mubr.bf16.vlgmr.msra.gmra.mrb[4].mxu0 %v18726_v34  ;;  %7485 = vmatprep.subr.bf16.mxu1 %v15285_v39  ;;  %v15579_v39 = vcombine.high %v650_v30, %v654_v31  ;;  %v6495_v48 = vadd.f32 %v18766_v9, %v1249_v29  ;;  %v415_v9 = vld [vmem:[#allocation5 + $0x638] sm:$0xff]  ;;  %v690_v31 = vld [vmem:[#allocation5 + $0xed0] sm:$0xff] }
 0x371   :  { %7238 = vmatpush1.bf16.msra.mxu0 %v15530_v38  ;;  %7269 = vmatprep.mubr.bf16.mxu0 %v18730_v42  ;;  %v6493_v38 = vadd.f32 %v18764_v6, %v1245_v53  ;;  %v435_v29 = vld [vmem:[#allocation5 + $0x6d8] sm:$0xff] }
 0x372   :  { %7239 = vmatprep.subr.bf16.mxu0 %v15539_v41  ;;  %v403_v41 = vld [vmem:[#allocation5 + $0x5d8] sm:$0xff] }
 0x373   :  { %7486 = vmatpush1.bf16.msra.mxu1 %v15284_v45  ;;  %v662_v45 = vld [vmem:[#allocation5 + $0xdf0] sm:$0xff]  ;;  %v15333_v6 = vcombine.high %v403_v41, %v407_v19  ;;  %v15332_v2 = vcombine.low %v403_v41, %v407_v19  ;;  %v439_v30 = vld [vmem:[#allocation5 + $0x6f8] sm:$0xff] }
 0x374   :  { %7487 = vmatprep.subr.bf16.mxu1 %v15293_v47  ;;  %v15586_v3 = vcombine.low %v658_v44, %v662_v45  ;;  %v443_v41 = vld [vmem:[#allocation5 + $0x718] sm:$0xff] }
 0x375   :  { %7240 = vmatpush1.bf16.msra.mxu0 %v15538_v46  ;;  %v447_v19 = vld [vmem:[#allocation5 + $0x738] sm:$0xff] }
 0x376   :  { %7241 = vmatprep.subr.bf16.mxu0 %v15547_v55  ;;  %v15324_v55 = vcombine.low %v395_v58, %v399_v54 }
 0x377   :  { %7488 = vmatpush1.bf16.msra.mxu1 %v15292_v16  ;;  %v15587_v16 = vcombine.high %v658_v44, %v662_v45  ;;  %v15364_v44 = vcombine.low %v435_v29, %v439_v30 }
 0x378   :  { %7489 = vmatprep.subr.bf16.mxu1 %v15301_v32  ;;  %v666_v32 = vld [vmem:[#allocation5 + $0xe10] sm:$0xff] }
 0x379   :  { %7242 = vmatpush1.bf16.msra.mxu0 %v15546_v63  ;;  %v411_v63 = vld [vmem:[#allocation5 + $0x618] sm:$0xff] }
 0x37a   :  { %7243 = vmatprep.subr.bf16.mxu0 %v15555_v1  ;;  %v670_v1 = vld [vmem:[#allocation5 + $0xe30] sm:$0xff]  ;;  %v15341_v4 = vcombine.high %v411_v63, %v415_v9  ;;  %v15340_v13 = vcombine.low %v411_v63, %v415_v9 }
 0x37b   :  { %7490 = vmatpush1.bf16.msra.mxu1 %v15300_v7  ;;  %v15595_v5 = vcombine.high %v666_v32, %v670_v1  ;;  %v419_v7 = vld [vmem:[#allocation5 + $0x658] sm:$0xff]  ;;  %v15594_v15 = vcombine.low %v666_v32, %v670_v1 }
 0x37c   :  { %7491 = vmatprep.subr.bf16.mxu1 %v15309_v61  ;;  %v674_v61 = vld [vmem:[#allocation5 + $0xe50] sm:$0xff]  ;;  %v459_v1 = vld [vmem:[#allocation5 + $0x798] sm:$0xff] }
 0x37d   :  { %7244 = vmatpush1.bf16.msra.mxu0 %v15554_v8  ;;  %v423_v8 = vld [vmem:[#allocation5 + $0x678] sm:$0xff] }
 0x37e   :  { %7245 = vmatprep.subr.bf16.mxu0 %v15563_v11  ;;  %v678_v11 = vld [vmem:[#allocation5 + $0xe70] sm:$0xff]  ;;  %v15349_v17 = vcombine.high %v419_v7, %v423_v8  ;;  %v15348_v53 = vcombine.low %v419_v7, %v423_v8 }
 0x37f   :  { %7492 = vmatpush1.bf16.msra.mxu1 %v15308_v24  ;;  %v15603_v22 = vcombine.high %v674_v61, %v678_v11  ;;  %v431_v24 = vld [vmem:[#allocation5 + $0x6b8] sm:$0xff] }
 0x380   :  { %7493 = vmatprep.subr.bf16.mxu1 %v15317_v26  ;;  %v686_v26 = vld [vmem:[#allocation5 + $0xeb0] sm:$0xff]  ;;  %v15357_v58 = vcombine.high %v427_v23, %v431_v24 }
 0x381   :  { %7246 = vmatpush1.bf16.msra.mxu0 %v15562_v50  ;;  %v682_v50 = vld [vmem:[#allocation5 + $0xe90] sm:$0xff] }
 0x382   :  { %7247 = vmatprep.subr.bf16.mxu0 %v15571_v27  ;;  %v15602_v27 = vcombine.low %v674_v61, %v678_v11  ;;  %v15611_v54 = vcombine.high %v682_v50, %v686_v26  ;;  %v467_v11 = vld [vmem:[#allocation5 + $0x7d8] sm:$0xff] }
 0x383   :  { %v6779_v43 = vpop.f32.mrb[0].mxu0  ;;  %7494 = vmatpush1.bf16.msra.mxu1 %v15316_v35  ;;  %v694_v35 = vld [vmem:[#allocation5 + $0xef0] sm:$0xff] }
 0x384   :  { %v18829_v46 = vadd.f32 %v6779_v43, %v6493_v38  ;;  %v6781_v47 = vpop.f32.mrb[1].mxu0  ;;  %7495 = vmatprep.subr.bf16.mxu1 %v15325_v37  ;;  %v15610_v37 = vcombine.low %v682_v50, %v686_v26  ;;  %v15365_v38 = vcombine.high %v435_v29, %v439_v30  ;;  %v702_v43 = vld [vmem:[#allocation5 + $0xf30] sm:$0xff]  ;;  %v15618_v45 = vcombine.low %v690_v31, %v694_v35  ;;  %v475_v26 = vld [vmem:[#allocation5 + $0x818] sm:$0xff] }
 0x385   :  { %v18831_v56 = vadd.f32 %v6781_v47, %v6495_v48  ;;  %v6783_v57 = vpop.f32.mrb[2].mxu0  ;;  %7248 = vmatpush1.bf16.msra.mxu0 %v15570_v36  ;;  %v15356_v36 = vcombine.low %v427_v23, %v431_v24  ;;  %v698_v48 = vld [vmem:[#allocation5 + $0xf10] sm:$0xff]  ;;  %v15373_v47 = vcombine.high %v443_v41, %v447_v19 }
 0x386   :  { %v6784_v60 = vpop.f32.mrb[3].mxu0  ;;  %7249 = vmatprep.subr.bf16.mxu0 %v15579_v39  ;;  %v15619_v39 = vcombine.high %v690_v31, %v694_v35  ;;  %v451_v57 = vld [vmem:[#allocation5 + $0x758] sm:$0xff]  ;;  %v15626_v63 = vcombine.low %v698_v48, %v702_v43 }
 0x387   :  { %7496 = vmatpush1.bf16.msra.mxu1 %v15324_v55  ;;  %v15627_v55 = vcombine.high %v698_v48, %v702_v43  ;;  %v710_v60 = vld [vmem:[#allocation5 + $0xf70] sm:$0xff]  ;;  %v483_v35 = vld [vmem:[#allocation5 + $0x858] sm:$0xff] }
 0x388   :  { %7497 = vmatprep.subr.bf16.mxu1 %v15333_v6  ;;  %v706_v6 = vld [vmem:[#allocation5 + $0xf50] sm:$0xff]  ;;  %v491_v43 = vld [vmem:[#allocation5 + $0x898] sm:$0xff] }
 0x389   :  { %7250 = vmatpush1.bf16.msra.mxu0 %v15578_v59  ;;  %v455_v59 = vld [vmem:[#allocation5 + $0x778] sm:$0xff]  ;;  %v15635_v32 = vcombine.high %v706_v6, %v710_v60  ;;  %v15634_v7 = vcombine.low %v706_v6, %v710_v60 }
 0x38a   :  { %7251 = vmatprep.subr.bf16.mxu0 %v15587_v16  ;;  %v15372_v16 = vcombine.low %v443_v41, %v447_v19  ;;  %v15381_v9 = vcombine.high %v451_v57, %v455_v59  ;;  %v499_v60 = vld [vmem:[#allocation5 + $0x8d8] sm:$0xff] }
 0x38b   :  { %7498 = vmatpush1.bf16.msra.mxu1 %v15332_v2  ;;  %v463_v2 = vld [vmem:[#allocation5 + $0x7b8] sm:$0xff] }
 0x38c   :  { %7499 = vmatprep.subr.bf16.mxu1 %v15341_v4  ;;  %v718_v4 = vld [vmem:[#allocation5 + $0xfb0] sm:$0xff]  ;;  %v15389_v8 = vcombine.high %v459_v1, %v463_v2 }
 0x38d   :  { %7252 = vmatpush1.bf16.msra.mxu0 %v15586_v3  ;;  %v714_v3 = vld [vmem:[#allocation5 + $0xf90] sm:$0xff] }
 0x38e   :  { %7253 = vmatprep.subr.bf16.mxu0 %v15595_v5  ;;  %v15380_v5 = vcombine.low %v451_v57, %v455_v59  ;;  %v15643_v61 = vcombine.high %v714_v3, %v718_v4  ;;  %v15642_v23 = vcombine.low %v714_v3, %v718_v4  ;;  %v507_v3 = vld [vmem:[#allocation5 + $0x918] sm:$0xff] }
 0x38f   :  { %7500 = vmatpush1.bf16.msra.mxu1 %v15340_v13  ;;  %v471_v13 = vld [vmem:[#allocation5 + $0x7f8] sm:$0xff] }
 0x390   :  { %7501 = vmatprep.subr.bf16.mxu1 %v15349_v17  ;;  %v726_v17 = vld [vmem:[#allocation5 + $0xff0] sm:$0xff]  ;;  %v15397_v24 = vcombine.high %v467_v11, %v471_v13  ;;  %v511_v4 = vld [vmem:[#allocation5 + $0x938] sm:$0xff] }
 0x391   :  { %7254 = vmatpush1.bf16.msra.mxu0 %v15594_v15  ;;  %v722_v15 = vld [vmem:[#allocation5 + $0xfd0] sm:$0xff] }
 0x392   :  { %7255 = vmatprep.subr.bf16.mxu0 %v15603_v22  ;;  %v15388_v22 = vcombine.low %v459_v1, %v463_v2  ;;  %v15651_v50 = vcombine.high %v722_v15, %v726_v17  ;;  %v15650_v29 = vcombine.low %v722_v15, %v726_v17  ;;  %v519_v15 = vld [vmem:[#allocation5 + $0x978] sm:$0xff]  ;;  %v770_v17 = vld [vmem:[#allocation5 + $0x1150] sm:$0xff] }
 0x393   :  { %7502 = vmatpush1.bf16.msra.mxu1 %v15348_v53  ;;  %v479_v53 = vld [vmem:[#allocation5 + $0x838] sm:$0xff] }
 0x394   :  { %7503 = vmatprep.subr.bf16.mxu1 %v15357_v58  ;;  %v734_v58 = vld [vmem:[#allocation5 + $0x1030] sm:$0xff]  ;;  %v15405_v30 = vcombine.high %v475_v26, %v479_v53 }
 0x395   :  { %7256 = vmatpush1.bf16.msra.mxu0 %v15602_v27  ;;  %v730_v27 = vld [vmem:[#allocation5 + $0x1010] sm:$0xff] }
 0x396   :  { %7257 = vmatprep.subr.bf16.mxu0 %v15611_v54  ;;  %v15396_v54 = vcombine.low %v467_v11, %v471_v13  ;;  %v15659_v31 = vcombine.high %v730_v27, %v734_v58  ;;  %v15658_v41 = vcombine.low %v730_v27, %v734_v58  ;;  %v15437_v11 = vcombine.high %v507_v3, %v511_v4  ;;  %v515_v13 = vld [vmem:[#allocation5 + $0x958] sm:$0xff]  ;;  %v778_v58 = vld [vmem:[#allocation5 + $0x1190] sm:$0xff] }
 0x397   :  { %7504 = vmatpush1.bf16.msra.mxu1 %v15356_v36  ;;  %v487_v36 = vld [vmem:[#allocation5 + $0x878] sm:$0xff] }
 0x398   :  { %7505 = vmatprep.subr.bf16.mxu1 %v15365_v38  ;;  %v742_v38 = vld [vmem:[#allocation5 + $0x1070] sm:$0xff]  ;;  %v15413_v19 = vcombine.high %v483_v35, %v487_v36  ;;  %v527_v27 = vld [vmem:[#allocation5 + $0x9b8] sm:$0xff] }
 0x399   :  { %7258 = vmatpush1.bf16.msra.mxu0 %v15610_v37  ;;  %v738_v37 = vld [vmem:[#allocation5 + $0x1050] sm:$0xff] }
 0x39a   :  { %7259 = vmatprep.subr.bf16.mxu0 %v15619_v39  ;;  %v15404_v39 = vcombine.low %v475_v26, %v479_v53  ;;  %v15667_v48 = vcombine.high %v738_v37, %v742_v38  ;;  %v15666_v57 = vcombine.low %v738_v37, %v742_v38  ;;  %v523_v53 = vld [vmem:[#allocation5 + $0x998] sm:$0xff]  ;;  %v786_v38 = vld [vmem:[#allocation5 + $0x11d0] sm:$0xff] }
 0x39b   :  { %7506 = vmatpush1.bf16.msra.mxu1 %v15364_v44  ;;  %v495_v44 = vld [vmem:[#allocation5 + $0x8b8] sm:$0xff] }
 0x39c   :  { %7507 = vmatprep.subr.bf16.mxu1 %v15373_v47  ;;  %v750_v47 = vld [vmem:[#allocation5 + $0x10b0] sm:$0xff]  ;;  %v15421_v59 = vcombine.high %v491_v43, %v495_v44  ;;  %v535_v37 = vld [vmem:[#allocation5 + $0x9f8] sm:$0xff] }
 0x39d   :  { %7260 = vmatpush1.bf16.msra.mxu0 %v15618_v45  ;;  %v746_v45 = vld [vmem:[#allocation5 + $0x1090] sm:$0xff] }
 0x39e   :  { %7261 = vmatprep.subr.bf16.mxu0 %v15627_v55  ;;  %v15412_v55 = vcombine.low %v483_v35, %v487_v36  ;;  %v15675_v6 = vcombine.high %v746_v45, %v750_v47  ;;  %v531_v36 = vld [vmem:[#allocation5 + $0x9d8] sm:$0xff] }
 0x39f   :  { %7508 = vmatpush1.bf16.msra.mxu1 %v15372_v16  ;;  %v503_v16 = vld [vmem:[#allocation5 + $0x8f8] sm:$0xff] }
 0x3a0   :  { %7509 = vmatprep.subr.bf16.mxu1 %v15381_v9  ;;  %v758_v9 = vld [vmem:[#allocation5 + $0x10f0] sm:$0xff]  ;;  %v15429_v1 = vcombine.high %v499_v60, %v503_v16 }
 0x3a1   :  { %7262 = vmatpush1.bf16.msra.mxu0 %v15626_v63  ;;  %v754_v63 = vld [vmem:[#allocation5 + $0x10d0] sm:$0xff] }
 0x3a2   :  { %7263 = vmatprep.subr.bf16.mxu0 %v15635_v32  ;;  %v15674_v32 = vcombine.low %v746_v45, %v750_v47  ;;  %v15683_v2 = vcombine.high %v754_v63, %v758_v9  ;;  %v543_v45 = vld [vmem:[#allocation5 + $0xa38] sm:$0xff]  ;;  %v794_v47 = vld [vmem:[#allocation5 + $0x1210] sm:$0xff] }
 0x3a3   :  { %7510 = vmatpush1.bf16.msra.mxu1 %v15380_v5  ;;  %v762_v5 = vld [vmem:[#allocation5 + $0x1110] sm:$0xff] }
 0x3a4   :  { %7511 = vmatprep.subr.bf16.mxu1 %v15389_v8  ;;  %v15428_v8 = vcombine.low %v499_v60, %v503_v16  ;;  %v547_v16 = vld [vmem:[#allocation5 + $0xa58] sm:$0xff] }
 0x3a5   :  { %7264 = vmatpush1.bf16.msra.mxu0 %v15634_v7  ;;  %v766_v7 = vld [vmem:[#allocation5 + $0x1130] sm:$0xff] }
 0x3a6   :  { %7265 = vmatprep.subr.bf16.mxu0 %v15643_v61  ;;  %v15682_v61 = vcombine.low %v754_v63, %v758_v9  ;;  %v551_v63 = vld [vmem:[#allocation5 + $0xa78] sm:$0xff]  ;;  %v802_v9 = vld [vmem:[#allocation5 + $0x1250] sm:$0xff] }
 0x3a7   :  { %7512 = vmatpush1.bf16.msra.mxu1 %v15388_v22  ;;  %v774_v22 = vld [vmem:[#allocation5 + $0x1170] sm:$0xff] }
 0x3a8   :  { %7513 = vmatprep.subr.bf16.mxu1 %v15397_v24  ;;  %v15690_v24 = vcombine.low %v762_v5, %v766_v7  ;;  %v15699_v26 = vcombine.high %v770_v17, %v774_v22 }
 0x3a9   :  { %7266 = vmatpush1.bf16.msra.mxu0 %v15642_v23  ;;  %v15436_v23 = vcombine.low %v507_v3, %v511_v4  ;;  %v555_v4 = vld [vmem:[#allocation5 + $0xa98] sm:$0xff] }
 0x3aa   :  { %7267 = vmatprep.subr.bf16.mxu0 %v15651_v50  ;;  %v15445_v50 = vcombine.high %v515_v13, %v519_v15 }
 0x3ab   :  { %7514 = vmatpush1.bf16.msra.mxu1 %v15396_v54  ;;  %v782_v54 = vld [vmem:[#allocation5 + $0x11b0] sm:$0xff] }
 0x3ac   :  { %7524 = vmatprep.subr.bf16.mxu1 %v15405_v30  ;;  %v15698_v30 = vcombine.low %v770_v17, %v774_v22  ;;  %v15707_v35 = vcombine.high %v778_v58, %v782_v54  ;;  %v567_v17 = vld [vmem:[#allocation5 + $0xaf8] sm:$0xff]  ;;  %v818_v22 = vld [vmem:[#allocation5 + $0x12d0] sm:$0xff] }
 0x3ad   :  { %7268 = vmatpush1.bf16.msra.mxu0 %v15650_v29  ;;  %v15444_v29 = vcombine.low %v515_v13, %v519_v15  ;;  %v563_v15 = vld [vmem:[#allocation5 + $0xad8] sm:$0xff] }
 0x3ae   :  { %7278 = vmatprep.subr.bf16.mxu0 %v15659_v31  ;;  %7516 = vmatmul.mubr.bf16.vlgmr.msra.gmra.mrb[8].mxu1 %v18712_v21  ;;  %v15420_v21 = vcombine.low %v491_v43, %v495_v44  ;;  %v15453_v31 = vcombine.high %v523_v53, %v527_v27  ;;  %v539_v44 = vld [vmem:[#allocation5 + $0xa18] sm:$0xff] }
 0x3af   :  { %7525 = vmatpush1.bf16.msra.mxu1 %v15404_v39  ;;  %7556 = vmatprep.mubr.bf16.mxu1 %v18716_v28  ;;  %v15691_v28 = vcombine.high %v762_v5, %v766_v7  ;;  %v790_v39 = vld [vmem:[#allocation5 + $0x11f0] sm:$0xff]  ;;  %v559_v5 = vld [vmem:[#allocation5 + $0xab8] sm:$0xff] }
 0x3b0   :  { %7270 = vmatmul.mubr.bf16.vlgmr.msra.gmra.mrb[4].mxu0 %v18740_v52  ;;  %7526 = vmatprep.subr.bf16.mxu1 %v15413_v19  ;;  %v15706_v19 = vcombine.low %v778_v58, %v782_v54  ;;  %v15715_v43 = vcombine.high %v786_v38, %v790_v39  ;;  %v810_v7 = vld [vmem:[#allocation5 + $0x1290] sm:$0xff]  ;;  %v575_v58 = vld [vmem:[#allocation5 + $0xb38] sm:$0xff] }
 0x3b1   :  { %7279 = vmatpush1.bf16.msra.mxu0 %v15658_v41  ;;  %7310 = vmatprep.mubr.bf16.mxu0 %v18744_v0  ;;  %v15452_v41 = vcombine.low %v523_v53, %v527_v27  ;;  %v571_v27 = vld [vmem:[#allocation5 + $0xb18] sm:$0xff]  ;;  %v826_v54 = vld [vmem:[#allocation5 + $0x1310] sm:$0xff] }
 0x3b2   :  { %7280 = vmatprep.subr.bf16.mxu0 %v15667_v48  ;;  %v15461_v48 = vcombine.high %v531_v36, %v535_v37 }
 0x3b3   :  { %7527 = vmatpush1.bf16.msra.mxu1 %v15412_v55  ;;  %v798_v55 = vld [vmem:[#allocation5 + $0x1230] sm:$0xff] }
 0x3b4   :  { %7528 = vmatprep.subr.bf16.mxu1 %v15421_v59  ;;  %v15714_v59 = vcombine.low %v786_v38, %v790_v39  ;;  %v15723_v60 = vcombine.high %v794_v47, %v798_v55  ;;  %v583_v38 = vld [vmem:[#allocation5 + $0xb78] sm:$0xff]  ;;  %v834_v39 = vld [vmem:[#allocation5 + $0x1350] sm:$0xff] }
 0x3b5   :  { %7281 = vmatpush1.bf16.msra.mxu0 %v15666_v57  ;;  %v15460_v57 = vcombine.low %v531_v36, %v535_v37  ;;  %v579_v37 = vld [vmem:[#allocation5 + $0xb58] sm:$0xff] }
 0x3b6   :  { %7282 = vmatprep.subr.bf16.mxu0 %v15675_v6  ;;  %v15469_v6 = vcombine.high %v539_v44, %v543_v45 }
 0x3b7   :  { %7529 = vmatpush1.bf16.msra.mxu1 %v15420_v21  ;;  %v806_v21 = vld [vmem:[#allocation5 + $0x1270] sm:$0xff] }
 0x3b8   :  { %7530 = vmatprep.subr.bf16.mxu1 %v15429_v1  ;;  %v15722_v1 = vcombine.low %v794_v47, %v798_v55  ;;  %v15731_v3 = vcombine.high %v802_v9, %v806_v21  ;;  %v591_v47 = vld [vmem:[#allocation5 + $0xbb8] sm:$0xff]  ;;  %v842_v55 = vld [vmem:[#allocation5 + $0x1390] sm:$0xff] }
 0x3b9   :  { %7283 = vmatpush1.bf16.msra.mxu0 %v15674_v32  ;;  %v15468_v32 = vcombine.low %v539_v44, %v543_v45  ;;  %v587_v45 = vld [vmem:[#allocation5 + $0xb98] sm:$0xff] }
 0x3ba   :  { %7284 = vmatprep.subr.bf16.mxu0 %v15683_v2  ;;  %v15477_v2 = vcombine.high %v547_v16, %v551_v63 }
 0x3bb   :  { %7531 = vmatpush1.bf16.msra.mxu1 %v15428_v8  ;;  %v814_v8 = vld [vmem:[#allocation5 + $0x12b0] sm:$0xff] }
 0x3bc   :  { %7532 = vmatprep.subr.bf16.mxu1 %v15437_v11  ;;  %v15730_v11 = vcombine.low %v802_v9, %v806_v21  ;;  %v15739_v13 = vcombine.high %v810_v7, %v814_v8  ;;  %v599_v9 = vld [vmem:[#allocation5 + $0xbf8] sm:$0xff]  ;;  %v850_v21 = vld [vmem:[#allocation5 + $0x13d0] sm:$0xff] }
 0x3bd   :  { %7285 = vmatpush1.bf16.msra.mxu0 %v15682_v61  ;;  %v15476_v61 = vcombine.low %v547_v16, %v551_v63  ;;  %v595_v63 = vld [vmem:[#allocation5 + $0xbd8] sm:$0xff] }
 0x3be   :  { %7286 = vmatprep.subr.bf16.mxu0 %v15691_v28  ;;  %v15485_v28 = vcombine.high %v555_v4, %v559_v5 }
 0x3bf   :  { %7533 = vmatpush1.bf16.msra.mxu1 %v15436_v23  ;;  %v822_v23 = vld [vmem:[#allocation5 + $0x12f0] sm:$0xff] }
 0x3c0   :  { %7534 = vmatprep.subr.bf16.mxu1 %v15445_v50  ;;  %v15738_v50 = vcombine.low %v810_v7, %v814_v8  ;;  %v15747_v53 = vcombine.high %v818_v22, %v822_v23  ;;  %v607_v7 = vld [vmem:[#allocation5 + $0xc38] sm:$0xff]  ;;  %v858_v8 = vld [vmem:[#allocation5 + $0x1410] sm:$0xff] }
 0x3c1   :  { %7287 = vmatpush1.bf16.msra.mxu0 %v15690_v24  ;;  %v15484_v24 = vcombine.low %v555_v4, %v559_v5  ;;  %v603_v5 = vld [vmem:[#allocation5 + $0xc18] sm:$0xff] }
 0x3c2   :  { %7288 = vmatprep.subr.bf16.mxu0 %v15699_v26  ;;  %v15493_v26 = vcombine.high %v563_v15, %v567_v17 }
 0x3c3   :  { %7535 = vmatpush1.bf16.msra.mxu1 %v15444_v29  ;;  %v830_v29 = vld [vmem:[#allocation5 + $0x1330] sm:$0xff] }
 0x3c4   :  { %7536 = vmatprep.subr.bf16.mxu1 %v15453_v31  ;;  %v15746_v31 = vcombine.low %v818_v22, %v822_v23  ;;  %v15755_v36 = vcombine.high %v826_v54, %v830_v29  ;;  %v615_v22 = vld [vmem:[#allocation5 + $0xc78] sm:$0xff]  ;;  %v866_v23 = vld [vmem:[#allocation5 + $0x1450] sm:$0xff] }
 0x3c5   :  { %7289 = vmatpush1.bf16.msra.mxu0 %v15698_v30  ;;  %v15492_v30 = vcombine.low %v563_v15, %v567_v17  ;;  %v611_v17 = vld [vmem:[#allocation5 + $0xc58] sm:$0xff] }
 0x3c6   :  { %7290 = vmatprep.subr.bf16.mxu0 %v15707_v35  ;;  %v15501_v35 = vcombine.high %v571_v27, %v575_v58 }
 0x3c7   :  { %7537 = vmatpush1.bf16.msra.mxu1 %v15452_v41  ;;  %v838_v41 = vld [vmem:[#allocation5 + $0x1370] sm:$0xff] }
 0x3c8   :  { %7538 = vmatprep.subr.bf16.mxu1 %v15461_v48  ;;  %v15754_v48 = vcombine.low %v826_v54, %v830_v29  ;;  %v15763_v44 = vcombine.high %v834_v39, %v838_v41  ;;  %v623_v54 = vld [vmem:[#allocation5 + $0xcb8] sm:$0xff]  ;;  %v874_v29 = vld [vmem:[#allocation5 + $0x1490] sm:$0xff] }
 0x3c9   :  { %7291 = vmatpush1.bf16.msra.mxu0 %v15706_v19  ;;  %v15500_v19 = vcombine.low %v571_v27, %v575_v58  ;;  %v619_v58 = vld [vmem:[#allocation5 + $0xc98] sm:$0xff] }
 0x3ca   :  { %7292 = vmatprep.subr.bf16.mxu0 %v15715_v43  ;;  %v15509_v43 = vcombine.high %v579_v37, %v583_v38 }
 0x3cb   :  { %7539 = vmatpush1.bf16.msra.mxu1 %v15460_v57  ;;  %v846_v57 = vld [vmem:[#allocation5 + $0x13b0] sm:$0xff] }
 0x3cc   :  { %7540 = vmatprep.subr.bf16.mxu1 %v15469_v6  ;;  %v15762_v6 = vcombine.low %v834_v39, %v838_v41  ;;  %v15771_v16 = vcombine.high %v842_v55, %v846_v57  ;;  %v631_v39 = vld [vmem:[#allocation5 + $0xcf8] sm:$0xff]  ;;  %v882_v41 = vld [vmem:[#allocation5 + $0x14d0] sm:$0xff] }
 0x3cd   :  { %7293 = vmatpush1.bf16.msra.mxu0 %v15714_v59  ;;  %v15508_v59 = vcombine.low %v579_v37, %v583_v38  ;;  %v627_v38 = vld [vmem:[#allocation5 + $0xcd8] sm:$0xff] }
 0x3ce   :  { %7294 = vmatprep.subr.bf16.mxu0 %v15723_v60  ;;  %v15517_v60 = vcombine.high %v587_v45, %v591_v47 }
 0x3cf   :  { %7541 = vmatpush1.bf16.msra.mxu1 %v15468_v32  ;;  %v854_v32 = vld [vmem:[#allocation5 + $0x13f0] sm:$0xff] }
 0x3d0   :  { %7542 = vmatprep.subr.bf16.mxu1 %v15477_v2  ;;  %v15770_v2 = vcombine.low %v842_v55, %v846_v57  ;;  %v15779_v4 = vcombine.high %v850_v21, %v854_v32  ;;  %v890_v55 = vld [vmem:[#allocation5 + $0x1510] sm:$0xff] }
 0x3d1   :  { %7295 = vmatpush1.bf16.msra.mxu0 %v15722_v1  ;;  %v15516_v1 = vcombine.low %v587_v45, %v591_v47  ;;  %v635_v45 = vld [vmem:[#allocation5 + $0xd18] sm:$0xff]  ;;  %v894_v57 = vld [vmem:[#allocation5 + $0x1530] sm:$0xff] }
 0x3d2   :  { %7296 = vmatprep.subr.bf16.mxu0 %v15731_v3  ;;  %v15525_v3 = vcombine.high %v595_v63, %v599_v9  ;;  %v639_v47 = vld [vmem:[#allocation5 + $0xd38] sm:$0xff] }
 0x3d3   :  { %7543 = vmatpush1.bf16.msra.mxu1 %v15476_v61  ;;  %v862_v61 = vld [vmem:[#allocation5 + $0x1430] sm:$0xff] }
 0x3d4   :  { %7544 = vmatprep.subr.bf16.mxu1 %v15485_v28  ;;  %v15778_v28 = vcombine.low %v850_v21, %v854_v32  ;;  %v15787_v15 = vcombine.high %v858_v8, %v862_v61  ;;  %v902_v21 = vld [vmem:[#allocation5 + $0x1570] sm:$0xff]  ;;  %v15564_v32 = vcombine.low %v635_v45, %v639_v47 }
 0x3d5   :  { %7297 = vmatpush1.bf16.msra.mxu0 %v15730_v11  ;;  %v15524_v11 = vcombine.low %v595_v63, %v599_v9  ;;  %v647_v63 = vld [vmem:[#allocation5 + $0xd78] sm:$0xff]  ;;  %v898_v9 = vld [vmem:[#allocation5 + $0x1550] sm:$0xff] }
 0x3d6   :  { %7298 = vmatprep.subr.bf16.mxu0 %v15739_v13  ;;  %v15533_v13 = vcombine.high %v603_v5, %v607_v7 }
 0x3d7   :  { %7545 = vmatpush1.bf16.msra.mxu1 %v15484_v24  ;;  %v870_v24 = vld [vmem:[#allocation5 + $0x1470] sm:$0xff] }
 0x3d8   :  { %7546 = vmatprep.subr.bf16.mxu1 %v15493_v26  ;;  %v15786_v26 = vcombine.low %v858_v8, %v862_v61  ;;  %v15795_v27 = vcombine.high %v866_v23, %v870_v24  ;;  %v910_v8 = vld [vmem:[#allocation5 + $0x15b0] sm:$0xff] }
 0x3d9   :  { %7299 = vmatpush1.bf16.msra.mxu0 %v15738_v50  ;;  %v15532_v50 = vcombine.low %v603_v5, %v607_v7  ;;  %v655_v5 = vld [vmem:[#allocation5 + $0xdb8] sm:$0xff]  ;;  %v906_v7 = vld [vmem:[#allocation5 + $0x1590] sm:$0xff] }
 0x3da   :  { %7300 = vmatprep.subr.bf16.mxu0 %v15747_v53  ;;  %v15541_v53 = vcombine.high %v611_v17, %v615_v22 }
 0x3db   :  { %7547 = vmatpush1.bf16.msra.mxu1 %v15492_v30  ;;  %v878_v30 = vld [vmem:[#allocation5 + $0x14b0] sm:$0xff] }
 0x3dc   :  { %7548 = vmatprep.subr.bf16.mxu1 %v15501_v35  ;;  %v15794_v35 = vcombine.low %v866_v23, %v870_v24  ;;  %v15803_v37 = vcombine.high %v874_v29, %v878_v30  ;;  %v914_v24 = vld [vmem:[#allocation5 + $0x15d0] sm:$0xff] }
 0x3dd   :  { %7301 = vmatpush1.bf16.msra.mxu0 %v15746_v31  ;;  %v15540_v31 = vcombine.low %v611_v17, %v615_v22  ;;  %v659_v17 = vld [vmem:[#allocation5 + $0xdd8] sm:$0xff] }
 0x3de   :  { %7302 = vmatprep.subr.bf16.mxu0 %v15755_v36  ;;  %v15549_v36 = vcombine.high %v619_v58, %v623_v54  ;;  %v663_v22 = vld [vmem:[#allocation5 + $0xdf8] sm:$0xff] }
 0x3df   :  { %7549 = vmatpush1.bf16.msra.mxu1 %v15500_v19  ;;  %v886_v19 = vld [vmem:[#allocation5 + $0x14f0] sm:$0xff] }
 0x3e0   :  { %7550 = vmatprep.subr.bf16.mxu1 %v15509_v43  ;;  %v15557_v43 = vcombine.high %v627_v38, %v631_v39 }
 0x3e1   :  { %7303 = vmatpush1.bf16.msra.mxu0 %v15754_v48  ;;  %v15802_v48 = vcombine.low %v874_v29, %v878_v30  ;;  %v667_v30 = vld [vmem:[#allocation5 + $0xe18] sm:$0xff] }
 0x3e2   :  { %7304 = vmatprep.subr.bf16.mxu0 %v15763_v44  ;;  %v15811_v44 = vcombine.high %v882_v41, %v886_v19 }
 0x3e3   :  { %7551 = vmatpush1.bf16.msra.mxu1 %v15508_v59  ;;  %v15556_v59 = vcombine.low %v627_v38, %v631_v39 }
 0x3e4   :  { %7552 = vmatprep.subr.bf16.mxu1 %v15517_v60  ;;  %v15565_v60 = vcombine.high %v635_v45, %v639_v47 }
 0x3e5   :  { %7305 = vmatpush1.bf16.msra.mxu0 %v15762_v6  ;;  %v15810_v6 = vcombine.low %v882_v41, %v886_v19  ;;  %v675_v19 = vld [vmem:[#allocation5 + $0xe58] sm:$0xff] }
 0x3e6   :  { %7306 = vmatprep.subr.bf16.mxu0 %v15771_v16  ;;  %v643_v16 = vld [vmem:[#allocation5 + $0xd58] sm:$0xff] }
 0x3e7   :  { %7553 = vmatpush1.bf16.msra.mxu1 %v15516_v1  ;;  %v15818_v1 = vcombine.low %v890_v55, %v894_v57  ;;  %v15572_v61 = vcombine.low %v643_v16, %v647_v63 }
 0x3e8   :  { %7554 = vmatprep.subr.bf16.mxu1 %v15525_v3  ;;  %v15827_v3 = vcombine.high %v898_v9, %v902_v21 }
 0x3e9   :  { %7307 = vmatpush1.bf16.msra.mxu0 %v15770_v2  ;;  %v15573_v2 = vcombine.high %v643_v16, %v647_v63 }
 0x3ea   :  { %7308 = vmatprep.subr.bf16.mxu0 %v15779_v4  ;;  %v651_v4 = vld [vmem:[#allocation5 + $0xd98] sm:$0xff] }
 0x3eb   :  { %7555 = vmatpush1.bf16.msra.mxu1 %v15524_v11  ;;  %v15826_v11 = vcombine.low %v898_v9, %v902_v21  ;;  %v691_v21 = vld [vmem:[#allocation5 + $0xed8] sm:$0xff] }
 0x3ec   :  { %7565 = vmatprep.subr.bf16.mxu1 %v15533_v13 }
 0x3ed   :  { %7309 = vmatpush1.bf16.msra.mxu0 %v15778_v28  ;;  %v15581_v28 = vcombine.high %v651_v4, %v655_v5 }
 0x3ee   :  { %7319 = vmatprep.subr.bf16.mxu0 %v15787_v15  ;;  %7557 = vmatmul.mubr.bf16.vlgmr.msra.gmra.mrb[8].mxu1 %v18726_v34  ;;  %v15548_v34 = vcombine.low %v619_v58, %v623_v54  ;;  %v15835_v15 = vcombine.high %v906_v7, %v910_v8  ;;  %v15834_v58 = vcombine.low %v906_v7, %v910_v8  ;;  %v699_v8 = vld [vmem:[#allocation5 + $0xf18] sm:$0xff] }
 0x3ef   :  { %7566 = vmatpush1.bf16.msra.mxu1 %v15532_v50  ;;  %7597 = vmatprep.mubr.bf16.mxu1 %v18730_v42  ;;  %v15819_v42 = vcombine.high %v890_v55, %v894_v57  ;;  %v918_v50 = vld [vmem:[#allocation5 + $0x15f0] sm:$0xff]  ;;  %v15589_v54 = vcombine.high %v659_v17, %v663_v22  ;;  %v683_v57 = vld [vmem:[#allocation5 + $0xe98] sm:$0xff] }
 0x3f0   :  { %7311 = vmatmul.mubr.bf16.vlgmr.msra.gmra.mrb[4].mxu0 %v18754_v14  ;;  %7567 = vmatprep.subr.bf16.mxu1 %v15541_v53  ;;  %v15580_v53 = vcombine.low %v651_v4, %v655_v5  ;;  %v15843_v29 = vcombine.high %v914_v24, %v918_v50  ;;  %v15842_v38 = vcombine.low %v914_v24, %v918_v50  ;;  %v707_v50 = vld [vmem:[#allocation5 + $0xf58] sm:$0xff] }
 0x3f1   :  { %7320 = vmatpush1.bf16.msra.mxu0 %v15786_v26  ;;  %7351 = vmatprep.mubr.bf16.mxu0 %v18758_v25 }
 0x3f2   :  { %7321 = vmatprep.subr.bf16.mxu0 %v15795_v27 }
 0x3f3   :  { %7568 = vmatpush1.bf16.msra.mxu1 %v15540_v31  ;;  %v671_v31 = vld [vmem:[#allocation5 + $0xe38] sm:$0xff] }
 0x3f4   :  { %7569 = vmatprep.subr.bf16.mxu1 %v15549_v36  ;;  %v926_v36 = vld [vmem:[#allocation5 + $0x1630] sm:$0xff]  ;;  %v15597_v39 = vcombine.high %v667_v30, %v671_v31 }
 0x3f5   :  { %7322 = vmatpush1.bf16.msra.mxu0 %v15794_v35  ;;  %v922_v35 = vld [vmem:[#allocation5 + $0x1610] sm:$0xff] }
 0x3f6   :  { %7323 = vmatprep.subr.bf16.mxu0 %v15803_v37  ;;  %v15588_v37 = vcombine.low %v659_v17, %v663_v22  ;;  %v15851_v41 = vcombine.high %v922_v35, %v926_v36  ;;  %v15850_v45 = vcombine.low %v922_v35, %v926_v36  ;;  %v719_v35 = vld [vmem:[#allocation5 + $0xfb8] sm:$0xff]  ;;  %v970_v36 = vld [vmem:[#allocation5 + $0x1790] sm:$0xff] }
 0x3f7   :  { %7570 = vmatpush1.bf16.msra.mxu1 %v15548_v34  ;;  %v679_v34 = vld [vmem:[#allocation5 + $0xe78] sm:$0xff] }
 0x3f8   :  { %7571 = vmatprep.subr.bf16.mxu1 %v15557_v43  ;;  %v934_v43 = vld [vmem:[#allocation5 + $0x1670] sm:$0xff]  ;;  %v15605_v47 = vcombine.high %v675_v19, %v679_v34 }
 0x3f9   :  { %7324 = vmatpush1.bf16.msra.mxu0 %v15802_v48  ;;  %v930_v48 = vld [vmem:[#allocation5 + $0x1650] sm:$0xff] }
 0x3fa   :  { %7325 = vmatprep.subr.bf16.mxu0 %v15811_v44  ;;  %v15596_v44 = vcombine.low %v667_v30, %v671_v31  ;;  %v15859_v55 = vcombine.high %v930_v48, %v934_v43  ;;  %v15858_v16 = vcombine.low %v930_v48, %v934_v43  ;;  %v715_v31 = vld [vmem:[#allocation5 + $0xf98] sm:$0xff]  ;;  %v978_v43 = vld [vmem:[#allocation5 + $0x17d0] sm:$0xff] }
 0x3fb   :  { %7572 = vmatpush1.bf16.msra.mxu1 %v15556_v59  ;;  %v687_v59 = vld [vmem:[#allocation5 + $0xeb8] sm:$0xff] }
 0x3fc   :  { %7573 = vmatprep.subr.bf16.mxu1 %v15565_v60  ;;  %v942_v60 = vld [vmem:[#allocation5 + $0x16b0] sm:$0xff]  ;;  %v15613_v63 = vcombine.high %v683_v57, %v687_v59  ;;  %v727_v48 = vld [vmem:[#allocation5 + $0xff8] sm:$0xff] }
 0x3fd   :  { %7326 = vmatpush1.bf16.msra.mxu0 %v15810_v6  ;;  %v938_v6 = vld [vmem:[#allocation5 + $0x1690] sm:$0xff] }
 0x3fe   :  { %7327 = vmatprep.subr.bf16.mxu0 %v15819_v42  ;;  %v15604_v42 = vcombine.low %v675_v19, %v679_v34  ;;  %v15867_v9 = vcombine.high %v938_v6, %v942_v60  ;;  %v15866_v4 = vcombine.low %v938_v6, %v942_v60  ;;  %v723_v34 = vld [vmem:[#allocation5 + $0xfd8] sm:$0xff]  ;;  %v986_v60 = vld [vmem:[#allocation5 + $0x1810] sm:$0xff] }
 0x3ff   :  { %7574 = vmatpush1.bf16.msra.mxu1 %v15564_v32  ;;  %v695_v32 = vld [vmem:[#allocation5 + $0xef8] sm:$0xff] }
 0x400   :  { %7575 = vmatprep.subr.bf16.mxu1 %v15573_v2  ;;  %v950_v2 = vld [vmem:[#allocation5 + $0x16f0] sm:$0xff]  ;;  %v15621_v5 = vcombine.high %v691_v21, %v695_v32  ;;  %v735_v6 = vld [vmem:[#allocation5 + $0x1038] sm:$0xff] }
 0x401   :  { %7328 = vmatpush1.bf16.msra.mxu0 %v15818_v1  ;;  %v18841_v13 = vpop.f32.mrb[4].mxu1  ;;  %v946_v1 = vld [vmem:[#allocation5 + $0x16d0] sm:$0xff] }
 0x402   :  { %7329 = vmatprep.subr.bf16.mxu0 %v15827_v3  ;;  %v18843_v23 = vpop.f32.mrb[5].mxu1  ;;  %v15612_v3 = vcombine.low %v683_v57, %v687_v59  ;;  %v15875_v7 = vcombine.high %v946_v1, %v950_v2  ;;  %v15874_v17 = vcombine.low %v946_v1, %v950_v2  ;;  %v731_v59 = vld [vmem:[#allocation5 + $0x1018] sm:$0xff]  ;;  %v994_v2 = vld [vmem:[#allocation5 + $0x1850] sm:$0xff] }
 0x403   :  { %v7111_v26 = vpop.f32.mrb[6].mxu1  ;;  %7576 = vmatpush1.bf16.msra.mxu1 %v15572_v61  ;;  %v703_v61 = vld [vmem:[#allocation5 + $0xf38] sm:$0xff] }
 0x404   :  { %v7112_v27 = vpop.f32.mrb[7].mxu1  ;;  %7577 = vmatprep.subr.bf16.mxu1 %v15581_v28  ;;  %v958_v28 = vld [vmem:[#allocation5 + $0x1730] sm:$0xff]  ;;  %v15629_v22 = vcombine.high %v699_v8, %v703_v61  ;;  %v711_v26 = vld [vmem:[#allocation5 + $0xf78] sm:$0xff] }
 0x405   :  { %7330 = vmatpush1.bf16.msra.mxu0 %v15826_v11  ;;  %v954_v11 = vld [vmem:[#allocation5 + $0x1710] sm:$0xff]  ;;  %v743_v1 = vld [vmem:[#allocation5 + $0x1078] sm:$0xff] }
 0x406   :  { %7331 = vmatprep.subr.bf16.mxu0 %v15835_v15  ;;  %v15620_v15 = vcombine.low %v691_v21, %v695_v32  ;;  %v15883_v24 = vcombine.high %v954_v11, %v958_v28  ;;  %v966_v27 = vld [vmem:[#allocation5 + $0x1770] sm:$0xff]  ;;  %v739_v32 = vld [vmem:[#allocation5 + $0x1058] sm:$0xff] }
 0x407   :  { %7578 = vmatpush1.bf16.msra.mxu1 %v15580_v53  ;;  %v962_v53 = vld [vmem:[#allocation5 + $0x1750] sm:$0xff] }
 0x408   :  { %7579 = vmatprep.subr.bf16.mxu1 %v15589_v54  ;;  %v15882_v54 = vcombine.low %v954_v11, %v958_v28  ;;  %v15891_v30 = vcombine.high %v962_v53, %v966_v27  ;;  %v751_v11 = vld [vmem:[#allocation5 + $0x10b8] sm:$0xff]  ;;  %v1002_v28 = vld [vmem:[#allocation5 + $0x1890] sm:$0xff] }
 0x409   :  { %7332 = vmatpush1.bf16.msra.mxu0 %v15834_v58  ;;  %v15628_v58 = vcombine.low %v699_v8, %v703_v61  ;;  %v747_v61 = vld [vmem:[#allocation5 + $0x1098] sm:$0xff] }
 0x40a   :  { %7333 = vmatprep.subr.bf16.mxu0 %v15843_v29  ;;  %v15637_v29 = vcombine.high %v707_v50, %v711_v26 }
 0x40b   :  { %7580 = vmatpush1.bf16.msra.mxu1 %v15588_v37  ;;  %v974_v37 = vld [vmem:[#allocation5 + $0x17b0] sm:$0xff] }
 0x40c   :  { %7581 = vmatprep.subr.bf16.mxu1 %v15597_v39  ;;  %v15890_v39 = vcombine.low %v962_v53, %v966_v27  ;;  %v15899_v19 = vcombine.high %v970_v36, %v974_v37  ;;  %v759_v53 = vld [vmem:[#allocation5 + $0x10f8] sm:$0xff]  ;;  %v1010_v27 = vld [vmem:[#allocation5 + $0x18d0] sm:$0xff] }
 0x40d   :  { %7334 = vmatpush1.bf16.msra.mxu0 %v15842_v38  ;;  %v15636_v38 = vcombine.low %v707_v50, %v711_v26  ;;  %v755_v26 = vld [vmem:[#allocation5 + $0x10d8] sm:$0xff] }
 0x40e   :  { %7335 = vmatprep.subr.bf16.mxu0 %v15851_v41  ;;  %v15645_v41 = vcombine.high %v715_v31, %v719_v35 }
 0x40f   :  { %7582 = vmatpush1.bf16.msra.mxu1 %v15596_v44  ;;  %v982_v44 = vld [vmem:[#allocation5 + $0x17f0] sm:$0xff] }
 0x410   :  { %7583 = vmatprep.subr.bf16.mxu1 %v15605_v47  ;;  %v15898_v47 = vcombine.low %v970_v36, %v974_v37  ;;  %v15907_v57 = vcombine.high %v978_v43, %v982_v44  ;;  %v1018_v36 = vld [vmem:[#allocation5 + $0x1910] sm:$0xff] }
 0x411   :  { %7336 = vmatpush1.bf16.msra.mxu0 %v15850_v45  ;;  %v15644_v45 = vcombine.low %v715_v31, %v719_v35  ;;  %v763_v31 = vld [vmem:[#allocation5 + $0x1118] sm:$0xff]  ;;  %v1022_v37 = vld [vmem:[#allocation5 + $0x1930] sm:$0xff] }
 0x412   :  { %7337 = vmatprep.subr.bf16.mxu0 %v15859_v55  ;;  %v15653_v55 = vcombine.high %v723_v34, %v727_v48  ;;  %v767_v35 = vld [vmem:[#allocation5 + $0x1138] sm:$0xff] }
 0x413   :  { %7584 = vmatpush1.bf16.msra.mxu1 %v15604_v42  ;;  %v990_v42 = vld [vmem:[#allocation5 + $0x1830] sm:$0xff] }
 0x414   :  { %7585 = vmatprep.subr.bf16.mxu1 %v15613_v63  ;;  %v15906_v63 = vcombine.low %v978_v43, %v982_v44  ;;  %v15915_v21 = vcombine.high %v986_v60, %v990_v42  ;;  %v1030_v43 = vld [vmem:[#allocation5 + $0x1970] sm:$0xff]  ;;  %v15692_v44 = vcombine.low %v763_v31, %v767_v35 }
 0x415   :  { %7338 = vmatpush1.bf16.msra.mxu0 %v15858_v16  ;;  %v15652_v16 = vcombine.low %v723_v34, %v727_v48  ;;  %v775_v34 = vld [vmem:[#allocation5 + $0x1178] sm:$0xff]  ;;  %v1026_v48 = vld [vmem:[#allocation5 + $0x1950] sm:$0xff] }
 0x416   :  { %7339 = vmatprep.subr.bf16.mxu0 %v15867_v9  ;;  %v15661_v9 = vcombine.high %v731_v59, %v735_v6 }
 0x417   :  { %7586 = vmatpush1.bf16.msra.mxu1 %v15612_v3  ;;  %v998_v3 = vld [vmem:[#allocation5 + $0x1870] sm:$0xff] }
 0x418   :  { %7587 = vmatprep.subr.bf16.mxu1 %v15621_v5  ;;  %v15914_v5 = vcombine.low %v986_v60, %v990_v42  ;;  %v15923_v8 = vcombine.high %v994_v2, %v998_v3  ;;  %v1038_v60 = vld [vmem:[#allocation5 + $0x19b0] sm:$0xff] }
 0x419   :  { %7340 = vmatpush1.bf16.msra.mxu0 %v15866_v4  ;;  %v15660_v4 = vcombine.low %v731_v59, %v735_v6  ;;  %v783_v59 = vld [vmem:[#allocation5 + $0x11b8] sm:$0xff]  ;;  %v1034_v6 = vld [vmem:[#allocation5 + $0x1990] sm:$0xff] }
 0x41a   :  { %7341 = vmatprep.subr.bf16.mxu0 %v15875_v7  ;;  %v15669_v7 = vcombine.high %v739_v32, %v743_v1 }
 0x41b   :  { %7588 = vmatpush1.bf16.msra.mxu1 %v15620_v15  ;;  %v1006_v15 = vld [vmem:[#allocation5 + $0x18b0] sm:$0xff] }
 0x41c   :  { %7589 = vmatprep.subr.bf16.mxu1 %v15629_v22  ;;  %v15922_v22 = vcombine.low %v994_v2, %v998_v3  ;;  %v15931_v50 = vcombine.high %v1002_v28, %v1006_v15  ;;  %v1046_v2 = vld [vmem:[#allocation5 + $0x19f0] sm:$0xff] }
 0x41d   :  { %7342 = vmatpush1.bf16.msra.mxu0 %v15874_v17  ;;  %v15668_v17 = vcombine.low %v739_v32, %v743_v1  ;;  %v791_v32 = vld [vmem:[#allocation5 + $0x11f8] sm:$0xff]  ;;  %v1042_v1 = vld [vmem:[#allocation5 + $0x19d0] sm:$0xff] }
 0x41e   :  { %7343 = vmatprep.subr.bf16.mxu0 %v15883_v24  ;;  %v15677_v24 = vcombine.high %v747_v61, %v751_v11 }
 0x41f   :  { %7590 = vmatpush1.bf16.msra.mxu1 %v15628_v58  ;;  %v1014_v58 = vld [vmem:[#allocation5 + $0x18f0] sm:$0xff] }
 0x420   :  { %7591 = vmatprep.subr.bf16.mxu1 %v15637_v29  ;;  %v15685_v29 = vcombine.high %v755_v26, %v759_v53 }
 0x421   :  { %7344 = vmatpush1.bf16.msra.mxu0 %v15882_v54  ;;  %v15930_v54 = vcombine.low %v1002_v28, %v1006_v15  ;;  %v1054_v28 = vld [vmem:[#allocation5 + $0x1a30] sm:$0xff] }
 0x422   :  { %7345 = vmatprep.subr.bf16.mxu0 %v15891_v30  ;;  %v15939_v30 = vcombine.high %v1010_v27, %v1014_v58 }
 0x423   :  { %7592 = vmatpush1.bf16.msra.mxu1 %v15636_v38  ;;  %v15684_v38 = vcombine.low %v755_v26, %v759_v53  ;;  %v807_v26 = vld [vmem:[#allocation5 + $0x1278] sm:$0xff]  ;;  %v1058_v53 = vld [vmem:[#allocation5 + $0x1a50] sm:$0xff] }
 0x424   :  { %7593 = vmatprep.subr.bf16.mxu1 %v15645_v41  ;;  %v15693_v41 = vcombine.high %v763_v31, %v767_v35  ;;  %v815_v31 = vld [vmem:[#allocation5 + $0x12b8] sm:$0xff]  ;;  %v1066_v35 = vld [vmem:[#allocation5 + $0x1a90] sm:$0xff] }
 0x425   :  { %7346 = vmatpush1.bf16.msra.mxu0 %v15890_v39  ;;  %v15938_v39 = vcombine.low %v1010_v27, %v1014_v58  ;;  %v1062_v27 = vld [vmem:[#allocation5 + $0x1a70] sm:$0xff] }
 0x426   :  { %7347 = vmatprep.subr.bf16.mxu0 %v15899_v19  ;;  %v771_v19 = vld [vmem:[#allocation5 + $0x1158] sm:$0xff] }
 0x427   :  { %7594 = vmatpush1.bf16.msra.mxu1 %v15644_v45  ;;  %v15946_v45 = vcombine.low %v1018_v36, %v1022_v37  ;;  %v15700_v42 = vcombine.low %v771_v19, %v775_v34 }
 0x428   :  { %7595 = vmatprep.subr.bf16.mxu1 %v15653_v55  ;;  %v15955_v55 = vcombine.high %v1026_v48, %v1030_v43 }
 0x429   :  { %7348 = vmatpush1.bf16.msra.mxu0 %v15898_v47  ;;  %v15701_v47 = vcombine.high %v771_v19, %v775_v34  ;;  %v823_v19 = vld [vmem:[#allocation5 + $0x12f8] sm:$0xff]  ;;  %v1074_v34 = vld [vmem:[#allocation5 + $0x1ad0] sm:$0xff] }
 0x42a   :  { %7349 = vmatprep.subr.bf16.mxu0 %v15907_v57  ;;  %v779_v57 = vld [vmem:[#allocation5 + $0x1198] sm:$0xff] }
 0x42b   :  { %7596 = vmatpush1.bf16.msra.mxu1 %v15652_v16  ;;  %v15954_v16 = vcombine.low %v1026_v48, %v1030_v43  ;;  %v15708_v3 = vcombine.low %v779_v57, %v783_v59  ;;  %v1078_v48 = vld [vmem:[#allocation5 + $0x1af0] sm:$0xff] }
 0x42c   :  { %7606 = vmatprep.subr.bf16.mxu1 %v15661_v9  ;;  %v15963_v9 = vcombine.high %v1034_v6, %v1038_v60 }
 0x42d   :  { %7350 = vmatpush1.bf16.msra.mxu0 %v15906_v63  ;;  %v15709_v63 = vcombine.high %v779_v57, %v783_v59  ;;  %v831_v57 = vld [vmem:[#allocation5 + $0x1338] sm:$0xff]  ;;  %v1082_v59 = vld [vmem:[#allocation5 + $0x1b10] sm:$0xff] }
 0x42e   :  { %7360 = vmatprep.subr.bf16.mxu0 %v15915_v21  ;;  %7598 = vmatmul.mubr.bf16.vlgmr.msra.gmra.mrb[8].mxu1 %v18740_v52  ;;  %v15676_v52 = vcombine.low %v747_v61, %v751_v11  ;;  %v787_v21 = vld [vmem:[#allocation5 + $0x11d8] sm:$0xff]  ;;  %v1050_v11 = vld [vmem:[#allocation5 + $0x1a10] sm:$0xff] }
 0x42f   :  { %7607 = vmatpush1.bf16.msra.mxu1 %v15660_v4  ;;  %7638 = vmatprep.mubr.bf16.mxu1 %v18744_v0  ;;  %v15947_v0 = vcombine.high %v1018_v36, %v1022_v37  ;;  %v15962_v4 = vcombine.low %v1034_v6, %v1038_v60  ;;  %v799_v61 = vld [vmem:[#allocation5 + $0x1238] sm:$0xff]  ;;  %v15716_v15 = vcombine.low %v787_v21, %v791_v32  ;;  %v1070_v36 = vld [vmem:[#allocation5 + $0x1ab0] sm:$0xff] }
 0x430   :  { %7352 = vmatmul.mubr.bf16.vlgmr.msra.gmra.mrb[4].mxu0 %v18772_v51  ;;  %7608 = vmatprep.subr.bf16.mxu1 %v15669_v7  ;;  %v15971_v7 = vcombine.high %v1042_v1, %v1046_v2  ;;  %v1086_v6 = vld [vmem:[#allocation5 + $0x1b30] sm:$0xff] }
 0x431   :  { %7361 = vmatpush1.bf16.msra.mxu0 %v15914_v5  ;;  %7392 = vmatprep.mubr.bf16.mxu0 %v18776_v62  ;;  %v15717_v5 = vcombine.high %v787_v21, %v791_v32  ;;  %v839_v21 = vld [vmem:[#allocation5 + $0x1378] sm:$0xff]  ;;  %v1090_v32 = vld [vmem:[#allocation5 + $0x1b50] sm:$0xff] }
 0x432   :  { %7362 = vmatprep.subr.bf16.mxu0 %v15923_v8  ;;  %v795_v8 = vld [vmem:[#allocation5 + $0x1218] sm:$0xff] }
 0x433   :  { %7609 = vmatpush1.bf16.msra.mxu1 %v15668_v17  ;;  %v15970_v17 = vcombine.low %v1042_v1, %v1046_v2  ;;  %v15724_v58 = vcombine.low %v795_v8, %v799_v61  ;;  %v1094_v1 = vld [vmem:[#allocation5 + $0x1b70] sm:$0xff] }
 0x434   :  { %7610 = vmatprep.subr.bf16.mxu1 %v15677_v24  ;;  %v15979_v24 = vcombine.high %v1050_v11, %v1054_v28 }
 0x435   :  { %7363 = vmatpush1.bf16.msra.mxu0 %v15922_v22  ;;  %v15725_v22 = vcombine.high %v795_v8, %v799_v61  ;;  %v847_v8 = vld [vmem:[#allocation5 + $0x13b8] sm:$0xff]  ;;  %v1098_v61 = vld [vmem:[#allocation5 + $0x1b90] sm:$0xff] }
 0x436   :  { %7364 = vmatprep.subr.bf16.mxu0 %v15931_v50  ;;  %v803_v50 = vld [vmem:[#allocation5 + $0x1258] sm:$0xff] }
 0x437   :  { %7611 = vmatpush1.bf16.msra.mxu1 %v15676_v52  ;;  %v15978_v52 = vcombine.low %v1050_v11, %v1054_v28  ;;  %v15732_v37 = vcombine.low %v803_v50, %v807_v26  ;;  %v1102_v11 = vld [vmem:[#allocation5 + $0x1bb0] sm:$0xff] }
 0x438   :  { %7612 = vmatprep.subr.bf16.mxu1 %v15685_v29  ;;  %v15987_v29 = vcombine.high %v1058_v53, %v1062_v27 }
 0x439   :  { %7365 = vmatpush1.bf16.msra.mxu0 %v15930_v54  ;;  %v15733_v54 = vcombine.high %v803_v50, %v807_v26  ;;  %v855_v50 = vld [vmem:[#allocation5 + $0x13f8] sm:$0xff]  ;;  %v1106_v26 = vld [vmem:[#allocation5 + $0x1bd0] sm:$0xff] }
 0x43a   :  { %7366 = vmatprep.subr.bf16.mxu0 %v15939_v30  ;;  %v811_v30 = vld [vmem:[#allocation5 + $0x1298] sm:$0xff] }
 0x43b   :  { %7613 = vmatpush1.bf16.msra.mxu1 %v15684_v38  ;;  %v15986_v38 = vcombine.low %v1058_v53, %v1062_v27  ;;  %v15740_v43 = vcombine.low %v811_v30, %v815_v31  ;;  %v1110_v53 = vld [vmem:[#allocation5 + $0x1bf0] sm:$0xff] }
 0x43c   :  { %7614 = vmatprep.subr.bf16.mxu1 %v15693_v41  ;;  %v15995_v41 = vcombine.high %v1066_v35, %v1070_v36 }
 0x43d   :  { %7367 = vmatpush1.bf16.msra.mxu0 %v15938_v39  ;;  %v15741_v39 = vcombine.high %v811_v30, %v815_v31  ;;  %v863_v30 = vld [vmem:[#allocation5 + $0x1438] sm:$0xff]  ;;  %v1114_v31 = vld [vmem:[#allocation5 + $0x1c10] sm:$0xff] }
 0x43e   :  { %7368 = vmatprep.subr.bf16.mxu0 %v15947_v0  ;;  %v819_v0 = vld [vmem:[#allocation5 + $0x12d8] sm:$0xff] }
 0x43f   :  { %7615 = vmatpush1.bf16.msra.mxu1 %v15692_v44  ;;  %v15994_v44 = vcombine.low %v1066_v35, %v1070_v36  ;;  %v15748_v60 = vcombine.low %v819_v0, %v823_v19  ;;  %v1118_v35 = vld [vmem:[#allocation5 + $0x1c30] sm:$0xff] }
 0x440   :  { %7616 = vmatprep.subr.bf16.mxu1 %v15701_v47  ;;  %v16003_v47 = vcombine.high %v1074_v34, %v1078_v48 }
 0x441   :  { %7369 = vmatpush1.bf16.msra.mxu0 %v15946_v45  ;;  %v15749_v45 = vcombine.high %v819_v0, %v823_v19  ;;  %v871_v0 = vld [vmem:[#allocation5 + $0x1478] sm:$0xff]  ;;  %v1122_v19 = vld [vmem:[#allocation5 + $0x1c50] sm:$0xff] }
 0x442   :  { %7370 = vmatprep.subr.bf16.mxu0 %v15955_v55  ;;  %v827_v55 = vld [vmem:[#allocation5 + $0x1318] sm:$0xff] }
 0x443   :  { %7617 = vmatpush1.bf16.msra.mxu1 %v15700_v42  ;;  %v16002_v42 = vcombine.low %v1074_v34, %v1078_v48  ;;  %v15756_v2 = vcombine.low %v827_v55, %v831_v57  ;;  %v1126_v34 = vld [vmem:[#allocation5 + $0x1c70] sm:$0xff] }
 0x444   :  { %7618 = vmatprep.subr.bf16.mxu1 %v15709_v63  ;;  %v16011_v63 = vcombine.high %v1082_v59, %v1086_v6 }
 0x445   :  { %7371 = vmatpush1.bf16.msra.mxu0 %v15954_v16  ;;  %v15757_v16 = vcombine.high %v827_v55, %v831_v57  ;;  %v879_v55 = vld [vmem:[#allocation5 + $0x14b8] sm:$0xff]  ;;  %v1130_v57 = vld [vmem:[#allocation5 + $0x1c90] sm:$0xff] }
 0x446   :  { %7372 = vmatprep.subr.bf16.mxu0 %v15963_v9  ;;  %v835_v9 = vld [vmem:[#allocation5 + $0x1358] sm:$0xff] }
 0x447   :  { %7619 = vmatpush1.bf16.msra.mxu1 %v15708_v3  ;;  %v16010_v3 = vcombine.low %v1082_v59, %v1086_v6  ;;  %v15764_v28 = vcombine.low %v835_v9, %v839_v21  ;;  %v1134_v59 = vld [vmem:[#allocation5 + $0x1cb0] sm:$0xff] }
 0x448   :  { %7620 = vmatprep.subr.bf16.mxu1 %v15717_v5  ;;  %v16019_v5 = vcombine.high %v1090_v32, %v1094_v1 }
 0x449   :  { %7373 = vmatpush1.bf16.msra.mxu0 %v15962_v4  ;;  %v15765_v4 = vcombine.high %v835_v9, %v839_v21  ;;  %v887_v9 = vld [vmem:[#allocation5 + $0x14f8] sm:$0xff]  ;;  %v1138_v21 = vld [vmem:[#allocation5 + $0x1cd0] sm:$0xff] }
 0x44a   :  { %7374 = vmatprep.subr.bf16.mxu0 %v15971_v7  ;;  %v843_v7 = vld [vmem:[#allocation5 + $0x1398] sm:$0xff] }
 0x44b   :  { %7621 = vmatpush1.bf16.msra.mxu1 %v15716_v15  ;;  %v16018_v15 = vcombine.low %v1090_v32, %v1094_v1  ;;  %v15772_v27 = vcombine.low %v843_v7, %v847_v8  ;;  %v1142_v32 = vld [vmem:[#allocation5 + $0x1cf0] sm:$0xff]  ;;  %v16058_v1 = vcombine.low %v1130_v57, %v1134_v59 }
 0x44c   :  { %7622 = vmatprep.subr.bf16.mxu1 %v15725_v22  ;;  %v16027_v22 = vcombine.high %v1098_v61, %v1102_v11 }
 0x44d   :  { %7375 = vmatpush1.bf16.msra.mxu0 %v15970_v17  ;;  %v15773_v17 = vcombine.high %v843_v7, %v847_v8  ;;  %v1146_v7 = vld [vmem:[#allocation5 + $0x1d10] sm:$0xff] }
 0x44e   :  { %7376 = vmatprep.subr.bf16.mxu0 %v15979_v24  ;;  %v851_v24 = vld [vmem:[#allocation5 + $0x13d8] sm:$0xff]  ;;  %v1150_v8 = vld [vmem:[#allocation5 + $0x1d30] sm:$0xff] }
 0x44f   :  { %7623 = vmatpush1.bf16.msra.mxu1 %v15724_v58  ;;  %v16026_v58 = vcombine.low %v1098_v61, %v1102_v11  ;;  %v15780_v36 = vcombine.low %v851_v24, %v855_v50  ;;  %v16066_v11 = vcombine.low %v1138_v21, %v1142_v32 }
 0x450   :  { %7624 = vmatprep.subr.bf16.mxu1 %v15733_v54  ;;  %v16035_v54 = vcombine.high %v1106_v26, %v1110_v53 }
 0x451   :  { %7377 = vmatpush1.bf16.msra.mxu0 %v15978_v52  ;;  %v15781_v52 = vcombine.high %v851_v24, %v855_v50  ;;  %v1158_v24 = vld [vmem:[#allocation5 + $0x1d70] sm:$0xff] }
 0x452   :  { %7378 = vmatprep.subr.bf16.mxu0 %v15987_v29  ;;  %v859_v29 = vld [vmem:[#allocation5 + $0x1418] sm:$0xff] }
 0x453   :  { %7625 = vmatpush1.bf16.msra.mxu1 %v15732_v37  ;;  %v16034_v37 = vcombine.low %v1106_v26, %v1110_v53  ;;  %v15788_v48 = vcombine.low %v859_v29, %v863_v30  ;;  %v16074_v26 = vcombine.low %v1146_v7, %v1150_v8 }
 0x454   :  { %7626 = vmatprep.subr.bf16.mxu1 %v15741_v39  ;;  %v16043_v39 = vcombine.high %v1114_v31, %v1118_v35 }
 0x455   :  { %7379 = vmatpush1.bf16.msra.mxu0 %v15986_v38  ;;  %v15789_v38 = vcombine.high %v859_v29, %v863_v30  ;;  %v1166_v29 = vld [vmem:[#allocation5 + $0x1db0] sm:$0xff] }
 0x456   :  { %7380 = vmatprep.subr.bf16.mxu0 %v15995_v41  ;;  %v867_v41 = vld [vmem:[#allocation5 + $0x1458] sm:$0xff] }
 0x457   :  { %7627 = vmatpush1.bf16.msra.mxu1 %v15740_v43  ;;  %v16042_v43 = vcombine.low %v1114_v31, %v1118_v35  ;;  %v15796_v6 = vcombine.low %v867_v41, %v871_v0 }
 0x458   :  { %7628 = vmatprep.subr.bf16.mxu1 %v15749_v45  ;;  %v16051_v45 = vcombine.high %v1122_v19, %v1126_v34 }
 0x459   :  { %7381 = vmatpush1.bf16.msra.mxu0 %v15994_v44  ;;  %v15797_v44 = vcombine.high %v867_v41, %v871_v0  ;;  %v1174_v41 = vld [vmem:[#allocation5 + $0x1df0] sm:$0xff] }
 0x45a   :  { %7382 = vmatprep.subr.bf16.mxu0 %v16003_v47  ;;  %v875_v47 = vld [vmem:[#allocation5 + $0x1498] sm:$0xff] }
 0x45b   :  { %7629 = vmatpush1.bf16.msra.mxu1 %v15748_v60  ;;  %v16050_v60 = vcombine.low %v1122_v19, %v1126_v34 }
 0x45c   :  { %7630 = vmatprep.subr.bf16.mxu1 %v15757_v16  ;;  %v16059_v16 = vcombine.high %v1130_v57, %v1134_v59 }
 0x45d   :  { %7383 = vmatpush1.bf16.msra.mxu0 %v16002_v42  ;;  %v15805_v42 = vcombine.high %v875_v47, %v879_v55 }
 0x45e   :  { %7384 = vmatprep.subr.bf16.mxu0 %v16011_v63  ;;  %v883_v63 = vld [vmem:[#allocation5 + $0x14d8] sm:$0xff] }
 0x45f   :  { %7631 = vmatpush1.bf16.msra.mxu1 %v15756_v2  ;;  %v15813_v2 = vcombine.high %v883_v63, %v887_v9  ;;  %v15812_v61 = vcombine.low %v883_v63, %v887_v9  ;;  %v1190_v63 = vld [vmem:[#allocation5 + $0x1e70] sm:$0xff] }
 0x460   :  { %7632 = vmatprep.subr.bf16.mxu1 %v15765_v4  ;;  %v891_v4 = vld [vmem:[#allocation5 + $0x1518] sm:$0xff] }
 0x461   :  { %7385 = vmatpush1.bf16.msra.mxu0 %v16010_v3  ;;  %v16067_v3 = vcombine.high %v1138_v21, %v1142_v32 }
 0x462   :  { %7386 = vmatprep.subr.bf16.mxu0 %v16019_v5  ;;  %v895_v5 = vld [vmem:[#allocation5 + $0x1538] sm:$0xff] }
 0x463   :  { %7633 = vmatpush1.bf16.msra.mxu1 %v15764_v28  ;;  %v15821_v28 = vcombine.high %v891_v4, %v895_v5  ;;  %v15820_v50 = vcombine.low %v891_v4, %v895_v5  ;;  %v1198_v4 = vld [vmem:[#allocation5 + $0x1eb0] sm:$0xff] }
 0x464   :  { %7634 = vmatprep.subr.bf16.mxu1 %v15773_v17  ;;  %v903_v17 = vld [vmem:[#allocation5 + $0x1578] sm:$0xff] }
 0x465   :  { %7387 = vmatpush1.bf16.msra.mxu0 %v16018_v15  ;;  %v899_v15 = vld [vmem:[#allocation5 + $0x1558] sm:$0xff] }
 0x466   :  { %7388 = vmatprep.subr.bf16.mxu0 %v16027_v22  ;;  %v1154_v22 = vld [vmem:[#allocation5 + $0x1d50] sm:$0xff]  ;;  %v15829_v53 = vcombine.high %v899_v15, %v903_v17  ;;  %v15828_v30 = vcombine.low %v899_v15, %v903_v17 }
 0x467   :  { %7635 = vmatpush1.bf16.msra.mxu1 %v15772_v27  ;;  %v16083_v27 = vcombine.high %v1154_v22, %v1158_v24  ;;  %v16082_v31 = vcombine.low %v1154_v22, %v1158_v24  ;;  %v1206_v15 = vld [vmem:[#allocation5 + $0x1ef0] sm:$0xff] }
 0x468   :  { %7636 = vmatprep.subr.bf16.mxu1 %v15781_v52  ;;  %v911_v52 = vld [vmem:[#allocation5 + $0x15b8] sm:$0xff] }
 0x469   :  { %7389 = vmatpush1.bf16.msra.mxu0 %v16026_v58  ;;  %v907_v58 = vld [vmem:[#allocation5 + $0x1598] sm:$0xff] }
 0x46a   :  { %7390 = vmatprep.subr.bf16.mxu0 %v16035_v54  ;;  %v1162_v54 = vld [vmem:[#allocation5 + $0x1d90] sm:$0xff]  ;;  %v15837_v35 = vcombine.high %v907_v58, %v911_v52  ;;  %v15836_v0 = vcombine.low %v907_v58, %v911_v52 }
 0x46b   :  { %7637 = vmatpush1.bf16.msra.mxu1 %v15780_v36  ;;  %v16091_v36 = vcombine.high %v1162_v54, %v1166_v29  ;;  %v16090_v19 = vcombine.low %v1162_v54, %v1166_v29  ;;  %v1214_v58 = vld [vmem:[#allocation5 + $0x1f30] sm:$0xff] }
 0x46c   :  { %7647 = vmatprep.subr.bf16.mxu1 %v15789_v38  ;;  %v919_v38 = vld [vmem:[#allocation5 + $0x15f8] sm:$0xff] }
 0x46d   :  { %7391 = vmatpush1.bf16.msra.mxu0 %v16034_v37  ;;  %v915_v37 = vld [vmem:[#allocation5 + $0x15d8] sm:$0xff] }
 0x46e   :  { %7401 = vmatprep.subr.bf16.mxu0 %v16043_v39  ;;  %7639 = vmatmul.mubr.bf16.vlgmr.msra.gmra.mrb[8].mxu1 %v18754_v14  ;;  %v15804_v14 = vcombine.low %v875_v47, %v879_v55  ;;  %v1170_v39 = vld [vmem:[#allocation5 + $0x1dd0] sm:$0xff]  ;;  %v15845_v34 = vcombine.high %v915_v37, %v919_v38  ;;  %v15844_v55 = vcombine.low %v915_v37, %v919_v38 }
 0x46f   :  { %7648 = vmatpush1.bf16.msra.mxu1 %v15788_v48  ;;  %7679 = vmatprep.mubr.bf16.mxu1 %v18758_v25  ;;  %v16075_v25 = vcombine.high %v1146_v7, %v1150_v8  ;;  %v16099_v48 = vcombine.high %v1170_v39, %v1174_v41  ;;  %v1182_v47 = vld [vmem:[#allocation5 + $0x1e30] sm:$0xff]  ;;  %v16098_v57 = vcombine.low %v1170_v39, %v1174_v41 }
 0x470   :  { %7393 = vmatmul.mubr.bf16.vlgmr.msra.gmra.mrb[4].mxu0 %v18786_v33  ;;  %7649 = vmatprep.subr.bf16.mxu1 %v15797_v44  ;;  %v927_v44 = vld [vmem:[#allocation5 + $0x1638] sm:$0xff]  ;;  %v1222_v37 = vld [vmem:[#allocation5 + $0x1f70] sm:$0xff] }
 0x471   :  { %7402 = vmatpush1.bf16.msra.mxu0 %v16042_v43  ;;  %7433 = vmatprep.mubr.bf16.mxu0 %v18790_v40  ;;  %v923_v43 = vld [vmem:[#allocation5 + $0x1618] sm:$0xff] }
 0x472   :  { %7403 = vmatprep.subr.bf16.mxu0 %v16051_v45  ;;  %v1178_v45 = vld [vmem:[#allocation5 + $0x1e10] sm:$0xff]  ;;  %v15853_v59 = vcombine.high %v923_v43, %v927_v44  ;;  %v15852_v9 = vcombine.low %v923_v43, %v927_v44 }
 0x473   :  { %7650 = vmatpush1.bf16.msra.mxu1 %v15796_v6  ;;  %v16107_v6 = vcombine.high %v1178_v45, %v1182_v47  ;;  %v16106_v21 = vcombine.low %v1178_v45, %v1182_v47  ;;  %v1230_v43 = vld [vmem:[#allocation5 + $0x1fb0] sm:$0xff] }
 0x474   :  { %7651 = vmatprep.subr.bf16.mxu1 %v15805_v42  ;;  %v935_v42 = vld [vmem:[#allocation5 + $0x1678] sm:$0xff] }
 0x475   :  { %7404 = vmatpush1.bf16.msra.mxu0 %v16050_v60  ;;  %v931_v60 = vld [vmem:[#allocation5 + $0x1658] sm:$0xff] }
 0x476   :  { %7405 = vmatprep.subr.bf16.mxu0 %v16059_v16  ;;  %v1186_v16 = vld [vmem:[#allocation5 + $0x1e50] sm:$0xff]  ;;  %v15861_v32 = vcombine.high %v931_v60, %v935_v42  ;;  %v15860_v5 = vcombine.low %v931_v60, %v935_v42 }
 0x477   :  { %7652 = vmatpush1.bf16.msra.mxu1 %v15804_v14  ;;  %v16115_v14 = vcombine.high %v1186_v16, %v1190_v63  ;;  %v16114_v7 = vcombine.low %v1186_v16, %v1190_v63  ;;  %v1238_v60 = vld [vmem:[#allocation5 + $0x1ff0] sm:$0xff] }
 0x478   :  { %7653 = vmatprep.subr.bf16.mxu1 %v15813_v2  ;;  %v943_v2 = vld [vmem:[#allocation5 + $0x16b8] sm:$0xff] }
 0x479   :  { %7406 = vmatpush1.bf16.msra.mxu0 %v16058_v1  ;;  %v939_v1 = vld [vmem:[#allocation5 + $0x1698] sm:$0xff] }
 0x47a   :  { %7407 = vmatprep.subr.bf16.mxu0 %v16067_v3  ;;  %v1194_v3 = vld [vmem:[#allocation5 + $0x1e90] sm:$0xff]  ;;  %v15869_v8 = vcombine.high %v939_v1, %v943_v2  ;;  %v15868_v17 = vcombine.low %v939_v1, %v943_v2  ;;  %v7790_v1 = vld [vmem:[#allocation8 + $0x20] sm:$0xff] }
 0x47b   :  { %7654 = vmatpush1.bf16.msra.mxu1 %v15812_v61  ;;  %v16123_v61 = vcombine.high %v1194_v3, %v1198_v4  ;;  %v16122_v22 = vcombine.low %v1194_v3, %v1198_v4 }
 0x47c   :  { %7655 = vmatprep.subr.bf16.mxu1 %v15821_v28  ;;  %v951_v28 = vld [vmem:[#allocation5 + $0x16f8] sm:$0xff] }
 0x47d   :  { %7408 = vmatpush1.bf16.msra.mxu0 %v16066_v11  ;;  %v947_v11 = vld [vmem:[#allocation5 + $0x16d8] sm:$0xff] }
 0x47e   :  { %7409 = vmatprep.subr.bf16.mxu0 %v16075_v25  ;;  %v1202_v25 = vld [vmem:[#allocation5 + $0x1ed0] sm:$0xff]  ;;  %v15877_v24 = vcombine.high %v947_v11, %v951_v28  ;;  %v15876_v52 = vcombine.low %v947_v11, %v951_v28  ;;  %v7794_v11 = vld [vmem:[#allocation8 + $0x40] sm:$0xff] }
 0x47f   :  { %7656 = vmatpush1.bf16.msra.mxu1 %v15820_v50  ;;  %v16131_v50 = vcombine.high %v1202_v25, %v1206_v15  ;;  %v16130_v54 = vcombine.low %v1202_v25, %v1206_v15  ;;  %v7798_v28 = vld [vmem:[#allocation8 + $0x60] sm:$0xff] }
 0x480   :  { %7657 = vmatprep.subr.bf16.mxu1 %v15829_v53  ;;  %v959_v53 = vld [vmem:[#allocation5 + $0x1738] sm:$0xff] }
 0x481   :  { %7410 = vmatpush1.bf16.msra.mxu0 %v16074_v26  ;;  %v955_v26 = vld [vmem:[#allocation5 + $0x1718] sm:$0xff] }
 0x482   :  { %7411 = vmatprep.subr.bf16.mxu0 %v16083_v27  ;;  %v1210_v27 = vld [vmem:[#allocation5 + $0x1f10] sm:$0xff]  ;;  %v15885_v29 = vcombine.high %v955_v26, %v959_v53  ;;  %v15884_v38 = vcombine.low %v955_v26, %v959_v53  ;;  %v7802_v53 = vld [vmem:[#allocation8 + $0x80] sm:$0xff] }
 0x483   :  { %7658 = vmatpush1.bf16.msra.mxu1 %v15828_v30  ;;  %v16139_v30 = vcombine.high %v1210_v27, %v1214_v58  ;;  %v16138_v39 = vcombine.low %v1210_v27, %v1214_v58  ;;  %v7806_v27 = vld [vmem:[#allocation8 + $0xa0] sm:$0xff]  ;;  %v16174_v58 = vcombine.low %v7794_v11, %v7798_v28 }
 0x484   :  { %7659 = vmatprep.subr.bf16.mxu1 %v15837_v35  ;;  %v967_v35 = vld [vmem:[#allocation5 + $0x1778] sm:$0xff] }
 0x485   :  { %7412 = vmatpush1.bf16.msra.mxu0 %v16082_v31  ;;  %v963_v31 = vld [vmem:[#allocation5 + $0x1758] sm:$0xff] }
 0x486   :  { %7413 = vmatprep.subr.bf16.mxu0 %v16091_v36  ;;  %v1218_v36 = vld [vmem:[#allocation5 + $0x1f50] sm:$0xff]  ;;  %v15893_v41 = vcombine.high %v963_v31, %v967_v35  ;;  %v15892_v44 = vcombine.low %v963_v31, %v967_v35  ;;  %v7810_v31 = vld [vmem:[#allocation8 + $0xc0] sm:$0xff] }
 0x487   :  { %7660 = vmatpush1.bf16.msra.mxu1 %v15836_v0  ;;  %v16147_v0 = vcombine.high %v1218_v36, %v1222_v37  ;;  %v16146_v45 = vcombine.low %v1218_v36, %v1222_v37  ;;  %v7814_v35 = vld [vmem:[#allocation8 + $0xe0] sm:$0xff]  ;;  %v16182_v36 = vcombine.low %v7802_v53, %v7806_v27 }
 0x488   :  { %7661 = vmatprep.subr.bf16.mxu1 %v15845_v34  ;;  %v975_v34 = vld [vmem:[#allocation5 + $0x17b8] sm:$0xff] }
 0x489   :  { %7414 = vmatpush1.bf16.msra.mxu0 %v16090_v19  ;;  %v971_v19 = vld [vmem:[#allocation5 + $0x1798] sm:$0xff] }
 0x48a   :  { %7415 = vmatprep.subr.bf16.mxu0 %v16099_v48  ;;  %v1226_v48 = vld [vmem:[#allocation5 + $0x1f90] sm:$0xff]  ;;  %v15901_v47 = vcombine.high %v971_v19, %v975_v34  ;;  %v15900_v42 = vcombine.low %v971_v19, %v975_v34  ;;  %v7822_v19 = vld [vmem:[#allocation8 + $0x120] sm:$0xff] }
 0x48b   :  { %7662 = vmatpush1.bf16.msra.mxu1 %v15844_v55  ;;  %v16155_v55 = vcombine.high %v1226_v48, %v1230_v43  ;;  %v16154_v16 = vcombine.low %v1226_v48, %v1230_v43  ;;  %v16190_v48 = vcombine.low %v7810_v31, %v7814_v35 }
 0x48c   :  { %7663 = vmatprep.subr.bf16.mxu1 %v15853_v59  ;;  %v983_v59 = vld [vmem:[#allocation5 + $0x17f8] sm:$0xff] }
 0x48d   :  { %7416 = vmatpush1.bf16.msra.mxu0 %v16098_v57  ;;  %v979_v57 = vld [vmem:[#allocation5 + $0x17d8] sm:$0xff] }
 0x48e   :  { %7417 = vmatprep.subr.bf16.mxu0 %v16107_v6  ;;  %v1234_v6 = vld [vmem:[#allocation5 + $0x1fd0] sm:$0xff]  ;;  %v15909_v63 = vcombine.high %v979_v57, %v983_v59  ;;  %v15908_v2 = vcombine.low %v979_v57, %v983_v59 }
 0x48f   :  { %7664 = vmatpush1.bf16.msra.mxu1 %v15852_v9  ;;  %v16163_v9 = vcombine.high %v1234_v6, %v1238_v60  ;;  %v16162_v3 = vcombine.low %v1234_v6, %v1238_v60 }
 0x490   :  { %7665 = vmatprep.subr.bf16.mxu1 %v15861_v32  ;;  %v991_v32 = vld [vmem:[#allocation5 + $0x1838] sm:$0xff] }
 0x491   :  { %7418 = vmatpush1.bf16.msra.mxu0 %v16106_v21  ;;  %v987_v21 = vld [vmem:[#allocation5 + $0x1818] sm:$0xff] }
 0x492   :  { %7419 = vmatprep.subr.bf16.mxu0 %v16115_v14  ;;  %v7786_v14 = vld [vmem:[#allocation8] sm:$0xff]  ;;  %v15917_v4 = vcombine.high %v987_v21, %v991_v32  ;;  %v15916_v25 = vcombine.low %v987_v21, %v991_v32 }
 0x493   :  { %7666 = vmatpush1.bf16.msra.mxu1 %v15860_v5  ;;  %v16167_v5 = vcombine.high %v7786_v14, %v7790_v1  ;;  %v16166_v15 = vcombine.low %v7786_v14, %v7790_v1 }
 0x494   :  { %7667 = vmatprep.subr.bf16.mxu1 %v15869_v8  ;;  %v7771_v8 = vmax.f32 %v18831_v56, 0.0 }
 0x495   :  { %7420 = vmatpush1.bf16.msra.mxu0 %v16114_v7  ;;  %v995_v7 = vld [vmem:[#allocation5 + $0x1858] sm:$0xff] }
 0x496   :  { %7421 = vmatprep.subr.bf16.mxu0 %v16123_v61  ;;  %v999_v61 = vld [vmem:[#allocation5 + $0x1878] sm:$0xff]  ;;  %v18854_v26 = vpack.c.bf16 %v7771_v8, %v7771_v8 }
 0x497   :  { %7668 = vmatpush1.bf16.msra.mxu1 %v15868_v17  ;;  %v15925_v17 = vcombine.high %v995_v7, %v999_v61  ;;  %v15924_v56 = vcombine.low %v995_v7, %v999_v61 }
 0x498   :  { %7669 = vmatprep.subr.bf16.mxu1 %v15877_v24  ;;  %v1003_v24 = vld [vmem:[#allocation5 + $0x1898] sm:$0xff] }
 0x499   :  { %7422 = vmatpush1.bf16.msra.mxu0 %v16122_v22  ;;  %v16175_v22 = vcombine.high %v7794_v11, %v7798_v28  ;;  %v1051_v28 = vld [vmem:[#allocation5 + $0x1a18] sm:$0xff] }
 0x49a   :  { %7423 = vmatprep.subr.bf16.mxu0 %v16131_v50  ;;  %v1007_v50 = vld [vmem:[#allocation5 + $0x18b8] sm:$0xff] }
 0x49b   :  { %7670 = vmatpush1.bf16.msra.mxu1 %v15876_v52  ;;  %v15933_v52 = vcombine.high %v1003_v24, %v1007_v50 }
 0x49c   :  { %7671 = vmatprep.subr.bf16.mxu1 %v15885_v29  ;;  %v1011_v29 = vld [vmem:[#allocation5 + $0x18d8] sm:$0xff] }
 0x49d   :  { %7424 = vmatpush1.bf16.msra.mxu0 %v16130_v54  ;;  %v16183_v54 = vcombine.high %v7802_v53, %v7806_v27  ;;  %v1059_v27 = vld [vmem:[#allocation5 + $0x1a58] sm:$0xff] }
 0x49e   :  { %7425 = vmatprep.subr.bf16.mxu0 %v16139_v30  ;;  %v1015_v30 = vld [vmem:[#allocation5 + $0x18f8] sm:$0xff] }
 0x49f   :  { %7672 = vmatpush1.bf16.msra.mxu1 %v15884_v38  ;;  %v15941_v37 = vcombine.high %v1011_v29, %v1015_v30  ;;  %v16191_v38 = vcombine.high %v7810_v31, %v7814_v35  ;;  %v15940_v34 = vcombine.low %v1011_v29, %v1015_v30  ;;  %v1067_v35 = vld [vmem:[#allocation5 + $0x1a98] sm:$0xff] }
 0x4a0   :  { %7673 = vmatprep.subr.bf16.mxu1 %v15893_v41  ;;  %v1023_v41 = vld [vmem:[#allocation5 + $0x1938] sm:$0xff] }
 0x4a1   :  { %7426 = vmatpush1.bf16.msra.mxu0 %v16138_v39  ;;  %v1019_v39 = vld [vmem:[#allocation5 + $0x1918] sm:$0xff] }
 0x4a2   :  { %7427 = vmatprep.subr.bf16.mxu0 %v16147_v0  ;;  %v7818_v0 = vld [vmem:[#allocation8 + $0x100] sm:$0xff]  ;;  %v15949_v43 = vcombine.high %v1019_v39, %v1023_v41  ;;  %v15948_v57 = vcombine.low %v1019_v39, %v1023_v41 }
 0x4a3   :  { %7674 = vmatpush1.bf16.msra.mxu1 %v15892_v44  ;;  %v1027_v44 = vld [vmem:[#allocation5 + $0x1958] sm:$0xff]  ;;  %v16198_v59 = vcombine.low %v7818_v0, %v7822_v19 }
 0x4a4   :  { %7675 = vmatprep.subr.bf16.mxu1 %v15901_v47  ;;  %v7826_v47 = vld [vmem:[#allocation8 + $0x140] sm:$0xff] }
 0x4a5   :  { %7428 = vmatpush1.bf16.msra.mxu0 %v16146_v45  ;;  %v1031_v45 = vld [vmem:[#allocation5 + $0x1978] sm:$0xff] }
 0x4a6   :  { %7429 = vmatprep.subr.bf16.mxu0 %v16155_v55  ;;  %v7830_v55 = vld [vmem:[#allocation8 + $0x160] sm:$0xff]  ;;  %v15957_v6 = vcombine.high %v1027_v44, %v1031_v45  ;;  %v15956_v21 = vcombine.low %v1027_v44, %v1031_v45 }
 0x4a7   :  { %7676 = vmatpush1.bf16.msra.mxu1 %v15900_v42  ;;  %v16207_v60 = vcombine.high %v7826_v47, %v7830_v55  ;;  %v1035_v42 = vld [vmem:[#allocation5 + $0x1998] sm:$0xff]  ;;  %v16206_v32 = vcombine.low %v7826_v47, %v7830_v55 }
 0x4a8   :  { %7677 = vmatprep.subr.bf16.mxu1 %v15909_v63  ;;  %v7834_v63 = vld [vmem:[#allocation8 + $0x180] sm:$0xff]  ;;  %v1083_v55 = vld [vmem:[#allocation5 + $0x1b18] sm:$0xff] }
 0x4a9   :  { %7430 = vmatpush1.bf16.msra.mxu0 %v16154_v16  ;;  %v1039_v16 = vld [vmem:[#allocation5 + $0x19b8] sm:$0xff] }
 0x4aa   :  { %7431 = vmatprep.subr.bf16.mxu0 %v16163_v9  ;;  %v7838_v9 = vld [vmem:[#allocation8 + $0x1a0] sm:$0xff]  ;;  %v15965_v14 = vcombine.high %v1035_v42, %v1039_v16  ;;  %v15964_v7 = vcombine.low %v1035_v42, %v1039_v16 }
 0x4ab   :  { %7678 = vmatpush1.bf16.msra.mxu1 %v15908_v2  ;;  %v16215_v1 = vcombine.high %v7834_v63, %v7838_v9  ;;  %v1043_v2 = vld [vmem:[#allocation5 + $0x19d8] sm:$0xff]  ;;  %v16214_v8 = vcombine.low %v7834_v63, %v7838_v9 }
 0x4ac   :  { %7688 = vmatprep.subr.bf16.mxu1 %v15917_v4  ;;  %v7842_v4 = vld [vmem:[#allocation8 + $0x1c0] sm:$0xff]  ;;  %v1091_v9 = vld [vmem:[#allocation5 + $0x1b58] sm:$0xff] }
 0x4ad   :  { %7432 = vmatpush1.bf16.msra.mxu0 %v16162_v3  ;;  %v1047_v3 = vld [vmem:[#allocation5 + $0x19f8] sm:$0xff] }
 0x4ae   :  { %10900 = vmatprep.subr.bf16.mxu0 %v16167_v5  ;;  %7680 = vmatmul.mubr.bf16.vlgmr.msra.gmra.mrb[8].mxu1 %v18772_v51  ;;  %v15932_v51 = vcombine.low %v1003_v24, %v1007_v50  ;;  %v7846_v5 = vld [vmem:[#allocation8 + $0x1e0] sm:$0xff]  ;;  %v15973_v61 = vcombine.high %v1043_v2, %v1047_v3 }
 0x4af   :  { %7689 = vmatpush1.bf16.msra.mxu1 %v15916_v25  ;;  %7720 = vmatprep.mubr.bf16.mxu1 %v18776_v62  ;;  %v16199_v62 = vcombine.high %v7818_v0, %v7822_v19  ;;  %v16223_v11 = vcombine.high %v7842_v4, %v7846_v5  ;;  %v1055_v25 = vld [vmem:[#allocation5 + $0x1a38] sm:$0xff]  ;;  %v16222_v24 = vcombine.low %v7842_v4, %v7846_v5 }
 0x4b0   :  { %7434 = vmatmul.mubr.bf16.vlgmr.msra.gmra.mrb[4].mxu0 %v18798_v20  ;;  %7690 = vmatprep.subr.bf16.mxu1 %v15925_v17  ;;  %v7854_v17 = vld [vmem:[#allocation8 + $0x220] sm:$0xff]  ;;  %v15981_v50 = vcombine.high %v1051_v28, %v1055_v25  ;;  %v1075_v19 = vld [vmem:[#allocation5 + $0x1ad8] sm:$0xff] }
 0x4b1   :  { %10901 = vmatpush1.bf16.msra.mxu0 %v16166_v15  ;;  %10932 = vmatprep.mubr.bf16.mxu0 %v18854_v26  ;;  %v7850_v15 = vld [vmem:[#allocation8 + $0x200] sm:$0xff]  ;;  %v1099_v5 = vld [vmem:[#allocation5 + $0x1b98] sm:$0xff] }
 0x4b2   :  { %10902 = vmatprep.subr.bf16.mxu0 %v16175_v22  ;;  %v15972_v22 = vcombine.low %v1043_v2, %v1047_v3  ;;  %v16231_v53 = vcombine.high %v7850_v15, %v7854_v17  ;;  %v16230_v29 = vcombine.low %v7850_v15, %v7854_v17 }
 0x4b3   :  { %7691 = vmatpush1.bf16.msra.mxu1 %v15924_v56  ;;  %v1063_v56 = vld [vmem:[#allocation5 + $0x1a78] sm:$0xff] }
 0x4b4   :  { %7692 = vmatprep.subr.bf16.mxu1 %v15933_v52  ;;  %v7862_v52 = vld [vmem:[#allocation8 + $0x260] sm:$0xff]  ;;  %v15989_v30 = vcombine.high %v1059_v27, %v1063_v56 }
 0x4b5   :  { %10903 = vmatpush1.bf16.msra.mxu0 %v16174_v58  ;;  %v7858_v58 = vld [vmem:[#allocation8 + $0x240] sm:$0xff] }
 0x4b6   :  { %10904 = vmatprep.subr.bf16.mxu0 %v16183_v54  ;;  %v15980_v54 = vcombine.low %v1051_v28, %v1055_v25  ;;  %v16239_v31 = vcombine.high %v7858_v58, %v7862_v52  ;;  %v16238_v39 = vcombine.low %v7858_v58, %v7862_v52 }
 0x4b7   :  { %7693 = vmatpush1.bf16.msra.mxu1 %v15932_v51  ;;  %v1071_v51 = vld [vmem:[#allocation5 + $0x1ab8] sm:$0xff] }
 0x4b8   :  { %7694 = vmatprep.subr.bf16.mxu1 %v15941_v37  ;;  %v7870_v37 = vld [vmem:[#allocation8 + $0x2a0] sm:$0xff]  ;;  %v15997_v41 = vcombine.high %v1067_v35, %v1071_v51 }
 0x4b9   :  { %10905 = vmatpush1.bf16.msra.mxu0 %v16182_v36  ;;  %v7866_v36 = vld [vmem:[#allocation8 + $0x280] sm:$0xff] }
 0x4ba   :  { %10906 = vmatprep.subr.bf16.mxu0 %v16191_v38  ;;  %v15988_v38 = vcombine.low %v1059_v27, %v1063_v56  ;;  %v16247_v0 = vcombine.high %v7866_v36, %v7870_v37  ;;  %v16246_v44 = vcombine.low %v7866_v36, %v7870_v37  ;;  %v7906_v27 = vld [vmem:[#allocation8 + $0x3c0] sm:$0xff] }
 0x4bb   :  { %7695 = vmatpush1.bf16.msra.mxu1 %v15940_v34  ;;  %v1079_v34 = vld [vmem:[#allocation5 + $0x1af8] sm:$0xff]  ;;  %v7910_v56 = vld [vmem:[#allocation8 + $0x3e0] sm:$0xff] }
 0x4bc   :  { %7696 = vmatprep.subr.bf16.mxu1 %v15949_v43  ;;  %v7878_v43 = vld [vmem:[#allocation8 + $0x2e0] sm:$0xff]  ;;  %v16005_v45 = vcombine.high %v1075_v19, %v1079_v34 }
 0x4bd   :  { %10907 = vmatpush1.bf16.msra.mxu0 %v16190_v48  ;;  %v7874_v48 = vld [vmem:[#allocation8 + $0x2c0] sm:$0xff] }
 0x4be   :  { %10908 = vmatprep.subr.bf16.mxu0 %v16199_v62  ;;  %v15996_v62 = vcombine.low %v1067_v35, %v1071_v51  ;;  %v16255_v47 = vcombine.high %v7874_v48, %v7878_v43  ;;  %v16254_v42 = vcombine.low %v7874_v48, %v7878_v43  ;;  %v7914_v51 = vld [vmem:[#allocation8 + $0x400] sm:$0xff]  ;;  %v1127_v48 = vld [vmem:[#allocation5 + $0x1c78] sm:$0xff] }
 0x4bf   :  { %7697 = vmatpush1.bf16.msra.mxu1 %v15948_v57  ;;  %v1087_v57 = vld [vmem:[#allocation5 + $0x1b38] sm:$0xff]  ;;  %v7918_v36 = vld [vmem:[#allocation8 + $0x420] sm:$0xff] }
 0x4c0   :  { %7698 = vmatprep.subr.bf16.mxu1 %v15957_v6  ;;  %v7886_v6 = vld [vmem:[#allocation8 + $0x320] sm:$0xff]  ;;  %v16013_v16 = vcombine.high %v1083_v55, %v1087_v57 }
 0x4c1   :  { %10909 = vmatpush1.bf16.msra.mxu0 %v16198_v59  ;;  %v7882_v59 = vld [vmem:[#allocation8 + $0x300] sm:$0xff] }
 0x4c2   :  { %10910 = vmatprep.subr.bf16.mxu0 %v16207_v60  ;;  %v16004_v60 = vcombine.low %v1075_v19, %v1079_v34  ;;  %v16263_v63 = vcombine.high %v7882_v59, %v7886_v6  ;;  %v16262_v2 = vcombine.low %v7882_v59, %v7886_v6  ;;  %v1123_v19 = vld [vmem:[#allocation5 + $0x1c58] sm:$0xff]  ;;  %v7922_v43 = vld [vmem:[#allocation8 + $0x440] sm:$0xff] }
 0x4c3   :  { %7699 = vmatpush1.bf16.msra.mxu1 %v15956_v21  ;;  %v1095_v21 = vld [vmem:[#allocation5 + $0x1b78] sm:$0xff]  ;;  %v7930_v6 = vld [vmem:[#allocation8 + $0x480] sm:$0xff] }
 0x4c4   :  { %7700 = vmatprep.subr.bf16.mxu1 %v15965_v14  ;;  %v7894_v14 = vld [vmem:[#allocation8 + $0x360] sm:$0xff]  ;;  %v16021_v3 = vcombine.high %v1091_v9, %v1095_v21  ;;  %v16020_v28 = vcombine.low %v1091_v9, %v1095_v21  ;;  %v1135_v59 = vld [vmem:[#allocation5 + $0x1cb8] sm:$0xff] }
 0x4c5   :  { %10911 = vmatpush1.bf16.msra.mxu0 %v16206_v32  ;;  %v7890_v32 = vld [vmem:[#allocation8 + $0x340] sm:$0xff]  ;;  %v1139_v21 = vld [vmem:[#allocation5 + $0x1cd8] sm:$0xff] }
 0x4c6   :  { %10912 = vmatprep.subr.bf16.mxu0 %v16215_v1  ;;  %v16012_v1 = vcombine.low %v1083_v55, %v1087_v57  ;;  %v16271_v4 = vcombine.high %v7890_v32, %v7894_v14  ;;  %v16270_v25 = vcombine.low %v7890_v32, %v7894_v14  ;;  %v1131_v57 = vld [vmem:[#allocation5 + $0x1c98] sm:$0xff]  ;;  %v7938_v14 = vld [vmem:[#allocation8 + $0x4c0] sm:$0xff] }
 0x4c7   :  { %7701 = vmatpush1.bf16.msra.mxu1 %v15964_v7  ;;  %v1103_v7 = vld [vmem:[#allocation5 + $0x1bb8] sm:$0xff] }
 0x4c8   :  { %7702 = vmatprep.subr.bf16.mxu1 %v15973_v61  ;;  %v7898_v61 = vld [vmem:[#allocation8 + $0x380] sm:$0xff]  ;;  %v16029_v15 = vcombine.high %v1099_v5, %v1103_v7  ;;  %v16028_v58 = vcombine.low %v1099_v5, %v1103_v7  ;;  %v1143_v32 = vld [vmem:[#allocation5 + $0x1cf8] sm:$0xff] }
 0x4c9   :  { %10913 = vmatpush1.bf16.msra.mxu0 %v16214_v8  ;;  %v18861_v8 = vsub.s32 3, %v18817_v12  ;;  %v1147_v5 = vld [vmem:[#allocation5 + $0x1d18] sm:$0xff] }
 0x4ca   :  { %10914 = vmatprep.subr.bf16.mxu0 %v16223_v11  ;;  %v7902_v11 = vld [vmem:[#allocation8 + $0x3a0] sm:$0xff]  ;;  %v1151_v7 = vld [vmem:[#allocation5 + $0x1d38] sm:$0xff] }
 0x4cb   :  { %7703 = vmatpush1.bf16.msra.mxu1 %v15972_v22  ;;  %v16279_v17 = vcombine.high %v7898_v61, %v7902_v11  ;;  %v1107_v22 = vld [vmem:[#allocation5 + $0x1bd8] sm:$0xff]  ;;  %v16278_v52 = vcombine.low %v7898_v61, %v7902_v11  ;;  %v7946_v61 = vld [vmem:[#allocation8 + $0x500] sm:$0xff] }
 0x4cc   :  { %7704 = vmatprep.subr.bf16.mxu1 %v15981_v50  ;;  %v18863_v50 = vld [vmem:[#allocation7] sm:$0xff]  ;;  %v7950_v11 = vld [vmem:[#allocation8 + $0x520] sm:$0xff] }
 0x4cd   :  { %10915 = vmatpush1.bf16.msra.mxu0 %v16222_v24  ;;  %v1111_v24 = vld [vmem:[#allocation5 + $0x1bf8] sm:$0xff] }
 0x4ce   :  { %10916 = vmatprep.subr.bf16.mxu0 %v16231_v53  ;;  %v1257_v53 = vrot.slane %v18863_v50, %v18861_v8  ;;  %v16036_v37 = vcombine.low %v1107_v22, %v1111_v24 }
 0x4cf   :  { %7705 = vmatpush1.bf16.msra.mxu1 %v15980_v54  ;;  %v16037_v54 = vcombine.high %v1107_v22, %v1111_v24  ;;  %v1159_v22 = vld [vmem:[#allocation5 + $0x1d78] sm:$0xff]  ;;  %v7954_v24 = vld [vmem:[#allocation8 + $0x540] sm:$0xff] }
 0x4d0   :  { %7706 = vmatprep.subr.bf16.mxu1 %v15989_v30  ;;  %v1115_v30 = vld [vmem:[#allocation5 + $0x1c18] sm:$0xff]  ;;  %v17170_v35 = vadd.f32 %v18843_v23, %v1257_v53  ;;  %v16294_v23 = vcombine.low %v7914_v51, %v7918_v36  ;;  %v7958_v53 = vld [vmem:[#allocation8 + $0x560] sm:$0xff] }
 0x4d1   :  { %10917 = vmatpush1.bf16.msra.mxu0 %v16230_v29  ;;  %v16287_v29 = vcombine.high %v7906_v27, %v7910_v56 }
 0x4d2   :  { %10918 = vmatprep.subr.bf16.mxu0 %v16239_v31  ;;  %v1119_v31 = vld [vmem:[#allocation5 + $0x1c38] sm:$0xff]  ;;  %v7773_v34 = vmax.f32 %v17170_v35, 0.0 }
 0x4d3   :  { %7707 = vmatpush1.bf16.msra.mxu1 %v15988_v38  ;;  %v16286_v38 = vcombine.low %v7906_v27, %v7910_v56  ;;  %v16076_v27 = vcombine.low %v1147_v5, %v1151_v7  ;;  %v16326_v56 = vcombine.low %v7946_v61, %v7950_v11 }
 0x4d4   :  { %7708 = vmatprep.subr.bf16.mxu1 %v15997_v41  ;;  %v7770_v41 = vmax.f32 %v18829_v46, 0.0  ;;  %v18871_v46 = vpack.c.bf16 %v7773_v34, %v7773_v34 }
 0x4d5   :  { %10919 = vmatpush1.bf16.msra.mxu0 %v16238_v39  ;;  %v16045_v39 = vcombine.high %v1115_v30, %v1119_v31 }
 0x4d6   :  { %10920 = vmatprep.subr.bf16.mxu0 %v16247_v0  ;;  %v16295_v0 = vcombine.high %v7914_v51, %v7918_v36  ;;  %v16334_v51 = vcombine.low %v7954_v24, %v7958_v53 }
 0x4d7   :  { %7709 = vmatpush1.bf16.msra.mxu1 %v15996_v62  ;;  %v7926_v62 = vld [vmem:[#allocation8 + $0x460] sm:$0xff] }
 0x4d8   :  { %7710 = vmatprep.subr.bf16.mxu1 %v16005_v45  ;;  %v18869_v45 = vpack.c.bf16 %v7770_v41, %v7770_v41  ;;  %v16303_v55 = vcombine.high %v7922_v43, %v7926_v62  ;;  %v7970_v41 = vld [vmem:[#allocation8 + $0x5c0] sm:$0xff] }
 0x4d9   :  { %10921 = vmatpush1.bf16.msra.mxu0 %v16246_v44  ;;  %v16044_v44 = vcombine.low %v1115_v30, %v1119_v31  ;;  %v7962_v30 = vld [vmem:[#allocation8 + $0x580] sm:$0xff] }
 0x4da   :  { %10922 = vmatprep.subr.bf16.mxu0 %v16255_v47  ;;  %v16053_v47 = vcombine.high %v1123_v19, %v1127_v48  ;;  %v7966_v31 = vld [vmem:[#allocation8 + $0x5a0] sm:$0xff] }
 0x4db   :  { %7711 = vmatpush1.bf16.msra.mxu1 %v16004_v60  ;;  %v7934_v60 = vld [vmem:[#allocation8 + $0x4a0] sm:$0xff]  ;;  %v16342_v34 = vcombine.low %v7962_v30, %v7966_v31 }
 0x4dc   :  { %7712 = vmatprep.subr.bf16.mxu1 %v16013_v16  ;;  %v16302_v16 = vcombine.low %v7922_v43, %v7926_v62  ;;  %v16311_v9 = vcombine.high %v7930_v6, %v7934_v60  ;;  %v1179_v62 = vld [vmem:[#allocation5 + $0x1e18] sm:$0xff] }
 0x4dd   :  { %10923 = vmatpush1.bf16.msra.mxu0 %v16254_v42  ;;  %v16052_v42 = vcombine.low %v1123_v19, %v1127_v48 }
 0x4de   :  { %10924 = vmatprep.subr.bf16.mxu0 %v16263_v63  ;;  %v16061_v63 = vcombine.high %v1131_v57, %v1135_v59 }
 0x4df   :  { %7713 = vmatpush1.bf16.msra.mxu1 %v16012_v1  ;;  %v7942_v1 = vld [vmem:[#allocation8 + $0x4e0] sm:$0xff] }
 0x4e0   :  { %7714 = vmatprep.subr.bf16.mxu1 %v16021_v3  ;;  %v16069_v3 = vcombine.high %v1139_v21, %v1143_v32 }
 0x4e1   :  { %10925 = vmatpush1.bf16.msra.mxu0 %v16262_v2  ;;  %v16310_v2 = vcombine.low %v7930_v6, %v7934_v60  ;;  %v1187_v60 = vld [vmem:[#allocation5 + $0x1e58] sm:$0xff] }
 0x4e2   :  { %10926 = vmatprep.subr.bf16.mxu0 %v16271_v4  ;;  %v16319_v4 = vcombine.high %v7938_v14, %v7942_v1 }
 0x4e3   :  { %7715 = vmatpush1.bf16.msra.mxu1 %v16020_v28  ;;  %v16068_v28 = vcombine.low %v1139_v21, %v1143_v32 }
 0x4e4   :  { %7716 = vmatprep.subr.bf16.mxu1 %v16029_v15  ;;  %v16077_v15 = vcombine.high %v1147_v5, %v1151_v7 }
 0x4e5   :  { %10927 = vmatpush1.bf16.msra.mxu0 %v16270_v25  ;;  %v16318_v25 = vcombine.low %v7938_v14, %v7942_v1  ;;  %v1195_v1 = vld [vmem:[#allocation5 + $0x1e98] sm:$0xff] }
 0x4e6   :  { %10928 = vmatprep.subr.bf16.mxu0 %v16279_v17  ;;  %v1155_v17 = vld [vmem:[#allocation5 + $0x1d58] sm:$0xff] }
 0x4e7   :  { %7717 = vmatpush1.bf16.msra.mxu1 %v16028_v58  ;;  %v16085_v58 = vcombine.high %v1155_v17, %v1159_v22  ;;  %v16084_v35 = vcombine.low %v1155_v17, %v1159_v22 }
 0x4e8   :  { %7718 = vmatprep.subr.bf16.mxu1 %v16037_v54  ;;  %v1163_v54 = vld [vmem:[#allocation5 + $0x1d98] sm:$0xff] }
 0x4e9   :  { %10929 = vmatpush1.bf16.msra.mxu0 %v16278_v52  ;;  %v16335_v52 = vcombine.high %v7954_v24, %v7958_v53  ;;  %v1211_v53 = vld [vmem:[#allocation5 + $0x1f18] sm:$0xff] }
 0x4ea   :  { %10930 = vmatprep.subr.bf16.mxu0 %v16287_v29  ;;  %v1167_v29 = vld [vmem:[#allocation5 + $0x1db8] sm:$0xff] }
 0x4eb   :  { %7719 = vmatpush1.bf16.msra.mxu1 %v16036_v37  ;;  %v16093_v36 = vcombine.high %v1163_v54, %v1167_v29  ;;  %v16343_v37 = vcombine.high %v7962_v30, %v7966_v31  ;;  %v16092_v19 = vcombine.low %v1163_v54, %v1167_v29  ;;  %v1219_v31 = vld [vmem:[#allocation5 + $0x1f58] sm:$0xff] }
 0x4ec   :  { %7729 = vmatprep.subr.bf16.mxu1 %v16045_v39  ;;  %v1175_v39 = vld [vmem:[#allocation5 + $0x1df8] sm:$0xff] }
 0x4ed   :  { %10931 = vmatpush1.bf16.msra.mxu0 %v16286_v38  ;;  %v1171_v38 = vld [vmem:[#allocation5 + $0x1dd8] sm:$0xff] }
 0x4ee   :  { %10941 = vmatprep.subr.bf16.mxu0 %v16295_v0  ;;  %7721 = vmatmul.mubr.bf16.vlgmr.msra.gmra.mrb[8].mxu1 %v18786_v33  ;;  %v16060_v33 = vcombine.low %v1131_v57, %v1135_v59  ;;  %v7974_v0 = vld [vmem:[#allocation8 + $0x5e0] sm:$0xff]  ;;  %v16101_v48 = vcombine.high %v1171_v38, %v1175_v39 }
 0x4ef   :  { %7730 = vmatpush1.bf16.msra.mxu1 %v16044_v44  ;;  %7761 = vmatprep.mubr.bf16.mxu1 %v18790_v40  ;;  %v16327_v40 = vcombine.high %v7946_v61, %v7950_v11  ;;  %v16351_v43 = vcombine.high %v7970_v41, %v7974_v0  ;;  %v1183_v44 = vld [vmem:[#allocation5 + $0x1e38] sm:$0xff]  ;;  %v16350_v57 = vcombine.low %v7970_v41, %v7974_v0  ;;  %v18878_v41 = vsub.s32 2, %v18817_v12 }
 0x4f0   :  { %10933 = vmatmul.mubr.bf16.vlgmr.msra.gmra.mrb[8].mxu0 %v18869_v45  ;;  %7731 = vmatprep.subr.bf16.mxu1 %v16053_v47  ;;  %v7982_v47 = vld [vmem:[#allocation8 + $0x620] sm:$0xff]  ;;  %v16109_v59 = vcombine.high %v1179_v62, %v1183_v44  ;;  %v1203_v11 = vld [vmem:[#allocation5 + $0x1ed8] sm:$0xff] }
 0x4f1   :  { %10942 = vmatpush1.bf16.msra.mxu0 %v16294_v23  ;;  %10973 = vmatprep.mubr.bf16.mxu0 %v18871_v46  ;;  %v7978_v23 = vld [vmem:[#allocation8 + $0x600] sm:$0xff] }
 0x4f2   :  { %10943 = vmatprep.subr.bf16.mxu0 %v16303_v55  ;;  %v16100_v55 = vcombine.low %v1171_v38, %v1175_v39  ;;  %v16359_v6 = vcombine.high %v7978_v23, %v7982_v47  ;;  %v16358_v21 = vcombine.low %v7978_v23, %v7982_v47  ;;  %v1253_v47 = vrot.slane %v18863_v50, %v18878_v41 }
 0x4f3   :  { %7732 = vmatpush1.bf16.msra.mxu1 %v16052_v42  ;;  %v1191_v42 = vld [vmem:[#allocation5 + $0x1e78] sm:$0xff] }
 0x4f4   :  { %7733 = vmatprep.subr.bf16.mxu1 %v16061_v63  ;;  %v7990_v63 = vld [vmem:[#allocation8 + $0x660] sm:$0xff]  ;;  %v16117_v32 = vcombine.high %v1187_v60, %v1191_v42 }
 0x4f5   :  { %10944 = vmatpush1.bf16.msra.mxu0 %v16302_v16  ;;  %v7986_v16 = vld [vmem:[#allocation8 + $0x640] sm:$0xff] }
 0x4f6   :  { %10945 = vmatprep.subr.bf16.mxu0 %v16311_v9  ;;  %v16108_v9 = vcombine.low %v1179_v62, %v1183_v44  ;;  %v16367_v14 = vcombine.high %v7986_v16, %v7990_v63  ;;  %v16366_v5 = vcombine.low %v7986_v16, %v7990_v63 }
 0x4f7   :  { %7734 = vmatpush1.bf16.msra.mxu1 %v16060_v33  ;;  %v1199_v33 = vld [vmem:[#allocation5 + $0x1eb8] sm:$0xff] }
 0x4f8   :  { %7735 = vmatprep.subr.bf16.mxu1 %v16069_v3  ;;  %v7998_v3 = vld [vmem:[#allocation8 + $0x6a0] sm:$0xff]  ;;  %v16125_v7 = vcombine.high %v1195_v1, %v1199_v33 }
 0x4f9   :  { %10946 = vmatpush1.bf16.msra.mxu0 %v16310_v2  ;;  %v7994_v2 = vld [vmem:[#allocation8 + $0x680] sm:$0xff] }
 0x4fa   :  { %10947 = vmatprep.subr.bf16.mxu0 %v16319_v4  ;;  %v16116_v4 = vcombine.low %v1187_v60, %v1191_v42  ;;  %v16375_v61 = vcombine.high %v7994_v2, %v7998_v3  ;;  %v16374_v17 = vcombine.low %v7994_v2, %v7998_v3  ;;  %v8038_v60 = vld [vmem:[#allocation8 + $0x7e0] sm:$0xff] }
 0x4fb   :  { %7736 = vmatpush1.bf16.msra.mxu1 %v16068_v28  ;;  %v1207_v28 = vld [vmem:[#allocation5 + $0x1ef8] sm:$0xff] }
 0x4fc   :  { %7737 = vmatprep.subr.bf16.mxu1 %v16077_v15  ;;  %v8006_v15 = vld [vmem:[#allocation8 + $0x6e0] sm:$0xff]  ;;  %v16133_v22 = vcombine.high %v1203_v11, %v1207_v28 }
 0x4fd   :  { %10948 = vmatpush1.bf16.msra.mxu0 %v16318_v25  ;;  %v8002_v25 = vld [vmem:[#allocation8 + $0x6c0] sm:$0xff] }
 0x4fe   :  { %10949 = vmatprep.subr.bf16.mxu0 %v16327_v40  ;;  %v16124_v40 = vcombine.low %v1195_v1, %v1199_v33  ;;  %v16383_v24 = vcombine.high %v8002_v25, %v8006_v15  ;;  %v16382_v54 = vcombine.low %v8002_v25, %v8006_v15  ;;  %v8042_v1 = vld [vmem:[#allocation8 + $0x800] sm:$0xff] }
 0x4ff   :  { %7738 = vmatpush1.bf16.msra.mxu1 %v16076_v27  ;;  %v1215_v27 = vld [vmem:[#allocation5 + $0x1f38] sm:$0xff]  ;;  %v8046_v33 = vld [vmem:[#allocation8 + $0x820] sm:$0xff] }
 0x500   :  { %7739 = vmatprep.subr.bf16.mxu1 %v16085_v58  ;;  %v8014_v58 = vld [vmem:[#allocation8 + $0x720] sm:$0xff]  ;;  %v16141_v29 = vcombine.high %v1211_v53, %v1215_v27 }
 0x501   :  { %10950 = vmatpush1.bf16.msra.mxu0 %v16326_v56  ;;  %v8010_v56 = vld [vmem:[#allocation8 + $0x700] sm:$0xff] }
 0x502   :  { %10951 = vmatprep.subr.bf16.mxu0 %v16335_v52  ;;  %v16132_v52 = vcombine.low %v1203_v11, %v1207_v28  ;;  %v16391_v30 = vcombine.high %v8010_v56, %v8014_v58  ;;  %v16390_v38 = vcombine.low %v8010_v56, %v8014_v58  ;;  %v16423_v11 = vcombine.high %v8042_v1, %v8046_v33  ;;  %v8054_v25 = vld [vmem:[#allocation8 + $0x860] sm:$0xff] }
 0x503   :  { %7740 = vmatpush1.bf16.msra.mxu1 %v16084_v35  ;;  %v1223_v35 = vld [vmem:[#allocation5 + $0x1f78] sm:$0xff]  ;;  %v8058_v56 = vld [vmem:[#allocation8 + $0x880] sm:$0xff] }
 0x504   :  { %7741 = vmatprep.subr.bf16.mxu1 %v16093_v36  ;;  %v8022_v36 = vld [vmem:[#allocation8 + $0x760] sm:$0xff]  ;;  %v16149_v39 = vcombine.high %v1219_v31, %v1223_v35  ;;  %v16148_v62 = vcombine.low %v1219_v31, %v1223_v35 }
 0x505   :  { %10952 = vmatpush1.bf16.msra.mxu0 %v16334_v51  ;;  %v8018_v51 = vld [vmem:[#allocation8 + $0x740] sm:$0xff] }
 0x506   :  { %10953 = vmatprep.subr.bf16.mxu0 %v16343_v37  ;;  %v16140_v37 = vcombine.low %v1211_v53, %v1215_v27  ;;  %v16399_v0 = vcombine.high %v8018_v51, %v8022_v36  ;;  %v16398_v44 = vcombine.low %v8018_v51, %v8022_v36  ;;  %v8062_v58 = vld [vmem:[#allocation8 + $0x8a0] sm:$0xff] }
 0x507   :  { %7742 = vmatpush1.bf16.msra.mxu1 %v16092_v19  ;;  %v1227_v19 = vld [vmem:[#allocation5 + $0x1f98] sm:$0xff]  ;;  %v16439_v31 = vcombine.high %v8058_v56, %v8062_v58  ;;  %v8070_v51 = vld [vmem:[#allocation8 + $0x8e0] sm:$0xff] }
 0x508   :  { %7743 = vmatprep.subr.bf16.mxu1 %v16101_v48  ;;  %v8026_v48 = vld [vmem:[#allocation8 + $0x780] sm:$0xff] }
 0x509   :  { %10954 = vmatpush1.bf16.msra.mxu0 %v16342_v34  ;;  %v1231_v34 = vld [vmem:[#allocation5 + $0x1fb8] sm:$0xff] }
 0x50a   :  { %10955 = vmatprep.subr.bf16.mxu0 %v16351_v43  ;;  %v8030_v43 = vld [vmem:[#allocation8 + $0x7a0] sm:$0xff]  ;;  %v16157_v23 = vcombine.high %v1227_v19, %v1231_v34  ;;  %v16156_v42 = vcombine.low %v1227_v19, %v1231_v34 }
 0x50b   :  { %7744 = vmatpush1.bf16.msra.mxu1 %v16100_v55  ;;  %v16407_v55 = vcombine.high %v8026_v48, %v8030_v43  ;;  %v16406_v16 = vcombine.low %v8026_v48, %v8030_v43  ;;  %v8074_v34 = vld [vmem:[#allocation8 + $0x900] sm:$0xff] }
 0x50c   :  { %7745 = vmatprep.subr.bf16.mxu1 %v16109_v59  ;;  %v1239_v59 = vld [vmem:[#allocation5 + $0x1ff8] sm:$0xff]  ;;  %v8078_v48 = vld [vmem:[#allocation8 + $0x920] sm:$0xff] }
 0x50d   :  { %10956 = vmatpush1.bf16.msra.mxu0 %v16350_v57  ;;  %v1235_v57 = vld [vmem:[#allocation5 + $0x1fd8] sm:$0xff] }
 0x50e   :  { %10957 = vmatprep.subr.bf16.mxu0 %v16359_v6  ;;  %v8034_v6 = vld [vmem:[#allocation8 + $0x7c0] sm:$0xff]  ;;  %v16165_v63 = vcombine.high %v1235_v57, %v1239_v59  ;;  %v16164_v2 = vcombine.low %v1235_v57, %v1239_v59 }
 0x50f   :  { %7746 = vmatpush1.bf16.msra.mxu1 %v16108_v9  ;;  %v17169_v9 = vadd.f32 %v18841_v13, %v1253_v47  ;;  %v16414_v3 = vcombine.low %v8034_v6, %v8038_v60  ;;  %v8050_v13 = vld [vmem:[#allocation8 + $0x840] sm:$0xff]  ;;  %v16455_v47 = vcombine.high %v8074_v34, %v8078_v48 }
 0x510   :  { %7747 = vmatprep.subr.bf16.mxu1 %v16117_v32  ;;  %v7787_v32 = vld [vmem:[#allocation8 + $0x8] sm:$0xff]  ;;  %v16431_v53 = vcombine.high %v8050_v13, %v8054_v25  ;;  %v8082_v57 = vld [vmem:[#allocation8 + $0x940] sm:$0xff] }
 0x511   :  { %10958 = vmatpush1.bf16.msra.mxu0 %v16358_v21  ;;  %v16415_v21 = vcombine.high %v8034_v6, %v8038_v60  ;;  %v8086_v59 = vld [vmem:[#allocation8 + $0x960] sm:$0xff]  ;;  %v7835_v60 = vld [vmem:[#allocation8 + $0x188] sm:$0xff] }
 0x512   :  { %10959 = vmatprep.subr.bf16.mxu0 %v16367_v14  ;;  %v7791_v14 = vld [vmem:[#allocation8 + $0x28] sm:$0xff] }
 0x513   :  { %7748 = vmatpush1.bf16.msra.mxu1 %v16116_v4  ;;  %v16169_v4 = vcombine.high %v7787_v32, %v7791_v14  ;;  %v16168_v28 = vcombine.low %v7787_v32, %v7791_v14  ;;  %v8094_v32 = vld [vmem:[#allocation8 + $0x9a0] sm:$0xff] }
 0x514   :  { %7749 = vmatprep.subr.bf16.mxu1 %v16125_v7  ;;  %v7795_v7 = vld [vmem:[#allocation8 + $0x48] sm:$0xff] }
 0x515   :  { %10960 = vmatpush1.bf16.msra.mxu0 %v16366_v5  ;;  %v7772_v5 = vmax.f32 %v17169_v9, 0.0 }
 0x516   :  { %10961 = vmatprep.subr.bf16.mxu0 %v16375_v61  ;;  %v7799_v61 = vld [vmem:[#allocation8 + $0x68] sm:$0xff] }
 0x517   :  { %7750 = vmatpush1.bf16.msra.mxu1 %v16124_v40  ;;  %v16177_v15 = vcombine.high %v7795_v7, %v7799_v61  ;;  %v18883_v40 = vpack.c.bf16 %v7772_v5, %v7772_v5  ;;  %v16176_v27 = vcombine.low %v7795_v7, %v7799_v61  ;;  %v8098_v5 = vld [vmem:[#allocation8 + $0x9c0] sm:$0xff] }
 0x518   :  { %7751 = vmatprep.subr.bf16.mxu1 %v16133_v22  ;;  %v7807_v22 = vld [vmem:[#allocation8 + $0xa8] sm:$0xff]  ;;  %v8102_v7 = vld [vmem:[#allocation8 + $0x9e0] sm:$0xff] }
 0x519   :  { %10962 = vmatpush1.bf16.msra.mxu0 %v16374_v17  ;;  %v7803_v17 = vld [vmem:[#allocation8 + $0x88] sm:$0xff] }
 0x51a   :  { %10963 = vmatprep.subr.bf16.mxu0 %v16383_v24  ;;  %v16422_v24 = vcombine.low %v8042_v1, %v8046_v33  ;;  %v16184_v35 = vcombine.low %v7803_v17, %v7807_v22  ;;  %v7843_v1 = vld [vmem:[#allocation8 + $0x1c8] sm:$0xff] }
 0x51b   :  { %7752 = vmatpush1.bf16.msra.mxu1 %v16132_v52  ;;  %v16185_v52 = vcombine.high %v7803_v17, %v7807_v22  ;;  %v7847_v33 = vld [vmem:[#allocation8 + $0x1e8] sm:$0xff]  ;;  %v8106_v17 = vld [vmem:[#allocation8 + $0xa00] sm:$0xff] }
 0x51c   :  { %7753 = vmatprep.subr.bf16.mxu1 %v16141_v29  ;;  %v7815_v29 = vld [vmem:[#allocation8 + $0xe8] sm:$0xff]  ;;  %v16225_v61 = vcombine.high %v7843_v1, %v7847_v33  ;;  %v8110_v22 = vld [vmem:[#allocation8 + $0xa20] sm:$0xff] }
 0x51d   :  { %10964 = vmatpush1.bf16.msra.mxu0 %v16382_v54  ;;  %v7811_v54 = vld [vmem:[#allocation8 + $0xc8] sm:$0xff] }
 0x51e   :  { %10965 = vmatprep.subr.bf16.mxu0 %v16391_v30  ;;  %v16430_v30 = vcombine.low %v8050_v13, %v8054_v25  ;;  %v16193_v36 = vcombine.high %v7811_v54, %v7815_v29  ;;  %v16192_v19 = vcombine.low %v7811_v54, %v7815_v29  ;;  %v16479_v25 = vcombine.high %v8098_v5, %v8102_v7  ;;  %v8114_v54 = vld [vmem:[#allocation8 + $0xa40] sm:$0xff] }
 0x51f   :  { %7754 = vmatpush1.bf16.msra.mxu1 %v16140_v37  ;;  %v7819_v37 = vld [vmem:[#allocation8 + $0x108] sm:$0xff]  ;;  %v8118_v29 = vld [vmem:[#allocation8 + $0xa60] sm:$0xff] }
 0x520   :  { %7755 = vmatprep.subr.bf16.mxu1 %v16149_v39  ;;  %v16438_v39 = vcombine.low %v8058_v56, %v8062_v58  ;;  %v16478_v56 = vcombine.low %v8098_v5, %v8102_v7  ;;  %v16487_v58 = vcombine.high %v8106_v17, %v8110_v22 }
 0x521   :  { %10966 = vmatpush1.bf16.msra.mxu0 %v16390_v38  ;;  %v7823_v38 = vld [vmem:[#allocation8 + $0x128] sm:$0xff] }
 0x522   :  { %10967 = vmatprep.subr.bf16.mxu0 %v16399_v0  ;;  %v16201_v43 = vcombine.high %v7819_v37, %v7823_v38 }
 0x523   :  { %7756 = vmatpush1.bf16.msra.mxu1 %v16148_v62  ;;  %v7827_v62 = vld [vmem:[#allocation8 + $0x148] sm:$0xff] }
 0x524   :  { %7757 = vmatprep.subr.bf16.mxu1 %v16157_v23 }
 0x525   :  { %10968 = vmatpush1.bf16.msra.mxu0 %v16398_v44  ;;  %v7831_v44 = vld [vmem:[#allocation8 + $0x168] sm:$0xff] }
 0x526   :  { %10969 = vmatprep.subr.bf16.mxu0 %v16407_v55  ;;  %v16200_v55 = vcombine.low %v7819_v37, %v7823_v38  ;;  %v16209_v6 = vcombine.high %v7827_v62, %v7831_v44  ;;  %v16208_v9 = vcombine.low %v7827_v62, %v7831_v44  ;;  %v8122_v37 = vld [vmem:[#allocation8 + $0xa80] sm:$0xff] }
 0x527   :  { %7758 = vmatpush1.bf16.msra.mxu1 %v16156_v42  ;;  %v7839_v42 = vld [vmem:[#allocation8 + $0x1a8] sm:$0xff]  ;;  %v8126_v38 = vld [vmem:[#allocation8 + $0xaa0] sm:$0xff] }
 0x528   :  { %7759 = vmatprep.subr.bf16.mxu1 %v16165_v63  ;;  %v16463_v63 = vcombine.high %v8082_v57, %v8086_v59  ;;  %v16217_v14 = vcombine.high %v7835_v60, %v7839_v42  ;;  %v8130_v62 = vld [vmem:[#allocation8 + $0xac0] sm:$0xff] }
 0x529   :  { %10970 = vmatpush1.bf16.msra.mxu0 %v16406_v16  ;;  %v16454_v16 = vcombine.low %v8074_v34, %v8078_v48  ;;  %v16494_v34 = vcombine.low %v8114_v54, %v8118_v29  ;;  %v16503_v48 = vcombine.high %v8122_v37, %v8126_v38  ;;  %v8134_v44 = vld [vmem:[#allocation8 + $0xae0] sm:$0xff] }
 0x52a   :  { %10971 = vmatprep.subr.bf16.mxu0 %v16415_v21  ;;  %v8090_v21 = vld [vmem:[#allocation8 + $0x980] sm:$0xff] }
 0x52b   :  { %7760 = vmatpush1.bf16.msra.mxu1 %v16164_v2  ;;  %v16462_v2 = vcombine.low %v8082_v57, %v8086_v59  ;;  %v16470_v13 = vcombine.low %v8090_v21, %v8094_v32  ;;  %v16502_v57 = vcombine.low %v8122_v37, %v8126_v38  ;;  %v16511_v59 = vcombine.high %v8130_v62, %v8134_v44 }
 0x52c   :  { %11064 = vmatprep.subr.bf16.mxu1 %v16169_v4  ;;  %v16216_v4 = vcombine.low %v7835_v60, %v7839_v42  ;;  %v8138_v60 = vld [vmem:[#allocation8 + $0xb00] sm:$0xff] }
 0x52d   :  { %10972 = vmatpush1.bf16.msra.mxu0 %v16414_v3  ;;  %v16471_v3 = vcombine.high %v8090_v21, %v8094_v32  ;;  %v8142_v42 = vld [vmem:[#allocation8 + $0xb20] sm:$0xff]  ;;  %v16510_v21 = vcombine.low %v8130_v62, %v8134_v44  ;;  %v7939_v62 = vld [vmem:[#allocation8 + $0x4c8] sm:$0xff] }
 0x52e   :  { %10982 = vmatprep.subr.bf16.mxu0 %v16423_v11  ;;  %7762 = vmatmul.mubr.bf16.vlgmr.msra.gmra.mrb[8].mxu1 %v18798_v20  ;;  %v8066_v20 = vld [vmem:[#allocation8 + $0x8c0] sm:$0xff]  ;;  %v7851_v11 = vld [vmem:[#allocation8 + $0x208] sm:$0xff]  ;;  %v16519_v32 = vcombine.high %v8138_v60, %v8142_v42  ;;  %v16518_v5 = vcombine.low %v8138_v60, %v8142_v42 }
 0x52f   :  { %11065 = vmatpush1.bf16.msra.mxu1 %v16168_v28  ;;  %11096 = vmatprep.mubr.bf16.mxu1 %v18854_v26  ;;  %v16447_v0 = vcombine.high %v8066_v20, %v8070_v51  ;;  %v16446_v23 = vcombine.low %v8066_v20, %v8070_v51  ;;  %v7855_v28 = vld [vmem:[#allocation8 + $0x228] sm:$0xff]  ;;  %v16486_v20 = vcombine.low %v8106_v17, %v8110_v22 }
 0x530   :  { %10974 = vmatmul.mubr.bf16.vlgmr.msra.gmra.mrb[8].mxu0 %v18883_v40  ;;  %11066 = vmatprep.subr.bf16.mxu1 %v16177_v15  ;;  %v16224_v15 = vcombine.low %v7843_v1, %v7847_v33  ;;  %v16495_v51 = vcombine.high %v8114_v54, %v8118_v29  ;;  %v8146_v1 = vld [vmem:[#allocation8 + $0xb40] sm:$0xff]  ;;  %v7943_v44 = vld [vmem:[#allocation8 + $0x4e8] sm:$0xff] }
 0x531   :  { %10983 = vmatpush1.bf16.msra.mxu0 %v16422_v24  ;;  %v16233_v24 = vcombine.high %v7851_v11, %v7855_v28  ;;  %v8150_v33 = vld [vmem:[#allocation8 + $0xb60] sm:$0xff]  ;;  %v7955_v60 = vld [vmem:[#allocation8 + $0x548] sm:$0xff] }
 0x532   :  { %10984 = vmatprep.subr.bf16.mxu0 %v16431_v53  ;;  %v7859_v53 = vld [vmem:[#allocation8 + $0x248] sm:$0xff]  ;;  %v16527_v7 = vcombine.high %v8146_v1, %v8150_v33  ;;  %v16526_v17 = vcombine.low %v8146_v1, %v8150_v33 }
 0x533   :  { %11067 = vmatpush1.bf16.msra.mxu1 %v16176_v27  ;;  %v7863_v27 = vld [vmem:[#allocation8 + $0x268] sm:$0xff] }
 0x534   :  { %11068 = vmatprep.subr.bf16.mxu1 %v16185_v52  ;;  %v16232_v52 = vcombine.low %v7851_v11, %v7855_v28  ;;  %v8154_v11 = vld [vmem:[#allocation8 + $0xb80] sm:$0xff]  ;;  %v7959_v42 = vld [vmem:[#allocation8 + $0x568] sm:$0xff] }
 0x535   :  { %10985 = vmatpush1.bf16.msra.mxu0 %v16430_v30  ;;  %v16241_v30 = vcombine.high %v7859_v53, %v7863_v27  ;;  %v8158_v28 = vld [vmem:[#allocation8 + $0xba0] sm:$0xff]  ;;  %v16336_v33 = vcombine.low %v7955_v60, %v7959_v42 }
 0x536   :  { %10986 = vmatprep.subr.bf16.mxu0 %v16439_v31  ;;  %v7867_v31 = vld [vmem:[#allocation8 + $0x288] sm:$0xff]  ;;  %v16535_v22 = vcombine.high %v8154_v11, %v8158_v28  ;;  %v16534_v54 = vcombine.low %v8154_v11, %v8158_v28 }
 0x537   :  { %11069 = vmatpush1.bf16.msra.mxu1 %v16184_v35  ;;  %v7871_v35 = vld [vmem:[#allocation8 + $0x2a8] sm:$0xff] }
 0x538   :  { %11070 = vmatprep.subr.bf16.mxu1 %v16193_v36  ;;  %v16240_v36 = vcombine.low %v7859_v53, %v7863_v27  ;;  %v8162_v53 = vld [vmem:[#allocation8 + $0xbc0] sm:$0xff] }
 0x539   :  { %10987 = vmatpush1.bf16.msra.mxu0 %v16438_v39  ;;  %v16249_v39 = vcombine.high %v7867_v31, %v7871_v35  ;;  %v8166_v27 = vld [vmem:[#allocation8 + $0xbe0] sm:$0xff] }
 0x53a   :  { %10988 = vmatprep.subr.bf16.mxu0 %v16447_v0  ;;  %v7875_v0 = vld [vmem:[#allocation8 + $0x2c8] sm:$0xff]  ;;  %v16543_v29 = vcombine.high %v8162_v53, %v8166_v27  ;;  %v16542_v37 = vcombine.low %v8162_v53, %v8166_v27 }
 0x53b   :  { %11071 = vmatpush1.bf16.msra.mxu1 %v16192_v19  ;;  %v7879_v19 = vld [vmem:[#allocation8 + $0x2e8] sm:$0xff] }
 0x53c   :  { %11072 = vmatprep.subr.bf16.mxu1 %v16201_v43  ;;  %v16248_v43 = vcombine.low %v7867_v31, %v7871_v35  ;;  %v18888_v31 = vld [vmem:[#allocation8 + $0xc00] sm:$0xff]  ;;  %v7983_v53 = vld [vmem:[#allocation8 + $0x628] sm:$0xff] }
 0x53d   :  { %10989 = vmatpush1.bf16.msra.mxu0 %v16446_v23  ;;  %v16257_v23 = vcombine.high %v7875_v0, %v7879_v19  ;;  %v18890_v35 = vld [vmem:[#allocation8 + $0xc20] sm:$0xff] }
 0x53e   :  { %10990 = vmatprep.subr.bf16.mxu0 %v16455_v47  ;;  %v7883_v47 = vld [vmem:[#allocation8 + $0x308] sm:$0xff]  ;;  %v16551_v38 = vcombine.high %v18888_v31, %v18890_v35 }
 0x53f   :  { %11073 = vmatpush1.bf16.msra.mxu1 %v16200_v55  ;;  %v7887_v55 = vld [vmem:[#allocation8 + $0x328] sm:$0xff] }
 0x540   :  { %11074 = vmatprep.subr.bf16.mxu1 %v16209_v6  ;;  %v16256_v6 = vcombine.low %v7875_v0, %v7879_v19  ;;  %v7931_v19 = vld [vmem:[#allocation8 + $0x488] sm:$0xff] }
 0x541   :  { %10991 = vmatpush1.bf16.msra.mxu0 %v16454_v16  ;;  %v16265_v16 = vcombine.high %v7883_v47, %v7887_v55 }
 0x542   :  { %10992 = vmatprep.subr.bf16.mxu0 %v16463_v63  ;;  %v7891_v63 = vld [vmem:[#allocation8 + $0x348] sm:$0xff] }
 0x543   :  { %11075 = vmatpush1.bf16.msra.mxu1 %v16208_v9  ;;  %v7895_v9 = vld [vmem:[#allocation8 + $0x368] sm:$0xff] }
 0x544   :  { %11076 = vmatprep.subr.bf16.mxu1 %v16217_v14  ;;  %v16264_v14 = vcombine.low %v7883_v47, %v7887_v55  ;;  %v16321_v47 = vcombine.high %v7939_v62, %v7943_v44  ;;  %v7947_v55 = vld [vmem:[#allocation8 + $0x508] sm:$0xff] }
 0x545   :  { %10993 = vmatpush1.bf16.msra.mxu0 %v16462_v2  ;;  %v16273_v2 = vcombine.high %v7891_v63, %v7895_v9 }
 0x546   :  { %10994 = vmatprep.subr.bf16.mxu0 %v16471_v3  ;;  %v7899_v3 = vld [vmem:[#allocation8 + $0x388] sm:$0xff] }
 0x547   :  { %11077 = vmatpush1.bf16.msra.mxu1 %v16216_v4  ;;  %v7903_v4 = vld [vmem:[#allocation8 + $0x3a8] sm:$0xff] }
 0x548   :  { %11078 = vmatprep.subr.bf16.mxu1 %v16225_v61  ;;  %v16272_v61 = vcombine.low %v7891_v63, %v7895_v9  ;;  %v1260_v63 = vsub.s32 4, %v18817_v12  ;;  %v1264_v9 = vsub.s32 5, %v18817_v12 }
 0x549   :  { %10995 = vmatpush1.bf16.msra.mxu0 %v16470_v13  ;;  %v16281_v13 = vcombine.high %v7899_v3, %v7903_v4 }
 0x54a   :  { %10996 = vmatprep.subr.bf16.mxu0 %v16479_v25  ;;  %v7907_v25 = vld [vmem:[#allocation8 + $0x3c8] sm:$0xff]  ;;  %v1261_v1 = vrot.slane %v18863_v50, %v1260_v63 }
 0x54b   :  { %11079 = vmatpush1.bf16.msra.mxu1 %v16224_v15  ;;  %v7911_v15 = vld [vmem:[#allocation8 + $0x3e8] sm:$0xff] }
 0x54c   :  { %11080 = vmatprep.subr.bf16.mxu1 %v16233_v24  ;;  %v16280_v24 = vcombine.low %v7899_v3, %v7903_v4  ;;  %v7971_v4 = vld [vmem:[#allocation8 + $0x5c8] sm:$0xff] }
 0x54d   :  { %10997 = vmatpush1.bf16.msra.mxu0 %v16478_v56  ;;  %v16289_v56 = vcombine.high %v7907_v25, %v7911_v15 }
 0x54e   :  { %10998 = vmatprep.subr.bf16.mxu0 %v16487_v58  ;;  %v7915_v58 = vld [vmem:[#allocation8 + $0x408] sm:$0xff] }
 0x54f   :  { %11081 = vmatpush1.bf16.msra.mxu1 %v16232_v52  ;;  %v7919_v52 = vld [vmem:[#allocation8 + $0x428] sm:$0xff] }
 0x550   :  { %11082 = vmatprep.subr.bf16.mxu1 %v16241_v30  ;;  %v16288_v30 = vcombine.low %v7907_v25, %v7911_v15 }
 0x551   :  { %10999 = vmatpush1.bf16.msra.mxu0 %v16486_v20  ;;  %v16297_v20 = vcombine.high %v7915_v58, %v7919_v52 }
 0x552   :  { %11000 = vmatprep.subr.bf16.mxu0 %v16495_v51  ;;  %v7923_v51 = vld [vmem:[#allocation8 + $0x448] sm:$0xff] }
 0x553   :  { %11083 = vmatpush1.bf16.msra.mxu1 %v16240_v36  ;;  %v7927_v36 = vld [vmem:[#allocation8 + $0x468] sm:$0xff] }
 0x554   :  { %11084 = vmatprep.subr.bf16.mxu1 %v16249_v39  ;;  %v16296_v39 = vcombine.low %v7915_v58, %v7919_v52  ;;  %v16305_v0 = vcombine.high %v7923_v51, %v7927_v36  ;;  %v18904_v52 = vld [vmem:[#allocation8 + $0x10] sm:$0xff] }
 0x555   :  { %11001 = vmatpush1.bf16.msra.mxu0 %v16494_v34  ;;  %v7935_v34 = vld [vmem:[#allocation8 + $0x4a8] sm:$0xff] }
 0x556   :  { %11002 = vmatprep.subr.bf16.mxu0 %v16503_v48  ;;  %v16304_v48 = vcombine.low %v7923_v51, %v7927_v36  ;;  %v7987_v36 = vld [vmem:[#allocation8 + $0x648] sm:$0xff] }
 0x557   :  { %11085 = vmatpush1.bf16.msra.mxu1 %v16248_v43  ;;  %v16313_v43 = vcombine.high %v7931_v19, %v7935_v34 }
 0x558   :  { %11086 = vmatprep.subr.bf16.mxu1 %v16257_v23  ;;  %v16312_v23 = vcombine.low %v7931_v19, %v7935_v34  ;;  %v8190_v19 = vld [vmem:[#allocation8 + $0xca0] sm:$0xff] }
 0x559   :  { %11003 = vmatpush1.bf16.msra.mxu0 %v16502_v57  ;;  %v7951_v57 = vld [vmem:[#allocation8 + $0x528] sm:$0xff] }
 0x55a   :  { %11004 = vmatprep.subr.bf16.mxu0 %v16511_v59  ;;  %v16320_v59 = vcombine.low %v7939_v62, %v7943_v44  ;;  %v8194_v44 = vld [vmem:[#allocation8 + $0xcc0] sm:$0xff] }
 0x55b   :  { %11087 = vmatpush1.bf16.msra.mxu1 %v16256_v6  ;;  %v16329_v6 = vcombine.high %v7947_v55, %v7951_v57 }
 0x55c   :  { %11088 = vmatprep.subr.bf16.mxu1 %v16265_v16  ;;  %v16328_v16 = vcombine.low %v7947_v55, %v7951_v57 }
 0x55d   :  { %11005 = vmatpush1.bf16.msra.mxu0 %v16510_v21  ;;  %v16337_v21 = vcombine.high %v7955_v60, %v7959_v42  ;;  %v8202_v42 = vld [vmem:[#allocation8 + $0xd00] sm:$0xff] }
 0x55e   :  { %11006 = vmatprep.subr.bf16.mxu0 %v16519_v32  ;;  %v7963_v32 = vld [vmem:[#allocation8 + $0x588] sm:$0xff] }
 0x55f   :  { %11089 = vmatpush1.bf16.msra.mxu1 %v16264_v14  ;;  %v7967_v14 = vld [vmem:[#allocation8 + $0x5a8] sm:$0xff] }
 0x560   :  { %11090 = vmatprep.subr.bf16.mxu1 %v16273_v2  ;;  %v1265_v2 = vrot.slane %v18863_v50, %v1264_v9  ;;  %v16345_v3 = vcombine.high %v7963_v32, %v7967_v14  ;;  %v16344_v28 = vcombine.low %v7963_v32, %v7967_v14  ;;  %v8182_v50 = vld [vmem:[#allocation8 + $0xc60] sm:$0xff] }
 0x561   :  { %11007 = vmatpush1.bf16.msra.mxu0 %v16518_v5  ;;  %v7975_v5 = vld [vmem:[#allocation8 + $0x5e8] sm:$0xff] }
 0x562   :  { %11008 = vmatprep.subr.bf16.mxu0 %v16527_v7  ;;  %v16353_v15 = vcombine.high %v7971_v4, %v7975_v5  ;;  %v16352_v58 = vcombine.low %v7971_v4, %v7975_v5  ;;  %v8214_v4 = vld [vmem:[#allocation8 + $0xd60] sm:$0xff] }
 0x563   :  { %11091 = vmatpush1.bf16.msra.mxu1 %v16272_v61 }
 0x564   :  { %11092 = vmatprep.subr.bf16.mxu1 %v16281_v13 }
 0x565   :  { %11009 = vmatpush1.bf16.msra.mxu0 %v16526_v17 }
 0x566   :  { %11010 = vmatprep.subr.bf16.mxu0 %v16535_v22 }
 0x567   :  { %11093 = vmatpush1.bf16.msra.mxu1 %v16280_v24  ;;  %v7979_v24 = vld [vmem:[#allocation8 + $0x608] sm:$0xff] }
 0x568   :  { %11094 = vmatprep.subr.bf16.mxu1 %v16289_v56  ;;  %v8178_v56 = vld [vmem:[#allocation8 + $0xc40] sm:$0xff]  ;;  %v16360_v34 = vcombine.low %v7979_v24, %v7983_v53 }
 0x569   :  { %11011 = vmatpush1.bf16.msra.mxu0 %v16534_v54  ;;  %v18906_v54 = vld [vmem:[#allocation8 + $0x30] sm:$0xff] }
 0x56a   :  { %11012 = vmatprep.subr.bf16.mxu0 %v16543_v29 }
 0x56b   :  { %11095 = vmatpush1.bf16.msra.mxu1 %v16288_v30  ;;  %v16361_v30 = vcombine.high %v7979_v24, %v7983_v53  ;;  %v8027_v53 = vld [vmem:[#allocation8 + $0x788] sm:$0xff] }
 0x56c   :  { %11105 = vmatprep.subr.bf16.mxu1 %v16297_v20  ;;  %v16550_v20 = vcombine.low %v18888_v31, %v18890_v35  ;;  %v16558_v31 = vcombine.low %v8178_v56, %v8182_v50  ;;  %v7995_v35 = vld [vmem:[#allocation8 + $0x688] sm:$0xff] }
 0x56d   :  { %11013 = vmatpush1.bf16.msra.mxu0 %v16542_v37  ;;  %v7991_v37 = vld [vmem:[#allocation8 + $0x668] sm:$0xff] }
 0x56e   :  { %11097 = vmatmul.mubr.bf16.vlgmr.msra.gmra.mrb[12].mxu1 %v18869_v45  ;;  %11023 = vmatprep.subr.bf16.mxu0 %v16551_v38  ;;  %v16559_v38 = vcombine.high %v8178_v56, %v8182_v50  ;;  %v8226_v50 = vld [vmem:[#allocation8 + $0xdc0] sm:$0xff] }
 0x56f   :  { %11106 = vmatpush1.bf16.msra.mxu1 %v16296_v39  ;;  %11137 = vmatprep.mubr.bf16.mxu1 %v18871_v46  ;;  %v16170_v39 = vcombine.low %v18904_v52, %v18906_v54 }
 0x570   :  { %11107 = vmatprep.subr.bf16.mxu1 %v16305_v0  ;;  %v8186_v0 = vld [vmem:[#allocation8 + $0xc80] sm:$0xff] }
 0x571   :  { %v16567_v62 = vcombine.high %v8186_v0, %v8190_v19  ;;  %v16566_v57 = vcombine.low %v8186_v0, %v8190_v19  ;;  %v8234_v19 = vld [vmem:[#allocation8 + $0xe00] sm:$0xff] }
 0x573   :  { %11108 = vmatpush1.bf16.msra.mxu1 %v16304_v48  ;;  %v16369_v48 = vcombine.high %v7987_v36, %v7991_v37 }
 0x574   :  { %11109 = vmatprep.subr.bf16.mxu1 %v16313_v43  ;;  %v7999_v43 = vld [vmem:[#allocation8 + $0x6a8] sm:$0xff] }
 0x575   :  { %v16377_v55 = vcombine.high %v7995_v35, %v7999_v43 }
 0x577   :  { %11110 = vmatpush1.bf16.msra.mxu1 %v16312_v23  ;;  %v8198_v23 = vld [vmem:[#allocation8 + $0xce0] sm:$0xff] }
 0x578   :  { %11111 = vmatprep.subr.bf16.mxu1 %v16321_v47  ;;  %v16368_v47 = vcombine.low %v7987_v36, %v7991_v37  ;;  %v16575_v60 = vcombine.high %v8194_v44, %v8198_v23  ;;  %v16574_v14 = vcombine.low %v8194_v44, %v8198_v23  ;;  %v8035_v37 = vld [vmem:[#allocation8 + $0x7c8] sm:$0xff]  ;;  %v8242_v23 = vld [vmem:[#allocation8 + $0xe40] sm:$0xff] }
 0x57b   :  { %11112 = vmatpush1.bf16.msra.mxu1 %v16320_v59  ;;  %v8003_v59 = vld [vmem:[#allocation8 + $0x6c8] sm:$0xff] }
 0x57c   :  { %11113 = vmatprep.subr.bf16.mxu1 %v16329_v6  ;;  %v8007_v6 = vld [vmem:[#allocation8 + $0x6e8] sm:$0xff] }
 0x57d   :  { %v16385_v32 = vcombine.high %v8003_v59, %v8007_v6  ;;  %v16384_v5 = vcombine.low %v8003_v59, %v8007_v6  ;;  %v8051_v6 = vld [vmem:[#allocation8 + $0x848] sm:$0xff] }
 0x57f   :  { %11114 = vmatpush1.bf16.msra.mxu1 %v16328_v16  ;;  %v8206_v16 = vld [vmem:[#allocation8 + $0xd20] sm:$0xff] }
 0x580   :  { %11115 = vmatprep.subr.bf16.mxu1 %v16337_v21  ;;  %v16376_v21 = vcombine.low %v7995_v35, %v7999_v43  ;;  %v8043_v43 = vld [vmem:[#allocation8 + $0x808] sm:$0xff] }
 0x583   :  { %v7435_v7 = vpop.f32.mrb[4].mxu0  ;;  %11116 = vmatpush1.bf16.msra.mxu1 %v16336_v33  ;;  %v8015_v33 = vld [vmem:[#allocation8 + $0x728] sm:$0xff] }
 0x584   :  { %v17171_v61 = vadd.f32 %v7435_v7, %v1261_v1  ;;  %v7437_v11 = vpop.f32.mrb[5].mxu0  ;;  %11117 = vmatprep.subr.bf16.mxu1 %v16345_v3  ;;  %v8011_v1 = vld [vmem:[#allocation8 + $0x708] sm:$0xff]  ;;  %v8210_v3 = vld [vmem:[#allocation8 + $0xd40] sm:$0xff] }
 0x585   :  { %v17172_v13 = vadd.f32 %v7437_v11, %v1265_v2  ;;  %v7439_v25 = vpop.f32.mrb[6].mxu0  ;;  %v16583_v2 = vcombine.high %v8202_v42, %v8206_v16  ;;  %v16393_v7 = vcombine.high %v8011_v1, %v8015_v33  ;;  %v8019_v11 = vld [vmem:[#allocation8 + $0x748] sm:$0xff]  ;;  %v16590_v24 = vcombine.low %v8210_v3, %v8214_v4 }
 0x586   :  { %v7774_v17 = vmax.f32 %v17171_v61, 0.0  ;;  %v7440_v22 = vpop.f32.mrb[7].mxu0  ;;  %v16582_v61 = vcombine.low %v8202_v42, %v8206_v16  ;;  %v8218_v25 = vld [vmem:[#allocation8 + $0xd80] sm:$0xff] }
 0x587   :  { %v7775_v27 = vmax.f32 %v17172_v13, 0.0  ;;  %11118 = vmatpush1.bf16.msra.mxu1 %v16344_v28  ;;  %v8023_v28 = vld [vmem:[#allocation8 + $0x768] sm:$0xff]  ;;  %v16591_v13 = vcombine.high %v8210_v3, %v8214_v4  ;;  %v8250_v16 = vld [vmem:[#allocation8 + $0xe80] sm:$0xff] }
 0x588   :  { %11119 = vmatprep.subr.bf16.mxu1 %v16353_v15  ;;  %v18912_v51 = vpack.c.bf16 %v7774_v17, %v7774_v17  ;;  %v8222_v15 = vld [vmem:[#allocation8 + $0xda0] sm:$0xff]  ;;  %v16392_v17 = vcombine.low %v8011_v1, %v8015_v33  ;;  %v16401_v22 = vcombine.high %v8019_v11, %v8023_v28  ;;  %v8059_v33 = vld [vmem:[#allocation8 + $0x888] sm:$0xff] }
 0x589   :  { %v18908_v29 = vpack.c.bf16 %v7775_v27, %v7775_v27  ;;  %v8031_v27 = vld [vmem:[#allocation8 + $0x7a8] sm:$0xff]  ;;  %v16599_v56 = vcombine.high %v8218_v25, %v8222_v15  ;;  %v16598_v36 = vcombine.low %v8218_v25, %v8222_v15  ;;  %v8258_v4 = vld [vmem:[#allocation8 + $0xec0] sm:$0xff] }
 0x58a   :  { %v8266_v15 = vld [vmem:[#allocation8 + $0xf00] sm:$0xff] }
 0x58b   :  { %11014 = vmatprep.mubr.bf16.mxu0 %v18908_v29  ;;  %11120 = vmatpush1.bf16.msra.mxu1 %v16352_v58  ;;  %v8230_v58 = vld [vmem:[#allocation8 + $0xde0] sm:$0xff] }
 0x58c   :  { %11015 = vmatmul.mubr.bf16.vlgmr.msra.gmra.mrb[8].mxu0 %v18912_v51  ;;  %11121 = vmatprep.subr.bf16.mxu1 %v16361_v30  ;;  %v16400_v30 = vcombine.low %v8019_v11, %v8023_v28  ;;  %v16607_v0 = vcombine.high %v8226_v50, %v8230_v58  ;;  %v16606_v35 = vcombine.low %v8226_v50, %v8230_v58  ;;  %v8067_v28 = vld [vmem:[#allocation8 + $0x8c8] sm:$0xff]  ;;  %v8274_v58 = vld [vmem:[#allocation8 + $0xf40] sm:$0xff] }
 0x58d   :  { %11024 = vmatpush1.bf16.msra.mxu0 %v16550_v20  ;;  %v16409_v20 = vcombine.high %v8027_v53, %v8031_v27 }
 0x58e   :  { %11025 = vmatprep.subr.bf16.mxu0 %v16559_v38  ;;  %v8039_v38 = vld [vmem:[#allocation8 + $0x7e8] sm:$0xff] }
 0x58f   :  { %11122 = vmatpush1.bf16.msra.mxu1 %v16360_v34  ;;  %v8238_v34 = vld [vmem:[#allocation8 + $0xe20] sm:$0xff] }
 0x590   :  { %11123 = vmatprep.subr.bf16.mxu1 %v16369_v48  ;;  %v16408_v48 = vcombine.low %v8027_v53, %v8031_v27  ;;  %v16615_v44 = vcombine.high %v8234_v19, %v8238_v34  ;;  %v16614_v59 = vcombine.low %v8234_v19, %v8238_v34  ;;  %v8075_v27 = vld [vmem:[#allocation8 + $0x908] sm:$0xff]  ;;  %v8282_v34 = vld [vmem:[#allocation8 + $0xf80] sm:$0xff] }
 0x591   :  { %11026 = vmatpush1.bf16.msra.mxu0 %v16558_v31  ;;  %v16417_v31 = vcombine.high %v8035_v37, %v8039_v38 }
 0x592   :  { %11027 = vmatprep.subr.bf16.mxu0 %v16567_v62  ;;  %v8047_v62 = vld [vmem:[#allocation8 + $0x828] sm:$0xff] }
 0x593   :  { %11124 = vmatpush1.bf16.msra.mxu1 %v16368_v47  ;;  %v8246_v47 = vld [vmem:[#allocation8 + $0xe60] sm:$0xff] }
 0x594   :  { %11125 = vmatprep.subr.bf16.mxu1 %v16377_v55  ;;  %v16416_v55 = vcombine.low %v8035_v37, %v8039_v38  ;;  %v16623_v42 = vcombine.high %v8242_v23, %v8246_v47  ;;  %v16622_v1 = vcombine.low %v8242_v23, %v8246_v47  ;;  %v8083_v38 = vld [vmem:[#allocation8 + $0x948] sm:$0xff]  ;;  %v8290_v47 = vld [vmem:[#allocation8 + $0xfc0] sm:$0xff] }
 0x595   :  { %11028 = vmatpush1.bf16.msra.mxu0 %v16566_v57  ;;  %v16425_v57 = vcombine.high %v8043_v43, %v8047_v62 }
 0x596   :  { %11029 = vmatprep.subr.bf16.mxu0 %v16575_v60  ;;  %v8055_v60 = vld [vmem:[#allocation8 + $0x868] sm:$0xff] }
 0x597   :  { %11126 = vmatpush1.bf16.msra.mxu1 %v16376_v21  ;;  %v8254_v21 = vld [vmem:[#allocation8 + $0xea0] sm:$0xff] }
 0x598   :  { %11127 = vmatprep.subr.bf16.mxu1 %v16385_v32  ;;  %v16424_v32 = vcombine.low %v8043_v43, %v8047_v62  ;;  %v16631_v3 = vcombine.high %v8250_v16, %v8254_v21  ;;  %v16630_v11 = vcombine.low %v8250_v16, %v8254_v21  ;;  %v8091_v62 = vld [vmem:[#allocation8 + $0x988] sm:$0xff] }
 0x599   :  { %11030 = vmatpush1.bf16.msra.mxu0 %v16574_v14  ;;  %v16433_v14 = vcombine.high %v8051_v6, %v8055_v60 }
 0x59a   :  { %11031 = vmatprep.subr.bf16.mxu0 %v16583_v2  ;;  %v8063_v2 = vld [vmem:[#allocation8 + $0x8a8] sm:$0xff] }
 0x59b   :  { %11128 = vmatpush1.bf16.msra.mxu1 %v16384_v5  ;;  %v8262_v5 = vld [vmem:[#allocation8 + $0xee0] sm:$0xff] }
 0x59c   :  { %11129 = vmatprep.subr.bf16.mxu1 %v16393_v7  ;;  %v16432_v7 = vcombine.low %v8051_v6, %v8055_v60  ;;  %v16639_v25 = vcombine.high %v8258_v4, %v8262_v5  ;;  %v16638_v53 = vcombine.low %v8258_v4, %v8262_v5  ;;  %v8099_v60 = vld [vmem:[#allocation8 + $0x9c8] sm:$0xff] }
 0x59d   :  { %11032 = vmatpush1.bf16.msra.mxu0 %v16582_v61  ;;  %v16441_v61 = vcombine.high %v8059_v33, %v8063_v2  ;;  %v8115_v5 = vld [vmem:[#allocation8 + $0xa48] sm:$0xff] }
 0x59e   :  { %11033 = vmatprep.subr.bf16.mxu0 %v16591_v13  ;;  %v8071_v13 = vld [vmem:[#allocation8 + $0x8e8] sm:$0xff] }
 0x59f   :  { %11130 = vmatpush1.bf16.msra.mxu1 %v16392_v17  ;;  %v8270_v17 = vld [vmem:[#allocation8 + $0xf20] sm:$0xff] }
 0x5a0   :  { %11131 = vmatprep.subr.bf16.mxu1 %v16401_v22  ;;  %v16440_v22 = vcombine.low %v8059_v33, %v8063_v2  ;;  %v16647_v50 = vcombine.high %v8266_v15, %v8270_v17  ;;  %v16646_v37 = vcombine.low %v8266_v15, %v8270_v17  ;;  %v8111_v33 = vld [vmem:[#allocation8 + $0xa28] sm:$0xff]  ;;  %v16171_v2 = vcombine.high %v18904_v52, %v18906_v54 }
 0x5a1   :  { %11034 = vmatpush1.bf16.msra.mxu0 %v16590_v24  ;;  %v16449_v24 = vcombine.high %v8067_v28, %v8071_v13  ;;  %v8131_v17 = vld [vmem:[#allocation8 + $0xac8] sm:$0xff] }
 0x5a2   :  { %11035 = vmatprep.subr.bf16.mxu0 %v16599_v56  ;;  %v8079_v56 = vld [vmem:[#allocation8 + $0x928] sm:$0xff] }
 0x5a3   :  { %11132 = vmatpush1.bf16.msra.mxu1 %v16400_v30  ;;  %v8278_v30 = vld [vmem:[#allocation8 + $0xf60] sm:$0xff] }
 0x5a4   :  { %11133 = vmatprep.subr.bf16.mxu1 %v16409_v20  ;;  %v16448_v20 = vcombine.low %v8067_v28, %v8071_v13  ;;  %v16655_v19 = vcombine.high %v8274_v58, %v8278_v30  ;;  %v16654_v43 = vcombine.low %v8274_v58, %v8278_v30  ;;  %v8123_v28 = vld [vmem:[#allocation8 + $0xa88] sm:$0xff] }
 0x5a5   :  { %11036 = vmatpush1.bf16.msra.mxu0 %v16598_v36  ;;  %v16457_v36 = vcombine.high %v8075_v27, %v8079_v56  ;;  %v8127_v13 = vld [vmem:[#allocation8 + $0xaa8] sm:$0xff] }
 0x5a6   :  { %11037 = vmatprep.subr.bf16.mxu0 %v16607_v0  ;;  %v8087_v0 = vld [vmem:[#allocation8 + $0x968] sm:$0xff]  ;;  %v16505_v15 = vcombine.high %v8123_v28, %v8127_v13 }
 0x5a7   :  { %11134 = vmatpush1.bf16.msra.mxu1 %v16408_v48  ;;  %v8286_v48 = vld [vmem:[#allocation8 + $0xfa0] sm:$0xff]  ;;  %v8147_v30 = vld [vmem:[#allocation8 + $0xb48] sm:$0xff] }
 0x5a8   :  { %11135 = vmatprep.subr.bf16.mxu1 %v16417_v31  ;;  %v16456_v31 = vcombine.low %v8075_v27, %v8079_v56  ;;  %v16663_v23 = vcombine.high %v8282_v34, %v8286_v48  ;;  %v16662_v6 = vcombine.low %v8282_v34, %v8286_v48  ;;  %v8139_v27 = vld [vmem:[#allocation8 + $0xb08] sm:$0xff] }
 0x5a9   :  { %11038 = vmatpush1.bf16.msra.mxu0 %v16606_v35  ;;  %v16465_v35 = vcombine.high %v8083_v38, %v8087_v0  ;;  %v8143_v56 = vld [vmem:[#allocation8 + $0xb28] sm:$0xff] }
 0x5aa   :  { %11039 = vmatprep.subr.bf16.mxu0 %v16615_v44  ;;  %v8095_v44 = vld [vmem:[#allocation8 + $0x9a8] sm:$0xff]  ;;  %v16521_v58 = vcombine.high %v8139_v27, %v8143_v56 }
 0x5ab   :  { %11136 = vmatpush1.bf16.msra.mxu1 %v16416_v55  ;;  %v8294_v55 = vld [vmem:[#allocation8 + $0xfe0] sm:$0xff]  ;;  %v16472_v21 = vcombine.low %v8091_v62, %v8095_v44  ;;  %v8163_v48 = vld [vmem:[#allocation8 + $0xbc8] sm:$0xff] }
 0x5ac   :  { %11146 = vmatprep.subr.bf16.mxu1 %v16425_v57  ;;  %v16464_v57 = vcombine.low %v8083_v38, %v8087_v0  ;;  %v16671_v16 = vcombine.high %v8290_v47, %v8294_v55  ;;  %v8155_v38 = vld [vmem:[#allocation8 + $0xb88] sm:$0xff] }
 0x5ad   :  { %11040 = vmatpush1.bf16.msra.mxu0 %v16614_v59  ;;  %v16473_v59 = vcombine.high %v8091_v62, %v8095_v44  ;;  %v8159_v0 = vld [vmem:[#allocation8 + $0xba8] sm:$0xff] }
 0x5ae   :  { %11041 = vmatprep.subr.bf16.mxu0 %v16623_v42  ;;  %11138 = vmatmul.mubr.bf16.vlgmr.msra.gmra.mrb[12].mxu1 %v18883_v40  ;;  %v8103_v42 = vld [vmem:[#allocation8 + $0x9e8] sm:$0xff]  ;;  %v16537_v34 = vcombine.high %v8155_v38, %v8159_v0 }
 0x5af   :  { %11147 = vmatpush1.bf16.msra.mxu1 %v16424_v32  ;;  %11178 = vmatprep.mubr.bf16.mxu1 %v18908_v29  ;;  %v16481_v32 = vcombine.high %v8099_v60, %v8103_v42  ;;  %v8171_v62 = vld [vmem:[#allocation8 + $0xc08] sm:$0xff] }
 0x5b0   :  { %11148 = vmatprep.subr.bf16.mxu1 %v16433_v14  ;;  %v16670_v14 = vcombine.low %v8290_v47, %v8294_v55  ;;  %v8175_v44 = vld [vmem:[#allocation8 + $0xc28] sm:$0xff] }
 0x5b1   :  { %11042 = vmatpush1.bf16.msra.mxu0 %v16622_v1  ;;  %v8107_v1 = vld [vmem:[#allocation8 + $0xa08] sm:$0xff]  ;;  %v16553_v47 = vcombine.high %v8171_v62, %v8175_v44 }
 0x5b2   :  { %11043 = vmatprep.subr.bf16.mxu0 %v16631_v3  ;;  %v16480_v3 = vcombine.low %v8099_v60, %v8103_v42  ;;  %v16489_v4 = vcombine.high %v8107_v1, %v8111_v33  ;;  %v8179_v55 = vld [vmem:[#allocation8 + $0xc48] sm:$0xff] }
 0x5b3   :  { %11149 = vmatpush1.bf16.msra.mxu1 %v16432_v7  ;;  %v8119_v7 = vld [vmem:[#allocation8 + $0xa68] sm:$0xff] }
 0x5b4   :  { %11150 = vmatprep.subr.bf16.mxu1 %v16441_v61  ;;  %v16488_v61 = vcombine.low %v8107_v1, %v8111_v33  ;;  %v8187_v60 = vld [vmem:[#allocation8 + $0xc88] sm:$0xff] }
 0x5b5   :  { %11044 = vmatpush1.bf16.msra.mxu0 %v16630_v11  ;;  %v16497_v11 = vcombine.high %v8115_v5, %v8119_v7  ;;  %v8191_v42 = vld [vmem:[#allocation8 + $0xca8] sm:$0xff] }
 0x5b6   :  { %11045 = vmatprep.subr.bf16.mxu0 %v16639_v25  ;;  %v16496_v25 = vcombine.low %v8115_v5, %v8119_v7  ;;  %v16568_v1 = vcombine.low %v8187_v60, %v8191_v42  ;;  %v8211_v7 = vld [vmem:[#allocation8 + $0xd48] sm:$0xff] }
 0x5b7   :  { %11151 = vmatpush1.bf16.msra.mxu1 %v16440_v22  ;;  %v8135_v22 = vld [vmem:[#allocation8 + $0xae8] sm:$0xff] }
 0x5b8   :  { %11152 = vmatprep.subr.bf16.mxu1 %v16449_v24  ;;  %v16504_v24 = vcombine.low %v8123_v28, %v8127_v13  ;;  %v1272_v13 = vsub.s32 7, %v18817_v12 }
 0x5b9   :  { %11046 = vmatpush1.bf16.msra.mxu0 %v16638_v53  ;;  %v16513_v53 = vcombine.high %v8131_v17, %v8135_v22 }
 0x5ba   :  { %11047 = vmatprep.subr.bf16.mxu0 %v16647_v50  ;;  %v16512_v50 = vcombine.low %v8131_v17, %v8135_v22  ;;  %v8223_v17 = vld [vmem:[#allocation8 + $0xda8] sm:$0xff]  ;;  %v18116_v22 = vld [vmem:[#allocation7] sm:$0xff] }
 0x5bb   :  { %11153 = vmatpush1.bf16.msra.mxu1 %v16448_v20  ;;  %v8151_v20 = vld [vmem:[#allocation8 + $0xb68] sm:$0xff] }
 0x5bc   :  { %11154 = vmatprep.subr.bf16.mxu1 %v16457_v36  ;;  %v16520_v36 = vcombine.low %v8139_v27, %v8143_v56 }
 0x5bd   :  { %11048 = vmatpush1.bf16.msra.mxu0 %v16646_v37  ;;  %v16529_v37 = vcombine.high %v8147_v30, %v8151_v20 }
 0x5be   :  { %11049 = vmatprep.subr.bf16.mxu0 %v16655_v19  ;;  %v16528_v19 = vcombine.low %v8147_v30, %v8151_v20  ;;  %v8231_v30 = vld [vmem:[#allocation8 + $0xde8] sm:$0xff] }
 0x5bf   :  { %11155 = vmatpush1.bf16.msra.mxu1 %v16456_v31  ;;  %v8167_v31 = vld [vmem:[#allocation8 + $0xbe8] sm:$0xff] }
 0x5c0   :  { %11156 = vmatprep.subr.bf16.mxu1 %v16465_v35  ;;  %v16536_v35 = vcombine.low %v8155_v38, %v8159_v0 }
 0x5c1   :  { %11050 = vmatpush1.bf16.msra.mxu0 %v16654_v43  ;;  %v16545_v43 = vcombine.high %v8163_v48, %v8167_v31 }
 0x5c2   :  { %11051 = vmatprep.subr.bf16.mxu0 %v16663_v23  ;;  %v16544_v23 = vcombine.low %v8163_v48, %v8167_v31 }
 0x5c3   :  { %11157 = vmatpush1.bf16.msra.mxu1 %v16464_v57  ;;  %v8183_v57 = vld [vmem:[#allocation8 + $0xc68] sm:$0xff] }
 0x5c4   :  { %11158 = vmatprep.subr.bf16.mxu1 %v16473_v59  ;;  %v16552_v59 = vcombine.low %v8171_v62, %v8175_v44  ;;  %v8235_v62 = vld [vmem:[#allocation8 + $0xe08] sm:$0xff] }
 0x5c5   :  { %11052 = vmatpush1.bf16.msra.mxu0 %v16662_v6  ;;  %v16561_v6 = vcombine.high %v8179_v55, %v8183_v57  ;;  %v8239_v44 = vld [vmem:[#allocation8 + $0xe28] sm:$0xff] }
 0x5c6   :  { %11053 = vmatprep.subr.bf16.mxu0 %v16671_v16  ;;  %v16560_v16 = vcombine.low %v8179_v55, %v8183_v57 }
 0x5c7   :  { %11159 = vmatpush1.bf16.msra.mxu1 %v16472_v21  ;;  %v16569_v21 = vcombine.high %v8187_v60, %v8191_v42  ;;  %v7808_v60 = vld [vmem:[#allocation8 + $0xb0] sm:$0xff]  ;;  %v8243_v42 = vld [vmem:[#allocation8 + $0xe48] sm:$0xff] }
 0x5c8   :  { %11160 = vmatprep.subr.bf16.mxu1 %v16481_v32  ;;  %v8195_v32 = vld [vmem:[#allocation8 + $0xcc8] sm:$0xff] }
 0x5c9   :  { %11054 = vmatpush1.bf16.msra.mxu0 %v16670_v14  ;;  %v8199_v14 = vld [vmem:[#allocation8 + $0xce8] sm:$0xff] }
 0x5ca   :  { %11228 = vmatprep.subr.bf16.mxu0 %v16171_v2  ;;  %v16577_v33 = vcombine.high %v8195_v32, %v8199_v14  ;;  %v8203_v2 = vld [vmem:[#allocation8 + $0xd08] sm:$0xff] }
 0x5cb   :  { %11161 = vmatpush1.bf16.msra.mxu1 %v16480_v3  ;;  %v8207_v3 = vld [vmem:[#allocation8 + $0xd28] sm:$0xff] }
 0x5cc   :  { %11162 = vmatprep.subr.bf16.mxu1 %v16489_v4  ;;  %v16576_v4 = vcombine.low %v8195_v32, %v8199_v14  ;;  %v16585_v5 = vcombine.high %v8203_v2, %v8207_v3  ;;  %v16584_v28 = vcombine.low %v8203_v2, %v8207_v3  ;;  %v16616_v32 = vcombine.low %v8235_v62, %v8239_v44  ;;  %v7816_v2 = vld [vmem:[#allocation8 + $0xf0] sm:$0xff]  ;;  %v8251_v3 = vld [vmem:[#allocation8 + $0xe88] sm:$0xff] }
 0x5cf   :  { %11163 = vmatpush1.bf16.msra.mxu1 %v16488_v61  ;;  %v8215_v61 = vld [vmem:[#allocation8 + $0xd68] sm:$0xff] }
 0x5d0   :  { %11164 = vmatprep.subr.bf16.mxu1 %v16497_v11  ;;  %v1268_v11 = vsub.s32 6, %v18817_v12  ;;  %v16592_v27 = vcombine.low %v8211_v7, %v8215_v61  ;;  %v17798_v12 = vld [vmem:[#allocation11 + $0x7a8] ss:$16 sps:$4 sm:$0xff]  }
 0x5d3   :  { %11165 = vmatpush1.bf16.msra.mxu1 %v16496_v25  ;;  %v16593_v25 = vcombine.high %v8211_v7, %v8215_v61  ;;  %v7824_v61 = vld [vmem:[#allocation8 + $0x130] sm:$0xff] }
 0x5d4   :  { %11166 = vmatprep.subr.bf16.mxu1 %v16505_v15  ;;  %v8219_v15 = vld [vmem:[#allocation8 + $0xd88] sm:$0xff] }
 0x5d5   :  { %v16601_v56 = vcombine.high %v8219_v15, %v8223_v17  ;;  %v16600_v0 = vcombine.low %v8219_v15, %v8223_v17 }
 0x5d7   :  { %11167 = vmatpush1.bf16.msra.mxu1 %v16504_v24  ;;  %v1269_v24 = vrot.slane %v18116_v22, %v1268_v11 }
 0x5d8   :  { %11168 = vmatprep.subr.bf16.mxu1 %v16513_v53  ;;  %v1273_v53 = vrot.slane %v18116_v22, %v1272_v13 }
 0x5db   :  { %11169 = vmatpush1.bf16.msra.mxu1 %v16512_v50 }
 0x5dc   :  { %11170 = vmatprep.subr.bf16.mxu1 %v16521_v58  ;;  %v8227_v58 = vld [vmem:[#allocation8 + $0xdc8] sm:$0xff] }
 0x5dd   :  { %v16609_v48 = vcombine.high %v8227_v58, %v8231_v30 }
 0x5df   :  { %11171 = vmatpush1.bf16.msra.mxu1 %v16520_v36 }
 0x5e0   :  { %11172 = vmatprep.subr.bf16.mxu1 %v16529_v37 }
 0x5e3   :  { %11173 = vmatpush1.bf16.msra.mxu1 %v16528_v19 }
 0x5e4   :  { %11174 = vmatprep.subr.bf16.mxu1 %v16537_v34 }
 0x5e7   :  { %11175 = vmatpush1.bf16.msra.mxu1 %v16536_v35  ;;  %v7796_v35 = vld [vmem:[#allocation8 + $0x50] sm:$0xff] }
 0x5e8   :  { %11176 = vmatprep.subr.bf16.mxu1 %v16545_v43  ;;  %v7800_v43 = vld [vmem:[#allocation8 + $0x70] sm:$0xff] }
 0x5e9   :  { %v16179_v57 = vcombine.high %v7796_v35, %v7800_v43 }
 0x5eb   :  { %11177 = vmatpush1.bf16.msra.mxu1 %v16544_v23 }
 0x5ec   :  { %11187 = vmatprep.subr.bf16.mxu1 %v16553_v47  ;;  %v16608_v47 = vcombine.low %v8227_v58, %v8231_v30 }
 0x5ee   :  { %11179 = vmatmul.mubr.bf16.vlgmr.msra.gmra.mrb[12].mxu1 %v18912_v51 }
 0x5ef   :  { %11188 = vmatpush1.bf16.msra.mxu1 %v16552_v59  ;;  %v7804_v59 = vld [vmem:[#allocation8 + $0x90] sm:$0xff] }
 0x5f0   :  { %11189 = vmatprep.subr.bf16.mxu1 %v16561_v6  ;;  %v16617_v6 = vcombine.high %v8235_v62, %v8239_v44  ;;  %v16187_v14 = vcombine.high %v7804_v59, %v7808_v60  ;;  %v7848_v62 = vld [vmem:[#allocation8 + $0x1f0] sm:$0xff]  ;;  %v8283_v44 = vld [vmem:[#allocation8 + $0xf88] sm:$0xff] }
 0x5f3   :  { %11190 = vmatpush1.bf16.msra.mxu1 %v16560_v16  ;;  %v8247_v16 = vld [vmem:[#allocation8 + $0xe68] sm:$0xff] }
 0x5f4   :  { %11191 = vmatprep.subr.bf16.mxu1 %v16569_v21  ;;  %v16178_v21 = vcombine.low %v7796_v35, %v7800_v43  ;;  %v16624_v7 = vcombine.low %v8243_v42, %v8247_v16  ;;  %v7844_v43 = vld [vmem:[#allocation8 + $0x1d0] sm:$0xff] }
 0x5f7   :  { %11192 = vmatpush1.bf16.msra.mxu1 %v16568_v1  ;;  %v16625_v1 = vcombine.high %v8243_v42, %v8247_v16  ;;  %v7852_v42 = vld [vmem:[#allocation8 + $0x210] sm:$0xff] }
 0x5f8   :  { %11193 = vmatprep.subr.bf16.mxu1 %v16577_v33  ;;  %v7812_v33 = vld [vmem:[#allocation8 + $0xd0] sm:$0xff] }
 0x5f9   :  { %v16195_v52 = vcombine.high %v7812_v33, %v7816_v2  ;;  %v16194_v15 = vcombine.low %v7812_v33, %v7816_v2  ;;  %v7856_v16 = vld [vmem:[#allocation8 + $0x230] sm:$0xff] }
 0x5fa   :  { %v16235_v33 = vcombine.high %v7852_v42, %v7856_v16 }
 0x5fb   :  { %11194 = vmatpush1.bf16.msra.mxu1 %v16576_v4  ;;  %v8255_v4 = vld [vmem:[#allocation8 + $0xea8] sm:$0xff] }
 0x5fc   :  { %11195 = vmatprep.subr.bf16.mxu1 %v16585_v5  ;;  %v16186_v5 = vcombine.low %v7804_v59, %v7808_v60  ;;  %v16633_v54 = vcombine.high %v8251_v3, %v8255_v4  ;;  %v16632_v17 = vcombine.low %v8251_v3, %v8255_v4  ;;  %v7860_v3 = vld [vmem:[#allocation8 + $0x250] sm:$0xff] }
 0x5fd   :  { %v7864_v4 = vld [vmem:[#allocation8 + $0x270] sm:$0xff] }
 0x5ff   :  { %11196 = vmatpush1.bf16.msra.mxu1 %v16584_v28  ;;  %v8259_v28 = vld [vmem:[#allocation8 + $0xec8] sm:$0xff] }
 0x600   :  { %11197 = vmatprep.subr.bf16.mxu1 %v16593_v25  ;;  %v8263_v25 = vld [vmem:[#allocation8 + $0xee8] sm:$0xff] }
 0x601   :  { %v7763_v50 = vpop.f32.mrb[8].mxu1  ;;  %v16640_v30 = vcombine.low %v8259_v28, %v8263_v25 }
 0x602   :  { %v17173_v20 = vadd.f32 %v7763_v50, %v1269_v24  ;;  %v7765_v36 = vpop.f32.mrb[9].mxu1  ;;  %v16641_v24 = vcombine.high %v8259_v28, %v8263_v25  ;;  %v8271_v50 = vld [vmem:[#allocation8 + $0xf28] sm:$0xff]  ;;  %v7868_v28 = vld [vmem:[#allocation8 + $0x290] sm:$0xff] }
 0x603   :  { %v17174_v37 = vadd.f32 %v7765_v36, %v1273_v53  ;;  %v7767_v38 = vpop.f32.mrb[10].mxu1  ;;  %11198 = vmatpush1.bf16.msra.mxu1 %v16592_v27  ;;  %v7828_v53 = vld [vmem:[#allocation8 + $0x150] sm:$0xff] }
 0x604   :  { %v7776_v19 = vmax.f32 %v17173_v20, 0.0  ;;  %v7768_v34 = vpop.f32.mrb[11].mxu1  ;;  %11199 = vmatprep.subr.bf16.mxu1 %v16601_v56  ;;  %v7832_v27 = vld [vmem:[#allocation8 + $0x170] sm:$0xff]  ;;  %v8267_v56 = vld [vmem:[#allocation8 + $0xf08] sm:$0xff] }
 0x605   :  { %v7777_v31 = vmax.f32 %v17174_v37, 0.0  ;;  %v16211_v20 = vcombine.high %v7828_v53, %v7832_v27  ;;  %v16649_v36 = vcombine.high %v8267_v56, %v8271_v50  ;;  %v7836_v37 = vld [vmem:[#allocation8 + $0x190] sm:$0xff]  ;;  %v16210_v34 = vcombine.low %v7828_v53, %v7832_v27 }
 0x606   :  { %v18931_v55 = vpack.c.bf16 %v7776_v19, %v7776_v19  ;;  %v7840_v38 = vld [vmem:[#allocation8 + $0x1b0] sm:$0xff]  ;;  %v8279_v19 = vld [vmem:[#allocation8 + $0xf68] sm:$0xff] }
 0x607   :  { %v18929_v23 = vpack.c.bf16 %v7777_v31, %v7777_v31  ;;  %11200 = vmatpush1.bf16.msra.mxu1 %v16600_v0  ;;  %v8275_v0 = vld [vmem:[#allocation8 + $0xf48] sm:$0xff]  ;;  %v16219_v31 = vcombine.high %v7836_v37, %v7840_v38  ;;  %v7872_v25 = vld [vmem:[#allocation8 + $0x2b0] sm:$0xff] }
 0x608   :  { %11201 = vmatprep.subr.bf16.mxu1 %v16609_v48  ;;  %v16648_v48 = vcombine.low %v8267_v56, %v8271_v50  ;;  %v16657_v35 = vcombine.high %v8275_v0, %v8279_v19  ;;  %v16656_v59 = vcombine.low %v8275_v0, %v8279_v19  ;;  %v16251_v53 = vcombine.high %v7868_v28, %v7872_v25  ;;  %v7876_v27 = vld [vmem:[#allocation8 + $0x2d0] sm:$0xff] }
 0x609   :  { %11055 = vmatprep.mubr.bf16.mxu0 %v18929_v23  ;;  %11219 = vmatprep.mubr.bf16.mxu1 %v18929_v23  ;;  %v7880_v50 = vld [vmem:[#allocation8 + $0x2f0] sm:$0xff] }
 0x60a   :  { %11056 = vmatmul.mubr.bf16.vlgmr.msra.gmra.mrb[8].mxu0 %v18931_v55  ;;  %v7884_v0 = vld [vmem:[#allocation8 + $0x310] sm:$0xff] }
 0x60b   :  { %11229 = vmatpush1.bf16.msra.mxu0 %v16170_v39  ;;  %11202 = vmatpush1.bf16.msra.mxu1 %v16608_v47  ;;  %v7820_v39 = vld [vmem:[#allocation8 + $0x110] sm:$0xff]  ;;  %v8287_v47 = vld [vmem:[#allocation8 + $0xfa8] sm:$0xff] }
 0x60c   :  { %11260 = vmatprep.mubr.bf16.mxu0 %v18854_v26  ;;  %11230 = vmatprep.subr.bf16.mxu0 %v16179_v57  ;;  %v16203_v22 = vcombine.high %v7820_v39, %v7824_v61  ;;  %v16202_v58 = vcombine.low %v7820_v39, %v7824_v61  ;;  %v16218_v57 = vcombine.low %v7836_v37, %v7840_v38  ;;  %v7888_v19 = vld [vmem:[#allocation8 + $0x330] sm:$0xff] }
 0x60d   :  { %11203 = vmatprep.subr.bf16.mxu1 %v16617_v6  ;;  %v16227_v6 = vcombine.high %v7844_v43, %v7848_v62  ;;  %v16665_v60 = vcombine.high %v8283_v44, %v8287_v47  ;;  %v16243_v39 = vcombine.high %v7860_v3, %v7864_v4  ;;  %v16259_v37 = vcombine.high %v7876_v27, %v7880_v50 }
 0x60f   :  { %11231 = vmatpush1.bf16.msra.mxu0 %v16178_v21  ;;  %11204 = vmatpush1.bf16.msra.mxu1 %v16616_v32  ;;  %v8291_v21 = vld [vmem:[#allocation8 + $0xfc8] sm:$0xff] }
 0x610   :  { %11232 = vmatprep.subr.bf16.mxu0 %v16187_v14  ;;  %11205 = vmatprep.subr.bf16.mxu1 %v16625_v1  ;;  %v8295_v32 = vld [vmem:[#allocation8 + $0xfe8] sm:$0xff]  ;;  %v16226_v14 = vcombine.low %v7844_v43, %v7848_v62  ;;  %v16664_v1 = vcombine.low %v8283_v44, %v8287_v47  ;;  %v16267_v43 = vcombine.high %v7884_v0, %v7888_v19  ;;  %v7892_v44 = vld [vmem:[#allocation8 + $0x350] sm:$0xff] }
 0x611   :  { %v16673_v2 = vcombine.high %v8291_v21, %v8295_v32  ;;  %v7896_v47 = vld [vmem:[#allocation8 + $0x370] sm:$0xff] }
 0x613   :  { %11233 = vmatpush1.bf16.msra.mxu0 %v16186_v5  ;;  %11206 = vmatpush1.bf16.msra.mxu1 %v16624_v7  ;;  %v7789_v5 = vld [vmem:[#allocation8 + $0x18] sm:$0xff] }
 0x614   :  { %11234 = vmatprep.subr.bf16.mxu0 %v16195_v52  ;;  %11207 = vmatprep.subr.bf16.mxu1 %v16633_v54  ;;  %v7793_v7 = vld [vmem:[#allocation8 + $0x38] sm:$0xff]  ;;  %v16234_v52 = vcombine.low %v7852_v42, %v7856_v16  ;;  %v16672_v54 = vcombine.low %v8291_v21, %v8295_v32  ;;  %v7900_v16 = vld [vmem:[#allocation8 + $0x390] sm:$0xff] }
 0x615   :  { %v16173_v61 = vcombine.high %v7789_v5, %v7793_v7  ;;  %v7904_v21 = vld [vmem:[#allocation8 + $0x3b0] sm:$0xff]  ;;  %v7829_v32 = vld [vmem:[#allocation8 + $0x158] sm:$0xff] }
 0x617   :  { %11235 = vmatpush1.bf16.msra.mxu0 %v16194_v15  ;;  %11208 = vmatpush1.bf16.msra.mxu1 %v16632_v17  ;;  %v7797_v15 = vld [vmem:[#allocation8 + $0x58] sm:$0xff] }
 0x618   :  { %11236 = vmatprep.subr.bf16.mxu0 %v16203_v22  ;;  %11209 = vmatprep.subr.bf16.mxu1 %v16641_v24  ;;  %v7801_v17 = vld [vmem:[#allocation8 + $0x78] sm:$0xff]  ;;  %v16242_v22 = vcombine.low %v7860_v3, %v7864_v4  ;;  %v16172_v24 = vcombine.low %v7789_v5, %v7793_v7  ;;  %v7908_v4 = vld [vmem:[#allocation8 + $0x3d0] sm:$0xff] }
 0x619   :  { %v16181_v56 = vcombine.high %v7797_v15, %v7801_v17  ;;  %v7912_v5 = vld [vmem:[#allocation8 + $0x3f0] sm:$0xff]  ;;  %v7837_v7 = vld [vmem:[#allocation8 + $0x198] sm:$0xff] }
 0x61b   :  { %11237 = vmatpush1.bf16.msra.mxu0 %v16202_v58  ;;  %11210 = vmatpush1.bf16.msra.mxu1 %v16640_v30  ;;  %v7805_v58 = vld [vmem:[#allocation8 + $0x98] sm:$0xff] }
 0x61c   :  { %11238 = vmatprep.subr.bf16.mxu0 %v16211_v20  ;;  %11211 = vmatprep.subr.bf16.mxu1 %v16649_v36  ;;  %v7809_v30 = vld [vmem:[#allocation8 + $0xb8] sm:$0xff]  ;;  %v16250_v20 = vcombine.low %v7868_v28, %v7872_v25  ;;  %v16180_v36 = vcombine.low %v7797_v15, %v7801_v17  ;;  %v7916_v25 = vld [vmem:[#allocation8 + $0x410] sm:$0xff] }
 0x61d   :  { %v16189_v38 = vcombine.high %v7805_v58, %v7809_v30  ;;  %v7920_v15 = vld [vmem:[#allocation8 + $0x430] sm:$0xff]  ;;  %v7845_v17 = vld [vmem:[#allocation8 + $0x1d8] sm:$0xff] }
 0x61f   :  { %11239 = vmatpush1.bf16.msra.mxu0 %v16210_v34  ;;  %11212 = vmatpush1.bf16.msra.mxu1 %v16648_v48  ;;  %v7813_v34 = vld [vmem:[#allocation8 + $0xd8] sm:$0xff] }
 0x620   :  { %11240 = vmatprep.subr.bf16.mxu0 %v16219_v31  ;;  %11213 = vmatprep.subr.bf16.mxu1 %v16657_v35  ;;  %v7817_v48 = vld [vmem:[#allocation8 + $0xf8] sm:$0xff]  ;;  %v16258_v31 = vcombine.low %v7876_v27, %v7880_v50  ;;  %v16188_v35 = vcombine.low %v7805_v58, %v7809_v30  ;;  %v16299_v27 = vcombine.high %v7916_v25, %v7920_v15  ;;  %v7924_v50 = vld [vmem:[#allocation8 + $0x450] sm:$0xff] }
 0x621   :  { %v16197_v62 = vcombine.high %v7813_v34, %v7817_v48  ;;  %v7928_v58 = vld [vmem:[#allocation8 + $0x470] sm:$0xff]  ;;  %v7853_v30 = vld [vmem:[#allocation8 + $0x218] sm:$0xff] }
 0x623   :  { %11241 = vmatpush1.bf16.msra.mxu0 %v16218_v57  ;;  %11214 = vmatpush1.bf16.msra.mxu1 %v16656_v59  ;;  %v7821_v57 = vld [vmem:[#allocation8 + $0x118] sm:$0xff]  ;;  %v16266_v59 = vcombine.low %v7884_v0, %v7888_v19  ;;  %v7932_v19 = vld [vmem:[#allocation8 + $0x490] sm:$0xff] }
 0x624   :  { %11242 = vmatprep.subr.bf16.mxu0 %v16227_v6  ;;  %11215 = vmatprep.subr.bf16.mxu1 %v16665_v60  ;;  %v16196_v6 = vcombine.low %v7813_v34, %v7817_v48  ;;  %v16275_v60 = vcombine.high %v7892_v44, %v7896_v47  ;;  %v7936_v34 = vld [vmem:[#allocation8 + $0x4b0] sm:$0xff]  ;;  %v7861_v48 = vld [vmem:[#allocation8 + $0x258] sm:$0xff] }
 0x627   :  { %11243 = vmatpush1.bf16.msra.mxu0 %v16226_v14  ;;  %11216 = vmatpush1.bf16.msra.mxu1 %v16664_v1  ;;  %v7833_v14 = vld [vmem:[#allocation8 + $0x178] sm:$0xff]  ;;  %v16274_v1 = vcombine.low %v7892_v44, %v7896_v47  ;;  %v7940_v47 = vld [vmem:[#allocation8 + $0x4d0] sm:$0xff] }
 0x628   :  { %11244 = vmatprep.subr.bf16.mxu0 %v16235_v33  ;;  %11217 = vmatprep.subr.bf16.mxu1 %v16673_v2  ;;  %v16283_v2 = vcombine.high %v7900_v16, %v7904_v21  ;;  %v16213_v3 = vcombine.high %v7829_v32, %v7833_v14 }
 0x62b   :  { %11245 = vmatpush1.bf16.msra.mxu0 %v16234_v52  ;;  %11218 = vmatpush1.bf16.msra.mxu1 %v16672_v54  ;;  %v7841_v52 = vld [vmem:[#allocation8 + $0x1b8] sm:$0xff]  ;;  %v16282_v54 = vcombine.low %v7900_v16, %v7904_v21  ;;  %v7948_v21 = vld [vmem:[#allocation8 + $0x510] sm:$0xff] }
 0x62c   :  { %11246 = vmatprep.subr.bf16.mxu0 %v16243_v39  ;;  %11392 = vmatprep.subr.bf16.mxu1 %v16173_v61  ;;  %v16212_v39 = vcombine.low %v7829_v32, %v7833_v14  ;;  %v16291_v61 = vcombine.high %v7908_v4, %v7912_v5  ;;  %v16221_v28 = vcombine.high %v7837_v7, %v7841_v52  ;;  %v7952_v32 = vld [vmem:[#allocation8 + $0x530] sm:$0xff]  ;;  %v7877_v14 = vld [vmem:[#allocation8 + $0x2d8] sm:$0xff] }
 0x62e   :  { %11220 = vmatmul.mubr.bf16.vlgmr.msra.gmra.mrb[12].mxu1 %v18931_v55 }
 0x62f   :  { %11247 = vmatpush1.bf16.msra.mxu0 %v16242_v22  ;;  %11393 = vmatpush1.bf16.msra.mxu1 %v16172_v24  ;;  %v7849_v22 = vld [vmem:[#allocation8 + $0x1f8] sm:$0xff]  ;;  %v16290_v24 = vcombine.low %v7908_v4, %v7912_v5  ;;  %v7956_v5 = vld [vmem:[#allocation8 + $0x550] sm:$0xff] }
 0x630   :  { %11424 = vmatprep.mubr.bf16.mxu1 %v18854_v26  ;;  %11248 = vmatprep.subr.bf16.mxu0 %v16251_v53  ;;  %v7825_v26 = vld [vmem:[#allocation8 + $0x138] sm:$0xff]  ;;  %v16220_v53 = vcombine.low %v7837_v7, %v7841_v52  ;;  %v7960_v7 = vld [vmem:[#allocation8 + $0x570] sm:$0xff] }
 0x631   :  { %11394 = vmatprep.subr.bf16.mxu1 %v16181_v56  ;;  %v16205_v42 = vcombine.high %v7821_v57, %v7825_v26  ;;  %v16204_v33 = vcombine.low %v7821_v57, %v7825_v26  ;;  %v16229_v56 = vcombine.high %v7845_v17, %v7849_v22  ;;  %v7944_v57 = vld [vmem:[#allocation8 + $0x4f0] sm:$0xff]  ;;  %v7869_v26 = vld [vmem:[#allocation8 + $0x298] sm:$0xff] }
 0x632   :  { %v7885_v52 = vld [vmem:[#allocation8 + $0x318] sm:$0xff] }
 0x633   :  { %11249 = vmatpush1.bf16.msra.mxu0 %v16250_v20  ;;  %11395 = vmatpush1.bf16.msra.mxu1 %v16180_v36  ;;  %v7857_v20 = vld [vmem:[#allocation8 + $0x238] sm:$0xff]  ;;  %v16298_v36 = vcombine.low %v7916_v25, %v7920_v15  ;;  %v7964_v15 = vld [vmem:[#allocation8 + $0x590] sm:$0xff] }
 0x634   :  { %11250 = vmatprep.subr.bf16.mxu0 %v16259_v37  ;;  %11396 = vmatprep.subr.bf16.mxu1 %v16189_v38  ;;  %v16228_v37 = vcombine.low %v7845_v17, %v7849_v22  ;;  %v16307_v38 = vcombine.high %v7924_v50, %v7928_v58  ;;  %v16237_v0 = vcombine.high %v7853_v30, %v7857_v20  ;;  %v7968_v17 = vld [vmem:[#allocation8 + $0x5b0] sm:$0xff]  ;;  %v7893_v22 = vld [vmem:[#allocation8 + $0x358] sm:$0xff] }
 0x637   :  { %11251 = vmatpush1.bf16.msra.mxu0 %v16258_v31  ;;  %11397 = vmatpush1.bf16.msra.mxu1 %v16188_v35  ;;  %v7865_v31 = vld [vmem:[#allocation8 + $0x278] sm:$0xff]  ;;  %v16306_v35 = vcombine.low %v7924_v50, %v7928_v58  ;;  %v7972_v58 = vld [vmem:[#allocation8 + $0x5d0] sm:$0xff] }
 0x638   :  { %11252 = vmatprep.subr.bf16.mxu0 %v16267_v43  ;;  %11398 = vmatprep.subr.bf16.mxu1 %v16197_v62  ;;  %v16236_v43 = vcombine.low %v7853_v30, %v7857_v20  ;;  %v16315_v62 = vcombine.high %v7932_v19, %v7936_v34  ;;  %v16245_v44 = vcombine.high %v7861_v48, %v7865_v31  ;;  %v7976_v30 = vld [vmem:[#allocation8 + $0x5f0] sm:$0xff]  ;;  %v7901_v20 = vld [vmem:[#allocation8 + $0x398] sm:$0xff] }
 0x63b   :  { %11253 = vmatpush1.bf16.msra.mxu0 %v16266_v59  ;;  %11399 = vmatpush1.bf16.msra.mxu1 %v16196_v6  ;;  %v7873_v59 = vld [vmem:[#allocation8 + $0x2b8] sm:$0xff]  ;;  %v16314_v6 = vcombine.low %v7932_v19, %v7936_v34  ;;  %v7980_v34 = vld [vmem:[#allocation8 + $0x610] sm:$0xff] }
 0x63c   :  { %11254 = vmatprep.subr.bf16.mxu0 %v16275_v60  ;;  %11400 = vmatprep.subr.bf16.mxu1 %v16205_v42  ;;  %v16244_v60 = vcombine.low %v7861_v48, %v7865_v31  ;;  %v16323_v42 = vcombine.high %v7940_v47, %v7944_v57  ;;  %v16253_v16 = vcombine.high %v7869_v26, %v7873_v59  ;;  %v7984_v48 = vld [vmem:[#allocation8 + $0x630] sm:$0xff]  ;;  %v7909_v31 = vld [vmem:[#allocation8 + $0x3d8] sm:$0xff] }
 0x63f   :  { %11255 = vmatpush1.bf16.msra.mxu0 %v16274_v1  ;;  %11401 = vmatpush1.bf16.msra.mxu1 %v16204_v33  ;;  %v7881_v1 = vld [vmem:[#allocation8 + $0x2f8] sm:$0xff]  ;;  %v16322_v33 = vcombine.low %v7940_v47, %v7944_v57  ;;  %v7988_v57 = vld [vmem:[#allocation8 + $0x650] sm:$0xff] }
 0x640   :  { %11256 = vmatprep.subr.bf16.mxu0 %v16283_v2  ;;  %11402 = vmatprep.subr.bf16.mxu1 %v16213_v3  ;;  %v16252_v2 = vcombine.low %v7869_v26, %v7873_v59  ;;  %v16331_v3 = vcombine.high %v7948_v21, %v7952_v32  ;;  %v16261_v4 = vcombine.high %v7877_v14, %v7881_v1  ;;  %v7992_v26 = vld [vmem:[#allocation8 + $0x670] sm:$0xff]  ;;  %v7917_v59 = vld [vmem:[#allocation8 + $0x418] sm:$0xff] }
 0x643   :  { %11257 = vmatpush1.bf16.msra.mxu0 %v16282_v54  ;;  %11403 = vmatpush1.bf16.msra.mxu1 %v16212_v39  ;;  %v7889_v54 = vld [vmem:[#allocation8 + $0x338] sm:$0xff]  ;;  %v16330_v39 = vcombine.low %v7948_v21, %v7952_v32  ;;  %v7996_v32 = vld [vmem:[#allocation8 + $0x690] sm:$0xff] }
 0x644   :  { %11258 = vmatprep.subr.bf16.mxu0 %v16291_v61  ;;  %11404 = vmatprep.subr.bf16.mxu1 %v16221_v28  ;;  %v16260_v61 = vcombine.low %v7877_v14, %v7881_v1  ;;  %v16339_v28 = vcombine.high %v7956_v5, %v7960_v7  ;;  %v16269_v25 = vcombine.high %v7885_v52, %v7889_v54  ;;  %v8000_v14 = vld [vmem:[#allocation8 + $0x6b0] sm:$0xff]  ;;  %v7925_v1 = vld [vmem:[#allocation8 + $0x458] sm:$0xff] }
 0x647   :  { %11259 = vmatpush1.bf16.msra.mxu0 %v16290_v24  ;;  %11405 = vmatpush1.bf16.msra.mxu1 %v16220_v53  ;;  %v7897_v24 = vld [vmem:[#allocation8 + $0x378] sm:$0xff]  ;;  %v16338_v53 = vcombine.low %v7956_v5, %v7960_v7  ;;  %v8004_v7 = vld [vmem:[#allocation8 + $0x6d0] sm:$0xff] }
 0x648   :  { %11269 = vmatprep.subr.bf16.mxu0 %v16299_v27  ;;  %11406 = vmatprep.subr.bf16.mxu1 %v16229_v56  ;;  %v16268_v27 = vcombine.low %v7885_v52, %v7889_v54  ;;  %v16347_v56 = vcombine.high %v7964_v15, %v7968_v17  ;;  %v16277_v50 = vcombine.high %v7893_v22, %v7897_v24  ;;  %v8008_v52 = vld [vmem:[#allocation8 + $0x6f0] sm:$0xff]  ;;  %v7933_v54 = vld [vmem:[#allocation8 + $0x498] sm:$0xff] }
 0x64a   :  { %11261 = vmatmul.mubr.bf16.vlgmr.msra.gmra.mrb[12].mxu0 %v18869_v45 }
 0x64b   :  { %11270 = vmatpush1.bf16.msra.mxu0 %v16298_v36  ;;  %11301 = vmatprep.mubr.bf16.mxu0 %v18871_v46  ;;  %v7905_v36 = vld [vmem:[#allocation8 + $0x3b8] sm:$0xff] }
 0x64c   :  { %11407 = vmatpush1.bf16.msra.mxu1 %v16228_v37  ;;  %11271 = vmatprep.subr.bf16.mxu0 %v16307_v38  ;;  %v16346_v37 = vcombine.low %v7964_v15, %v7968_v17  ;;  %v16276_v38 = vcombine.low %v7893_v22, %v7897_v24  ;;  %v16285_v19 = vcombine.high %v7901_v20, %v7905_v36  ;;  %v8012_v17 = vld [vmem:[#allocation8 + $0x710] sm:$0xff]  ;;  %v7941_v24 = vld [vmem:[#allocation8 + $0x4d8] sm:$0xff] }
 0x64d   :  { %11408 = vmatprep.subr.bf16.mxu1 %v16237_v0  ;;  %v16355_v0 = vcombine.high %v7972_v58, %v7976_v30  ;;  %v8016_v22 = vld [vmem:[#allocation8 + $0x730] sm:$0xff] }
 0x64f   :  { %11272 = vmatpush1.bf16.msra.mxu0 %v16306_v35  ;;  %v7913_v35 = vld [vmem:[#allocation8 + $0x3f8] sm:$0xff] }
 0x650   :  { %11409 = vmatpush1.bf16.msra.mxu1 %v16236_v43  ;;  %11273 = vmatprep.subr.bf16.mxu0 %v16315_v62  ;;  %v16354_v43 = vcombine.low %v7972_v58, %v7976_v30  ;;  %v16284_v62 = vcombine.low %v7901_v20, %v7905_v36  ;;  %v16293_v47 = vcombine.high %v7909_v31, %v7913_v35  ;;  %v8020_v58 = vld [vmem:[#allocation8 + $0x750] sm:$0xff]  ;;  %v7953_v20 = vld [vmem:[#allocation8 + $0x538] sm:$0xff] }
 0x651   :  { %11410 = vmatprep.subr.bf16.mxu1 %v16245_v44  ;;  %v16363_v44 = vcombine.high %v7980_v34, %v7984_v48  ;;  %v8024_v30 = vld [vmem:[#allocation8 + $0x770] sm:$0xff]  ;;  %v16394_v36 = vcombine.low %v8012_v17, %v8016_v22 }
 0x653   :  { %11274 = vmatpush1.bf16.msra.mxu0 %v16314_v6  ;;  %v7921_v6 = vld [vmem:[#allocation8 + $0x438] sm:$0xff] }
 0x654   :  { %11411 = vmatpush1.bf16.msra.mxu1 %v16244_v60  ;;  %11275 = vmatprep.subr.bf16.mxu0 %v16323_v42  ;;  %v16362_v60 = vcombine.low %v7980_v34, %v7984_v48  ;;  %v16292_v42 = vcombine.low %v7909_v31, %v7913_v35  ;;  %v16301_v21 = vcombine.high %v7917_v59, %v7921_v6  ;;  %v8032_v34 = vld [vmem:[#allocation8 + $0x7b0] sm:$0xff]  ;;  %v7957_v48 = vld [vmem:[#allocation8 + $0x558] sm:$0xff] }
 0x655   :  { %11412 = vmatprep.subr.bf16.mxu1 %v16253_v16  ;;  %v16371_v16 = vcombine.high %v7988_v57, %v7992_v26  ;;  %v7961_v31 = vld [vmem:[#allocation8 + $0x578] sm:$0xff]  ;;  %v16402_v35 = vcombine.low %v8020_v58, %v8024_v30 }
 0x657   :  { %11276 = vmatpush1.bf16.msra.mxu0 %v16322_v33  ;;  %v7929_v33 = vld [vmem:[#allocation8 + $0x478] sm:$0xff] }
 0x658   :  { %11413 = vmatpush1.bf16.msra.mxu1 %v16252_v2  ;;  %11277 = vmatprep.subr.bf16.mxu0 %v16331_v3  ;;  %v16370_v2 = vcombine.low %v7988_v57, %v7992_v26  ;;  %v16300_v3 = vcombine.low %v7917_v59, %v7921_v6  ;;  %v16309_v5 = vcombine.high %v7925_v1, %v7929_v33  ;;  %v8040_v57 = vld [vmem:[#allocation8 + $0x7f0] sm:$0xff]  ;;  %v7965_v26 = vld [vmem:[#allocation8 + $0x598] sm:$0xff] }
 0x659   :  { %11414 = vmatprep.subr.bf16.mxu1 %v16261_v4  ;;  %v16379_v4 = vcombine.high %v7996_v32, %v8000_v14  ;;  %v7969_v59 = vld [vmem:[#allocation8 + $0x5b8] sm:$0xff] }
 0x65b   :  { %11278 = vmatpush1.bf16.msra.mxu0 %v16330_v39  ;;  %v7937_v39 = vld [vmem:[#allocation8 + $0x4b8] sm:$0xff] }
 0x65c   :  { %11415 = vmatpush1.bf16.msra.mxu1 %v16260_v61  ;;  %11279 = vmatprep.subr.bf16.mxu0 %v16339_v28  ;;  %v16378_v61 = vcombine.low %v7996_v32, %v8000_v14  ;;  %v16308_v28 = vcombine.low %v7925_v1, %v7929_v33  ;;  %v16317_v15 = vcombine.high %v7933_v54, %v7937_v39  ;;  %v8048_v32 = vld [vmem:[#allocation8 + $0x830] sm:$0xff]  ;;  %v7973_v14 = vld [vmem:[#allocation8 + $0x5d8] sm:$0xff] }
 0x65d   :  { %11416 = vmatprep.subr.bf16.mxu1 %v16269_v25  ;;  %v16387_v25 = vcombine.high %v8004_v7, %v8008_v52  ;;  %v7977_v1 = vld [vmem:[#allocation8 + $0x5f8] sm:$0xff] }
 0x65f   :  { %11280 = vmatpush1.bf16.msra.mxu0 %v16338_v53  ;;  %v7945_v53 = vld [vmem:[#allocation8 + $0x4f8] sm:$0xff] }
 0x660   :  { %11417 = vmatpush1.bf16.msra.mxu1 %v16268_v27  ;;  %11281 = vmatprep.subr.bf16.mxu0 %v16347_v56  ;;  %v16386_v27 = vcombine.low %v8004_v7, %v8008_v52  ;;  %v16316_v56 = vcombine.low %v7933_v54, %v7937_v39  ;;  %v8056_v7 = vld [vmem:[#allocation8 + $0x870] sm:$0xff]  ;;  %v7981_v52 = vld [vmem:[#allocation8 + $0x618] sm:$0xff] }
 0x661   :  { %11418 = vmatprep.subr.bf16.mxu1 %v16277_v50  ;;  %v16395_v50 = vcombine.high %v8012_v17, %v8016_v22  ;;  %v7985_v54 = vld [vmem:[#allocation8 + $0x638] sm:$0xff]  ;;  %v8064_v17 = vld [vmem:[#allocation8 + $0x8b0] sm:$0xff] }
 0x662   :  { %v7989_v22 = vld [vmem:[#allocation8 + $0x658] sm:$0xff] }
 0x663   :  { %11282 = vmatpush1.bf16.msra.mxu0 %v16346_v37  ;;  %v16324_v37 = vcombine.low %v7941_v24, %v7945_v53 }
 0x664   :  { %11419 = vmatpush1.bf16.msra.mxu1 %v16276_v38  ;;  %11283 = vmatprep.subr.bf16.mxu0 %v16355_v0  ;;  %v16403_v38 = vcombine.high %v8020_v58, %v8024_v30  ;;  %v8072_v58 = vld [vmem:[#allocation8 + $0x8f0] sm:$0xff]  ;;  %v7997_v30 = vld [vmem:[#allocation8 + $0x698] sm:$0xff] }
 0x665   :  { %11420 = vmatprep.subr.bf16.mxu1 %v16285_v19  ;;  %v8028_v19 = vld [vmem:[#allocation8 + $0x790] sm:$0xff] }
 0x666   :  { %v16410_v6 = vcombine.low %v8028_v19, %v8032_v34 }
 0x667   :  { %11284 = vmatpush1.bf16.msra.mxu0 %v16354_v43 }
 0x668   :  { %11421 = vmatpush1.bf16.msra.mxu1 %v16284_v62  ;;  %11285 = vmatprep.subr.bf16.mxu0 %v16363_v44  ;;  %v16411_v62 = vcombine.high %v8028_v19, %v8032_v34  ;;  %v16341_v44 = vcombine.high %v7957_v48, %v7961_v31  ;;  %v8080_v19 = vld [vmem:[#allocation8 + $0x930] sm:$0xff]  ;;  %v8005_v34 = vld [vmem:[#allocation8 + $0x6d8] sm:$0xff] }
 0x669   :  { %11422 = vmatprep.subr.bf16.mxu1 %v16293_v47  ;;  %v8036_v47 = vld [vmem:[#allocation8 + $0x7d0] sm:$0xff] }
 0x66a   :  { %v16418_v33 = vcombine.low %v8036_v47, %v8040_v57 }
 0x66b   :  { %11286 = vmatpush1.bf16.msra.mxu0 %v16362_v60  ;;  %v16340_v60 = vcombine.low %v7957_v48, %v7961_v31  ;;  %v8009_v48 = vld [vmem:[#allocation8 + $0x6f8] sm:$0xff] }
 0x66c   :  { %11423 = vmatpush1.bf16.msra.mxu1 %v16292_v42  ;;  %11287 = vmatprep.subr.bf16.mxu0 %v16371_v16  ;;  %v16419_v42 = vcombine.high %v8036_v47, %v8040_v57  ;;  %v16349_v16 = vcombine.high %v7965_v26, %v7969_v59  ;;  %v8088_v47 = vld [vmem:[#allocation8 + $0x970] sm:$0xff]  ;;  %v8013_v57 = vld [vmem:[#allocation8 + $0x718] sm:$0xff] }
 0x66d   :  { %11433 = vmatprep.subr.bf16.mxu1 %v16301_v21  ;;  %v8044_v21 = vld [vmem:[#allocation8 + $0x810] sm:$0xff] }
 0x66e   :  { %v16426_v39 = vcombine.low %v8044_v21, %v8048_v32 }
 0x66f   :  { %11288 = vmatpush1.bf16.msra.mxu0 %v16370_v2  ;;  %11425 = vmatmul.mubr.bf16.vlgmr.msra.gmra.mrb[16].mxu1 %v18869_v45  ;;  %v16325_v45 = vcombine.high %v7941_v24, %v7945_v53  ;;  %v16348_v2 = vcombine.low %v7965_v26, %v7969_v59  ;;  %v7993_v24 = vld [vmem:[#allocation8 + $0x678] sm:$0xff] }
 0x670   :  { %11434 = vmatpush1.bf16.msra.mxu1 %v16300_v3  ;;  %11465 = vmatprep.mubr.bf16.mxu1 %v18871_v46  ;;  %v7949_v46 = vld [vmem:[#allocation8 + $0x518] sm:$0xff]  ;;  %v16427_v3 = vcombine.high %v8044_v21, %v8048_v32  ;;  %v8096_v21 = vld [vmem:[#allocation8 + $0x9b0] sm:$0xff] }
 0x671   :  { %11289 = vmatprep.subr.bf16.mxu0 %v16379_v4  ;;  %11435 = vmatprep.subr.bf16.mxu1 %v16309_v5  ;;  %v16333_v0 = vcombine.high %v7949_v46, %v7953_v20  ;;  %v16332_v43 = vcombine.low %v7949_v46, %v7953_v20  ;;  %v16357_v4 = vcombine.high %v7973_v14, %v7977_v1  ;;  %v8052_v5 = vld [vmem:[#allocation8 + $0x850] sm:$0xff]  ;;  %v8001_v46 = vld [vmem:[#allocation8 + $0x6b8] sm:$0xff] }
 0x672   :  { %v16434_v53 = vcombine.low %v8052_v5, %v8056_v7  ;;  %v8017_v26 = vld [vmem:[#allocation8 + $0x738] sm:$0xff] }
 0x673   :  { %11290 = vmatpush1.bf16.msra.mxu0 %v16378_v61  ;;  %v16356_v61 = vcombine.low %v7973_v14, %v7977_v1  ;;  %v8021_v32 = vld [vmem:[#allocation8 + $0x758] sm:$0xff] }
 0x674   :  { %11436 = vmatpush1.bf16.msra.mxu1 %v16308_v28  ;;  %11291 = vmatprep.subr.bf16.mxu0 %v16387_v25  ;;  %v16435_v28 = vcombine.high %v8052_v5, %v8056_v7  ;;  %v16365_v25 = vcombine.high %v7981_v52, %v7985_v54  ;;  %v8025_v14 = vld [vmem:[#allocation8 + $0x778] sm:$0xff]  ;;  %v8104_v5 = vld [vmem:[#allocation8 + $0x9f0] sm:$0xff] }
 0x675   :  { %11437 = vmatprep.subr.bf16.mxu1 %v16317_v15  ;;  %v8060_v15 = vld [vmem:[#allocation8 + $0x890] sm:$0xff]  ;;  %v8029_v7 = vld [vmem:[#allocation8 + $0x798] sm:$0xff] }
 0x676   :  { %v16442_v20 = vcombine.low %v8060_v15, %v8064_v17 }
 0x677   :  { %11292 = vmatpush1.bf16.msra.mxu0 %v16386_v27  ;;  %v16364_v27 = vcombine.low %v7981_v52, %v7985_v54  ;;  %v8033_v52 = vld [vmem:[#allocation8 + $0x7b8] sm:$0xff] }
 0x678   :  { %11438 = vmatpush1.bf16.msra.mxu1 %v16316_v56  ;;  %11293 = vmatprep.subr.bf16.mxu0 %v16395_v50  ;;  %v16443_v56 = vcombine.high %v8060_v15, %v8064_v17  ;;  %v16373_v50 = vcombine.high %v7989_v22, %v7993_v24  ;;  %v8112_v15 = vld [vmem:[#allocation8 + $0xa30] sm:$0xff]  ;;  %v8037_v17 = vld [vmem:[#allocation8 + $0x7d8] sm:$0xff] }
 0x679   :  { %11439 = vmatprep.subr.bf16.mxu1 %v16325_v45  ;;  %v8068_v45 = vld [vmem:[#allocation8 + $0x8d0] sm:$0xff] }
 0x67a   :  { %v16450_v31 = vcombine.low %v8068_v45, %v8072_v58 }
 0x67b   :  { %11294 = vmatpush1.bf16.msra.mxu0 %v16394_v36  ;;  %v16372_v36 = vcombine.low %v7989_v22, %v7993_v24  ;;  %v8041_v22 = vld [vmem:[#allocation8 + $0x7f8] sm:$0xff] }
 0x67c   :  { %11440 = vmatpush1.bf16.msra.mxu1 %v16324_v37  ;;  %11295 = vmatprep.subr.bf16.mxu0 %v16403_v38  ;;  %v16451_v37 = vcombine.high %v8068_v45, %v8072_v58  ;;  %v16381_v38 = vcombine.high %v7997_v30, %v8001_v46  ;;  %v8120_v45 = vld [vmem:[#allocation8 + $0xa70] sm:$0xff]  ;;  %v8045_v58 = vld [vmem:[#allocation8 + $0x818] sm:$0xff] }
 0x67d   :  { %11441 = vmatprep.subr.bf16.mxu1 %v16333_v0  ;;  %v8076_v0 = vld [vmem:[#allocation8 + $0x910] sm:$0xff] }
 0x67e   :  { %v16458_v59 = vcombine.low %v8076_v0, %v8080_v19 }
 0x67f   :  { %11296 = vmatpush1.bf16.msra.mxu0 %v16402_v35  ;;  %v16380_v35 = vcombine.low %v7997_v30, %v8001_v46  ;;  %v8049_v30 = vld [vmem:[#allocation8 + $0x838] sm:$0xff] }
 0x680   :  { %11442 = vmatpush1.bf16.msra.mxu1 %v16332_v43  ;;  %11297 = vmatprep.subr.bf16.mxu0 %v16411_v62  ;;  %v16459_v43 = vcombine.high %v8076_v0, %v8080_v19  ;;  %v16389_v62 = vcombine.high %v8005_v34, %v8009_v48  ;;  %v8128_v0 = vld [vmem:[#allocation8 + $0xab0] sm:$0xff]  ;;  %v8053_v19 = vld [vmem:[#allocation8 + $0x858] sm:$0xff] }
 0x681   :  { %11443 = vmatprep.subr.bf16.mxu1 %v16341_v44  ;;  %v8084_v44 = vld [vmem:[#allocation8 + $0x950] sm:$0xff] }
 0x682   :  { %v16466_v1 = vcombine.low %v8084_v44, %v8088_v47 }
 0x683   :  { %11298 = vmatpush1.bf16.msra.mxu0 %v16410_v6  ;;  %v16388_v6 = vcombine.low %v8005_v34, %v8009_v48  ;;  %v8057_v34 = vld [vmem:[#allocation8 + $0x878] sm:$0xff] }
 0x684   :  { %11444 = vmatpush1.bf16.msra.mxu1 %v16340_v60  ;;  %11299 = vmatprep.subr.bf16.mxu0 %v16419_v42  ;;  %v16467_v60 = vcombine.high %v8084_v44, %v8088_v47  ;;  %v16397_v42 = vcombine.high %v8013_v57, %v8017_v26  ;;  %v8136_v44 = vld [vmem:[#allocation8 + $0xaf0] sm:$0xff]  ;;  %v8061_v47 = vld [vmem:[#allocation8 + $0x898] sm:$0xff] }
 0x685   :  { %11445 = vmatprep.subr.bf16.mxu1 %v16349_v16  ;;  %v8092_v16 = vld [vmem:[#allocation8 + $0x990] sm:$0xff] }
 0x686   :  { %v16474_v54 = vcombine.low %v8092_v16, %v8096_v21 }
 0x687   :  { %11300 = vmatpush1.bf16.msra.mxu0 %v16418_v33  ;;  %v16396_v33 = vcombine.low %v8013_v57, %v8017_v26  ;;  %v8065_v57 = vld [vmem:[#allocation8 + $0x8b8] sm:$0xff] }
 0x688   :  { %11446 = vmatpush1.bf16.msra.mxu1 %v16348_v2  ;;  %11310 = vmatprep.subr.bf16.mxu0 %v16427_v3  ;;  %v16475_v2 = vcombine.high %v8092_v16, %v8096_v21  ;;  %v16405_v3 = vcombine.high %v8021_v32, %v8025_v14  ;;  %v8144_v16 = vld [vmem:[#allocation8 + $0xb30] sm:$0xff]  ;;  %v8069_v21 = vld [vmem:[#allocation8 + $0x8d8] sm:$0xff] }
 0x689   :  { %11447 = vmatprep.subr.bf16.mxu1 %v16357_v4  ;;  %v8100_v4 = vld [vmem:[#allocation8 + $0x9d0] sm:$0xff] }
 0x68a   :  { %11302 = vmatmul.mubr.bf16.vlgmr.msra.gmra.mrb[12].mxu0 %v18883_v40  ;;  %v16482_v24 = vcombine.low %v8100_v4, %v8104_v5 }
 0x68b   :  { %11311 = vmatpush1.bf16.msra.mxu0 %v16426_v39  ;;  %11342 = vmatprep.mubr.bf16.mxu0 %v18908_v29  ;;  %v16404_v39 = vcombine.low %v8021_v32, %v8025_v14  ;;  %v8073_v32 = vld [vmem:[#allocation8 + $0x8f8] sm:$0xff] }
 0x68c   :  { %11448 = vmatpush1.bf16.msra.mxu1 %v16356_v61  ;;  %11312 = vmatprep.subr.bf16.mxu0 %v16435_v28  ;;  %v16483_v61 = vcombine.high %v8100_v4, %v8104_v5  ;;  %v16413_v28 = vcombine.high %v8029_v7, %v8033_v52  ;;  %v8081_v4 = vld [vmem:[#allocation8 + $0x938] sm:$0xff] }
 0x68d   :  { %11449 = vmatprep.subr.bf16.mxu1 %v16365_v25  ;;  %v8108_v25 = vld [vmem:[#allocation8 + $0xa10] sm:$0xff] }
 0x68e   :  { %v16490_v46 = vcombine.low %v8108_v25, %v8112_v15 }
 0x68f   :  { %11313 = vmatpush1.bf16.msra.mxu0 %v16434_v53  ;;  %v16412_v53 = vcombine.low %v8029_v7, %v8033_v52  ;;  %v16452_v7 = vcombine.low %v8069_v21, %v8073_v32 }
 0x690   :  { %11450 = vmatpush1.bf16.msra.mxu1 %v16364_v27  ;;  %11314 = vmatprep.subr.bf16.mxu0 %v16443_v56  ;;  %v16491_v27 = vcombine.high %v8108_v25, %v8112_v15  ;;  %v16421_v56 = vcombine.high %v8037_v17, %v8041_v22  ;;  %v8089_v25 = vld [vmem:[#allocation8 + $0x978] sm:$0xff] }
 0x691   :  { %11451 = vmatprep.subr.bf16.mxu1 %v16373_v50  ;;  %v8116_v50 = vld [vmem:[#allocation8 + $0xa50] sm:$0xff] }
 0x692   :  { %v16498_v48 = vcombine.low %v8116_v50, %v8120_v45 }
 0x693   :  { %11315 = vmatpush1.bf16.msra.mxu0 %v16442_v20  ;;  %v16420_v20 = vcombine.low %v8037_v17, %v8041_v22 }
 0x694   :  { %11452 = vmatpush1.bf16.msra.mxu1 %v16372_v36  ;;  %11316 = vmatprep.subr.bf16.mxu0 %v16451_v37  ;;  %v16499_v36 = vcombine.high %v8116_v50, %v8120_v45  ;;  %v16429_v37 = vcombine.high %v8045_v58, %v8049_v30  ;;  %v8097_v50 = vld [vmem:[#allocation8 + $0x9b8] sm:$0xff] }
 0x695   :  { %11453 = vmatprep.subr.bf16.mxu1 %v16381_v38  ;;  %v8124_v38 = vld [vmem:[#allocation8 + $0xa90] sm:$0xff] }
 0x696   :  { %v16506_v26 = vcombine.low %v8124_v38, %v8128_v0 }
 0x697   :  { %11317 = vmatpush1.bf16.msra.mxu0 %v16450_v31  ;;  %v16428_v31 = vcombine.low %v8045_v58, %v8049_v30 }
 0x698   :  { %11454 = vmatpush1.bf16.msra.mxu1 %v16380_v35  ;;  %11318 = vmatprep.subr.bf16.mxu0 %v16459_v43  ;;  %v16507_v35 = vcombine.high %v8124_v38, %v8128_v0  ;;  %v16437_v43 = vcombine.high %v8053_v19, %v8057_v34  ;;  %v8105_v38 = vld [vmem:[#allocation8 + $0x9f8] sm:$0xff] }
 0x699   :  { %11455 = vmatprep.subr.bf16.mxu1 %v16389_v62  ;;  %v8132_v62 = vld [vmem:[#allocation8 + $0xad0] sm:$0xff] }
 0x69a   :  { %v16514_v14 = vcombine.low %v8132_v62, %v8136_v44 }
 0x69b   :  { %11319 = vmatpush1.bf16.msra.mxu0 %v16458_v59  ;;  %v16436_v59 = vcombine.low %v8053_v19, %v8057_v34 }
 0x69c   :  { %11456 = vmatpush1.bf16.msra.mxu1 %v16388_v6  ;;  %11320 = vmatprep.subr.bf16.mxu0 %v16467_v60  ;;  %v16515_v6 = vcombine.high %v8132_v62, %v8136_v44  ;;  %v16445_v60 = vcombine.high %v8061_v47, %v8065_v57  ;;  %v8113_v62 = vld [vmem:[#allocation8 + $0xa38] sm:$0xff] }
 0x69d   :  { %11457 = vmatprep.subr.bf16.mxu1 %v16397_v42  ;;  %v8140_v42 = vld [vmem:[#allocation8 + $0xb10] sm:$0xff] }
 0x69e   :  { %v16522_v5 = vcombine.low %v8140_v42, %v8144_v16 }
 0x69f   :  { %11321 = vmatpush1.bf16.msra.mxu0 %v16466_v1  ;;  %v16444_v1 = vcombine.low %v8061_v47, %v8065_v57 }
 0x6a0   :  { %11458 = vmatpush1.bf16.msra.mxu1 %v16396_v33  ;;  %11322 = vmatprep.subr.bf16.mxu0 %v16475_v2  ;;  %v16523_v33 = vcombine.high %v8140_v42, %v8144_v16  ;;  %v8148_v2 = vld [vmem:[#allocation8 + $0xb50] sm:$0xff]  ;;  %v8121_v42 = vld [vmem:[#allocation8 + $0xa78] sm:$0xff] }
 0x6a1   :  { %11459 = vmatprep.subr.bf16.mxu1 %v16405_v3  ;;  %v8152_v3 = vld [vmem:[#allocation8 + $0xb70] sm:$0xff] }
 0x6a2   :  { %v16531_v52 = vcombine.high %v8148_v2, %v8152_v3  ;;  %v16530_v15 = vcombine.low %v8148_v2, %v8152_v3  ;;  %v8129_v2 = vld [vmem:[#allocation8 + $0xab8] sm:$0xff] }
 0x6a3   :  { %11323 = vmatpush1.bf16.msra.mxu0 %v16474_v54 }
 0x6a4   :  { %11460 = vmatpush1.bf16.msra.mxu1 %v16404_v39  ;;  %11324 = vmatprep.subr.bf16.mxu0 %v16483_v61  ;;  %v8156_v39 = vld [vmem:[#allocation8 + $0xb90] sm:$0xff] }
 0x6a5   :  { %11461 = vmatprep.subr.bf16.mxu1 %v16413_v28  ;;  %v8160_v61 = vld [vmem:[#allocation8 + $0xbb0] sm:$0xff]  ;;  %v8085_v28 = vld [vmem:[#allocation8 + $0x958] sm:$0xff] }
 0x6a6   :  { %v16539_v22 = vcombine.high %v8156_v39, %v8160_v61  ;;  %v16538_v45 = vcombine.low %v8156_v39, %v8160_v61  ;;  %v16468_v58 = vcombine.low %v8085_v28, %v8089_v25  ;;  %v8137_v39 = vld [vmem:[#allocation8 + $0xaf8] sm:$0xff] }
 0x6a7   :  { %11325 = vmatpush1.bf16.msra.mxu0 %v16482_v24  ;;  %v16469_v24 = vcombine.high %v8085_v28, %v8089_v25 }
 0x6a8   :  { %11462 = vmatpush1.bf16.msra.mxu1 %v16412_v53  ;;  %11326 = vmatprep.subr.bf16.mxu0 %v16491_v27  ;;  %v8164_v53 = vld [vmem:[#allocation8 + $0xbd0] sm:$0xff] }
 0x6a9   :  { %11463 = vmatprep.subr.bf16.mxu1 %v16421_v56  ;;  %v8168_v27 = vld [vmem:[#allocation8 + $0xbf0] sm:$0xff]  ;;  %v8093_v56 = vld [vmem:[#allocation8 + $0x998] sm:$0xff] }
 0x6aa   :  { %v16547_v30 = vcombine.high %v8164_v53, %v8168_v27  ;;  %v16546_v0 = vcombine.low %v8164_v53, %v8168_v27  ;;  %v16476_v19 = vcombine.low %v8093_v56, %v8097_v50  ;;  %v8145_v53 = vld [vmem:[#allocation8 + $0xb38] sm:$0xff] }
 0x6ab   :  { %11327 = vmatpush1.bf16.msra.mxu0 %v16490_v46  ;;  %v16477_v46 = vcombine.high %v8093_v56, %v8097_v50 }
 0x6ac   :  { %11464 = vmatpush1.bf16.msra.mxu1 %v16420_v20  ;;  %11328 = vmatprep.subr.bf16.mxu0 %v16499_v36  ;;  %v8172_v20 = vld [vmem:[#allocation8 + $0xc10] sm:$0xff] }
 0x6ad   :  { %11474 = vmatprep.subr.bf16.mxu1 %v16429_v37  ;;  %v8176_v36 = vld [vmem:[#allocation8 + $0xc30] sm:$0xff]  ;;  %v8101_v37 = vld [vmem:[#allocation8 + $0x9d8] sm:$0xff] }
 0x6ae   :  { %v16555_v34 = vcombine.high %v8172_v20, %v8176_v36  ;;  %v16554_v44 = vcombine.low %v8172_v20, %v8176_v36  ;;  %v16484_v47 = vcombine.low %v8101_v37, %v8105_v38  ;;  %v8153_v20 = vld [vmem:[#allocation8 + $0xb78] sm:$0xff] }
 0x6af   :  { %11329 = vmatpush1.bf16.msra.mxu0 %v16498_v48  ;;  %11466 = vmatmul.mubr.bf16.vlgmr.msra.gmra.mrb[16].mxu1 %v18883_v40  ;;  %v16453_v40 = vcombine.high %v8069_v21, %v8073_v32  ;;  %v16485_v48 = vcombine.high %v8101_v37, %v8105_v38 }
 0x6b0   :  { %11475 = vmatpush1.bf16.msra.mxu1 %v16428_v31  ;;  %11506 = vmatprep.mubr.bf16.mxu1 %v18908_v29  ;;  %v8077_v29 = vld [vmem:[#allocation8 + $0x918] sm:$0xff]  ;;  %v8180_v31 = vld [vmem:[#allocation8 + $0xc50] sm:$0xff] }
 0x6b1   :  { %11330 = vmatprep.subr.bf16.mxu0 %v16507_v35  ;;  %11476 = vmatprep.subr.bf16.mxu1 %v16437_v43  ;;  %v16461_v54 = vcombine.high %v8077_v29, %v8081_v4  ;;  %v16460_v17 = vcombine.low %v8077_v29, %v8081_v4  ;;  %v8184_v35 = vld [vmem:[#allocation8 + $0xc70] sm:$0xff]  ;;  %v8109_v43 = vld [vmem:[#allocation8 + $0xa18] sm:$0xff] }
 0x6b2   :  { %v16563_v57 = vcombine.high %v8180_v31, %v8184_v35  ;;  %v16562_v16 = vcombine.low %v8180_v31, %v8184_v35  ;;  %v16492_v21 = vcombine.low %v8109_v43, %v8113_v62  ;;  %v8157_v35 = vld [vmem:[#allocation8 + $0xb98] sm:$0xff] }
 0x6b3   :  { %11331 = vmatpush1.bf16.msra.mxu0 %v16506_v26  ;;  %v16493_v26 = vcombine.high %v8109_v43, %v8113_v62  ;;  %v8161_v43 = vld [vmem:[#allocation8 + $0xbb8] sm:$0xff] }
 0x6b4   :  { %11477 = vmatpush1.bf16.msra.mxu1 %v16436_v59  ;;  %11332 = vmatprep.subr.bf16.mxu0 %v16515_v6  ;;  %v8188_v59 = vld [vmem:[#allocation8 + $0xc90] sm:$0xff] }
 0x6b5   :  { %11478 = vmatprep.subr.bf16.mxu1 %v16445_v60  ;;  %v8192_v6 = vld [vmem:[#allocation8 + $0xcb0] sm:$0xff]  ;;  %v8117_v60 = vld [vmem:[#allocation8 + $0xa58] sm:$0xff] }
 0x6b6   :  { %v16571_v32 = vcombine.high %v8188_v59, %v8192_v6  ;;  %v16570_v3 = vcombine.low %v8188_v59, %v8192_v6  ;;  %v16500_v29 = vcombine.low %v8117_v60, %v8121_v42  ;;  %v16541_v59 = vcombine.high %v8157_v35, %v8161_v43  ;;  %v8236_v6 = vld [vmem:[#allocation8 + $0xe10] sm:$0xff] }
 0x6b7   :  { %11333 = vmatpush1.bf16.msra.mxu0 %v16514_v14  ;;  %v16501_v14 = vcombine.high %v8117_v60, %v8121_v42  ;;  %v8240_v60 = vld [vmem:[#allocation8 + $0xe30] sm:$0xff]  ;;  %v8165_v42 = vld [vmem:[#allocation8 + $0xbd8] sm:$0xff] }
 0x6b8   :  { %11479 = vmatpush1.bf16.msra.mxu1 %v16444_v1  ;;  %11334 = vmatprep.subr.bf16.mxu0 %v16523_v33  ;;  %v8196_v1 = vld [vmem:[#allocation8 + $0xcd0] sm:$0xff] }
 0x6b9   :  { %11480 = vmatprep.subr.bf16.mxu1 %v16453_v40  ;;  %v8200_v33 = vld [vmem:[#allocation8 + $0xcf0] sm:$0xff]  ;;  %v8125_v40 = vld [vmem:[#allocation8 + $0xa98] sm:$0xff] }
 0x6ba   :  { %v16579_v4 = vcombine.high %v8196_v1, %v8200_v33  ;;  %v16578_v61 = vcombine.low %v8196_v1, %v8200_v33  ;;  %v16508_v28 = vcombine.low %v8125_v40, %v8129_v2  ;;  %v8244_v33 = vld [vmem:[#allocation8 + $0xe50] sm:$0xff] }
 0x6bb   :  { %11335 = vmatpush1.bf16.msra.mxu0 %v16522_v5  ;;  %v16509_v5 = vcombine.high %v8125_v40, %v8129_v2  ;;  %v8248_v40 = vld [vmem:[#allocation8 + $0xe70] sm:$0xff]  ;;  %v8173_v2 = vld [vmem:[#allocation8 + $0xc18] sm:$0xff] }
 0x6bc   :  { %11481 = vmatpush1.bf16.msra.mxu1 %v16452_v7  ;;  %11336 = vmatprep.subr.bf16.mxu0 %v16531_v52  ;;  %v8204_v7 = vld [vmem:[#allocation8 + $0xd10] sm:$0xff] }
 0x6bd   :  { %11482 = vmatprep.subr.bf16.mxu1 %v16461_v54  ;;  %v8208_v52 = vld [vmem:[#allocation8 + $0xd30] sm:$0xff]  ;;  %v8133_v54 = vld [vmem:[#allocation8 + $0xad8] sm:$0xff] }
 0x6be   :  { %v16587_v25 = vcombine.high %v8204_v7, %v8208_v52  ;;  %v16586_v27 = vcombine.low %v8204_v7, %v8208_v52  ;;  %v16516_v56 = vcombine.low %v8133_v54, %v8137_v39  ;;  %v8252_v52 = vld [vmem:[#allocation8 + $0xe90] sm:$0xff] }
 0x6bf   :  { %11337 = vmatpush1.bf16.msra.mxu0 %v16530_v15  ;;  %v16517_v15 = vcombine.high %v8133_v54, %v8137_v39  ;;  %v8256_v54 = vld [vmem:[#allocation8 + $0xeb0] sm:$0xff]  ;;  %v8181_v39 = vld [vmem:[#allocation8 + $0xc58] sm:$0xff] }
 0x6c0   :  { %11483 = vmatpush1.bf16.msra.mxu1 %v16460_v17  ;;  %11338 = vmatprep.subr.bf16.mxu0 %v16539_v22  ;;  %v8212_v17 = vld [vmem:[#allocation8 + $0xd50] sm:$0xff] }
 0x6c1   :  { %11484 = vmatprep.subr.bf16.mxu1 %v16469_v24  ;;  %v8216_v22 = vld [vmem:[#allocation8 + $0xd70] sm:$0xff]  ;;  %v8141_v24 = vld [vmem:[#allocation8 + $0xb18] sm:$0xff] }
 0x6c2   :  { %v16595_v50 = vcombine.high %v8212_v17, %v8216_v22  ;;  %v16594_v36 = vcombine.low %v8212_v17, %v8216_v22  ;;  %v16524_v37 = vcombine.low %v8141_v24, %v8145_v53  ;;  %v8260_v22 = vld [vmem:[#allocation8 + $0xed0] sm:$0xff] }
 0x6c3   :  { %11339 = vmatpush1.bf16.msra.mxu0 %v16538_v45  ;;  %v16525_v45 = vcombine.high %v8141_v24, %v8145_v53  ;;  %v8264_v24 = vld [vmem:[#allocation8 + $0xef0] sm:$0xff]  ;;  %v8189_v53 = vld [vmem:[#allocation8 + $0xc98] sm:$0xff] }
 0x6c4   :  { %11485 = vmatpush1.bf16.msra.mxu1 %v16468_v58  ;;  %11340 = vmatprep.subr.bf16.mxu0 %v16547_v30  ;;  %v8220_v58 = vld [vmem:[#allocation8 + $0xd90] sm:$0xff] }
 0x6c5   :  { %11486 = vmatprep.subr.bf16.mxu1 %v16477_v46  ;;  %v8224_v30 = vld [vmem:[#allocation8 + $0xdb0] sm:$0xff]  ;;  %v8149_v46 = vld [vmem:[#allocation8 + $0xb58] sm:$0xff] }
 0x6c6   :  { %v16603_v38 = vcombine.high %v8220_v58, %v8224_v30 }
 0x6c7   :  { %11341 = vmatpush1.bf16.msra.mxu0 %v16546_v0 }
 0x6c8   :  { %11487 = vmatpush1.bf16.msra.mxu1 %v16476_v19  ;;  %11351 = vmatprep.subr.bf16.mxu0 %v16555_v34  ;;  %v16533_v19 = vcombine.high %v8149_v46, %v8153_v20  ;;  %v8228_v34 = vld [vmem:[#allocation8 + $0xdd0] sm:$0xff] }
 0x6c9   :  { %11488 = vmatprep.subr.bf16.mxu1 %v16485_v48  ;;  %v8232_v48 = vld [vmem:[#allocation8 + $0xdf0] sm:$0xff] }
 0x6ca   :  { %11343 = vmatmul.mubr.bf16.vlgmr.msra.gmra.mrb[12].mxu0 %v18912_v51 }
 0x6cb   :  { %11352 = vmatpush1.bf16.msra.mxu0 %v16554_v44  ;;  %11383 = vmatprep.mubr.bf16.mxu0 %v18929_v23  ;;  %v16602_v44 = vcombine.low %v8220_v58, %v8224_v30  ;;  %v8268_v30 = vld [vmem:[#allocation8 + $0xf10] sm:$0xff] }
 0x6cc   :  { %11489 = vmatpush1.bf16.msra.mxu1 %v16484_v47  ;;  %11353 = vmatprep.subr.bf16.mxu0 %v16563_v57  ;;  %v16532_v57 = vcombine.low %v8149_v46, %v8153_v20  ;;  %v8272_v46 = vld [vmem:[#allocation8 + $0xf30] sm:$0xff]  ;;  %v8197_v20 = vld [vmem:[#allocation8 + $0xcd8] sm:$0xff] }
 0x6cd   :  { %11490 = vmatprep.subr.bf16.mxu1 %v16493_v26  ;;  %v16611_v26 = vcombine.high %v8228_v34, %v8232_v48 }
 0x6cf   :  { %11354 = vmatpush1.bf16.msra.mxu0 %v16562_v16  ;;  %v8169_v16 = vld [vmem:[#allocation8 + $0xbf8] sm:$0xff] }
 0x6d0   :  { %11491 = vmatpush1.bf16.msra.mxu1 %v16492_v21  ;;  %11355 = vmatprep.subr.bf16.mxu0 %v16571_v32  ;;  %v16610_v21 = vcombine.low %v8228_v34, %v8232_v48  ;;  %v16540_v32 = vcombine.low %v8157_v35, %v8161_v43  ;;  %v16549_v1 = vcombine.high %v8165_v42, %v8169_v16  ;;  %v8276_v34 = vld [vmem:[#allocation8 + $0xf50] sm:$0xff]  ;;  %v8209_v35 = vld [vmem:[#allocation8 + $0xd38] sm:$0xff] }
 0x6d1   :  { %11492 = vmatprep.subr.bf16.mxu1 %v16501_v14  ;;  %v16619_v14 = vcombine.high %v8236_v6, %v8240_v60  ;;  %v8280_v48 = vld [vmem:[#allocation8 + $0xf70] sm:$0xff]  ;;  %v16650_v43 = vcombine.low %v8268_v30, %v8272_v46 }
 0x6d3   :  { %11356 = vmatpush1.bf16.msra.mxu0 %v16570_v3  ;;  %v8177_v3 = vld [vmem:[#allocation8 + $0xc38] sm:$0xff] }
 0x6d4   :  { %11493 = vmatpush1.bf16.msra.mxu1 %v16500_v29  ;;  %11357 = vmatprep.subr.bf16.mxu0 %v16579_v4  ;;  %v16618_v29 = vcombine.low %v8236_v6, %v8240_v60  ;;  %v16548_v4 = vcombine.low %v8165_v42, %v8169_v16  ;;  %v16557_v7 = vcombine.high %v8173_v2, %v8177_v3  ;;  %v8213_v6 = vld [vmem:[#allocation8 + $0xd58] sm:$0xff] }
 0x6d5   :  { %11494 = vmatprep.subr.bf16.mxu1 %v16509_v5  ;;  %v16627_v5 = vcombine.high %v8244_v33, %v8248_v40  ;;  %v8217_v60 = vld [vmem:[#allocation8 + $0xd78] sm:$0xff]  ;;  %v16658_v42 = vcombine.low %v8276_v34, %v8280_v48 }
 0x6d7   :  { %11358 = vmatpush1.bf16.msra.mxu0 %v16578_v61  ;;  %v8185_v61 = vld [vmem:[#allocation8 + $0xc78] sm:$0xff] }
 0x6d8   :  { %11495 = vmatpush1.bf16.msra.mxu1 %v16508_v28  ;;  %11359 = vmatprep.subr.bf16.mxu0 %v16587_v25  ;;  %v16626_v28 = vcombine.low %v8244_v33, %v8248_v40  ;;  %v16556_v25 = vcombine.low %v8173_v2, %v8177_v3  ;;  %v16565_v17 = vcombine.high %v8181_v39, %v8185_v61  ;;  %v8296_v33 = vld [vmem:[#allocation8 + $0xff0] sm:$0xff]  ;;  %v8221_v40 = vld [vmem:[#allocation8 + $0xd98] sm:$0xff] }
 0x6d9   :  { %11496 = vmatprep.subr.bf16.mxu1 %v16517_v15  ;;  %v16635_v15 = vcombine.high %v8252_v52, %v8256_v54  ;;  %v8225_v2 = vld [vmem:[#allocation8 + $0xdb8] sm:$0xff] }
 0x6db   :  { %11360 = vmatpush1.bf16.msra.mxu0 %v16586_v27  ;;  %v8193_v27 = vld [vmem:[#allocation8 + $0xcb8] sm:$0xff] }
 0x6dc   :  { %11497 = vmatpush1.bf16.msra.mxu1 %v16516_v56  ;;  %11361 = vmatprep.subr.bf16.mxu0 %v16595_v50  ;;  %v16634_v56 = vcombine.low %v8252_v52, %v8256_v54  ;;  %v16564_v50 = vcombine.low %v8181_v39, %v8185_v61  ;;  %v16573_v58 = vcombine.high %v8189_v53, %v8193_v27  ;;  %v8229_v39 = vld [vmem:[#allocation8 + $0xdd8] sm:$0xff] }
 0x6dd   :  { %v18952_v0 = vpop.f32.mrb[8].mxu0  ;;  %11498 = vmatprep.subr.bf16.mxu1 %v16525_v45  ;;  %v16643_v45 = vcombine.high %v8260_v22, %v8264_v24  ;;  %v16605_v52 = vcombine.high %v8221_v40, %v8225_v2  ;;  %v8233_v61 = vld [vmem:[#allocation8 + $0xdf8] sm:$0xff] }
 0x6de   :  { %v18954_v31 = vpop.f32.mrb[9].mxu0 }
 0x6df   :  { %11362 = vmatpush1.bf16.msra.mxu0 %v16594_v36  ;;  %v11061_v62 = vpop.f32.mrb[10].mxu0  ;;  %v8201_v36 = vld [vmem:[#allocation8 + $0xcf8] sm:$0xff] }
 0x6e0   :  { %11499 = vmatpush1.bf16.msra.mxu1 %v16524_v37  ;;  %v11062_v47 = vpop.f32.mrb[11].mxu0  ;;  %11363 = vmatprep.subr.bf16.mxu0 %v16603_v38  ;;  %v16642_v37 = vcombine.low %v8260_v22, %v8264_v24  ;;  %v16572_v38 = vcombine.low %v8189_v53, %v8193_v27  ;;  %v16580_v62 = vcombine.low %v8197_v20, %v8201_v36  ;;  %v17425_v22 = vld [vmem:[#allocation11 + $0x4] ss:$16 sps:$4 sm:$0xff]  }
 0x6e1   :  { %11500 = vmatprep.subr.bf16.mxu1 %v16533_v19  ;;  %v16651_v19 = vcombine.high %v8268_v30, %v8272_v46  ;;  %v16613_v53 = vcombine.high %v8229_v39, %v8233_v61  ;;  %v8241_v27 = vld [vmem:[#allocation8 + $0xe38] sm:$0xff] }
 0x6e2   :  { %v8245_v46 = vld [vmem:[#allocation8 + $0xe58] sm:$0xff] }
 0x6e3   :  { %11364 = vmatpush1.bf16.msra.mxu0 %v16602_v44  ;;  %v16659_v44 = vcombine.high %v8276_v34, %v8280_v48  ;;  %v8257_v34 = vld [vmem:[#allocation8 + $0xeb8] sm:$0xff] }
 0x6e4   :  { %11501 = vmatpush1.bf16.msra.mxu1 %v16532_v57  ;;  %11365 = vmatprep.subr.bf16.mxu0 %v16611_v26  ;;  %v8284_v57 = vld [vmem:[#allocation8 + $0xf90] sm:$0xff]  ;;  %v17429_v48 = vld [vmem:[#allocation11 + $0x40] ss:$16 sps:$4 sm:$0xff]  }
 0x6e5   :  { %11502 = vmatprep.subr.bf16.mxu1 %v16541_v59  ;;  %v8288_v26 = vld [vmem:[#allocation8 + $0xfb0] sm:$0xff]  ;;  %v18958_v59 = vld [vmem:[#allocation10] sm:$0xff] }
 0x6e6   :  { %v16666_v3 = vcombine.low %v8284_v57, %v8288_v26 }
 0x6e7   :  { %11366 = vmatpush1.bf16.msra.mxu0 %v16610_v21  ;;  %v16667_v21 = vcombine.high %v8284_v57, %v8288_v26  ;;  %v17437_v26 = vld [vmem:[#allocation11 + $0x84] ss:$16 sps:$4 sm:$0xff]  }
 0x6e8   :  { %11503 = vmatpush1.bf16.msra.mxu1 %v16540_v32  ;;  %11367 = vmatprep.subr.bf16.mxu0 %v16619_v14  ;;  %v8307_v32 = vrot.slane %v18958_v59, %v18823_v18  ;;  %v16597_v14 = vcombine.high %v8213_v6, %v8217_v60 }
 0x6e9   :  { %11504 = vmatprep.subr.bf16.mxu1 %v16549_v1  ;;  %v8292_v1 = vld [vmem:[#allocation8 + $0xfd0] sm:$0xff] }
 0x6eb   :  { %11368 = vmatpush1.bf16.msra.mxu0 %v16618_v29  ;;  %v16596_v29 = vcombine.low %v8213_v6, %v8217_v60  ;;  %v8269_v60 = vld [vmem:[#allocation8 + $0xf18] sm:$0xff] }
 0x6ec   :  { %11505 = vmatpush1.bf16.msra.mxu1 %v16548_v4  ;;  %11369 = vmatprep.subr.bf16.mxu0 %v16627_v5  ;;  %v16675_v4 = vcombine.high %v8292_v1, %v8296_v33  ;;  %v17176_v5 = vadd.f32 %v18954_v31, %v8307_v32  ;;  %v8237_v31 = vld [vmem:[#allocation8 + $0xe18] sm:$0xff] }
 0x6ed   :  { %11515 = vmatprep.subr.bf16.mxu1 %v16557_v7  ;;  %v16621_v30 = vcombine.high %v8237_v31, %v8241_v27  ;;  %v17440_v32 = vld [vmem:[#allocation11 + $0xa4] ss:$16 sps:$4 sm:$0xff]  }
 0x6ee   :  { %v11557_v24 = vmax.f32 %v17176_v5, 0.0  ;;  %v8289_v5 = vld [vmem:[#allocation8 + $0xfb8] sm:$0xff] }
 0x6ef   :  { %11370 = vmatpush1.bf16.msra.mxu0 %v16626_v28  ;;  %11507 = vmatmul.mubr.bf16.vlgmr.msra.gmra.mrb[16].mxu1 %v18912_v51  ;;  %v16581_v51 = vcombine.high %v8197_v20, %v8201_v36  ;;  %v8249_v20 = vld [vmem:[#allocation8 + $0xe78] sm:$0xff] }
 0x6f0   :  { %11516 = vmatpush1.bf16.msra.mxu1 %v16556_v25  ;;  %11547 = vmatprep.mubr.bf16.mxu1 %v18929_v23  ;;  %v8205_v23 = vld [vmem:[#allocation8 + $0xd18] sm:$0xff]  ;;  %v16674_v25 = vcombine.low %v8292_v1, %v8296_v33 }
 0x6f1   :  { %11371 = vmatprep.subr.bf16.mxu0 %v16635_v15  ;;  %11517 = vmatprep.subr.bf16.mxu1 %v16565_v17  ;;  %v16589_v47 = vcombine.high %v8205_v23, %v8209_v35  ;;  %v16588_v16 = vcombine.low %v8205_v23, %v8209_v35  ;;  %v16604_v17 = vcombine.low %v8221_v40, %v8225_v2  ;;  %v17426_v36 = vld [vmem:[#allocation11 + $0x20] ss:$16 sps:$4 sm:$0xff]   ;;  %v17434_v35 = vld [vmem:[#allocation11 + $0x64] ss:$16 sps:$4 sm:$0xff]  }
 0x6f2   :  { %v16628_v23 = vcombine.low %v8245_v46, %v8249_v20  ;;  %v8277_v1 = vld [vmem:[#allocation8 + $0xf58] sm:$0xff] }
 0x6f3   :  { %11372 = vmatpush1.bf16.msra.mxu0 %v16634_v56  ;;  %v17423_v56 = vld [vmem:[#allocation11] ss:$16 sps:$4 sm:$0xff]  }
 0x6f4   :  { %11518 = vmatpush1.bf16.msra.mxu1 %v16564_v50  ;;  %11373 = vmatprep.subr.bf16.mxu0 %v16643_v45  ;;  %v16612_v50 = vcombine.low %v8229_v39, %v8233_v61  ;;  %v17428_v45 = vld [vmem:[#allocation11 + $0x24] ss:$16 sps:$4 sm:$0xff]   ;;  %v17438_v40 = vld [vmem:[#allocation11 + $0xa0] ss:$16 sps:$4 sm:$0xff]  }
 0x6f5   :  { %11519 = vmatprep.subr.bf16.mxu1 %v16573_v58  ;;  %v18967_v58 = vpack.c.bf16 %v11557_v24, %v11557_v24  ;;  %v8281_v33 = vld [vmem:[#allocation8 + $0xf78] sm:$0xff] }
 0x6f6   :  { %v16660_v39 = vcombine.low %v8277_v1, %v8281_v33  ;;  %v17446_v61 = vld [vmem:[#allocation11 + $0xe4] ss:$16 sps:$4 sm:$0xff]  }
 0x6f7   :  { %11374 = vmatpush1.bf16.msra.mxu0 %v16642_v37  ;;  %v16620_v37 = vcombine.low %v8237_v31, %v8241_v27  ;;  %v17449_v24 = vld [vmem:[#allocation11 + $0x104] ss:$16 sps:$4 sm:$0xff]   ;;  %v17447_v31 = vld [vmem:[#allocation11 + $0x100] ss:$16 sps:$4 sm:$0xff]  }
 0x6f8   :  { %11520 = vmatpush1.bf16.msra.mxu1 %v16572_v38  ;;  %11375 = vmatprep.subr.bf16.mxu0 %v16651_v19  ;;  %v17431_v38 = vld [vmem:[#allocation11 + $0x44] ss:$16 sps:$4 sm:$0xff]   ;;  %v16629_v19 = vcombine.high %v8245_v46, %v8249_v20  ;;  %v17461_v20 = vld [vmem:[#allocation11 + $0x2c] ss:$16 sps:$4 sm:$0xff]  }
 0x6f9   :  { %11521 = vmatprep.subr.bf16.mxu1 %v16581_v51  ;;  %v8253_v51 = vld [vmem:[#allocation8 + $0xe98] sm:$0xff] }
 0x6fa   :  { %v16636_v57 = vcombine.low %v8253_v51, %v8257_v34  ;;  %v17458_v46 = vld [vmem:[#allocation11 + $0x144] ss:$16 sps:$4 sm:$0xff]  }
 0x6fb   :  { %11376 = vmatpush1.bf16.msra.mxu0 %v16650_v43  ;;  %v16637_v43 = vcombine.high %v8253_v51, %v8257_v34  ;;  %v17462_v51 = vld [vmem:[#allocation11 + $0x160] ss:$16 sps:$4 sm:$0xff]   ;;  %v17465_v34 = vld [vmem:[#allocation11 + $0x48] ss:$16 sps:$4 sm:$0xff]  }
 0x6fc   :  { %11522 = vmatpush1.bf16.msra.mxu1 %v16580_v62  ;;  %11377 = vmatprep.subr.bf16.mxu0 %v16659_v44  ;;  %v8261_v62 = vld [vmem:[#allocation8 + $0xed8] sm:$0xff] }
 0x6fd   :  { %11523 = vmatprep.subr.bf16.mxu1 %v16589_v47  ;;  %v8265_v44 = vld [vmem:[#allocation8 + $0xef8] sm:$0xff] }
 0x6fe   :  { %v17432_v47 = vld [vmem:[#allocation11 + $0x60] ss:$16 sps:$4 sm:$0xff]   ;;  %v16645_v6 = vcombine.high %v8261_v62, %v8265_v44 }
 0x6ff   :  { %11378 = vmatpush1.bf16.msra.mxu0 %v16658_v42  ;;  %v8273_v42 = vld [vmem:[#allocation8 + $0xf38] sm:$0xff] }
 0x700   :  { %11524 = vmatpush1.bf16.msra.mxu1 %v16588_v16  ;;  %11379 = vmatprep.subr.bf16.mxu0 %v16667_v21  ;;  %v17435_v16 = vld [vmem:[#allocation11 + $0x80] ss:$16 sps:$4 sm:$0xff]   ;;  %v16644_v21 = vcombine.low %v8261_v62, %v8265_v44  ;;  %v16652_v2 = vcombine.low %v8269_v60, %v8273_v42  ;;  %v8303_v44 = vrot.slane %v18958_v59, %v18820_v10 }
 0x701   :  { %v18963_v7 = vpop.f32.mrb[12].mxu1  ;;  %11525 = vmatprep.subr.bf16.mxu1 %v16597_v14  ;;  %v16653_v14 = vcombine.high %v8269_v60, %v8273_v42  ;;  %v17474_v62 = vld [vmem:[#allocation11 + $0x1a0] ss:$16 sps:$4 sm:$0xff]  }
 0x702   :  { %v18965_v54 = vpop.f32.mrb[13].mxu1  ;;  %v17480_v60 = vld [vmem:[#allocation11 + $0x1c0] ss:$16 sps:$4 sm:$0xff]   ;;  %v17175_v42 = vadd.f32 %v18952_v0, %v8303_v44  ;;  %v17543_v44 = vld [vmem:[#allocation11 + $0x1e8] ss:$16 sps:$4 sm:$0xff]  }
 0x703   :  { %11380 = vmatpush1.bf16.msra.mxu0 %v16666_v3  ;;  %v11225_v28 = vpop.f32.mrb[14].mxu1  ;;  %v17443_v3 = vld [vmem:[#allocation11 + $0xc4] ss:$16 sps:$4 sm:$0xff]   ;;  %v17492_v0 = vld [vmem:[#allocation11 + $0x200] ss:$16 sps:$4 sm:$0xff]  }
 0x704   :  { %11526 = vmatpush1.bf16.msra.mxu1 %v16596_v29  ;;  %v11226_v15 = vpop.f32.mrb[15].mxu1  ;;  %11381 = vmatprep.subr.bf16.mxu0 %v16675_v4  ;;  %v16661_v29 = vcombine.high %v8277_v1, %v8281_v33  ;;  %v8285_v4 = vld [vmem:[#allocation8 + $0xf98] sm:$0xff]  ;;  %v11556_v33 = vmax.f32 %v17175_v42, 0.0  ;;  %v17557_v42 = vld [vmem:[#allocation11 + $0x22c] ss:$16 sps:$4 sm:$0xff]  }
 0x705   :  { %11527 = vmatprep.subr.bf16.mxu1 %v16605_v52  ;;  %v17441_v52 = vld [vmem:[#allocation11 + $0xc0] ss:$16 sps:$4 sm:$0xff]   ;;  %v16669_v28 = vcombine.high %v8285_v4, %v8289_v5 }
 0x706   :  { %v8297_v15 = vld [vmem:[#allocation8 + $0xff8] sm:$0xff] }
 0x707   :  { %11382 = vmatpush1.bf16.msra.mxu0 %v16674_v25  ;;  %v8293_v25 = vld [vmem:[#allocation8 + $0xfd8] sm:$0xff] }
 0x708   :  { %11528 = vmatpush1.bf16.msra.mxu1 %v16604_v17  ;;  %13130 = vmatprep.subr.bf16.mxu0 %v17425_v22  ;;  %v17444_v17 = vld [vmem:[#allocation11 + $0xe0] ss:$16 sps:$4 sm:$0xff]   ;;  %v16668_v22 = vcombine.low %v8285_v4, %v8289_v5  ;;  %v16676_v27 = vcombine.low %v8293_v25, %v8297_v15  ;;  %v18979_v4 = vpack.c.bf16 %v11556_v33, %v11556_v33  ;;  %v17495_v5 = vld [vmem:[#allocation11 + $0xe8] ss:$16 sps:$4 sm:$0xff]  }
 0x709   :  { %11529 = vmatprep.subr.bf16.mxu1 %v16613_v53  ;;  %v16677_v53 = vcombine.high %v8293_v25, %v8297_v15  ;;  %v17486_v1 = vld [vmem:[#allocation11 + $0x1e0] ss:$16 sps:$4 sm:$0xff]   ;;  %v17506_v25 = vld [vmem:[#allocation11 + $0x244] ss:$16 sps:$4 sm:$0xff]   ;;  %v17509_v15 = vld [vmem:[#allocation11 + $0x12c] ss:$16 sps:$4 sm:$0xff]  }
 0x70a   :  { %11384 = vmatmul.mubr.bf16.vlgmr.msra.gmra.mrb[12].mxu0 %v18931_v55  ;;  %v17561_v33 = vld [vmem:[#allocation11 + $0x248] ss:$16 sps:$4 sm:$0xff]  }
 0x70b   :  { %13131 = vmatpush1.bf16.msra.mxu0 %v17423_v56  ;;  %13162 = vmatprep.mubr.bf16.mxu0 %v18967_v58  ;;  %v17452_v56 = vld [vmem:[#allocation11 + $0x124] ss:$16 sps:$4 sm:$0xff]  }
 0x70c   :  { %11530 = vmatpush1.bf16.msra.mxu1 %v16612_v50  ;;  %13132 = vmatprep.subr.bf16.mxu0 %v17428_v45  ;;  %v17455_v50 = vld [vmem:[#allocation11 + $0xc] ss:$16 sps:$4 sm:$0xff]   ;;  %v17450_v45 = vld [vmem:[#allocation11 + $0x120] ss:$16 sps:$4 sm:$0xff]  }
 0x70d   :  { %11531 = vmatprep.subr.bf16.mxu1 %v16621_v30  ;;  %v17453_v30 = vld [vmem:[#allocation11 + $0x8] ss:$16 sps:$4 sm:$0xff]  }
 0x70f   :  { %13133 = vmatpush1.bf16.msra.mxu0 %v17426_v36  ;;  %v17456_v36 = vld [vmem:[#allocation11 + $0x140] ss:$16 sps:$4 sm:$0xff]  }
 0x710   :  { %11532 = vmatpush1.bf16.msra.mxu1 %v16620_v37  ;;  %13134 = vmatprep.subr.bf16.mxu0 %v17431_v38  ;;  %v17459_v37 = vld [vmem:[#allocation11 + $0x28] ss:$16 sps:$4 sm:$0xff]   ;;  %v17464_v38 = vld [vmem:[#allocation11 + $0x164] ss:$16 sps:$4 sm:$0xff]  }
 0x711   :  { %11533 = vmatprep.subr.bf16.mxu1 %v16629_v19  ;;  %v17467_v19 = vld [vmem:[#allocation11 + $0x4c] ss:$16 sps:$4 sm:$0xff]  }
 0x713   :  { %13135 = vmatpush1.bf16.msra.mxu0 %v17429_v48  ;;  %v17470_v48 = vld [vmem:[#allocation11 + $0x184] ss:$16 sps:$4 sm:$0xff]  }
 0x714   :  { %11534 = vmatpush1.bf16.msra.mxu1 %v16628_v23  ;;  %13136 = vmatprep.subr.bf16.mxu0 %v17434_v35  ;;  %v17473_v23 = vld [vmem:[#allocation11 + $0x6c] ss:$16 sps:$4 sm:$0xff]   ;;  %v17471_v35 = vld [vmem:[#allocation11 + $0x68] ss:$16 sps:$4 sm:$0xff]  }
 0x715   :  { %11535 = vmatprep.subr.bf16.mxu1 %v16637_v43  ;;  %v17476_v43 = vld [vmem:[#allocation11 + $0x1a4] ss:$16 sps:$4 sm:$0xff]  }
 0x717   :  { %13137 = vmatpush1.bf16.msra.mxu0 %v17432_v47  ;;  %v17477_v47 = vld [vmem:[#allocation11 + $0x88] ss:$16 sps:$4 sm:$0xff]  }
 0x718   :  { %11536 = vmatpush1.bf16.msra.mxu1 %v16636_v57  ;;  %13138 = vmatprep.subr.bf16.mxu0 %v17437_v26  ;;  %v17482_v57 = vld [vmem:[#allocation11 + $0x1c4] ss:$16 sps:$4 sm:$0xff]   ;;  %v8315_v26 = vrot.slane %v18958_v59, %v18861_v8 }
 0x719   :  { %11537 = vmatprep.subr.bf16.mxu1 %v16645_v6  ;;  %v17485_v6 = vld [vmem:[#allocation11 + $0xac] ss:$16 sps:$4 sm:$0xff]  }
 0x71b   :  { %13139 = vmatpush1.bf16.msra.mxu0 %v17435_v16  ;;  %v17483_v16 = vld [vmem:[#allocation11 + $0xa8] ss:$16 sps:$4 sm:$0xff]  }
 0x71c   :  { %11538 = vmatpush1.bf16.msra.mxu1 %v16644_v21  ;;  %13140 = vmatprep.subr.bf16.mxu0 %v17440_v32  ;;  %v17488_v21 = vld [vmem:[#allocation11 + $0x1e4] ss:$16 sps:$4 sm:$0xff]   ;;  %v17178_v32 = vadd.f32 %v18965_v54, %v8315_v26  ;;  %v17546_v26 = vld [vmem:[#allocation11 + $0x320] ss:$16 sps:$4 sm:$0xff]  }
 0x71d   :  { %11539 = vmatprep.subr.bf16.mxu1 %v16653_v14  ;;  %v17491_v14 = vld [vmem:[#allocation11 + $0xcc] ss:$16 sps:$4 sm:$0xff]   ;;  %v17500_v54 = vld [vmem:[#allocation11 + $0x224] ss:$16 sps:$4 sm:$0xff]  }
 0x71f   :  { %13141 = vmatpush1.bf16.msra.mxu0 %v17438_v40  ;;  %v17489_v40 = vld [vmem:[#allocation11 + $0xc8] ss:$16 sps:$4 sm:$0xff]  }
 0x720   :  { %11540 = vmatpush1.bf16.msra.mxu1 %v16652_v2  ;;  %13142 = vmatprep.subr.bf16.mxu0 %v17443_v3  ;;  %v17494_v2 = vld [vmem:[#allocation11 + $0x204] ss:$16 sps:$4 sm:$0xff]   ;;  %v11559_v3 = vmax.f32 %v17178_v32, 0.0 }
 0x721   :  { %11541 = vmatprep.subr.bf16.mxu1 %v16661_v29  ;;  %v17497_v29 = vld [vmem:[#allocation11 + $0xec] ss:$16 sps:$4 sm:$0xff]   ;;  %v17560_v32 = vld [vmem:[#allocation11 + $0x364] ss:$16 sps:$4 sm:$0xff]  }
 0x723   :  { %13143 = vmatpush1.bf16.msra.mxu0 %v17441_v52  ;;  %v18981_v52 = vpack.c.bf16 %v11559_v3, %v11559_v3  ;;  %v17564_v3 = vld [vmem:[#allocation11 + $0x380] ss:$16 sps:$4 sm:$0xff]  }
 0x724   :  { %11542 = vmatpush1.bf16.msra.mxu1 %v16660_v39  ;;  %13144 = vmatprep.subr.bf16.mxu0 %v17446_v61  ;;  %v17503_v39 = vld [vmem:[#allocation11 + $0x10c] ss:$16 sps:$4 sm:$0xff]   ;;  %v17498_v61 = vld [vmem:[#allocation11 + $0x220] ss:$16 sps:$4 sm:$0xff]  }
 0x725   :  { %11543 = vmatprep.subr.bf16.mxu1 %v16669_v28  ;;  %v17501_v28 = vld [vmem:[#allocation11 + $0x108] ss:$16 sps:$4 sm:$0xff]  }
 0x727   :  { %13145 = vmatpush1.bf16.msra.mxu0 %v17444_v17  ;;  %v17504_v17 = vld [vmem:[#allocation11 + $0x240] ss:$16 sps:$4 sm:$0xff]  }
 0x728   :  { %11544 = vmatpush1.bf16.msra.mxu1 %v16668_v22  ;;  %13146 = vmatprep.subr.bf16.mxu0 %v17449_v24  ;;  %v17507_v22 = vld [vmem:[#allocation11 + $0x128] ss:$16 sps:$4 sm:$0xff]   ;;  %v17512_v24 = vld [vmem:[#allocation11 + $0x264] ss:$16 sps:$4 sm:$0xff]  }
 0x729   :  { %11545 = vmatprep.subr.bf16.mxu1 %v16677_v53  ;;  %v17515_v53 = vld [vmem:[#allocation11 + $0x14c] ss:$16 sps:$4 sm:$0xff]  }
 0x72b   :  { %13147 = vmatpush1.bf16.msra.mxu0 %v17447_v31  ;;  %v17510_v31 = vld [vmem:[#allocation11 + $0x260] ss:$16 sps:$4 sm:$0xff]  }
 0x72c   :  { %11546 = vmatpush1.bf16.msra.mxu1 %v16676_v27  ;;  %13148 = vmatprep.subr.bf16.mxu0 %v17452_v56  ;;  %v17513_v27 = vld [vmem:[#allocation11 + $0x148] ss:$16 sps:$4 sm:$0xff]   ;;  %v17518_v56 = vld [vmem:[#allocation11 + $0x284] ss:$16 sps:$4 sm:$0xff]  }
 0x72d   :  { %13294 = vmatprep.subr.bf16.mxu1 %v17455_v50  ;;  %v17521_v50 = vld [vmem:[#allocation11 + $0x16c] ss:$16 sps:$4 sm:$0xff]  }
 0x72f   :  { %11548 = vmatmul.mubr.bf16.vlgmr.msra.gmra.mrb[16].mxu1 %v18931_v55  ;;  %13149 = vmatpush1.bf16.msra.mxu0 %v17450_v45  ;;  %v17468_v55 = vld [vmem:[#allocation11 + $0x180] ss:$16 sps:$4 sm:$0xff]  }
 0x730   :  { %13295 = vmatpush1.bf16.msra.mxu1 %v17453_v30  ;;  %13326 = vmatprep.mubr.bf16.mxu1 %v18967_v58  ;;  %v17479_v58 = vld [vmem:[#allocation11 + $0x8c] ss:$16 sps:$4 sm:$0xff]   ;;  %v17516_v45 = vld [vmem:[#allocation11 + $0x280] ss:$16 sps:$4 sm:$0xff]   ;;  %v17519_v30 = vld [vmem:[#allocation11 + $0x168] ss:$16 sps:$4 sm:$0xff]  }
 0x731   :  { %13150 = vmatprep.subr.bf16.mxu0 %v17458_v46  ;;  %13296 = vmatprep.subr.bf16.mxu1 %v17461_v20  ;;  %v17524_v46 = vld [vmem:[#allocation11 + $0x2a4] ss:$16 sps:$4 sm:$0xff]   ;;  %v17527_v20 = vld [vmem:[#allocation11 + $0x18c] ss:$16 sps:$4 sm:$0xff]  }
 0x733   :  { %13151 = vmatpush1.bf16.msra.mxu0 %v17456_v36  ;;  %v17522_v36 = vld [vmem:[#allocation11 + $0x2a0] ss:$16 sps:$4 sm:$0xff]  }
 0x734   :  { %13297 = vmatpush1.bf16.msra.mxu1 %v17459_v37  ;;  %13152 = vmatprep.subr.bf16.mxu0 %v17464_v38  ;;  %v17525_v37 = vld [vmem:[#allocation11 + $0x188] ss:$16 sps:$4 sm:$0xff]   ;;  %v17530_v38 = vld [vmem:[#allocation11 + $0x2c4] ss:$16 sps:$4 sm:$0xff]  }
 0x735   :  { %13298 = vmatprep.subr.bf16.mxu1 %v17467_v19  ;;  %v17533_v19 = vld [vmem:[#allocation11 + $0x1ac] ss:$16 sps:$4 sm:$0xff]  }
 0x737   :  { %13153 = vmatpush1.bf16.msra.mxu0 %v17462_v51  ;;  %v17528_v51 = vld [vmem:[#allocation11 + $0x2c0] ss:$16 sps:$4 sm:$0xff]  }
 0x738   :  { %13299 = vmatpush1.bf16.msra.mxu1 %v17465_v34  ;;  %13154 = vmatprep.subr.bf16.mxu0 %v17470_v48  ;;  %v17531_v34 = vld [vmem:[#allocation11 + $0x1a8] ss:$16 sps:$4 sm:$0xff]   ;;  %v17536_v48 = vld [vmem:[#allocation11 + $0x2e4] ss:$16 sps:$4 sm:$0xff]  }
 0x739   :  { %13300 = vmatprep.subr.bf16.mxu1 %v17473_v23  ;;  %v17539_v23 = vld [vmem:[#allocation11 + $0x1cc] ss:$16 sps:$4 sm:$0xff]  }
 0x73b   :  { %13155 = vmatpush1.bf16.msra.mxu0 %v17468_v55  ;;  %v17534_v55 = vld [vmem:[#allocation11 + $0x2e0] ss:$16 sps:$4 sm:$0xff]  }
 0x73c   :  { %13301 = vmatpush1.bf16.msra.mxu1 %v17471_v35  ;;  %13156 = vmatprep.subr.bf16.mxu0 %v17476_v43  ;;  %v17537_v35 = vld [vmem:[#allocation11 + $0x1c8] ss:$16 sps:$4 sm:$0xff]   ;;  %v17542_v43 = vld [vmem:[#allocation11 + $0x304] ss:$16 sps:$4 sm:$0xff]  }
 0x73d   :  { %13302 = vmatprep.subr.bf16.mxu1 %v17479_v58  ;;  %v17545_v58 = vld [vmem:[#allocation11 + $0x1ec] ss:$16 sps:$4 sm:$0xff]  }
 0x73f   :  { %13157 = vmatpush1.bf16.msra.mxu0 %v17474_v62  ;;  %v17540_v62 = vld [vmem:[#allocation11 + $0x300] ss:$16 sps:$4 sm:$0xff]  }
 0x740   :  { %13303 = vmatpush1.bf16.msra.mxu1 %v17477_v47  ;;  %13158 = vmatprep.subr.bf16.mxu0 %v17482_v57  ;;  %v17548_v47 = vld [vmem:[#allocation11 + $0x324] ss:$16 sps:$4 sm:$0xff]   ;;  %v17551_v57 = vld [vmem:[#allocation11 + $0x20c] ss:$16 sps:$4 sm:$0xff]  }
 0x741   :  { %13304 = vmatprep.subr.bf16.mxu1 %v17485_v6  ;;  %v17549_v6 = vld [vmem:[#allocation11 + $0x208] ss:$16 sps:$4 sm:$0xff]  }
 0x743   :  { %13159 = vmatpush1.bf16.msra.mxu0 %v17480_v60  ;;  %v17554_v60 = vld [vmem:[#allocation11 + $0x344] ss:$16 sps:$4 sm:$0xff]  }
 0x744   :  { %13305 = vmatpush1.bf16.msra.mxu1 %v17483_v16  ;;  %13160 = vmatprep.subr.bf16.mxu0 %v17488_v21  ;;  %v17552_v16 = vld [vmem:[#allocation11 + $0x340] ss:$16 sps:$4 sm:$0xff]   ;;  %v17555_v21 = vld [vmem:[#allocation11 + $0x228] ss:$16 sps:$4 sm:$0xff]  }
 0x745   :  { %13306 = vmatprep.subr.bf16.mxu1 %v17491_v14  ;;  %v17563_v14 = vld [vmem:[#allocation11 + $0x24c] ss:$16 sps:$4 sm:$0xff]  }
 0x747   :  { %13161 = vmatpush1.bf16.msra.mxu0 %v17486_v1  ;;  %v17558_v1 = vld [vmem:[#allocation11 + $0x360] ss:$16 sps:$4 sm:$0xff]  }
 0x748   :  { %13307 = vmatpush1.bf16.msra.mxu1 %v17489_v40  ;;  %13171 = vmatprep.subr.bf16.mxu0 %v17494_v2  ;;  %v17566_v40 = vld [vmem:[#allocation11 + $0x384] ss:$16 sps:$4 sm:$0xff]   ;;  %v17569_v2 = vld [vmem:[#allocation11 + $0x26c] ss:$16 sps:$4 sm:$0xff]  }
 0x749   :  { %13308 = vmatprep.subr.bf16.mxu1 %v17497_v29  ;;  %v17567_v29 = vld [vmem:[#allocation11 + $0x268] ss:$16 sps:$4 sm:$0xff]  }
 0x74a   :  { %13163 = vmatmul.mubr.bf16.vlgmr.msra.gmra.mrb[16].mxu0 %v18979_v4 }
 0x74b   :  { %13172 = vmatpush1.bf16.msra.mxu0 %v17492_v0  ;;  %13203 = vmatprep.mubr.bf16.mxu0 %v18981_v52  ;;  %v17572_v0 = vld [vmem:[#allocation11 + $0x3a4] ss:$16 sps:$4 sm:$0xff]  }
 0x74c   :  { %13309 = vmatpush1.bf16.msra.mxu1 %v17495_v5  ;;  %13173 = vmatprep.subr.bf16.mxu0 %v17500_v54  ;;  %v17570_v5 = vld [vmem:[#allocation11 + $0x3a0] ss:$16 sps:$4 sm:$0xff]   ;;  %v8311_v54 = vrot.slane %v18958_v59, %v18878_v41 }
 0x74d   :  { %13310 = vmatprep.subr.bf16.mxu1 %v17503_v39  ;;  %v17578_v39 = vld [vmem:[#allocation11 + $0x3c4] ss:$16 sps:$4 sm:$0xff]  }
 0x74f   :  { %13174 = vmatpush1.bf16.msra.mxu0 %v17498_v61  ;;  %v17581_v61 = vld [vmem:[#allocation11 + $0x2ac] ss:$16 sps:$4 sm:$0xff]  }
 0x750   :  { %13311 = vmatpush1.bf16.msra.mxu1 %v17501_v28  ;;  %13175 = vmatprep.subr.bf16.mxu0 %v17506_v25  ;;  %v17576_v28 = vld [vmem:[#allocation11 + $0x3c0] ss:$16 sps:$4 sm:$0xff]   ;;  %v17177_v25 = vadd.f32 %v18963_v7, %v8311_v54  ;;  %v17588_v7 = vld [vmem:[#allocation11 + $0x2e8] ss:$16 sps:$4 sm:$0xff]   ;;  %v17671_v54 = vld [vmem:[#allocation11 + $0x544] ss:$16 sps:$4 sm:$0xff]  }
 0x751   :  { %13312 = vmatprep.subr.bf16.mxu1 %v17509_v15  ;;  %v17579_v15 = vld [vmem:[#allocation11 + $0x2a8] ss:$16 sps:$4 sm:$0xff]  }
 0x753   :  { %13176 = vmatpush1.bf16.msra.mxu0 %v17504_v17  ;;  %v17584_v17 = vld [vmem:[#allocation11 + $0x3e4] ss:$16 sps:$4 sm:$0xff]  }
 0x754   :  { %13313 = vmatpush1.bf16.msra.mxu1 %v17507_v22  ;;  %13177 = vmatprep.subr.bf16.mxu0 %v17512_v24  ;;  %v17587_v22 = vld [vmem:[#allocation11 + $0x2cc] ss:$16 sps:$4 sm:$0xff]   ;;  %v17582_v24 = vld [vmem:[#allocation11 + $0x3e0] ss:$16 sps:$4 sm:$0xff]  }
 0x755   :  { %13314 = vmatprep.subr.bf16.mxu1 %v17515_v53  ;;  %v11558_v53 = vmax.f32 %v17177_v25, 0.0  ;;  %v17638_v25 = vld [vmem:[#allocation11 + $0x44c] ss:$16 sps:$4 sm:$0xff]  }
 0x757   :  { %13178 = vmatpush1.bf16.msra.mxu0 %v17510_v31  ;;  %v17585_v31 = vld [vmem:[#allocation11 + $0x2c8] ss:$16 sps:$4 sm:$0xff]  }
 0x758   :  { %13315 = vmatpush1.bf16.msra.mxu1 %v17513_v27  ;;  %13179 = vmatprep.subr.bf16.mxu0 %v17518_v56  ;;  %v17611_v27 = vld [vmem:[#allocation11 + $0x404] ss:$16 sps:$4 sm:$0xff]   ;;  %v17590_v56 = vld [vmem:[#allocation11 + $0x2ec] ss:$16 sps:$4 sm:$0xff]  }
 0x759   :  { %13316 = vmatprep.subr.bf16.mxu1 %v17521_v50  ;;  %v17609_v50 = vld [vmem:[#allocation11 + $0x400] ss:$16 sps:$4 sm:$0xff]  }
 0x75b   :  { %13180 = vmatpush1.bf16.msra.mxu0 %v17516_v45  ;;  %v18990_v45 = vpack.c.bf16 %v11558_v53, %v11558_v53  ;;  %v17681_v53 = vld [vmem:[#allocation11 + $0x580] ss:$16 sps:$4 sm:$0xff]  }
 0x75c   :  { %13317 = vmatpush1.bf16.msra.mxu1 %v17519_v30  ;;  %13181 = vmatprep.subr.bf16.mxu0 %v17524_v46  ;;  %v17617_v30 = vld [vmem:[#allocation11 + $0x424] ss:$16 sps:$4 sm:$0xff]   ;;  %v17593_v46 = vld [vmem:[#allocation11 + $0x30c] ss:$16 sps:$4 sm:$0xff]  }
 0x75d   :  { %13318 = vmatprep.subr.bf16.mxu1 %v17527_v20  ;;  %v17615_v20 = vld [vmem:[#allocation11 + $0x420] ss:$16 sps:$4 sm:$0xff]  }
 0x75f   :  { %13182 = vmatpush1.bf16.msra.mxu0 %v17522_v36  ;;  %v17591_v36 = vld [vmem:[#allocation11 + $0x308] ss:$16 sps:$4 sm:$0xff]  }
 0x760   :  { %13319 = vmatpush1.bf16.msra.mxu1 %v17525_v37  ;;  %13183 = vmatprep.subr.bf16.mxu0 %v17530_v38  ;;  %v17623_v37 = vld [vmem:[#allocation11 + $0x444] ss:$16 sps:$4 sm:$0xff]   ;;  %v17596_v38 = vld [vmem:[#allocation11 + $0x32c] ss:$16 sps:$4 sm:$0xff]  }
 0x761   :  { %13320 = vmatprep.subr.bf16.mxu1 %v17533_v19  ;;  %v17621_v19 = vld [vmem:[#allocation11 + $0x440] ss:$16 sps:$4 sm:$0xff]  }
 0x763   :  { %13184 = vmatpush1.bf16.msra.mxu0 %v17528_v51  ;;  %v17594_v51 = vld [vmem:[#allocation11 + $0x328] ss:$16 sps:$4 sm:$0xff]  }
 0x764   :  { %13321 = vmatpush1.bf16.msra.mxu1 %v17531_v34  ;;  %13185 = vmatprep.subr.bf16.mxu0 %v17536_v48  ;;  %v17629_v34 = vld [vmem:[#allocation11 + $0x464] ss:$16 sps:$4 sm:$0xff]   ;;  %v17599_v48 = vld [vmem:[#allocation11 + $0x34c] ss:$16 sps:$4 sm:$0xff]  }
 0x765   :  { %13322 = vmatprep.subr.bf16.mxu1 %v17539_v23  ;;  %v17627_v23 = vld [vmem:[#allocation11 + $0x460] ss:$16 sps:$4 sm:$0xff]  }
 0x767   :  { %13186 = vmatpush1.bf16.msra.mxu0 %v17534_v55  ;;  %v17597_v55 = vld [vmem:[#allocation11 + $0x348] ss:$16 sps:$4 sm:$0xff]  }
 0x768   :  { %13323 = vmatpush1.bf16.msra.mxu1 %v17537_v35  ;;  %13187 = vmatprep.subr.bf16.mxu0 %v17542_v43  ;;  %v17635_v35 = vld [vmem:[#allocation11 + $0x484] ss:$16 sps:$4 sm:$0xff]   ;;  %v17602_v43 = vld [vmem:[#allocation11 + $0x36c] ss:$16 sps:$4 sm:$0xff]  }
 0x769   :  { %13324 = vmatprep.subr.bf16.mxu1 %v17545_v58  ;;  %v17633_v58 = vld [vmem:[#allocation11 + $0x480] ss:$16 sps:$4 sm:$0xff]  }
 0x76b   :  { %13188 = vmatpush1.bf16.msra.mxu0 %v17540_v62  ;;  %v17600_v62 = vld [vmem:[#allocation11 + $0x368] ss:$16 sps:$4 sm:$0xff]  }
 0x76c   :  { %13325 = vmatpush1.bf16.msra.mxu1 %v17543_v44  ;;  %13189 = vmatprep.subr.bf16.mxu0 %v17548_v47  ;;  %v17641_v44 = vld [vmem:[#allocation11 + $0x4a4] ss:$16 sps:$4 sm:$0xff]   ;;  %v17605_v47 = vld [vmem:[#allocation11 + $0x38c] ss:$16 sps:$4 sm:$0xff]  }
 0x76d   :  { %13335 = vmatprep.subr.bf16.mxu1 %v17551_v57  ;;  %v17639_v57 = vld [vmem:[#allocation11 + $0x4a0] ss:$16 sps:$4 sm:$0xff]  }
 0x76f   :  { %13190 = vmatpush1.bf16.msra.mxu0 %v17546_v26  ;;  %13327 = vmatmul.mubr.bf16.vlgmr.msra.gmra.mrb[20].mxu1 %v18979_v4  ;;  %v17575_v4 = vld [vmem:[#allocation11 + $0x28c] ss:$16 sps:$4 sm:$0xff]   ;;  %v17603_v26 = vld [vmem:[#allocation11 + $0x388] ss:$16 sps:$4 sm:$0xff]  }
 0x770   :  { %13336 = vmatpush1.bf16.msra.mxu1 %v17549_v6  ;;  %13367 = vmatprep.mubr.bf16.mxu1 %v18981_v52  ;;  %v17573_v52 = vld [vmem:[#allocation11 + $0x288] ss:$16 sps:$4 sm:$0xff]   ;;  %v17647_v6 = vld [vmem:[#allocation11 + $0x4c4] ss:$16 sps:$4 sm:$0xff]  }
 0x771   :  { %13191 = vmatprep.subr.bf16.mxu0 %v17554_v60  ;;  %13337 = vmatprep.subr.bf16.mxu1 %v17557_v42  ;;  %v17608_v60 = vld [vmem:[#allocation11 + $0x3ac] ss:$16 sps:$4 sm:$0xff]   ;;  %v17645_v42 = vld [vmem:[#allocation11 + $0x4c0] ss:$16 sps:$4 sm:$0xff]  }
 0x773   :  { %13192 = vmatpush1.bf16.msra.mxu0 %v17552_v16  ;;  %v17606_v16 = vld [vmem:[#allocation11 + $0x3a8] ss:$16 sps:$4 sm:$0xff]  }
 0x774   :  { %13338 = vmatpush1.bf16.msra.mxu1 %v17555_v21  ;;  %13193 = vmatprep.subr.bf16.mxu0 %v17560_v32  ;;  %v17653_v21 = vld [vmem:[#allocation11 + $0x4e4] ss:$16 sps:$4 sm:$0xff]   ;;  %v17614_v32 = vld [vmem:[#allocation11 + $0x3cc] ss:$16 sps:$4 sm:$0xff]  }
 0x775   :  { %13339 = vmatprep.subr.bf16.mxu1 %v17563_v14  ;;  %v17651_v14 = vld [vmem:[#allocation11 + $0x4e0] ss:$16 sps:$4 sm:$0xff]  }
 0x777   :  { %13194 = vmatpush1.bf16.msra.mxu0 %v17558_v1  ;;  %v17612_v1 = vld [vmem:[#allocation11 + $0x3c8] ss:$16 sps:$4 sm:$0xff]  }
 0x778   :  { %13340 = vmatpush1.bf16.msra.mxu1 %v17561_v33  ;;  %13195 = vmatprep.subr.bf16.mxu0 %v17566_v40  ;;  %v17659_v33 = vld [vmem:[#allocation11 + $0x504] ss:$16 sps:$4 sm:$0xff]   ;;  %v17620_v40 = vld [vmem:[#allocation11 + $0x3ec] ss:$16 sps:$4 sm:$0xff]  }
 0x779   :  { %13341 = vmatprep.subr.bf16.mxu1 %v17569_v2  ;;  %v17657_v2 = vld [vmem:[#allocation11 + $0x500] ss:$16 sps:$4 sm:$0xff]  }
 0x77b   :  { %13196 = vmatpush1.bf16.msra.mxu0 %v17564_v3  ;;  %v17618_v3 = vld [vmem:[#allocation11 + $0x3e8] ss:$16 sps:$4 sm:$0xff]  }
 0x77c   :  { %13342 = vmatpush1.bf16.msra.mxu1 %v17567_v29  ;;  %13197 = vmatprep.subr.bf16.mxu0 %v17572_v0  ;;  %v17665_v29 = vld [vmem:[#allocation11 + $0x524] ss:$16 sps:$4 sm:$0xff]   ;;  %v17626_v0 = vld [vmem:[#allocation11 + $0x40c] ss:$16 sps:$4 sm:$0xff]  }
 0x77d   :  { %13343 = vmatprep.subr.bf16.mxu1 %v17575_v4  ;;  %v17663_v4 = vld [vmem:[#allocation11 + $0x520] ss:$16 sps:$4 sm:$0xff]  }
 0x77f   :  { %13198 = vmatpush1.bf16.msra.mxu0 %v17570_v5  ;;  %v17624_v5 = vld [vmem:[#allocation11 + $0x408] ss:$16 sps:$4 sm:$0xff]  }
 0x780   :  { %13344 = vmatpush1.bf16.msra.mxu1 %v17573_v52  ;;  %13199 = vmatprep.subr.bf16.mxu0 %v17578_v39  ;;  %v17632_v52 = vld [vmem:[#allocation11 + $0x42c] ss:$16 sps:$4 sm:$0xff]   ;;  %v17669_v39 = vld [vmem:[#allocation11 + $0x540] ss:$16 sps:$4 sm:$0xff]  }
 0x781   :  { %13345 = vmatprep.subr.bf16.mxu1 %v17581_v61  ;;  %v17630_v61 = vld [vmem:[#allocation11 + $0x428] ss:$16 sps:$4 sm:$0xff]  }
 0x783   :  { %13200 = vmatpush1.bf16.msra.mxu0 %v17576_v28  ;;  %v17677_v28 = vld [vmem:[#allocation11 + $0x564] ss:$16 sps:$4 sm:$0xff]  }
 0x784   :  { %13346 = vmatpush1.bf16.msra.mxu1 %v17579_v15  ;;  %13201 = vmatprep.subr.bf16.mxu0 %v17584_v17  ;;  %v17675_v15 = vld [vmem:[#allocation11 + $0x560] ss:$16 sps:$4 sm:$0xff]   ;;  %v17636_v17 = vld [vmem:[#allocation11 + $0x448] ss:$16 sps:$4 sm:$0xff]  }
 0x785   :  { %13347 = vmatprep.subr.bf16.mxu1 %v17587_v22  ;;  %v17683_v22 = vld [vmem:[#allocation11 + $0x584] ss:$16 sps:$4 sm:$0xff]  }
 0x787   :  { %13202 = vmatpush1.bf16.msra.mxu0 %v17582_v24  ;;  %v17644_v24 = vld [vmem:[#allocation11 + $0x46c] ss:$16 sps:$4 sm:$0xff]  }
 0x788   :  { %13348 = vmatpush1.bf16.msra.mxu1 %v17585_v31  ;;  %13212 = vmatprep.subr.bf16.mxu0 %v17611_v27  ;;  %v17642_v31 = vld [vmem:[#allocation11 + $0x468] ss:$16 sps:$4 sm:$0xff]   ;;  %v17689_v27 = vld [vmem:[#allocation11 + $0x5a4] ss:$16 sps:$4 sm:$0xff]  }
 0x789   :  { %13349 = vmatprep.subr.bf16.mxu1 %v17590_v56  ;;  %v17650_v56 = vld [vmem:[#allocation11 + $0x48c] ss:$16 sps:$4 sm:$0xff]  }
 0x78a   :  { %13204 = vmatmul.mubr.bf16.vlgmr.msra.gmra.mrb[16].mxu0 %v18990_v45 }
 0x78b   :  { %13213 = vmatpush1.bf16.msra.mxu0 %v17609_v50  ;;  %v17687_v50 = vld [vmem:[#allocation11 + $0x5a0] ss:$16 sps:$4 sm:$0xff]  }
 0x78c   :  { %13350 = vmatpush1.bf16.msra.mxu1 %v17588_v7  ;;  %13214 = vmatprep.subr.bf16.mxu0 %v17617_v30  ;;  %v17695_v7 = vld [vmem:[#allocation11 + $0x5c4] ss:$16 sps:$4 sm:$0xff]   ;;  %v17656_v30 = vld [vmem:[#allocation11 + $0x4ac] ss:$16 sps:$4 sm:$0xff]  }
 0x78d   :  { %13351 = vmatprep.subr.bf16.mxu1 %v17593_v46  ;;  %v17693_v46 = vld [vmem:[#allocation11 + $0x5c0] ss:$16 sps:$4 sm:$0xff]  }
 0x78f   :  { %13215 = vmatpush1.bf16.msra.mxu0 %v17615_v20  ;;  %v17654_v20 = vld [vmem:[#allocation11 + $0x4a8] ss:$16 sps:$4 sm:$0xff]  }
 0x790   :  { %13352 = vmatpush1.bf16.msra.mxu1 %v17591_v36  ;;  %13216 = vmatprep.subr.bf16.mxu0 %v17623_v37  ;;  %v17701_v36 = vld [vmem:[#allocation11 + $0x5e4] ss:$16 sps:$4 sm:$0xff]   ;;  %v17662_v37 = vld [vmem:[#allocation11 + $0x4cc] ss:$16 sps:$4 sm:$0xff]  }
 0x791   :  { %13353 = vmatprep.subr.bf16.mxu1 %v17596_v38  ;;  %v17699_v38 = vld [vmem:[#allocation11 + $0x5e0] ss:$16 sps:$4 sm:$0xff]  }
 0x793   :  { %13217 = vmatpush1.bf16.msra.mxu0 %v17621_v19  ;;  %v17660_v19 = vld [vmem:[#allocation11 + $0x4c8] ss:$16 sps:$4 sm:$0xff]  }
 0x794   :  { %13354 = vmatpush1.bf16.msra.mxu1 %v17594_v51  ;;  %13218 = vmatprep.subr.bf16.mxu0 %v17629_v34  ;;  %v17707_v51 = vld [vmem:[#allocation11 + $0x604] ss:$16 sps:$4 sm:$0xff]   ;;  %v17668_v34 = vld [vmem:[#allocation11 + $0x4ec] ss:$16 sps:$4 sm:$0xff]  }
 0x795   :  { %13355 = vmatprep.subr.bf16.mxu1 %v17599_v48  ;;  %v17666_v48 = vld [vmem:[#allocation11 + $0x4e8] ss:$16 sps:$4 sm:$0xff]  }
 0x797   :  { %13219 = vmatpush1.bf16.msra.mxu0 %v17627_v23  ;;  %v17674_v23 = vld [vmem:[#allocation11 + $0x50c] ss:$16 sps:$4 sm:$0xff]  }
 0x798   :  { %13356 = vmatpush1.bf16.msra.mxu1 %v17597_v55  ;;  %13220 = vmatprep.subr.bf16.mxu0 %v17635_v35  ;;  %v17672_v55 = vld [vmem:[#allocation11 + $0x508] ss:$16 sps:$4 sm:$0xff]   ;;  %v17680_v35 = vld [vmem:[#allocation11 + $0x52c] ss:$16 sps:$4 sm:$0xff]  }
 0x799   :  { %13357 = vmatprep.subr.bf16.mxu1 %v17602_v43  ;;  %v17678_v43 = vld [vmem:[#allocation11 + $0x528] ss:$16 sps:$4 sm:$0xff]  }
 0x79b   :  { %13221 = vmatpush1.bf16.msra.mxu0 %v17633_v58  ;;  %v17686_v58 = vld [vmem:[#allocation11 + $0x54c] ss:$16 sps:$4 sm:$0xff]  }
 0x79c   :  { %13358 = vmatpush1.bf16.msra.mxu1 %v17600_v62  ;;  %13222 = vmatprep.subr.bf16.mxu0 %v17641_v44  ;;  %v17684_v62 = vld [vmem:[#allocation11 + $0x548] ss:$16 sps:$4 sm:$0xff]   ;;  %v17692_v44 = vld [vmem:[#allocation11 + $0x56c] ss:$16 sps:$4 sm:$0xff]  }
 0x79d   :  { %13359 = vmatprep.subr.bf16.mxu1 %v17605_v47  ;;  %v17690_v47 = vld [vmem:[#allocation11 + $0x568] ss:$16 sps:$4 sm:$0xff]  }
 0x79f   :  { %13223 = vmatpush1.bf16.msra.mxu0 %v17639_v57  ;;  %v17698_v57 = vld [vmem:[#allocation11 + $0x58c] ss:$16 sps:$4 sm:$0xff]  }
 0x7a0   :  { %13360 = vmatpush1.bf16.msra.mxu1 %v17603_v26  ;;  %13224 = vmatprep.subr.bf16.mxu0 %v17647_v6  ;;  %v8319_v26 = vrot.slane %v18958_v59, %v1260_v63  ;;  %v8323_v6 = vrot.slane %v18958_v59, %v1264_v9  ;;  %v17710_v63 = vld [vmem:[#allocation11 + $0x5cc] ss:$16 sps:$4 sm:$0xff]   ;;  %v17708_v9 = vld [vmem:[#allocation11 + $0x5c8] ss:$16 sps:$4 sm:$0xff]   ;;  %v17713_v59 = vld [vmem:[#allocation11 + $0x624] ss:$16 sps:$4 sm:$0xff]  }
 0x7a1   :  { %13361 = vmatprep.subr.bf16.mxu1 %v17608_v60  ;;  %v17696_v60 = vld [vmem:[#allocation11 + $0x588] ss:$16 sps:$4 sm:$0xff]  }
 0x7a3   :  { %13225 = vmatpush1.bf16.msra.mxu0 %v17645_v42 }
 0x7a4   :  { %13362 = vmatpush1.bf16.msra.mxu1 %v17606_v16  ;;  %13226 = vmatprep.subr.bf16.mxu0 %v17653_v21  ;;  %v17704_v16 = vld [vmem:[#allocation11 + $0x5ac] ss:$16 sps:$4 sm:$0xff]  }
 0x7a5   :  { %13363 = vmatprep.subr.bf16.mxu1 %v17614_v32 }
 0x7a7   :  { %13227 = vmatpush1.bf16.msra.mxu0 %v17651_v14 }
 0x7a8   :  { %13364 = vmatpush1.bf16.msra.mxu1 %v17612_v1  ;;  %13228 = vmatprep.subr.bf16.mxu0 %v17659_v33 }
 0x7a9   :  { %13365 = vmatprep.subr.bf16.mxu1 %v17620_v40 }
 0x7ab   :  { %13229 = vmatpush1.bf16.msra.mxu0 %v17657_v2  ;;  %v17702_v2 = vld [vmem:[#allocation11 + $0x5a8] ss:$16 sps:$4 sm:$0xff]  }
 0x7ac   :  { %13366 = vmatpush1.bf16.msra.mxu1 %v17618_v3  ;;  %13230 = vmatprep.subr.bf16.mxu0 %v17665_v29 }
 0x7ad   :  { %13376 = vmatprep.subr.bf16.mxu1 %v17626_v0  ;;  %v17705_v0 = vld [vmem:[#allocation11 + $0x600] ss:$16 sps:$4 sm:$0xff]  }
 0x7af   :  { %13368 = vmatmul.mubr.bf16.vlgmr.msra.gmra.mrb[20].mxu1 %v18990_v45  ;;  %13231 = vmatpush1.bf16.msra.mxu0 %v17663_v4  ;;  %v17648_v45 = vld [vmem:[#allocation11 + $0x488] ss:$16 sps:$4 sm:$0xff]  }
 0x7b0   :  { %13377 = vmatpush1.bf16.msra.mxu1 %v17624_v5  ;;  %13232 = vmatprep.subr.bf16.mxu0 %v17671_v54  ;;  %v17716_v5 = vld [vmem:[#allocation11 + $0x5ec] ss:$16 sps:$4 sm:$0xff]   ;;  %v17711_v54 = vld [vmem:[#allocation11 + $0x620] ss:$16 sps:$4 sm:$0xff]  }
 0x7b1   :  { %13378 = vmatprep.subr.bf16.mxu1 %v17632_v52  ;;  %v17714_v52 = vld [vmem:[#allocation11 + $0x5e8] ss:$16 sps:$4 sm:$0xff]  }
 0x7b3   :  { %13233 = vmatpush1.bf16.msra.mxu0 %v17669_v39  ;;  %v17719_v39 = vld [vmem:[#allocation11 + $0x644] ss:$16 sps:$4 sm:$0xff]  }
 0x7b4   :  { %13379 = vmatpush1.bf16.msra.mxu1 %v17630_v61  ;;  %13234 = vmatprep.subr.bf16.mxu0 %v17677_v28  ;;  %v17722_v61 = vld [vmem:[#allocation11 + $0x60c] ss:$16 sps:$4 sm:$0xff]   ;;  %v17717_v28 = vld [vmem:[#allocation11 + $0x640] ss:$16 sps:$4 sm:$0xff]  }
 0x7b5   :  { %13380 = vmatprep.subr.bf16.mxu1 %v17638_v25  ;;  %v17720_v25 = vld [vmem:[#allocation11 + $0x608] ss:$16 sps:$4 sm:$0xff]  }
 0x7b7   :  { %13235 = vmatpush1.bf16.msra.mxu0 %v17675_v15  ;;  %v17725_v15 = vld [vmem:[#allocation11 + $0x664] ss:$16 sps:$4 sm:$0xff]  }
 0x7b8   :  { %13381 = vmatpush1.bf16.msra.mxu1 %v17636_v17  ;;  %13236 = vmatprep.subr.bf16.mxu0 %v17683_v22  ;;  %v17728_v17 = vld [vmem:[#allocation11 + $0x62c] ss:$16 sps:$4 sm:$0xff]   ;;  %v17723_v22 = vld [vmem:[#allocation11 + $0x660] ss:$16 sps:$4 sm:$0xff]  }
 0x7b9   :  { %13382 = vmatprep.subr.bf16.mxu1 %v17644_v24  ;;  %v17726_v24 = vld [vmem:[#allocation11 + $0x628] ss:$16 sps:$4 sm:$0xff]  }
 0x7bb   :  { %13237 = vmatpush1.bf16.msra.mxu0 %v17681_v53  ;;  %v17731_v53 = vld [vmem:[#allocation11 + $0x684] ss:$16 sps:$4 sm:$0xff]  }
 0x7bc   :  { %13383 = vmatpush1.bf16.msra.mxu1 %v17642_v31  ;;  %13238 = vmatprep.subr.bf16.mxu0 %v17689_v27  ;;  %v17734_v31 = vld [vmem:[#allocation11 + $0x64c] ss:$16 sps:$4 sm:$0xff]   ;;  %v17729_v27 = vld [vmem:[#allocation11 + $0x680] ss:$16 sps:$4 sm:$0xff]  }
 0x7bd   :  { %13384 = vmatprep.subr.bf16.mxu1 %v17650_v56  ;;  %v17732_v56 = vld [vmem:[#allocation11 + $0x648] ss:$16 sps:$4 sm:$0xff]  }
 0x7bf   :  { %13239 = vmatpush1.bf16.msra.mxu0 %v17687_v50  ;;  %v17737_v50 = vld [vmem:[#allocation11 + $0x6a4] ss:$16 sps:$4 sm:$0xff]  }
 0x7c0   :  { %13385 = vmatpush1.bf16.msra.mxu1 %v17648_v45  ;;  %13240 = vmatprep.subr.bf16.mxu0 %v17695_v7  ;;  %v17740_v45 = vld [vmem:[#allocation11 + $0x66c] ss:$16 sps:$4 sm:$0xff]   ;;  %v17735_v7 = vld [vmem:[#allocation11 + $0x6a0] ss:$16 sps:$4 sm:$0xff]  }
 0x7c1   :  { %13386 = vmatprep.subr.bf16.mxu1 %v17656_v30  ;;  %v17738_v30 = vld [vmem:[#allocation11 + $0x668] ss:$16 sps:$4 sm:$0xff]  }
 0x7c3   :  { %13241 = vmatpush1.bf16.msra.mxu0 %v17693_v46  ;;  %v17743_v46 = vld [vmem:[#allocation11 + $0x6c4] ss:$16 sps:$4 sm:$0xff]  }
 0x7c4   :  { %13387 = vmatpush1.bf16.msra.mxu1 %v17654_v20  ;;  %13242 = vmatprep.subr.bf16.mxu0 %v17701_v36  ;;  %v17746_v20 = vld [vmem:[#allocation11 + $0x68c] ss:$16 sps:$4 sm:$0xff]   ;;  %v17741_v36 = vld [vmem:[#allocation11 + $0x6c0] ss:$16 sps:$4 sm:$0xff]  }
 0x7c5   :  { %13388 = vmatprep.subr.bf16.mxu1 %v17662_v37  ;;  %v17744_v37 = vld [vmem:[#allocation11 + $0x688] ss:$16 sps:$4 sm:$0xff]  }
 0x7c7   :  { %13243 = vmatpush1.bf16.msra.mxu0 %v17699_v38  ;;  %v17749_v38 = vld [vmem:[#allocation11 + $0x6e4] ss:$16 sps:$4 sm:$0xff]  }
 0x7c8   :  { %13389 = vmatpush1.bf16.msra.mxu1 %v17660_v19  ;;  %13253 = vmatprep.subr.bf16.mxu0 %v17707_v51  ;;  %v17752_v19 = vld [vmem:[#allocation11 + $0x6ac] ss:$16 sps:$4 sm:$0xff]   ;;  %v17747_v51 = vld [vmem:[#allocation11 + $0x6e0] ss:$16 sps:$4 sm:$0xff]  }
 0x7c9   :  { %13390 = vmatprep.subr.bf16.mxu1 %v17668_v34  ;;  %v18117_v34 = vld [vmem:[#allocation10] sm:$0xff] }
 0x7cc   :  { %13391 = vmatpush1.bf16.msra.mxu1 %v17666_v48  ;;  %v8331_v48 = vrot.slane %v18117_v34, %v1272_v13  ;;  %v17759_v13 = vld [vmem:[#allocation11 + $0x720] ss:$16 sps:$4 sm:$0xff]  }
 0x7cd   :  { %13392 = vmatprep.subr.bf16.mxu1 %v17674_v23  ;;  %v17750_v23 = vld [vmem:[#allocation11 + $0x6a8] ss:$16 sps:$4 sm:$0xff]  }
 0x7d0   :  { %13393 = vmatpush1.bf16.msra.mxu1 %v17672_v55  ;;  %v17755_v55 = vld [vmem:[#allocation11 + $0x704] ss:$16 sps:$4 sm:$0xff]  }
 0x7d1   :  { %13394 = vmatprep.subr.bf16.mxu1 %v17680_v35  ;;  %v17758_v35 = vld [vmem:[#allocation11 + $0x6cc] ss:$16 sps:$4 sm:$0xff]  }
 0x7d4   :  { %13395 = vmatpush1.bf16.msra.mxu1 %v17678_v43 }
 0x7d5   :  { %13396 = vmatprep.subr.bf16.mxu1 %v17686_v58 }
 0x7d8   :  { %13397 = vmatpush1.bf16.msra.mxu1 %v17684_v62  ;;  %v17753_v62 = vld [vmem:[#allocation11 + $0x700] ss:$16 sps:$4 sm:$0xff]  }
 0x7d9   :  { %13398 = vmatprep.subr.bf16.mxu1 %v17692_v44 }
 0x7dc   :  { %13399 = vmatpush1.bf16.msra.mxu1 %v17690_v47 }
 0x7dd   :  { %v11385_v42 = vpop.f32.mrb[12].mxu0  ;;  %13400 = vmatprep.subr.bf16.mxu1 %v17698_v57  ;;  %v17756_v57 = vld [vmem:[#allocation11 + $0x6c8] ss:$16 sps:$4 sm:$0xff]  }
 0x7de   :  { %v17179_v21 = vadd.f32 %v11385_v42, %v8319_v26  ;;  %v11387_v32 = vpop.f32.mrb[13].mxu0  ;;  %v17761_v26 = vld [vmem:[#allocation11 + $0x724] ss:$16 sps:$4 sm:$0xff]  }
 0x7df   :  { %v17180_v14 = vadd.f32 %v11387_v32, %v8323_v6  ;;  %v11389_v1 = vpop.f32.mrb[14].mxu0  ;;  %v17767_v32 = vld [vmem:[#allocation11 + $0x744] ss:$16 sps:$4 sm:$0xff]  }
 0x7e0   :  { %v11560_v33 = vmax.f32 %v17179_v21, 0.0  ;;  %v11390_v40 = vpop.f32.mrb[15].mxu0  ;;  %13401 = vmatpush1.bf16.msra.mxu1 %v17696_v60  ;;  %v17764_v60 = vld [vmem:[#allocation11 + $0x6ec] ss:$16 sps:$4 sm:$0xff]   ;;  %v17762_v21 = vld [vmem:[#allocation11 + $0x6e8] ss:$16 sps:$4 sm:$0xff]  }
 0x7e1   :  { %v11561_v3 = vmax.f32 %v17180_v14, 0.0  ;;  %13402 = vmatprep.subr.bf16.mxu1 %v17704_v16  ;;  %v17770_v14 = vld [vmem:[#allocation11 + $0x70c] ss:$16 sps:$4 sm:$0xff]   ;;  %v17765_v1 = vld [vmem:[#allocation11 + $0x740] ss:$16 sps:$4 sm:$0xff]  }
 0x7e2   :  { %v11568_v4 = vpack.c.bf16 %v11560_v33, %v11560_v33  ;;  %v17768_v33 = vld [vmem:[#allocation11 + $0x708] ss:$16 sps:$4 sm:$0xff]   ;;  %v17773_v40 = vld [vmem:[#allocation11 + $0x764] ss:$16 sps:$4 sm:$0xff]  }
 0x7e3   :  { %v11569_v29 = vpack.c.bf16 %v11561_v3, %v11561_v3  ;;  %v17771_v3 = vld [vmem:[#allocation11 + $0x760] ss:$16 sps:$4 sm:$0xff]  }
 0x7e4   :  { %13403 = vmatpush1.bf16.msra.mxu1 %v17702_v2  ;;  %v17776_v2 = vld [vmem:[#allocation11 + $0x72c] ss:$16 sps:$4 sm:$0xff]  }
 0x7e5   :  { %13244 = vmatprep.mubr.bf16.mxu0 %v11569_v29  ;;  %13408 = vmatprep.mubr.bf16.mxu1 %v11569_v29  ;;  %v17779_v29 = vld [vmem:[#allocation11 + $0x784] ss:$16 sps:$4 sm:$0xff]  }
 0x7e6   :  { %13245 = vmatmul.mubr.bf16.vlgmr.msra.gmra.mrb[16].mxu0 %v11568_v4  ;;  %13404 = vmatprep.subr.bf16.mxu1 %v17710_v63  ;;  %v17774_v63 = vld [vmem:[#allocation11 + $0x728] ss:$16 sps:$4 sm:$0xff]  }
 0x7e7   :  { %13254 = vmatpush1.bf16.msra.mxu0 %v17705_v0  ;;  %v17782_v0 = vld [vmem:[#allocation11 + $0x74c] ss:$16 sps:$4 sm:$0xff]  }
 0x7e8   :  { %13405 = vmatpush1.bf16.msra.mxu1 %v17708_v9  ;;  %13255 = vmatprep.subr.bf16.mxu0 %v17713_v59  ;;  %v17780_v9 = vld [vmem:[#allocation11 + $0x748] ss:$16 sps:$4 sm:$0xff]   ;;  %v17785_v59 = vld [vmem:[#allocation11 + $0x7a4] ss:$16 sps:$4 sm:$0xff]  }
 0x7e9   :  { %13406 = vmatprep.subr.bf16.mxu1 %v17716_v5  ;;  %v17788_v5 = vld [vmem:[#allocation11 + $0x76c] ss:$16 sps:$4 sm:$0xff]  }
 0x7eb   :  { %13256 = vmatpush1.bf16.msra.mxu0 %v17711_v54  ;;  %v17783_v54 = vld [vmem:[#allocation11 + $0x7a0] ss:$16 sps:$4 sm:$0xff]  }
 0x7ec   :  { %13407 = vmatpush1.bf16.msra.mxu1 %v17714_v52  ;;  %13257 = vmatprep.subr.bf16.mxu0 %v17719_v39  ;;  %v8327_v52 = vrot.slane %v18117_v34, %v1268_v11  ;;  %v17786_v39 = vld [vmem:[#allocation11 + $0x768] ss:$16 sps:$4 sm:$0xff]   ;;  %v17818_v34 = vld [vmem:[#allocation14 + $0x2c] ss:$16 sps:$4 sm:$0xff]  }
 0x7ed   :  { %13417 = vmatprep.subr.bf16.mxu1 %v17722_v61  ;;  %v17791_v61 = vld [vmem:[#allocation11 + $0x7c4] ss:$16 sps:$4 sm:$0xff]   ;;  %v17809_v11 = vld [vmem:[#allocation14 + $0x4] ss:$16 sps:$4 sm:$0xff]  }
 0x7ef   :  { %13258 = vmatpush1.bf16.msra.mxu0 %v17717_v28  ;;  %13409 = vmatmul.mubr.bf16.vlgmr.msra.gmra.mrb[20].mxu1 %v11568_v4  ;;  %v17777_v4 = vld [vmem:[#allocation11 + $0x780] ss:$16 sps:$4 sm:$0xff]   ;;  %v17794_v28 = vld [vmem:[#allocation11 + $0x78c] ss:$16 sps:$4 sm:$0xff]  }
 0x7f0   :  { %13418 = vmatpush1.bf16.msra.mxu1 %v17720_v25  ;;  %13259 = vmatprep.subr.bf16.mxu0 %v17725_v15  ;;  %v17789_v25 = vld [vmem:[#allocation11 + $0x7c0] ss:$16 sps:$4 sm:$0xff]  }
 0x7f1   :  { %13419 = vmatprep.subr.bf16.mxu1 %v17728_v17  ;;  %v17792_v17 = vld [vmem:[#allocation11 + $0x788] ss:$16 sps:$4 sm:$0xff]  }
 0x7f3   :  { %13260 = vmatpush1.bf16.msra.mxu0 %v17723_v22  ;;  %v17797_v22 = vld [vmem:[#allocation11 + $0x7e4] ss:$16 sps:$4 sm:$0xff]  }
 0x7f4   :  { %13420 = vmatpush1.bf16.msra.mxu1 %v17726_v24  ;;  %13261 = vmatprep.subr.bf16.mxu0 %v17731_v53  ;;  %v17800_v24 = vld [vmem:[#allocation11 + $0x7ac] ss:$16 sps:$4 sm:$0xff]   ;;  %v17795_v53 = vld [vmem:[#allocation11 + $0x7e0] ss:$16 sps:$4 sm:$0xff]  }
 0x7f5   :  { %13421 = vmatprep.subr.bf16.mxu1 %v17734_v31 }
 0x7f7   :  { %13262 = vmatpush1.bf16.msra.mxu0 %v17729_v27  ;;  %v17803_v27 = vld [vmem:[#allocation11 + $0x7cc] ss:$16 sps:$4 sm:$0xff]  }
 0x7f8   :  { %13422 = vmatpush1.bf16.msra.mxu1 %v17732_v56  ;;  %13263 = vmatprep.subr.bf16.mxu0 %v17737_v50  ;;  %v17807_v56 = vld [vmem:[#allocation14] ss:$16 sps:$4 sm:$0xff]  }
 0x7f9   :  { %13423 = vmatprep.subr.bf16.mxu1 %v17740_v45  ;;  %v17801_v45 = vld [vmem:[#allocation11 + $0x7c8] ss:$16 sps:$4 sm:$0xff]  }
 0x7fb   :  { %13264 = vmatpush1.bf16.msra.mxu0 %v17735_v7  ;;  %v17815_v7 = vld [vmem:[#allocation14 + $0x24] ss:$16 sps:$4 sm:$0xff]  }
 0x7fc   :  { %13424 = vmatpush1.bf16.msra.mxu1 %v17738_v30  ;;  %13265 = vmatprep.subr.bf16.mxu0 %v17743_v46  ;;  %v17806_v30 = vld [vmem:[#allocation11 + $0x7ec] ss:$16 sps:$4 sm:$0xff]   ;;  %v17813_v46 = vld [vmem:[#allocation14 + $0x20] ss:$16 sps:$4 sm:$0xff]  }
 0x7fd   :  { %13425 = vmatprep.subr.bf16.mxu1 %v17746_v20  ;;  %v17804_v20 = vld [vmem:[#allocation11 + $0x7e8] ss:$16 sps:$4 sm:$0xff]  }
 0x7ff   :  { %13266 = vmatpush1.bf16.msra.mxu0 %v17741_v36  ;;  %v17821_v36 = vld [vmem:[#allocation14 + $0x44] ss:$16 sps:$4 sm:$0xff]  }
 0x800   :  { %13426 = vmatpush1.bf16.msra.mxu1 %v17744_v37  ;;  %13267 = vmatprep.subr.bf16.mxu0 %v17749_v38  ;;  %v17812_v37 = vld [vmem:[#allocation14 + $0xc] ss:$16 sps:$4 sm:$0xff]   ;;  %v17819_v38 = vld [vmem:[#allocation14 + $0x40] ss:$16 sps:$4 sm:$0xff]  }
 0x801   :  { %13427 = vmatprep.subr.bf16.mxu1 %v17752_v19  ;;  %v17810_v19 = vld [vmem:[#allocation14 + $0x8] ss:$16 sps:$4 sm:$0xff]  }
 0x802   :  { %v11549_v43 = vpop.f32.mrb[16].mxu1 }
 0x803   :  { %13268 = vmatpush1.bf16.msra.mxu0 %v17747_v51  ;;  %v11551_v58 = vpop.f32.mrb[17].mxu1  ;;  %v17181_v15 = vadd.f32 %v11549_v43, %v8327_v52  ;;  %v17827_v51 = vld [vmem:[#allocation14 + $0x64] ss:$16 sps:$4 sm:$0xff]   ;;  %v17831_v43 = vld [vmem:[#allocation14 + $0x80] ss:$16 sps:$4 sm:$0xff]  }
 0x804   :  { %v17182_v44 = vadd.f32 %v11551_v58, %v8331_v48  ;;  %v11553_v47 = vpop.f32.mrb[18].mxu1  ;;  %13428 = vmatpush1.bf16.msra.mxu1 %v17750_v23  ;;  %13269 = vmatprep.subr.bf16.mxu0 %v17755_v55  ;;  %v17825_v48 = vld [vmem:[#allocation14 + $0x60] ss:$16 sps:$4 sm:$0xff]   ;;  %v17816_v23 = vld [vmem:[#allocation14 + $0x28] ss:$16 sps:$4 sm:$0xff]  }
 0x805   :  { %v11554_v6 = vpop.f32.mrb[19].mxu1  ;;  %13429 = vmatprep.subr.bf16.mxu1 %v17758_v35  ;;  %v11562_v31 = vmax.f32 %v17181_v15, 0.0  ;;  %v17833_v55 = vld [vmem:[#allocation14 + $0x84] ss:$16 sps:$4 sm:$0xff]   ;;  %v17824_v35 = vld [vmem:[#allocation14 + $0x4c] ss:$16 sps:$4 sm:$0xff]  }
 0x806   :  { %v11563_v42 = vmax.f32 %v17182_v44, 0.0  ;;  %v17822_v58 = vld [vmem:[#allocation14 + $0x48] ss:$16 sps:$4 sm:$0xff]   ;;  %v17830_v44 = vld [vmem:[#allocation14 + $0x6c] ss:$16 sps:$4 sm:$0xff]  }
 0x807   :  { %13270 = vmatpush1.bf16.msra.mxu0 %v17753_v62  ;;  %v11570_v50 = vpack.c.bf16 %v11562_v31, %v11562_v31  ;;  %v17839_v62 = vld [vmem:[#allocation14 + $0xa4] ss:$16 sps:$4 sm:$0xff]   ;;  %v17837_v47 = vld [vmem:[#allocation14 + $0xa0] ss:$16 sps:$4 sm:$0xff]   ;;  %v17836_v6 = vld [vmem:[#allocation14 + $0x8c] ss:$16 sps:$4 sm:$0xff]  }
 0x808   :  { %v11571_v16 = vpack.c.bf16 %v11563_v42, %v11563_v42  ;;  %13430 = vmatpush1.bf16.msra.mxu1 %v17756_v57  ;;  %13271 = vmatprep.subr.bf16.mxu0 %v17761_v26  ;;  %v17828_v57 = vld [vmem:[#allocation14 + $0x68] ss:$16 sps:$4 sm:$0xff]   ;;  %v17845_v26 = vld [vmem:[#allocation14 + $0xc4] ss:$16 sps:$4 sm:$0xff]   ;;  %v17873_v52 = vld [vmem:[#allocation14 + $0x160] ss:$16 sps:$4 sm:$0xff]  }
 0x809   :  { %13431 = vmatprep.subr.bf16.mxu1 %v17764_v60  ;;  %v17843_v60 = vld [vmem:[#allocation14 + $0xc0] ss:$16 sps:$4 sm:$0xff]   ;;  %v17834_v42 = vld [vmem:[#allocation14 + $0x88] ss:$16 sps:$4 sm:$0xff]   ;;  %v17884_v31 = vld [vmem:[#allocation14 + $0x18c] ss:$16 sps:$4 sm:$0xff]  }
 0x80a   :  { %13285 = vmatprep.mubr.bf16.mxu0 %v11571_v16  ;;  %13449 = vmatprep.mubr.bf16.mxu1 %v11571_v16  ;;  %v17842_v16 = vld [vmem:[#allocation14 + $0xac] ss:$16 sps:$4 sm:$0xff]   ;;  %v17870_v15 = vld [vmem:[#allocation14 + $0x148] ss:$16 sps:$4 sm:$0xff]  }
 0x80b   :  { %13272 = vmatpush1.bf16.msra.mxu0 %v17759_v13  ;;  %v17851_v13 = vld [vmem:[#allocation14 + $0xe4] ss:$16 sps:$4 sm:$0xff]  }
 0x80c   :  { %13432 = vmatpush1.bf16.msra.mxu1 %v17762_v21  ;;  %13273 = vmatprep.subr.bf16.mxu0 %v17767_v32  ;;  %v17849_v21 = vld [vmem:[#allocation14 + $0xe0] ss:$16 sps:$4 sm:$0xff]   ;;  %v17840_v32 = vld [vmem:[#allocation14 + $0xa8] ss:$16 sps:$4 sm:$0xff]  }
 0x80d   :  { %13433 = vmatprep.subr.bf16.mxu1 %v17770_v14  ;;  %v17857_v14 = vld [vmem:[#allocation14 + $0x104] ss:$16 sps:$4 sm:$0xff]  }
 0x80f   :  { %13274 = vmatpush1.bf16.msra.mxu0 %v17765_v1  ;;  %v17848_v1 = vld [vmem:[#allocation14 + $0xcc] ss:$16 sps:$4 sm:$0xff]  }
 0x810   :  { %13434 = vmatpush1.bf16.msra.mxu1 %v17768_v33  ;;  %13275 = vmatprep.subr.bf16.mxu0 %v17773_v40  ;;  %v17855_v33 = vld [vmem:[#allocation14 + $0x100] ss:$16 sps:$4 sm:$0xff]   ;;  %v17846_v40 = vld [vmem:[#allocation14 + $0xc8] ss:$16 sps:$4 sm:$0xff]  }
 0x811   :  { %13435 = vmatprep.subr.bf16.mxu1 %v17776_v2  ;;  %v17863_v2 = vld [vmem:[#allocation14 + $0x124] ss:$16 sps:$4 sm:$0xff]  }
 0x813   :  { %13276 = vmatpush1.bf16.msra.mxu0 %v17771_v3  ;;  %v17854_v3 = vld [vmem:[#allocation14 + $0xec] ss:$16 sps:$4 sm:$0xff]  }
 0x814   :  { %13436 = vmatpush1.bf16.msra.mxu1 %v17774_v63  ;;  %13277 = vmatprep.subr.bf16.mxu0 %v17779_v29  ;;  %v17861_v63 = vld [vmem:[#allocation14 + $0x120] ss:$16 sps:$4 sm:$0xff]   ;;  %v17852_v29 = vld [vmem:[#allocation14 + $0xe8] ss:$16 sps:$4 sm:$0xff]  }
 0x815   :  { %13437 = vmatprep.subr.bf16.mxu1 %v17782_v0  ;;  %v17869_v0 = vld [vmem:[#allocation14 + $0x144] ss:$16 sps:$4 sm:$0xff]  }
 0x817   :  { %13278 = vmatpush1.bf16.msra.mxu0 %v17777_v4  ;;  %v17860_v4 = vld [vmem:[#allocation14 + $0x10c] ss:$16 sps:$4 sm:$0xff]  }
 0x818   :  { %13438 = vmatpush1.bf16.msra.mxu1 %v17780_v9  ;;  %13279 = vmatprep.subr.bf16.mxu0 %v17785_v59  ;;  %v17867_v9 = vld [vmem:[#allocation14 + $0x140] ss:$16 sps:$4 sm:$0xff]   ;;  %v17858_v59 = vld [vmem:[#allocation14 + $0x108] ss:$16 sps:$4 sm:$0xff]  }
 0x819   :  { %13439 = vmatprep.subr.bf16.mxu1 %v17788_v5  ;;  %v17875_v5 = vld [vmem:[#allocation14 + $0x164] ss:$16 sps:$4 sm:$0xff]  }
 0x81b   :  { %13280 = vmatpush1.bf16.msra.mxu0 %v17783_v54  ;;  %v17866_v54 = vld [vmem:[#allocation14 + $0x12c] ss:$16 sps:$4 sm:$0xff]  }
 0x81c   :  { %13440 = vmatpush1.bf16.msra.mxu1 %v17786_v39  ;;  %13281 = vmatprep.subr.bf16.mxu0 %v17791_v61  ;;  %v17864_v39 = vld [vmem:[#allocation14 + $0x128] ss:$16 sps:$4 sm:$0xff]   ;;  %v17881_v61 = vld [vmem:[#allocation14 + $0x184] ss:$16 sps:$4 sm:$0xff]  }
 0x81d   :  { %13441 = vmatprep.subr.bf16.mxu1 %v17794_v28  ;;  %v17872_v28 = vld [vmem:[#allocation14 + $0x14c] ss:$16 sps:$4 sm:$0xff]  }
 0x81f   :  { %13282 = vmatpush1.bf16.msra.mxu0 %v17789_v25  ;;  %v17879_v25 = vld [vmem:[#allocation14 + $0x180] ss:$16 sps:$4 sm:$0xff]  }
 0x820   :  { %13442 = vmatpush1.bf16.msra.mxu1 %v17792_v17  ;;  %13283 = vmatprep.subr.bf16.mxu0 %v17797_v22  ;;  %v17887_v17 = vld [vmem:[#allocation14 + $0x1a4] ss:$16 sps:$4 sm:$0xff]   ;;  %v17878_v22 = vld [vmem:[#allocation14 + $0x16c] ss:$16 sps:$4 sm:$0xff]  }
 0x821   :  { %13443 = vmatprep.subr.bf16.mxu1 %v17800_v24  ;;  %v17885_v24 = vld [vmem:[#allocation14 + $0x1a0] ss:$16 sps:$4 sm:$0xff]  }
 0x823   :  { %13284 = vmatpush1.bf16.msra.mxu0 %v17795_v53  ;;  %v17876_v53 = vld [vmem:[#allocation14 + $0x168] ss:$16 sps:$4 sm:$0xff]  }
 0x824   :  { %13444 = vmatpush1.bf16.msra.mxu1 %v17798_v12  ;;  %14256 = vmatprep.subr.bf16.mxu0 %v17809_v11  ;;  %v17882_v12 = vld [vmem:[#allocation14 + $0x188] ss:$16 sps:$4 sm:$0xff]   ;;  %v17890_v11 = vld [vmem:[#allocation14 + $0x1ac] ss:$16 sps:$4 sm:$0xff]  }
 0x825   :  { %13445 = vmatprep.subr.bf16.mxu1 %v17803_v27  ;;  %v17888_v27 = vld [vmem:[#allocation14 + $0x1a8] ss:$16 sps:$4 sm:$0xff]  }
 0x826   :  { %13286 = vmatmul.mubr.bf16.vlgmr.msra.gmra.mrb[16].mxu0 %v11570_v50 }
 0x827   :  { %14257 = vmatpush1.bf16.msra.mxu0 %v17807_v56  ;;  %v17893_v56 = vld [vmem:[#allocation14 + $0x1c4] ss:$16 sps:$4 sm:$0xff]  }
 0x828   :  { %13446 = vmatpush1.bf16.msra.mxu1 %v17801_v45  ;;  %14258 = vmatprep.subr.bf16.mxu0 %v17815_v7  ;;  %v17891_v45 = vld [vmem:[#allocation14 + $0x1c0] ss:$16 sps:$4 sm:$0xff]   ;;  %v17894_v7 = vld [vmem:[#allocation14 + $0x1c8] ss:$16 sps:$4 sm:$0xff]  }
 0x829   :  { %13447 = vmatprep.subr.bf16.mxu1 %v17806_v30  ;;  %v17899_v30 = vld [vmem:[#allocation14 + $0x1e4] ss:$16 sps:$4 sm:$0xff]  }
 0x82b   :  { %14259 = vmatpush1.bf16.msra.mxu0 %v17813_v46  ;;  %v17902_v46 = vld [vmem:[#allocation14 + $0x1ec] ss:$16 sps:$4 sm:$0xff]  }
 0x82c   :  { %13448 = vmatpush1.bf16.msra.mxu1 %v17804_v20  ;;  %14260 = vmatprep.subr.bf16.mxu0 %v17821_v36  ;;  %v17897_v20 = vld [vmem:[#allocation14 + $0x1e0] ss:$16 sps:$4 sm:$0xff]   ;;  %v17900_v36 = vld [vmem:[#allocation14 + $0x1e8] ss:$16 sps:$4 sm:$0xff]  }
 0x82d   :  { %14338 = vmatprep.subr.bf16.mxu1 %v17812_v37  ;;  %v17905_v37 = vld [vmem:[#allocation14 + $0x204] ss:$16 sps:$4 sm:$0xff]  }
 0x82f   :  { %13450 = vmatmul.mubr.bf16.vlgmr.msra.gmra.mrb[20].mxu1 %v11570_v50  ;;  %14261 = vmatpush1.bf16.msra.mxu0 %v17819_v38  ;;  %v17896_v50 = vld [vmem:[#allocation14 + $0x1cc] ss:$16 sps:$4 sm:$0xff]  }
 0x830   :  { %14339 = vmatpush1.bf16.msra.mxu1 %v17810_v19  ;;  %14262 = vmatprep.subr.bf16.mxu0 %v17827_v51  ;;  %v17908_v38 = vld [vmem:[#allocation14 + $0x20c] ss:$16 sps:$4 sm:$0xff]  }
 0x831   :  { %14340 = vmatprep.subr.bf16.mxu1 %v17818_v34  ;;  %v19004_v19 = vld [vmem:[#allocation13] sm:$0xf] }
 0x832   :  { %v11833_v51 = vrot.slane %v19004_v19, %v18820_v10  ;;  %v11837_v34 = vrot.slane %v19004_v19, %v18823_v18 }
 0x833   :  { %14263 = vmatpush1.bf16.msra.mxu0 %v17825_v48 }
 0x834   :  { %14341 = vmatpush1.bf16.msra.mxu1 %v17816_v23  ;;  %14264 = vmatprep.subr.bf16.mxu0 %v17833_v55 }
 0x835   :  { %14342 = vmatprep.subr.bf16.mxu1 %v17824_v35 }
 0x837   :  { %14265 = vmatpush1.bf16.msra.mxu0 %v17831_v43 }
 0x838   :  { %14343 = vmatpush1.bf16.msra.mxu1 %v17822_v58  ;;  %14266 = vmatprep.subr.bf16.mxu0 %v17839_v62 }
 0x839   :  { %14344 = vmatprep.subr.bf16.mxu1 %v17830_v44 }
 0x83b   :  { %14267 = vmatpush1.bf16.msra.mxu0 %v17837_v47 }
 0x83c   :  { %14345 = vmatpush1.bf16.msra.mxu1 %v17828_v57  ;;  %14268 = vmatprep.subr.bf16.mxu0 %v17845_v26  ;;  %v17903_v57 = vld [vmem:[#allocation14 + $0x200] ss:$16 sps:$4 sm:$0xff]   ;;  %v17906_v26 = vld [vmem:[#allocation14 + $0x208] ss:$16 sps:$4 sm:$0xff]  }
 0x83d   :  { %14346 = vmatprep.subr.bf16.mxu1 %v17836_v6 }
 0x83f   :  { %14269 = vmatpush1.bf16.msra.mxu0 %v17843_v60  ;;  %v11845_v60 = vrot.slane %v19004_v19, %v18861_v8 }
 0x840   :  { %14347 = vmatpush1.bf16.msra.mxu1 %v17834_v42  ;;  %14270 = vmatprep.subr.bf16.mxu0 %v17851_v13  ;;  %v17911_v42 = vld [vmem:[#allocation14 + $0x224] ss:$16 sps:$4 sm:$0xff]   ;;  %v17914_v13 = vld [vmem:[#allocation14 + $0x22c] ss:$16 sps:$4 sm:$0xff]  }
 0x841   :  { %14348 = vmatprep.subr.bf16.mxu1 %v17842_v16 }
 0x843   :  { %14271 = vmatpush1.bf16.msra.mxu0 %v17849_v21 }
 0x844   :  { %14349 = vmatpush1.bf16.msra.mxu1 %v17840_v32  ;;  %14272 = vmatprep.subr.bf16.mxu0 %v17857_v14  ;;  %v17909_v32 = vld [vmem:[#allocation14 + $0x220] ss:$16 sps:$4 sm:$0xff]   ;;  %v17912_v14 = vld [vmem:[#allocation14 + $0x228] ss:$16 sps:$4 sm:$0xff]  }
 0x845   :  { %14350 = vmatprep.subr.bf16.mxu1 %v17848_v1 }
 0x847   :  { %14273 = vmatpush1.bf16.msra.mxu0 %v17855_v33 }
 0x848   :  { %14351 = vmatpush1.bf16.msra.mxu1 %v17846_v40  ;;  %14274 = vmatprep.subr.bf16.mxu0 %v17863_v2  ;;  %v17917_v40 = vld [vmem:[#allocation14 + $0x244] ss:$16 sps:$4 sm:$0xff]   ;;  %v17920_v2 = vld [vmem:[#allocation14 + $0x24c] ss:$16 sps:$4 sm:$0xff]  }
 0x849   :  { %14352 = vmatprep.subr.bf16.mxu1 %v17854_v3 }
 0x84b   :  { %14275 = vmatpush1.bf16.msra.mxu0 %v17861_v63 }
 0x84c   :  { %14353 = vmatpush1.bf16.msra.mxu1 %v17852_v29  ;;  %14276 = vmatprep.subr.bf16.mxu0 %v17869_v0  ;;  %v17915_v29 = vld [vmem:[#allocation14 + $0x240] ss:$16 sps:$4 sm:$0xff]   ;;  %v17918_v0 = vld [vmem:[#allocation14 + $0x248] ss:$16 sps:$4 sm:$0xff]  }
 0x84d   :  { %14354 = vmatprep.subr.bf16.mxu1 %v17860_v4 }
 0x84f   :  { %14277 = vmatpush1.bf16.msra.mxu0 %v17867_v9  ;;  %v17923_v9 = vld [vmem:[#allocation14 + $0x264] ss:$16 sps:$4 sm:$0xff]  }
 0x850   :  { %14355 = vmatpush1.bf16.msra.mxu1 %v17858_v59  ;;  %14278 = vmatprep.subr.bf16.mxu0 %v17875_v5  ;;  %v17926_v59 = vld [vmem:[#allocation14 + $0x26c] ss:$16 sps:$4 sm:$0xff]   ;;  %v17921_v5 = vld [vmem:[#allocation14 + $0x260] ss:$16 sps:$4 sm:$0xff]  }
 0x851   :  { %14356 = vmatprep.subr.bf16.mxu1 %v17866_v54  ;;  %v17924_v54 = vld [vmem:[#allocation14 + $0x268] ss:$16 sps:$4 sm:$0xff]  }
 0x853   :  { %14279 = vmatpush1.bf16.msra.mxu0 %v17873_v52  ;;  %v17929_v52 = vld [vmem:[#allocation14 + $0x284] ss:$16 sps:$4 sm:$0xff]  }
 0x854   :  { %14357 = vmatpush1.bf16.msra.mxu1 %v17864_v39  ;;  %14280 = vmatprep.subr.bf16.mxu0 %v17881_v61  ;;  %v17932_v39 = vld [vmem:[#allocation14 + $0x28c] ss:$16 sps:$4 sm:$0xff]   ;;  %v17927_v61 = vld [vmem:[#allocation14 + $0x280] ss:$16 sps:$4 sm:$0xff]  }
 0x855   :  { %14358 = vmatprep.subr.bf16.mxu1 %v17872_v28  ;;  %v17930_v28 = vld [vmem:[#allocation14 + $0x288] ss:$16 sps:$4 sm:$0xff]  }
 0x857   :  { %14281 = vmatpush1.bf16.msra.mxu0 %v17879_v25  ;;  %v17935_v25 = vld [vmem:[#allocation14 + $0x2a4] ss:$16 sps:$4 sm:$0xff]  }
 0x858   :  { %14359 = vmatpush1.bf16.msra.mxu1 %v17870_v15  ;;  %14282 = vmatprep.subr.bf16.mxu0 %v17887_v17  ;;  %v17938_v15 = vld [vmem:[#allocation14 + $0x2ac] ss:$16 sps:$4 sm:$0xff]   ;;  %v17933_v17 = vld [vmem:[#allocation14 + $0x2a0] ss:$16 sps:$4 sm:$0xff]  }
 0x859   :  { %14360 = vmatprep.subr.bf16.mxu1 %v17878_v22  ;;  %v17936_v22 = vld [vmem:[#allocation14 + $0x2a8] ss:$16 sps:$4 sm:$0xff]  }
 0x85b   :  { %14283 = vmatpush1.bf16.msra.mxu0 %v17885_v24  ;;  %v17941_v24 = vld [vmem:[#allocation14 + $0x2c4] ss:$16 sps:$4 sm:$0xff]  }
 0x85c   :  { %14361 = vmatpush1.bf16.msra.mxu1 %v17876_v53  ;;  %14284 = vmatprep.subr.bf16.mxu0 %v17893_v56  ;;  %v17944_v53 = vld [vmem:[#allocation14 + $0x2cc] ss:$16 sps:$4 sm:$0xff]   ;;  %v17945_v56 = vld [vmem:[#allocation14 + $0x2e0] ss:$16 sps:$4 sm:$0xff]  }
 0x85d   :  { %14362 = vmatprep.subr.bf16.mxu1 %v17884_v31  ;;  %v17939_v31 = vld [vmem:[#allocation14 + $0x2c0] ss:$16 sps:$4 sm:$0xff]  }
 0x85f   :  { %14285 = vmatpush1.bf16.msra.mxu0 %v17891_v45  ;;  %v17953_v45 = vld [vmem:[#allocation14 + $0x304] ss:$16 sps:$4 sm:$0xff]  }
 0x860   :  { %14363 = vmatpush1.bf16.msra.mxu1 %v17882_v12  ;;  %14286 = vmatprep.subr.bf16.mxu0 %v17899_v30  ;;  %v17942_v12 = vld [vmem:[#allocation14 + $0x2c8] ss:$16 sps:$4 sm:$0xff]   ;;  %v17951_v30 = vld [vmem:[#allocation14 + $0x300] ss:$16 sps:$4 sm:$0xff]  }
 0x861   :  { %14364 = vmatprep.subr.bf16.mxu1 %v17890_v11  ;;  %v17947_v11 = vld [vmem:[#allocation14 + $0x2e4] ss:$16 sps:$4 sm:$0xff]  }
 0x863   :  { %14287 = vmatpush1.bf16.msra.mxu0 %v17897_v20  ;;  %v17959_v20 = vld [vmem:[#allocation14 + $0x324] ss:$16 sps:$4 sm:$0xff]  }
 0x864   :  { %14365 = vmatpush1.bf16.msra.mxu1 %v17888_v27  ;;  %14297 = vmatprep.subr.bf16.mxu0 %v17905_v37  ;;  %v17950_v27 = vld [vmem:[#allocation14 + $0x2ec] ss:$16 sps:$4 sm:$0xff]   ;;  %v17957_v37 = vld [vmem:[#allocation14 + $0x320] ss:$16 sps:$4 sm:$0xff]  }
 0x865   :  { %14366 = vmatprep.subr.bf16.mxu1 %v17896_v50  ;;  %v17948_v50 = vld [vmem:[#allocation14 + $0x2e8] ss:$16 sps:$4 sm:$0xff]  }
 0x868   :  { %14367 = vmatpush1.bf16.msra.mxu1 %v17894_v7  ;;  %v17956_v7 = vld [vmem:[#allocation14 + $0x30c] ss:$16 sps:$4 sm:$0xff]  }
 0x869   :  { %14368 = vmatprep.subr.bf16.mxu1 %v17902_v46  ;;  %v17954_v46 = vld [vmem:[#allocation14 + $0x308] ss:$16 sps:$4 sm:$0xff]  }
 0x86c   :  { %14369 = vmatpush1.bf16.msra.mxu1 %v17900_v36  ;;  %v17962_v36 = vld [vmem:[#allocation14 + $0x32c] ss:$16 sps:$4 sm:$0xff]  }
 0x86d   :  { %14379 = vmatprep.subr.bf16.mxu1 %v17908_v38  ;;  %v17960_v38 = vld [vmem:[#allocation14 + $0x328] ss:$16 sps:$4 sm:$0xff]  }
 0x8f9   :  { %v13287_v48 = vpop.f32.mrb[16].mxu0 }
 0x8fa   :  { %v17183_v23 = vadd.f32 %v13287_v48, %v11833_v51  ;;  %v13289_v55 = vpop.f32.mrb[17].mxu0  ;;  %v17965_v51 = vld [vmem:[#allocation14 + $0x344] ss:$16 sps:$4 sm:$0xff]   ;;  %v17963_v48 = vld [vmem:[#allocation14 + $0x340] ss:$16 sps:$4 sm:$0xff]  }
 0x8fb   :  { %v17184_v35 = vadd.f32 %v13289_v55, %v11837_v34  ;;  %v13291_v43 = vpop.f32.mrb[18].mxu0  ;;  %v17968_v34 = vld [vmem:[#allocation14 + $0x34c] ss:$16 sps:$4 sm:$0xff]   ;;  %v17971_v55 = vld [vmem:[#allocation14 + $0x364] ss:$16 sps:$4 sm:$0xff]  }
 0x8fc   :  { %v13458_v58 = vmax.f32 %v17183_v23, 0.0  ;;  %v13292_v62 = vpop.f32.mrb[19].mxu0  ;;  %v17966_v23 = vld [vmem:[#allocation14 + $0x348] ss:$16 sps:$4 sm:$0xff]   ;;  %v17969_v43 = vld [vmem:[#allocation14 + $0x360] ss:$16 sps:$4 sm:$0xff]  }
 0x8fd   :  { %v13459_v44 = vmax.f32 %v17184_v35, 0.0  ;;  %v17974_v35 = vld [vmem:[#allocation14 + $0x36c] ss:$16 sps:$4 sm:$0xff]   ;;  %v17977_v62 = vld [vmem:[#allocation14 + $0x384] ss:$16 sps:$4 sm:$0xff]  }
 0x8fe   :  { %v13462_v6 = vpack.c.bf16 %v13458_v58, %v13458_v58  ;;  %v17972_v58 = vld [vmem:[#allocation14 + $0x368] ss:$16 sps:$4 sm:$0xff]  }
 0x8ff   :  { %v13463_v47 = vpack.c.bf16 %v13459_v44, %v13459_v44  ;;  %v17980_v44 = vld [vmem:[#allocation14 + $0x38c] ss:$16 sps:$4 sm:$0xff]  }
 0x901   :  { %14288 = vmatprep.mubr.bf16.mxu0 %v13463_v47  ;;  %14370 = vmatprep.mubr.bf16.mxu1 %v13463_v47  ;;  %v17975_v47 = vld [vmem:[#allocation14 + $0x380] ss:$16 sps:$4 sm:$0xff]  }
 0x902   :  { %14289 = vmatmul.mubr.bf16.vlgmr.msra.gmra.mrb[20].mxu0 %v13462_v6  ;;  %14371 = vmatmul.mubr.bf16.vlgmr.msra.gmra.mrb[24].mxu1 %v13462_v6  ;;  %v19012_v16 = vpop.f32.mrb[20].mxu1  ;;  %v17986_v6 = vld [vmem:[#allocation14 + $0x3ac] ss:$16 sps:$4 sm:$0xff]  }
 0x903   :  { %14298 = vmatpush1.bf16.msra.mxu0 %v17903_v57  ;;  %14380 = vmatpush1.bf16.msra.mxu1 %v17906_v26  ;;  %v13453_v21 = vpop.f32.mrb[21].mxu1  ;;  %v17978_v57 = vld [vmem:[#allocation14 + $0x388] ss:$16 sps:$4 sm:$0xff]   ;;  %v17983_v26 = vld [vmem:[#allocation14 + $0x3a4] ss:$16 sps:$4 sm:$0xff]  }
 0x904   :  { %v17186_v1 = vadd.f32 %v13453_v21, %v11845_v60  ;;  %v13455_v33 = vpop.f32.mrb[22].mxu1  ;;  %14299 = vmatprep.subr.bf16.mxu0 %v17911_v42  ;;  %14381 = vmatprep.subr.bf16.mxu1 %v17914_v13  ;;  %v17981_v60 = vld [vmem:[#allocation14 + $0x3a0] ss:$16 sps:$4 sm:$0xff]   ;;  %v17984_v42 = vld [vmem:[#allocation14 + $0x3a8] ss:$16 sps:$4 sm:$0xff]   ;;  %v11841_v13 = vrot.slane %v19004_v19, %v18878_v41 }
 0x905   :  { %v13456_v3 = vpop.f32.mrb[23].mxu1  ;;  %v17989_v21 = vld [vmem:[#allocation14 + $0x3c4] ss:$16 sps:$4 sm:$0xff]   ;;  %v18001_v19 = vld [vmem:[#allocation17 + $0x4] ss:$8 sps:$4 sm:$0xff]  }
 0x906   :  { %v13461_v63 = vmax.f32 %v17186_v1, 0.0  ;;  %v17990_v1 = vld [vmem:[#allocation14 + $0x3c8] ss:$16 sps:$4 sm:$0xff]   ;;  %v17185_v33 = vadd.f32 %v19012_v16, %v11841_v13  ;;  %v17993_v3 = vld [vmem:[#allocation14 + $0x3e0] ss:$16 sps:$4 sm:$0xff]  }
 0x907   :  { %14300 = vmatpush1.bf16.msra.mxu0 %v17909_v32  ;;  %14382 = vmatpush1.bf16.msra.mxu1 %v17912_v14  ;;  %v17992_v32 = vld [vmem:[#allocation14 + $0x3cc] ss:$16 sps:$4 sm:$0xff]   ;;  %v17987_v14 = vld [vmem:[#allocation14 + $0x3c0] ss:$16 sps:$4 sm:$0xff]  }
 0x908   :  { %v13465_v4 = vpack.c.bf16 %v13461_v63, %v13461_v63  ;;  %14301 = vmatprep.subr.bf16.mxu0 %v17917_v40  ;;  %14383 = vmatprep.subr.bf16.mxu1 %v17920_v2  ;;  %v17995_v40 = vld [vmem:[#allocation14 + $0x3e4] ss:$16 sps:$4 sm:$0xff]   ;;  %v17998_v2 = vld [vmem:[#allocation14 + $0x3ec] ss:$16 sps:$4 sm:$0xff]   ;;  %v17996_v63 = vld [vmem:[#allocation14 + $0x3e8] ss:$16 sps:$4 sm:$0xff]  }
 0x909   :  { %v18002_v16 = vld [vmem:[#allocation17 + $0x10] ss:$8 sps:$4 sm:$0xff]  }
 0x90a   :  { %14329 = vmatprep.mubr.bf16.mxu0 %v13465_v4  ;;  %14411 = vmatprep.mubr.bf16.mxu1 %v13465_v4 }
 0x90b   :  { %14302 = vmatpush1.bf16.msra.mxu0 %v17915_v29  ;;  %14384 = vmatpush1.bf16.msra.mxu1 %v17918_v0  ;;  %v13460_v29 = vmax.f32 %v17185_v33, 0.0  ;;  %v17999_v0 = vld [vmem:[#allocation17] ss:$8 sps:$4 sm:$0xff]  }
 0x90c   :  { %14303 = vmatprep.subr.bf16.mxu0 %v17923_v9  ;;  %14385 = vmatprep.subr.bf16.mxu1 %v17926_v59  ;;  %v18004_v9 = vld [vmem:[#allocation17 + $0x14] ss:$8 sps:$4 sm:$0xff]   ;;  %v18007_v59 = vld [vmem:[#allocation17 + $0x24] ss:$8 sps:$4 sm:$0xff]  }
 0x90d   :  { %v13464_v4 = vpack.c.bf16 %v13460_v29, %v13460_v29 }
 0x90f   :  { %14304 = vmatpush1.bf16.msra.mxu0 %v17921_v5  ;;  %14386 = vmatpush1.bf16.msra.mxu1 %v17924_v54  ;;  %v18005_v5 = vld [vmem:[#allocation17 + $0x20] ss:$8 sps:$4 sm:$0xff]   ;;  %v18010_v54 = vld [vmem:[#allocation17 + $0x34] ss:$8 sps:$4 sm:$0xff]  }
 0x910   :  { %14305 = vmatprep.subr.bf16.mxu0 %v17929_v52  ;;  %14387 = vmatprep.subr.bf16.mxu1 %v17932_v39  ;;  %v18008_v52 = vld [vmem:[#allocation17 + $0x30] ss:$8 sps:$4 sm:$0xff]   ;;  %v18013_v39 = vld [vmem:[#allocation17 + $0x44] ss:$8 sps:$4 sm:$0xff]  }
 0x913   :  { %14306 = vmatpush1.bf16.msra.mxu0 %v17927_v61  ;;  %14388 = vmatpush1.bf16.msra.mxu1 %v17930_v28  ;;  %v18011_v61 = vld [vmem:[#allocation17 + $0x40] ss:$8 sps:$4 sm:$0xff]   ;;  %v18016_v28 = vld [vmem:[#allocation17 + $0x54] ss:$8 sps:$4 sm:$0xff]  }
 0x914   :  { %14307 = vmatprep.subr.bf16.mxu0 %v17935_v25  ;;  %14389 = vmatprep.subr.bf16.mxu1 %v17938_v15  ;;  %v18014_v25 = vld [vmem:[#allocation17 + $0x50] ss:$8 sps:$4 sm:$0xff]   ;;  %v18019_v15 = vld [vmem:[#allocation17 + $0x64] ss:$8 sps:$4 sm:$0xff]  }
 0x917   :  { %14308 = vmatpush1.bf16.msra.mxu0 %v17933_v17  ;;  %14390 = vmatpush1.bf16.msra.mxu1 %v17936_v22  ;;  %v18017_v17 = vld [vmem:[#allocation17 + $0x60] ss:$8 sps:$4 sm:$0xff]   ;;  %v18022_v22 = vld [vmem:[#allocation17 + $0x74] ss:$8 sps:$4 sm:$0xff]  }
 0x918   :  { %14309 = vmatprep.subr.bf16.mxu0 %v17941_v24  ;;  %14391 = vmatprep.subr.bf16.mxu1 %v17944_v53  ;;  %v18020_v24 = vld [vmem:[#allocation17 + $0x70] ss:$8 sps:$4 sm:$0xff]   ;;  %v18025_v53 = vld [vmem:[#allocation17 + $0x84] ss:$8 sps:$4 sm:$0xff]  }
 0x91b   :  { %14310 = vmatpush1.bf16.msra.mxu0 %v17939_v31  ;;  %14392 = vmatpush1.bf16.msra.mxu1 %v17942_v12  ;;  %v18023_v31 = vld [vmem:[#allocation17 + $0x80] ss:$8 sps:$4 sm:$0xff]   ;;  %v18028_v12 = vld [vmem:[#allocation17 + $0x94] ss:$8 sps:$4 sm:$0xff]  }
 0x91c   :  { %14311 = vmatprep.subr.bf16.mxu0 %v17947_v11  ;;  %14393 = vmatprep.subr.bf16.mxu1 %v17950_v27  ;;  %v18026_v11 = vld [vmem:[#allocation17 + $0x90] ss:$8 sps:$4 sm:$0xff]   ;;  %v18031_v27 = vld [vmem:[#allocation17 + $0xa4] ss:$8 sps:$4 sm:$0xff]  }
 0x91f   :  { %14312 = vmatpush1.bf16.msra.mxu0 %v17945_v56  ;;  %14394 = vmatpush1.bf16.msra.mxu1 %v17948_v50  ;;  %v18029_v56 = vld [vmem:[#allocation17 + $0xa0] ss:$8 sps:$4 sm:$0xff]   ;;  %v18034_v50 = vld [vmem:[#allocation17 + $0xb4] ss:$8 sps:$4 sm:$0xff]  }
 0x920   :  { %14313 = vmatprep.subr.bf16.mxu0 %v17953_v45  ;;  %14395 = vmatprep.subr.bf16.mxu1 %v17956_v7  ;;  %v18032_v45 = vld [vmem:[#allocation17 + $0xb0] ss:$8 sps:$4 sm:$0xff]   ;;  %v18037_v7 = vld [vmem:[#allocation17 + $0xc4] ss:$8 sps:$4 sm:$0xff]  }
 0x923   :  { %14314 = vmatpush1.bf16.msra.mxu0 %v17951_v30  ;;  %14396 = vmatpush1.bf16.msra.mxu1 %v17954_v46  ;;  %v18035_v30 = vld [vmem:[#allocation17 + $0xc0] ss:$8 sps:$4 sm:$0xff]   ;;  %v18040_v46 = vld [vmem:[#allocation17 + $0xd4] ss:$8 sps:$4 sm:$0xff]  }
 0x924   :  { %14315 = vmatprep.subr.bf16.mxu0 %v17959_v20  ;;  %14397 = vmatprep.subr.bf16.mxu1 %v17962_v36  ;;  %v18038_v20 = vld [vmem:[#allocation17 + $0xd0] ss:$8 sps:$4 sm:$0xff]   ;;  %v18043_v36 = vld [vmem:[#allocation17 + $0xe4] ss:$8 sps:$4 sm:$0xff]  }
 0x927   :  { %14316 = vmatpush1.bf16.msra.mxu0 %v17957_v37  ;;  %14398 = vmatpush1.bf16.msra.mxu1 %v17960_v38  ;;  %v18041_v37 = vld [vmem:[#allocation17 + $0xe0] ss:$8 sps:$4 sm:$0xff]   ;;  %v18046_v38 = vld [vmem:[#allocation17 + $0xf4] ss:$8 sps:$4 sm:$0xff]  }
 0x928   :  { %14317 = vmatprep.subr.bf16.mxu0 %v17965_v51  ;;  %14399 = vmatprep.subr.bf16.mxu1 %v17968_v34  ;;  %v18044_v51 = vld [vmem:[#allocation17 + $0xf0] ss:$8 sps:$4 sm:$0xff]   ;;  %v18049_v34 = vld [vmem:[#allocation17 + $0x104] ss:$8 sps:$4 sm:$0xff]  }
 0x92b   :  { %14318 = vmatpush1.bf16.msra.mxu0 %v17963_v48  ;;  %14400 = vmatpush1.bf16.msra.mxu1 %v17966_v23  ;;  %v18095_v48 = vld [vmem:[#allocation20 + $0x40] sm:$0xff]  }
 0x92c   :  { %14319 = vmatprep.subr.bf16.mxu0 %v17971_v55  ;;  %14401 = vmatprep.subr.bf16.mxu1 %v17974_v35  ;;  %v18096_v23 = vld [vmem:[#allocation20] sm:$0xff]   ;;  %v18097_v55 = vld [vmem:[#allocation20 + $0x48] sm:$0xff]  }
 0x92d   :  { %v18098_v35 = vld [vmem:[#allocation20 + $0x8] sm:$0xff]  }
 0x92f   :  { %14320 = vmatpush1.bf16.msra.mxu0 %v17969_v43  ;;  %14402 = vmatpush1.bf16.msra.mxu1 %v17972_v58  ;;  %v18099_v43 = vld [vmem:[#allocation20 + $0x50] sm:$0xff]  }
 0x930   :  { %14321 = vmatprep.subr.bf16.mxu0 %v17977_v62  ;;  %14403 = vmatprep.subr.bf16.mxu1 %v17980_v44  ;;  %v18100_v58 = vld [vmem:[#allocation20 + $0x10] sm:$0xff]   ;;  %v18101_v62 = vld [vmem:[#allocation20 + $0x58] sm:$0xff]  }
 0x931   :  { %v18102_v44 = vld [vmem:[#allocation20 + $0x18] sm:$0xff]  }
 0x933   :  { %14322 = vmatpush1.bf16.msra.mxu0 %v17975_v47  ;;  %14404 = vmatpush1.bf16.msra.mxu1 %v17978_v57  ;;  %v18103_v47 = vld [vmem:[#allocation20 + $0x60] sm:$0xff]  }
 0x934   :  { %14323 = vmatprep.subr.bf16.mxu0 %v17983_v26  ;;  %14405 = vmatprep.subr.bf16.mxu1 %v17986_v6  ;;  %v18104_v57 = vld [vmem:[#allocation20 + $0x20] sm:$0xff]   ;;  %v18105_v26 = vld [vmem:[#allocation20 + $0x68] sm:$0xff]  }
 0x935   :  { %v18106_v6 = vld [vmem:[#allocation20 + $0x28] sm:$0xff]  }
 0x937   :  { %14324 = vmatpush1.bf16.msra.mxu0 %v17981_v60  ;;  %14406 = vmatpush1.bf16.msra.mxu1 %v17984_v42  ;;  %v19017_v60 = vld [vmem:[#allocation16] sm:$0xf] }
 0x938   :  { %14325 = vmatprep.subr.bf16.mxu0 %v17989_v21  ;;  %14407 = vmatprep.subr.bf16.mxu1 %v17992_v32  ;;  %v13599_v42 = vrot.slane %v19017_v60, %v18820_v10  ;;  %v13603_v13 = vrot.slane %v19017_v60, %v18823_v18  ;;  %v13611_v21 = vrot.slane %v19017_v60, %v18861_v8 }
 0x93b   :  { %14326 = vmatpush1.bf16.msra.mxu0 %v17987_v14  ;;  %14408 = vmatpush1.bf16.msra.mxu1 %v17990_v1 }
 0x93c   :  { %14327 = vmatprep.subr.bf16.mxu0 %v17995_v40  ;;  %14409 = vmatprep.subr.bf16.mxu1 %v17998_v2 }
 0x93f   :  { %14328 = vmatpush1.bf16.msra.mxu0 %v17993_v3  ;;  %14410 = vmatpush1.bf16.msra.mxu1 %v17996_v63 }
 0x940   :  { %14824 = vmatprep.subr.bf16.mxu0 %v18001_v19  ;;  %17143 = vmatprep.subr.bf16.mxu1 %v18095_v48  ;;  %v13607_v48 = vrot.slane %v19017_v60, %v18878_v41  ;;  %v18109_v41 = vld [vmem:[#allocation20 + $0x78] sm:$0xff]  }
 0x942   :  { %14330 = vmatmul.mubr.bf16.vlgmr.msra.gmra.mrb[20].mxu0 %v13464_v4  ;;  %14412 = vmatmul.mubr.bf16.vlgmr.msra.gmra.mrb[24].mxu1 %v13464_v4 }
 0x943   :  { %14825 = vmatpush1.bf16.msra.mxu0 %v17999_v0  ;;  %17144 = vmatpush3.bf16.msra.mxu1 %v18096_v23  ;;  %v18091_v23 = vld [vmem:[#allocation17 + $0x1e4] ss:$8 sps:$4 sm:$0xff]  }
 0x944   :  { %14826 = vmatprep.subr.bf16.mxu0 %v18004_v9  ;;  %17145 = vmatprep.subr.bf16.mxu1 %v18097_v55  ;;  %v18089_v55 = vld [vmem:[#allocation17 + $0x1e0] ss:$8 sps:$4 sm:$0xff]  }
 0x947   :  { %14827 = vmatpush1.bf16.msra.mxu0 %v18002_v16  ;;  %17146 = vmatpush3.bf16.msra.mxu1 %v18098_v35 }
 0x948   :  { %14828 = vmatprep.subr.bf16.mxu0 %v18007_v59  ;;  %17147 = vmatprep.subr.bf16.mxu1 %v18099_v43  ;;  %v18094_v43 = vld [vmem:[#allocation17 + $0x1f4] ss:$8 sps:$4 sm:$0xff]  }
 0x94b   :  { %14829 = vmatpush1.bf16.msra.mxu0 %v18005_v5  ;;  %17148 = vmatpush3.bf16.msra.mxu1 %v18100_v58  ;;  %v18047_v5 = vld [vmem:[#allocation17 + $0x100] ss:$8 sps:$4 sm:$0xff]   ;;  %v18092_v58 = vld [vmem:[#allocation17 + $0x1f0] ss:$8 sps:$4 sm:$0xff]  }
 0x94c   :  { %14830 = vmatprep.subr.bf16.mxu0 %v18010_v54  ;;  %17149 = vmatprep.subr.bf16.mxu1 %v18101_v62 }
 0x94f   :  { %14831 = vmatpush1.bf16.msra.mxu0 %v18008_v52  ;;  %17150 = vmatpush3.bf16.msra.mxu1 %v18102_v44  ;;  %v18052_v52 = vld [vmem:[#allocation17 + $0x114] ss:$8 sps:$4 sm:$0xff]  }
 0x950   :  { %14832 = vmatprep.subr.bf16.mxu0 %v18013_v39  ;;  %17151 = vmatprep.subr.bf16.mxu1 %v18103_v47  ;;  %v18050_v39 = vld [vmem:[#allocation17 + $0x110] ss:$8 sps:$4 sm:$0xff]  }
 0x951   :  { %v18107_v47 = vld [vmem:[#allocation20 + $0x70] sm:$0xff]  }
 0x953   :  { %14833 = vmatpush1.bf16.msra.mxu0 %v18011_v61  ;;  %17152 = vmatpush3.bf16.msra.mxu1 %v18104_v57  ;;  %v18055_v61 = vld [vmem:[#allocation17 + $0x124] ss:$8 sps:$4 sm:$0xff]   ;;  %v18108_v57 = vld [vmem:[#allocation20 + $0x30] sm:$0xff]  }
 0x954   :  { %14834 = vmatprep.subr.bf16.mxu0 %v18016_v28  ;;  %17153 = vmatprep.subr.bf16.mxu1 %v18105_v26  ;;  %v18053_v28 = vld [vmem:[#allocation17 + $0x120] ss:$8 sps:$4 sm:$0xff]  }
 0x955   :  { %v18110_v26 = vld [vmem:[#allocation20 + $0x38] sm:$0xff]  }
 0x957   :  { %14835 = vmatpush1.bf16.msra.mxu0 %v18014_v25  ;;  %17154 = vmatpush3.bf16.msra.mxu1 %v18106_v6  ;;  %v18058_v25 = vld [vmem:[#allocation17 + $0x134] ss:$8 sps:$4 sm:$0xff]   ;;  %v14492_v6 = vld [vmem:[#allocation19] sm:$0x3] }
 0x958   :  { %14836 = vmatprep.subr.bf16.mxu0 %v18019_v15  ;;  %v18056_v15 = vld [vmem:[#allocation17 + $0x130] ss:$8 sps:$4 sm:$0xff]   ;;  %17155 = vmatprep.subr.bf16.mxu1 %v18107_v47  ;;  %v14497_v60 = vrot.slane %v14492_v6, %v18820_v10 }
 0x95b   :  { %14837 = vmatpush1.bf16.msra.mxu0 %v18017_v17  ;;  %v18061_v17 = vld [vmem:[#allocation17 + $0x144] ss:$8 sps:$4 sm:$0xff]   ;;  %17156 = vmatpush3.bf16.msra.mxu1 %v18108_v57 }
 0x95c   :  { %14838 = vmatprep.subr.bf16.mxu0 %v18022_v22  ;;  %v18059_v22 = vld [vmem:[#allocation17 + $0x140] ss:$8 sps:$4 sm:$0xff]   ;;  %17157 = vmatprep.subr.bf16.mxu1 %v18109_v41 }
 0x95f   :  { %14839 = vmatpush1.bf16.msra.mxu0 %v18020_v24  ;;  %v18064_v24 = vld [vmem:[#allocation17 + $0x154] ss:$8 sps:$4 sm:$0xff]   ;;  %17158 = vmatpush3.bf16.msra.mxu1 %v18110_v26 }
 0x960   :  { %14840 = vmatprep.subr.bf16.mxu0 %v18025_v53  ;;  %v18062_v53 = vld [vmem:[#allocation17 + $0x150] ss:$8 sps:$4 sm:$0xff]  }
 0x963   :  { %14841 = vmatpush1.bf16.msra.mxu0 %v18023_v31  ;;  %v18067_v31 = vld [vmem:[#allocation17 + $0x164] ss:$8 sps:$4 sm:$0xff]  }
 0x964   :  { %14842 = vmatprep.subr.bf16.mxu0 %v18028_v12  ;;  %v18065_v12 = vld [vmem:[#allocation17 + $0x160] ss:$8 sps:$4 sm:$0xff]  }
 0x967   :  { %14843 = vmatpush1.bf16.msra.mxu0 %v18026_v11  ;;  %v18070_v11 = vld [vmem:[#allocation17 + $0x174] ss:$8 sps:$4 sm:$0xff]  }
 0x968   :  { %14844 = vmatprep.subr.bf16.mxu0 %v18031_v27  ;;  %v18068_v27 = vld [vmem:[#allocation17 + $0x170] ss:$8 sps:$4 sm:$0xff]  }
 0x96b   :  { %14845 = vmatpush1.bf16.msra.mxu0 %v18029_v56  ;;  %v18073_v56 = vld [vmem:[#allocation17 + $0x184] ss:$8 sps:$4 sm:$0xff]  }
 0x96c   :  { %14846 = vmatprep.subr.bf16.mxu0 %v18034_v50  ;;  %v18071_v50 = vld [vmem:[#allocation17 + $0x180] ss:$8 sps:$4 sm:$0xff]  }
 0x96f   :  { %14847 = vmatpush1.bf16.msra.mxu0 %v18032_v45  ;;  %v18076_v45 = vld [vmem:[#allocation17 + $0x194] ss:$8 sps:$4 sm:$0xff]  }
 0x970   :  { %14848 = vmatprep.subr.bf16.mxu0 %v18037_v7  ;;  %v18074_v7 = vld [vmem:[#allocation17 + $0x190] ss:$8 sps:$4 sm:$0xff]  }
 0x973   :  { %14849 = vmatpush1.bf16.msra.mxu0 %v18035_v30  ;;  %v18079_v30 = vld [vmem:[#allocation17 + $0x1a4] ss:$8 sps:$4 sm:$0xff]  }
 0x974   :  { %14850 = vmatprep.subr.bf16.mxu0 %v18040_v46  ;;  %v18077_v46 = vld [vmem:[#allocation17 + $0x1a0] ss:$8 sps:$4 sm:$0xff]  }
 0x977   :  { %14851 = vmatpush1.bf16.msra.mxu0 %v18038_v20  ;;  %v18082_v20 = vld [vmem:[#allocation17 + $0x1b4] ss:$8 sps:$4 sm:$0xff]  }
 0x978   :  { %14852 = vmatprep.subr.bf16.mxu0 %v18043_v36  ;;  %v18080_v36 = vld [vmem:[#allocation17 + $0x1b0] ss:$8 sps:$4 sm:$0xff]  }
 0x97b   :  { %14853 = vmatpush1.bf16.msra.mxu0 %v18041_v37  ;;  %v18085_v37 = vld [vmem:[#allocation17 + $0x1c4] ss:$8 sps:$4 sm:$0xff]  }
 0x97c   :  { %14854 = vmatprep.subr.bf16.mxu0 %v18046_v38  ;;  %v18083_v38 = vld [vmem:[#allocation17 + $0x1c0] ss:$8 sps:$4 sm:$0xff]  }
 0x97f   :  { %14855 = vmatpush1.bf16.msra.mxu0 %v18044_v51  ;;  %v18088_v51 = vld [vmem:[#allocation17 + $0x1d4] ss:$8 sps:$4 sm:$0xff]  }
 0x980   :  { %14865 = vmatprep.subr.bf16.mxu0 %v18049_v34  ;;  %v18086_v34 = vld [vmem:[#allocation17 + $0x1d0] ss:$8 sps:$4 sm:$0xff]  }
 0xa15   :  { %v14331_v32 = vpop.f32.mrb[20].mxu0  ;;  %v19025_v14 = vpop.f32.mrb[24].mxu1 }
 0xa16   :  { %v17187_v1 = vadd.f32 %v14331_v32, %v13599_v42  ;;  %v14333_v33 = vpop.f32.mrb[21].mxu0  ;;  %v14415_v40 = vpop.f32.mrb[25].mxu1  ;;  %v17189_v35 = vadd.f32 %v19025_v14, %v13607_v48  ;;  %v14501_v42 = vrot.slane %v14492_v6, %v18823_v18 }
 0xa17   :  { %v17188_v2 = vadd.f32 %v14333_v33, %v13603_v13  ;;  %v17190_v3 = vadd.f32 %v14415_v40, %v13611_v21  ;;  %v14335_v63 = vpop.f32.mrb[22].mxu0  ;;  %v14417_v29 = vpop.f32.mrb[26].mxu1 }
 0xa18   :  { %v14420_v19 = vmax.f32 %v17187_v1, 0.0  ;;  %v14336_v0 = vpop.f32.mrb[23].mxu0  ;;  %v14418_v4 = vpop.f32.mrb[27].mxu1  ;;  %v14422_v62 = vmax.f32 %v17189_v35, 0.0 }
 0xa19   :  { %v14421_v9 = vmax.f32 %v17188_v2, 0.0  ;;  %v14423_v16 = vmax.f32 %v17190_v3, 0.0  ;;  %v15086_v4 = vand.u32 127, %v1242_v49 }
 0xa1a   :  { %v14424_v54 = vpack.c.bf16 %v14420_v19, %v14420_v19  ;;  %v14426_v44 = vpack.c.bf16 %v14422_v62, %v14422_v62  ;;  %v17126_v19 = vld [vmem:[#allocation22] ss:$0 sm:$0xff] }
 0xa1b   :  { %v14425_v59 = vpack.c.bf16 %v14421_v9, %v14421_v9  ;;  %v14427_v8 = vpack.c.bf16 %v14423_v16, %v14423_v16  ;;  %vm15087_vm0 = vcmp.lt.s32.totalorder %v15086_v4, 4 }
 0xa1d   :  { %14856 = vmatprep.mubr.bf16.mxu0 %v14425_v59 }
 0xa1e   :  { %14857 = vmatmul.mubr.bf16.vlgmr.msra.gmra.mrb[24].mxu0 %v14424_v54 }
 0xa1f   :  { %14866 = vmatpush1.bf16.msra.mxu0 %v18047_v5  ;;  %14897 = vmatprep.mubr.bf16.mxu0 %v14427_v8 }
 0xa20   :  { %14867 = vmatprep.subr.bf16.mxu0 %v18052_v52 }
 0xa23   :  { %14868 = vmatpush1.bf16.msra.mxu0 %v18050_v39 }
 0xa24   :  { %14869 = vmatprep.subr.bf16.mxu0 %v18055_v61 }
 0xa27   :  { %14870 = vmatpush1.bf16.msra.mxu0 %v18053_v28 }
 0xa28   :  { %14871 = vmatprep.subr.bf16.mxu0 %v18058_v25 }
 0xa2b   :  { %14872 = vmatpush1.bf16.msra.mxu0 %v18056_v15 }
 0xa2c   :  { %14873 = vmatprep.subr.bf16.mxu0 %v18061_v17 }
 0xa2f   :  { %14874 = vmatpush1.bf16.msra.mxu0 %v18059_v22 }
 0xa30   :  { %14875 = vmatprep.subr.bf16.mxu0 %v18064_v24 }
 0xa33   :  { %14876 = vmatpush1.bf16.msra.mxu0 %v18062_v53 }
 0xa34   :  { %14877 = vmatprep.subr.bf16.mxu0 %v18067_v31 }
 0xa37   :  { %14878 = vmatpush1.bf16.msra.mxu0 %v18065_v12 }
 0xa38   :  { %14879 = vmatprep.subr.bf16.mxu0 %v18070_v11 }
 0xa3b   :  { %14880 = vmatpush1.bf16.msra.mxu0 %v18068_v27 }
 0xa3c   :  { %14881 = vmatprep.subr.bf16.mxu0 %v18073_v56 }
 0xa3f   :  { %14882 = vmatpush1.bf16.msra.mxu0 %v18071_v50 }
 0xa40   :  { %14883 = vmatprep.subr.bf16.mxu0 %v18076_v45 }
 0xa43   :  { %14884 = vmatpush1.bf16.msra.mxu0 %v18074_v7 }
 0xa44   :  { %14885 = vmatprep.subr.bf16.mxu0 %v18079_v30 }
 0xa47   :  { %14886 = vmatpush1.bf16.msra.mxu0 %v18077_v46 }
 0xa48   :  { %14887 = vmatprep.subr.bf16.mxu0 %v18082_v20 }
 0xa4b   :  { %14888 = vmatpush1.bf16.msra.mxu0 %v18080_v36 }
 0xa4c   :  { %14889 = vmatprep.subr.bf16.mxu0 %v18085_v37 }
 0xa4f   :  { %14890 = vmatpush1.bf16.msra.mxu0 %v18083_v38 }
 0xa50   :  { %14891 = vmatprep.subr.bf16.mxu0 %v18088_v51 }
 0xa53   :  { %14892 = vmatpush1.bf16.msra.mxu0 %v18086_v34 }
 0xa54   :  { %14893 = vmatprep.subr.bf16.mxu0 %v18091_v23 }
 0xa57   :  { %14894 = vmatpush1.bf16.msra.mxu0 %v18089_v55 }
 0xa58   :  { %14895 = vmatprep.subr.bf16.mxu0 %v18094_v43 }
 0xa5b   :  { %14896 = vmatpush1.bf16.msra.mxu0 %v18092_v58 }
 0xa5e   :  { %14898 = vmatmul.mubr.bf16.vlgmr.msra.gmra.mrb[24].mxu0 %v14426_v44 }
 0xb31   :  { %v14899_v13 = vpop.f32.mrb[24].mxu0 }
 0xb32   :  { %v17191_v21 = vadd.f32 %v14899_v13, %v14497_v60  ;;  %v14901_v32 = vpop.f32.mrb[25].mxu0 }
 0xb33   :  { %v17192_v14 = vadd.f32 %v14901_v32, %v14501_v42  ;;  %v14903_v1 = vpop.f32.mrb[26].mxu0 }
 0xb34   :  { %v14906_v33 = vmax.f32 %v17191_v21, 0.0  ;;  %v14904_v40 = vpop.f32.mrb[27].mxu0 }
 0xb35   :  { %v14907_v2 = vmax.f32 %v17192_v14, 0.0 }
 0xb36   :  { %v14908_v63 = vpack.c.bf16 %v14906_v33, %v14906_v33 }
 0xb37   :  { %v14909_v3 = vpack.c.bf16 %v14907_v2, %v14907_v2 }
 0xb39   :  { %15077 = vmatprep.mubr.bf16.mxu1 %v14909_v3 }
 0xb3a   :  { %15078 = vmatmul.mubr.bf16.vlgmr.msra.gmra.mrb[28].mxu1 %v14908_v63 }
 0xc0d   :  { %v17159_v29 = vpop.f32.mrb[28].mxu1 }
 0xc0e   :  { %v17160_v0 = vpop.f32.mrb[29].mxu1 }
 0xc0f   :  { %v17161_v10 = vadd.f32 %v17160_v0, %v17159_v29  ;;  %v17162_v9 = vpop.f32.mrb[30].mxu1 }
 0xc10   :  { %v17163_v18 = vpop.f32.mrb[31].mxu1 }
 0xc11   :  { %v15080_v16 = vadd.f32 %v17161_v10, %v17126_v19 }
 0xc13   :  { %v15088_v59 = vmul.f32 %v15080_v16, %v15080_v16 }
 0xc15   :  { %v15089_v5 = vsel %vm15087_vm0, %v15088_v59, 0.0 }
 0xc16   :  { %15090 = vadd.xlane.f32.xlu0 %v15089_v5 }
 0xca3   :  { %v15091_v54 = vpop.xlane.xlu0 %15090 }
 0xca4   :  { %18111 = vrsqrt.f32 %v15091_v54  ;;  %vm15094_vm1 = vcmp.eq.f32.partialorder %v15091_v54, inf  ;;  %v15097_v39 = vand.u32 2147483648, %v15091_v54  ;;  %vm15096_vm2 = vcmp.eq.f32.partialorder %v15091_v54, 0.0 }
 0xcae   :  { %v18112_v52 = vpop.eup %18111 }
 0xcaf   :  { %v15093_v8 = vmul.f32 %v18112_v52, %v15091_v54 }
 0xcb1   :  { %v15095_v61 = vsel %vm15094_vm1, %v15091_v54, %v15093_v8 }
 0xcb2   :  { %v15098_v28 = vsel %vm15096_vm2, %v15097_v39, %v15095_v61 }
 0xcb3   :  { %v15099_v25 = vmax.f32 %v15098_v28, 1e-12 }
 0xcb5   :  { %18113 = vrcp.f32 %v15099_v25 }
 0xcbf   :  { %v18114_v49 = vpop.eup %18113 }
 0xcc0   :  { %v15102_v15 = vmul.f32 %v18114_v49, %v15080_v16 }
 0xcc2   :  { %v15103_v17 = vsel %vm15087_vm0, %v15102_v15, %v15080_v16 }
 0xcc3   :  { %15104 = vst [vmem:[#allocation23] sm:$0xff] %v15103_v17 }
 0xcc4   :  { %18415 = shalt.err (!%p18412_p10)
}
 0xcc5   :  { %s18416_s7 = scalar_lea.hbm %s19060_s13, 128 }
 0xcc6   :  { %p18417_p11 = scmp.ne.s32.totalorder %s19060_s13, %s18416_s7  ;;  %p18420_p12 = scmp.lt.u32.totalorder %s18416_s7, %s19060_s13 }
 0xcc8   :  { %p18422_p13 = pnand %p18420_p12, %p18417_p11 }
 0xcca   :  { %18425 = shalt.err (!%p18422_p13)
}
 0xccb   :  { %15114 = dma.vmem_to_hbm [thread:$0]  %s15112_s20, 128, %s19060_s13, [#allocation4]  }
 0xccc   :  { %18440 = dma.done.wait [#allocation4], 128  }
 0xccd   :  { %18441 = vsyncadd [#allocation4], 4294967168 }
 0xcce   :  { %15118 = vsyncpa [#allocation3], 1 }
 0xccf   :  { %15119 = vsyncpa [#allocation6], 1 }
 0xcd0   :  { %15120 = vsyncpa [#allocation9], 1 }
 0xcd1   :  { %15121 = vsyncpa [#allocation12], 1 }
 0xcd2   :  { %15122 = vsyncpa [#allocation15], 1 }
 0xcd3   :  { %15123 = vsyncpa [#allocation18], 1 }
 0xcd4   :  { %15124 = vsyncpa [#allocation21], 1 }
 0xcd5   :  { %15125 = vsyncpa [#allocation4], 1 }

</bundles_post_ra>
